<compile_context>
chip_gen: v7x
topology: tpu7x:2x2x1
jax: 0.10.0
libtpu: 0.0.40
codegen_flags: <defaults>
</compile_context>

<pallas_src>
import jax
import jax.numpy as jnp
from jax.experimental import pallas as pl
from jax.experimental.pallas import tpu as pltpu

TINY = 1e-12
SELU_ALPHA = 1.6732632423543772
SELU_SCALE = 1.0507009873554805


def _selu(x):
    # f32 elementwise (v5e VPU/EUP have no bf16 path).
    return SELU_SCALE * jnp.where(x > 0, x, SELU_ALPHA * (jnp.exp(x) - 1.0))


def _mlp3(x, w1, b1, w2, b2, w3, b3, *, final_sigmoid, mm_dtype):
    """lin3(selu(lin2(selu(lin1(x)))))  [+ sigmoid].

    Matmul operands in `mm_dtype` (bf16 on bf16-native MXUs), f32 accumulation,
    f32 elementwise math.  Dropout layers run as identity (see TODO above).
    """
    h = _selu(jnp.dot(x.astype(mm_dtype), w1,
                      preferred_element_type=jnp.float32) + b1)
    h = _selu(jnp.dot(h.astype(mm_dtype), w2,
                      preferred_element_type=jnp.float32) + b2)
    out = jnp.dot(h.astype(mm_dtype), w3,
                  preferred_element_type=jnp.float32) + b3
    if final_sigmoid:
        out = jax.nn.sigmoid(out)
    return out


# ---------------------------------------------------------------------------
# Fused per-batch-tile AAE forward kernel.
#   outputs per tile:
#     xs_ref   : (tb, n_input) f32   decoder output + TINY
#     loss_ref : (8, 128) f32        [0,0]=sum BCE, [0,1]=sum disc terms,
#                                    [0,2]=sum gen terms, rest 0
# ---------------------------------------------------------------------------
def _aae_tile_kernel(x_ref, zr_ref,
                     ew1, eb1, ew2, eb2, ew3, eb3,
                     dw1, db1, dw2, db2, dw3, db3,
                     cw1, cb1, cw2, cb2, cw3, cb3,
                     xs_ref, loss_ref):
    tb = x_ref.shape[0]
    mm_dtype = ew1.dtype                    # bf16 (or f32 when parity flag off)
    x = x_ref[...]                          # f32, also the BCE target

    # --- encoder (gauss prior -> linear head), computed ONCE ---------------
    z = _mlp3(x, ew1[...], eb1[...], ew2[...], eb2[...], ew3[...], eb3[...],
              final_sigmoid=False, mm_dtype=mm_dtype)

    # --- decoder -> x_sample (reference adds TINY before returning) --------
    dec_out = _mlp3(z, dw1[...], db1[...], dw2[...], db2[...], dw3[...], db3[...],
                    final_sigmoid=True, mm_dtype=mm_dtype)
    x_sample = dec_out + TINY
    xs_ref[...] = x_sample

    # --- recon loss: F.binary_cross_entropy(x_sample + TINY, x + TINY) -----
    # PyTorch clamps the log terms at -100 -> stays finite at sigmoid
    # saturation; reproduce that clamp exactly.
    p = x_sample + TINY
    t = x + TINY
    log_p = jnp.maximum(jnp.log(p), -100.0)
    log_1mp = jnp.maximum(jnp.log(1.0 - p), -100.0)
    bce_sum = jnp.sum(-(t * log_p + (1.0 - t) * log_1mp))

    # --- discriminator on stacked [z_real ; z_fake] (weights pushed once) --
    zz = jnp.concatenate([zr_ref[...].astype(mm_dtype), z.astype(mm_dtype)],
                         axis=0)                                   # (2*tb, n_code)
    h = _selu(jnp.dot(zz, cw1[...], preferred_element_type=jnp.float32) + cb1[...])
    h = _selu(jnp.dot(h.astype(mm_dtype), cw2[...],
                      preferred_element_type=jnp.float32) + cb2[...])
    # N=1 head: VPU multiply + lane reduce instead of a 1-lane MXU matmul.
    d_logit = jnp.sum(h * cw3[...], axis=-1, keepdims=True) + cb3[...]
    d = jax.nn.sigmoid(d_logit)                                    # (2*tb, 1)
    d_real = d[:tb, :]
    d_fake = d[tb:, :]

    # disc_step / gen_step sums (reference: TINY added after sigmoid -> finite)
    disc_sum = jnp.sum(jnp.log(d_real + TINY) + jnp.log(1.0 - d_fake + TINY))
    gen_sum = jnp.sum(jnp.log(d_fake + TINY + TINY))

    # Lane-dense (8,128) partial-sum tile (unmasked store).
    sub = jax.lax.broadcasted_iota(jnp.int32, (8, 128), 0)
    lane = jax.lax.broadcasted_iota(jnp.int32, (8, 128), 1)
    row0 = sub == 0
    loss_ref[...] = jnp.where(row0 & (lane == 0), bce_sum,
                    jnp.where(row0 & (lane == 1), disc_sum,
                    jnp.where(row0 & (lane == 2), gen_sum, 0.0)))


# ---------------------------------------------------------------------------
# Parameter construction (deterministic, in-script)
# ---------------------------------------------------------------------------
def _linear_params(key, n_in, n_out, scale=0.05):
    kw, kb = jax.random.split(key)
    w = scale * jax.random.normal(kw, (n_in, n_out), jnp.float32)
    b = scale * jax.random.normal(kb, (1, n_out), jnp.float32)
    return w, b


def init_aae_params(key, n_input, n_hidden, n_code):
    keys = jax.random.split(key, 9)
    enc = (*_linear_params(keys[0], n_input, n_hidden),
           *_linear_params(keys[1], n_hidden, n_hidden),
           *_linear_params(keys[2], n_hidden, n_code))
    dec = (*_linear_params(keys[3], n_code, n_hidden),
           *_linear_params(keys[4], n_hidden, n_hidden),
           *_linear_params(keys[5], n_hidden, n_input))
    disc = (*_linear_params(keys[6], n_code, n_hidden),
            *_linear_params(keys[7], n_hidden, n_hidden),
            *_linear_params(keys[8], n_hidden, 1))
    return {"enc": enc, "dec": dec, "disc": disc}


def _replicated_spec(shape):
    # Whole-array block, same block every grid step -> stays VMEM resident.
    return pl.BlockSpec(shape, lambda i: (0,) * len(shape))


# ---------------------------------------------------------------------------
# AAE forward:   (output, recon_loss, disc_loss, gen_loss)
# ---------------------------------------------------------------------------
def aae_forward(params, x, z_real, *, batch_tile=128, use_bf16_matmul=True):
    batch, n_input = x.shape
    n_code = z_real.shape[1]
    n_hidden = params["enc"][0].shape[1]

    # Pick the largest batch tile (<= batch_tile) that divides the batch.
    candidates = [c for c in (512, 256, 128, 64, 32, 16, 8)
                  if c <= min(batch, batch_tile)]
    tb = next((c for c in candidates if batch % c == 0), None)
    if tb is None:
        raise ValueError("batch must be a multiple of 8")
    if tb % 16 != 0:
        # bf16 packs 16 rows per sublane tile; keep the [z_real; z_fake]
        # concat tile-aligned by falling back to f32 matmuls for tiny tiles.
        use_bf16_matmul = False
    num_tiles = batch // tb
    mm_dtype = jnp.bfloat16 if use_bf16_matmul else jnp.float32

    ew1, eb1, ew2, eb2, ew3, eb3 = params["enc"]
    dw1, db1, dw2, db2, dw3, db3 = params["dec"]
    cw1, cb1, cw2, cb2, cw3, cb3 = params["disc"]

    # Weight matrices carried as bf16 (half DMA/VMEM bytes); biases stay f32.
    cast = lambda w: w.astype(mm_dtype)
    cw3_row = cw3.reshape(1, n_hidden)          # (H,1) -> (1,H) for the VPU head
    flat_inputs = (
        x, z_real.astype(mm_dtype),
        cast(ew1), eb1, cast(ew2), eb2, cast(ew3), eb3,
        cast(dw1), db1, cast(dw2), db2, cast(dw3), db3,
        cast(cw1), cb1, cast(cw2), cb2, cw3_row, cb3,
    )

    in_specs = [
        pl.BlockSpec((tb, n_input), lambda i: (i, 0)),   # x tile
        pl.BlockSpec((tb, n_code), lambda i: (i, 0)),    # z_real tile
    ] + [_replicated_spec(a.shape) for a in flat_inputs[2:]]

    out_specs = (
        pl.BlockSpec((tb, n_input), lambda i: (i, 0)),   # x_sample (lane-dense)
        pl.BlockSpec((8, 128), lambda i: (i, 0)),        # per-tile loss sums
    )
    out_shape = (
        jax.ShapeDtypeStruct((batch, n_input), jnp.float32),
        jax.ShapeDtypeStruct((num_tiles * 8, 128), jnp.float32),
    )

    # Advisory cost estimate for XLA scheduling.
    flops = 2 * batch * (
        n_input * n_hidden + n_hidden * n_hidden + n_hidden * n_code      # encoder
        + n_code * n_hidden + n_hidden * n_hidden + n_hidden * n_input    # decoder
        + 2 * (n_code * n_hidden + n_hidden * n_hidden + n_hidden)        # disc (2B rows)
    )
    transcendentals = (batch * (4 * n_hidden + 3 * n_input)
                       + 2 * batch * (2 * n_hidden + 2))
    bytes_accessed = (sum(int(a.size) * a.dtype.itemsize for a in flat_inputs)
                      + batch * n_input * 4 + num_tiles * 8 * 128 * 4)

    x_sample, loss_parts = pl.pallas_call(
        _aae_tile_kernel,
        grid=(num_tiles,),
        in_specs=in_specs,
        out_specs=out_specs,
        out_shape=out_shape,
        compiler_params=pltpu.CompilerParams(
            dimension_semantics=("parallel",)),
        cost_estimate=pl.CostEstimate(flops=flops,
                                      transcendentals=transcendentals,
                                      bytes_accessed=bytes_accessed),
    )(*flat_inputs)

    # Trivial cross-tile finish (3 sums over num_tiles scalars) in plain JAX.
    parts = loss_parts.reshape(num_tiles, 8, 128)
    recon_loss = parts[:, 0, 0].sum() / (batch * n_input)
    disc_loss = -parts[:, 0, 1].sum() / batch
    gen_loss = -parts[:, 0, 2].sum() / batch
    return x_sample, recon_loss, disc_loss, gen_loss


# ---------------------------------------------------------------------------
if __name__ == "__main__":
    # Small-but-MXU-reasonable shapes (>=128-row batch tiles, 2 tiles so the
    # parallel grid axis can shard across v7x TensorCores).
    BATCH, N_INPUT, N_HIDDEN, N_CODE = 256, 512, 256, 256

    key = jax.random.PRNGKey(0)
    k_params, k_x, k_prior = jax.random.split(key, 3)

    params = init_aae_params(k_params, N_INPUT, N_HIDDEN, N_CODE)

    # Input in [0, 1] (used as BCE target, like the bag-of-words inputs in AAE).
    x = jax.random.uniform(k_x, (BATCH, N_INPUT), jnp.float32)
    # Gaussian prior sample z_real ~ N(0, 1), shape (batch, n_code).
    z_real = jax.random.normal(k_prior, (BATCH, N_CODE), jnp.float32)

    fwd = jax.jit(aae_forward)
    output, recon_loss, disc_loss, gen_loss = fwd(params, x, z_real)
    jax.block_until_ready((output, recon_loss, disc_loss, gen_loss))

    assert output.shape == (BATCH, N_INPUT)
    assert bool(jnp.isfinite(recon_loss)) and bool(jnp.isfinite(disc_loss)) \
        and bool(jnp.isfinite(gen_loss))
    print("KERNEL_OK")
</pallas_src>

<mosaic_0001>
module attributes {stable_mosaic.version = 11 : i64} {
  func.func @_aae_tile_kernel(%arg0: i32, %arg1: memref<128x512xf32, #tpu.memory_space<vmem>>, %arg2: memref<128x256xbf16, #tpu.memory_space<vmem>>, %arg3: memref<512x256xbf16, #tpu.memory_space<vmem>>, %arg4: memref<1x256xf32, #tpu.memory_space<vmem>>, %arg5: memref<256x256xbf16, #tpu.memory_space<vmem>>, %arg6: memref<1x256xf32, #tpu.memory_space<vmem>>, %arg7: memref<256x256xbf16, #tpu.memory_space<vmem>>, %arg8: memref<1x256xf32, #tpu.memory_space<vmem>>, %arg9: memref<256x256xbf16, #tpu.memory_space<vmem>>, %arg10: memref<1x256xf32, #tpu.memory_space<vmem>>, %arg11: memref<256x256xbf16, #tpu.memory_space<vmem>>, %arg12: memref<1x256xf32, #tpu.memory_space<vmem>>, %arg13: memref<256x512xbf16, #tpu.memory_space<vmem>>, %arg14: memref<1x512xf32, #tpu.memory_space<vmem>>, %arg15: memref<256x256xbf16, #tpu.memory_space<vmem>>, %arg16: memref<1x256xf32, #tpu.memory_space<vmem>>, %arg17: memref<256x256xbf16, #tpu.memory_space<vmem>>, %arg18: memref<1x256xf32, #tpu.memory_space<vmem>>, %arg19: memref<1x256xf32, #tpu.memory_space<vmem>>, %arg20: memref<1x1xf32, #tpu.memory_space<vmem>>, %arg21: memref<128x512xf32, #tpu.memory_space<vmem>>, %arg22: memref<8x128xf32, #tpu.memory_space<vmem>>) attributes {dimension_semantics = [#tpu.dimension_semantics<parallel>], iteration_bounds = array<i64: 2>, scalar_prefetch = 0 : i64, scratch_operands = 0 : i64, tpu.core_type = #tpu.core_type<tc>, window_params = [{transform_indices = @transform_0, window_bounds = array<i64: 128, 512>}, {transform_indices = @transform_1, window_bounds = array<i64: 128, 256>}, {pipeline_mode = #tpu.pipeline_mode<synchronous>, transform_indices = @transform_2, window_bounds = array<i64: 512, 256>}, {pipeline_mode = #tpu.pipeline_mode<synchronous>, transform_indices = @transform_3, window_bounds = array<i64: 1, 256>}, {pipeline_mode = #tpu.pipeline_mode<synchronous>, transform_indices = @transform_4, window_bounds = array<i64: 256, 256>}, {pipeline_mode = #tpu.pipeline_mode<synchronous>, transform_indices = @transform_5, window_bounds = array<i64: 1, 256>}, {pipeline_mode = #tpu.pipeline_mode<synchronous>, transform_indices = @transform_6, window_bounds = array<i64: 256, 256>}, {pipeline_mode = #tpu.pipeline_mode<synchronous>, transform_indices = @transform_7, window_bounds = array<i64: 1, 256>}, {pipeline_mode = #tpu.pipeline_mode<synchronous>, transform_indices = @transform_8, window_bounds = array<i64: 256, 256>}, {pipeline_mode = #tpu.pipeline_mode<synchronous>, transform_indices = @transform_9, window_bounds = array<i64: 1, 256>}, {pipeline_mode = #tpu.pipeline_mode<synchronous>, transform_indices = @transform_10, window_bounds = array<i64: 256, 256>}, {pipeline_mode = #tpu.pipeline_mode<synchronous>, transform_indices = @transform_11, window_bounds = array<i64: 1, 256>}, {pipeline_mode = #tpu.pipeline_mode<synchronous>, transform_indices = @transform_12, window_bounds = array<i64: 256, 512>}, {pipeline_mode = #tpu.pipeline_mode<synchronous>, transform_indices = @transform_13, window_bounds = array<i64: 1, 512>}, {pipeline_mode = #tpu.pipeline_mode<synchronous>, transform_indices = @transform_14, window_bounds = array<i64: 256, 256>}, {pipeline_mode = #tpu.pipeline_mode<synchronous>, transform_indices = @transform_15, window_bounds = array<i64: 1, 256>}, {pipeline_mode = #tpu.pipeline_mode<synchronous>, transform_indices = @transform_16, window_bounds = array<i64: 256, 256>}, {pipeline_mode = #tpu.pipeline_mode<synchronous>, transform_indices = @transform_17, window_bounds = array<i64: 1, 256>}, {pipeline_mode = #tpu.pipeline_mode<synchronous>, transform_indices = @transform_18, window_bounds = array<i64: 1, 256>}, {pipeline_mode = #tpu.pipeline_mode<synchronous>, transform_indices = @transform_19, window_bounds = array<i64: 1, 1>}, {transform_indices = @transform_20, window_bounds = array<i64: 128, 512>}, {transform_indices = @transform_21, window_bounds = array<i64: 8, 128>}]} {
    %c0 = arith.constant 0 : index
    %c0_0 = arith.constant 0 : index
    %0 = vector.load %arg1[%c0, %c0_0] : memref<128x512xf32, #tpu.memory_space<vmem>>, vector<128x512xf32>
    %c0_1 = arith.constant 0 : index
    %c0_2 = arith.constant 0 : index
    %1 = vector.load %arg3[%c0_1, %c0_2] : memref<512x256xbf16, #tpu.memory_space<vmem>>, vector<512x256xbf16>
    %c0_3 = arith.constant 0 : index
    %c0_4 = arith.constant 0 : index
    %2 = vector.load %arg4[%c0_3, %c0_4] : memref<1x256xf32, #tpu.memory_space<vmem>>, vector<1x256xf32>
    %c0_5 = arith.constant 0 : index
    %c0_6 = arith.constant 0 : index
    %3 = vector.load %arg5[%c0_5, %c0_6] : memref<256x256xbf16, #tpu.memory_space<vmem>>, vector<256x256xbf16>
    %c0_7 = arith.constant 0 : index
    %c0_8 = arith.constant 0 : index
    %4 = vector.load %arg6[%c0_7, %c0_8] : memref<1x256xf32, #tpu.memory_space<vmem>>, vector<1x256xf32>
    %c0_9 = arith.constant 0 : index
    %c0_10 = arith.constant 0 : index
    %5 = vector.load %arg7[%c0_9, %c0_10] : memref<256x256xbf16, #tpu.memory_space<vmem>>, vector<256x256xbf16>
    %c0_11 = arith.constant 0 : index
    %c0_12 = arith.constant 0 : index
    %6 = vector.load %arg8[%c0_11, %c0_12] : memref<1x256xf32, #tpu.memory_space<vmem>>, vector<1x256xf32>
    %7 = arith.truncf %0 : vector<128x512xf32> to vector<128x512xbf16>
    %cst = arith.constant dense<0.000000e+00> : vector<128x256xf32>
    %8 = tpu.matmul %7, %1, %cst {dimension_numbers = #tpu.dot_dimension_numbers<[1], [0], [0], [1], [0, 0, 1, 1], [], []>} : vector<128x512xbf16>, vector<512x256xbf16>, vector<128x256xf32> -> vector<128x256xf32>
    %9 = vector.broadcast %2 : vector<1x256xf32> to vector<128x256xf32>
    %10 = arith.addf %8, %9 : vector<128x256xf32>
    %cst_13 = arith.constant 0.000000e+00 : f32
    %11 = vector.broadcast %cst_13 : f32 to vector<128x256xf32>
    %12 = arith.cmpf ogt, %10, %11 : vector<128x256xf32>
    %13 = math.exp %10 : vector<128x256xf32>
    %cst_14 = arith.constant 1.000000e+00 : f32
    %14 = vector.broadcast %cst_14 : f32 to vector<128x256xf32>
    %15 = arith.subf %13, %14 : vector<128x256xf32>
    %cst_15 = arith.constant 1.67326319 : f32
    %16 = vector.broadcast %cst_15 : f32 to vector<128x256xf32>
    %17 = arith.mulf %16, %15 : vector<128x256xf32>
    %18 = arith.select %12, %10, %17 : vector<128x256xi1>, vector<128x256xf32>
    %cst_16 = arith.constant 1.05070102 : f32
    %19 = vector.broadcast %cst_16 : f32 to vector<128x256xf32>
    %20 = arith.mulf %19, %18 : vector<128x256xf32>
    %21 = arith.truncf %20 : vector<128x256xf32> to vector<128x256xbf16>
    %cst_17 = arith.constant dense<0.000000e+00> : vector<128x256xf32>
    %22 = tpu.matmul %21, %3, %cst_17 {dimension_numbers = #tpu.dot_dimension_numbers<[1], [0], [0], [1], [0, 0, 1, 1], [], []>} : vector<128x256xbf16>, vector<256x256xbf16>, vector<128x256xf32> -> vector<128x256xf32>
    %23 = vector.broadcast %4 : vector<1x256xf32> to vector<128x256xf32>
    %24 = arith.addf %22, %23 : vector<128x256xf32>
    %cst_18 = arith.constant 0.000000e+00 : f32
    %25 = vector.broadcast %cst_18 : f32 to vector<128x256xf32>
    %26 = arith.cmpf ogt, %24, %25 : vector<128x256xf32>
    %27 = math.exp %24 : vector<128x256xf32>
    %cst_19 = arith.constant 1.000000e+00 : f32
    %28 = vector.broadcast %cst_19 : f32 to vector<128x256xf32>
    %29 = arith.subf %27, %28 : vector<128x256xf32>
    %cst_20 = arith.constant 1.67326319 : f32
    %30 = vector.broadcast %cst_20 : f32 to vector<128x256xf32>
    %31 = arith.mulf %30, %29 : vector<128x256xf32>
    %32 = arith.select %26, %24, %31 : vector<128x256xi1>, vector<128x256xf32>
    %cst_21 = arith.constant 1.05070102 : f32
    %33 = vector.broadcast %cst_21 : f32 to vector<128x256xf32>
    %34 = arith.mulf %33, %32 : vector<128x256xf32>
    %35 = arith.truncf %34 : vector<128x256xf32> to vector<128x256xbf16>
    %cst_22 = arith.constant dense<0.000000e+00> : vector<128x256xf32>
    %36 = tpu.matmul %35, %5, %cst_22 {dimension_numbers = #tpu.dot_dimension_numbers<[1], [0], [0], [1], [0, 0, 1, 1], [], []>} : vector<128x256xbf16>, vector<256x256xbf16>, vector<128x256xf32> -> vector<128x256xf32>
    %37 = vector.broadcast %6 : vector<1x256xf32> to vector<128x256xf32>
    %38 = arith.addf %36, %37 : vector<128x256xf32>
    %c0_23 = arith.constant 0 : index
    %c0_24 = arith.constant 0 : index
    %39 = vector.load %arg9[%c0_23, %c0_24] : memref<256x256xbf16, #tpu.memory_space<vmem>>, vector<256x256xbf16>
    %c0_25 = arith.constant 0 : index
    %c0_26 = arith.constant 0 : index
    %40 = vector.load %arg10[%c0_25, %c0_26] : memref<1x256xf32, #tpu.memory_space<vmem>>, vector<1x256xf32>
    %c0_27 = arith.constant 0 : index
    %c0_28 = arith.constant 0 : index
    %41 = vector.load %arg11[%c0_27, %c0_28] : memref<256x256xbf16, #tpu.memory_space<vmem>>, vector<256x256xbf16>
    %c0_29 = arith.constant 0 : index
    %c0_30 = arith.constant 0 : index
    %42 = vector.load %arg12[%c0_29, %c0_30] : memref<1x256xf32, #tpu.memory_space<vmem>>, vector<1x256xf32>
    %c0_31 = arith.constant 0 : index
    %c0_32 = arith.constant 0 : index
    %43 = vector.load %arg13[%c0_31, %c0_32] : memref<256x512xbf16, #tpu.memory_space<vmem>>, vector<256x512xbf16>
    %c0_33 = arith.constant 0 : index
    %c0_34 = arith.constant 0 : index
    %44 = vector.load %arg14[%c0_33, %c0_34] : memref<1x512xf32, #tpu.memory_space<vmem>>, vector<1x512xf32>
    %45 = arith.truncf %38 : vector<128x256xf32> to vector<128x256xbf16>
    %cst_35 = arith.constant dense<0.000000e+00> : vector<128x256xf32>
    %46 = tpu.matmul %45, %39, %cst_35 {dimension_numbers = #tpu.dot_dimension_numbers<[1], [0], [0], [1], [0, 0, 1, 1], [], []>} : vector<128x256xbf16>, vector<256x256xbf16>, vector<128x256xf32> -> vector<128x256xf32>
    %47 = vector.broadcast %40 : vector<1x256xf32> to vector<128x256xf32>
    %48 = arith.addf %46, %47 : vector<128x256xf32>
    %cst_36 = arith.constant 0.000000e+00 : f32
    %49 = vector.broadcast %cst_36 : f32 to vector<128x256xf32>
    %50 = arith.cmpf ogt, %48, %49 : vector<128x256xf32>
    %51 = math.exp %48 : vector<128x256xf32>
    %cst_37 = arith.constant 1.000000e+00 : f32
    %52 = vector.broadcast %cst_37 : f32 to vector<128x256xf32>
    %53 = arith.subf %51, %52 : vector<128x256xf32>
    %cst_38 = arith.constant 1.67326319 : f32
    %54 = vector.broadcast %cst_38 : f32 to vector<128x256xf32>
    %55 = arith.mulf %54, %53 : vector<128x256xf32>
    %56 = arith.select %50, %48, %55 : vector<128x256xi1>, vector<128x256xf32>
    %cst_39 = arith.constant 1.05070102 : f32
    %57 = vector.broadcast %cst_39 : f32 to vector<128x256xf32>
    %58 = arith.mulf %57, %56 : vector<128x256xf32>
    %59 = arith.truncf %58 : vector<128x256xf32> to vector<128x256xbf16>
    %cst_40 = arith.constant dense<0.000000e+00> : vector<128x256xf32>
    %60 = tpu.matmul %59, %41, %cst_40 {dimension_numbers = #tpu.dot_dimension_numbers<[1], [0], [0], [1], [0, 0, 1, 1], [], []>} : vector<128x256xbf16>, vector<256x256xbf16>, vector<128x256xf32> -> vector<128x256xf32>
    %61 = vector.broadcast %42 : vector<1x256xf32> to vector<128x256xf32>
    %62 = arith.addf %60, %61 : vector<128x256xf32>
    %cst_41 = arith.constant 0.000000e+00 : f32
    %63 = vector.broadcast %cst_41 : f32 to vector<128x256xf32>
    %64 = arith.cmpf ogt, %62, %63 : vector<128x256xf32>
    %65 = math.exp %62 : vector<128x256xf32>
    %cst_42 = arith.constant 1.000000e+00 : f32
    %66 = vector.broadcast %cst_42 : f32 to vector<128x256xf32>
    %67 = arith.subf %65, %66 : vector<128x256xf32>
    %cst_43 = arith.constant 1.67326319 : f32
    %68 = vector.broadcast %cst_43 : f32 to vector<128x256xf32>
    %69 = arith.mulf %68, %67 : vector<128x256xf32>
    %70 = arith.select %64, %62, %69 : vector<128x256xi1>, vector<128x256xf32>
    %cst_44 = arith.constant 1.05070102 : f32
    %71 = vector.broadcast %cst_44 : f32 to vector<128x256xf32>
    %72 = arith.mulf %71, %70 : vector<128x256xf32>
    %73 = arith.truncf %72 : vector<128x256xf32> to vector<128x256xbf16>
    %cst_45 = arith.constant dense<0.000000e+00> : vector<128x512xf32>
    %74 = tpu.matmul %73, %43, %cst_45 {dimension_numbers = #tpu.dot_dimension_numbers<[1], [0], [0], [1], [0, 0, 1, 1], [], []>} : vector<128x256xbf16>, vector<256x512xbf16>, vector<128x512xf32> -> vector<128x512xf32>
    %75 = vector.broadcast %44 : vector<1x512xf32> to vector<128x512xf32>
    %76 = arith.addf %74, %75 : vector<128x512xf32>
    %77 = arith.negf %76 : vector<128x512xf32>
    %78 = math.exp %77 : vector<128x512xf32>
    %cst_46 = arith.constant 1.000000e+00 : f32
    %79 = vector.broadcast %cst_46 : f32 to vector<128x512xf32>
    %80 = arith.addf %79, %78 : vector<128x512xf32>
    %81 = arith.divf %79, %80 : vector<128x512xf32>
    %cst_47 = arith.constant 9.99999996E-13 : f32
    %82 = vector.broadcast %cst_47 : f32 to vector<128x512xf32>
    %83 = arith.addf %81, %82 : vector<128x512xf32>
    %c0_48 = arith.constant 0 : index
    %c0_49 = arith.constant 0 : index
    %84 = vector.load %arg21[%c0_48, %c0_49] : memref<128x512xf32, #tpu.memory_space<vmem>>, vector<128x512xf32>
    tpu.vector_store %arg21[%c0_48, %c0_49], %83 {strides = array<i32>} : memref<128x512xf32, #tpu.memory_space<vmem>>, vector<128x512xf32>,
    %cst_50 = arith.constant 9.99999996E-13 : f32
    %85 = vector.broadcast %cst_50 : f32 to vector<128x512xf32>
    %86 = arith.addf %83, %85 : vector<128x512xf32>
    %cst_51 = arith.constant 9.99999996E-13 : f32
    %87 = vector.broadcast %cst_51 : f32 to vector<128x512xf32>
    %88 = arith.addf %0, %87 : vector<128x512xf32>
    %89 = math.log %86 : vector<128x512xf32>
    %cst_52 = arith.constant -1.000000e+02 : f32
    %90 = vector.broadcast %cst_52 : f32 to vector<128x512xf32>
    %91 = arith.maximumf %89, %90 : vector<128x512xf32>
    %cst_53 = arith.constant 1.000000e+00 : f32
    %92 = vector.broadcast %cst_53 : f32 to vector<128x512xf32>
    %93 = arith.subf %92, %86 : vector<128x512xf32>
    %94 = math.log %93 : vector<128x512xf32>
    %cst_54 = arith.constant -1.000000e+02 : f32
    %95 = vector.broadcast %cst_54 : f32 to vector<128x512xf32>
    %96 = arith.maximumf %94, %95 : vector<128x512xf32>
    %97 = arith.mulf %88, %91 : vector<128x512xf32>
    %cst_55 = arith.constant 1.000000e+00 : f32
    %98 = vector.broadcast %cst_55 : f32 to vector<128x512xf32>
    %99 = arith.subf %98, %88 : vector<128x512xf32>
    %100 = arith.mulf %99, %96 : vector<128x512xf32>
    %101 = arith.addf %97, %100 : vector<128x512xf32>
    %cst_56 = arith.constant 0.000000e+00 : f32
    %102 = vector.broadcast %cst_56 : f32 to vector<128x512xf32>
    %103 = arith.subf %102, %101 : vector<128x512xf32>
    %104 = vector.shape_cast %103 : vector<128x512xf32> to vector<1x128x512xf32>
    %cst_57 = arith.constant dense<0.000000e+00> : vector<1xf32>
    %105 = vector.multi_reduction <add>, %104, %cst_57 [1, 2] : vector<1x128x512xf32> to vector<1xf32>
    %106 = vector.shape_cast %105 : vector<1xf32> to vector<1x1x1xf32>
    %107 = vector.extract %106[0, 0, 0] : f32 from vector<1x1x1xf32>
    %c0_58 = arith.constant 0 : index
    %c0_59 = arith.constant 0 : index
    %108 = vector.load %arg2[%c0_58, %c0_59] : memref<128x256xbf16, #tpu.memory_space<vmem>>, vector<128x256xbf16>
    %109 = arith.truncf %38 : vector<128x256xf32> to vector<128x256xbf16>
    %110 = tpu.concatenate %108, %109 in 0 : vector<128x256xbf16>, vector<128x256xbf16> -> vector<256x256xbf16>
    %c0_60 = arith.constant 0 : index
    %c0_61 = arith.constant 0 : index
    %111 = vector.load %arg15[%c0_60, %c0_61] : memref<256x256xbf16, #tpu.memory_space<vmem>>, vector<256x256xbf16>
    %cst_62 = arith.constant dense<0.000000e+00> : vector<256x256xf32>
    %112 = tpu.matmul %110, %111, %cst_62 {dimension_numbers = #tpu.dot_dimension_numbers<[1], [0], [0], [1], [0, 0, 1, 1], [], []>} : vector<256x256xbf16>, vector<256x256xbf16>, vector<256x256xf32> -> vector<256x256xf32>
    %c0_63 = arith.constant 0 : index
    %c0_64 = arith.constant 0 : index
    %113 = vector.load %arg16[%c0_63, %c0_64] : memref<1x256xf32, #tpu.memory_space<vmem>>, vector<1x256xf32>
    %114 = vector.broadcast %113 : vector<1x256xf32> to vector<256x256xf32>
    %115 = arith.addf %112, %114 : vector<256x256xf32>
    %cst_65 = arith.constant 0.000000e+00 : f32
    %116 = vector.broadcast %cst_65 : f32 to vector<256x256xf32>
    %117 = arith.cmpf ogt, %115, %116 : vector<256x256xf32>
    %118 = math.exp %115 : vector<256x256xf32>
    %cst_66 = arith.constant 1.000000e+00 : f32
    %119 = vector.broadcast %cst_66 : f32 to vector<256x256xf32>
    %120 = arith.subf %118, %119 : vector<256x256xf32>
    %cst_67 = arith.constant 1.67326319 : f32
    %121 = vector.broadcast %cst_67 : f32 to vector<256x256xf32>
    %122 = arith.mulf %121, %120 : vector<256x256xf32>
    %123 = arith.select %117, %115, %122 : vector<256x256xi1>, vector<256x256xf32>
    %cst_68 = arith.constant 1.05070102 : f32
    %124 = vector.broadcast %cst_68 : f32 to vector<256x256xf32>
    %125 = arith.mulf %124, %123 : vector<256x256xf32>
    %126 = arith.truncf %125 : vector<256x256xf32> to vector<256x256xbf16>
    %c0_69 = arith.constant 0 : index
    %c0_70 = arith.constant 0 : index
    %127 = vector.load %arg17[%c0_69, %c0_70] : memref<256x256xbf16, #tpu.memory_space<vmem>>, vector<256x256xbf16>
    %cst_71 = arith.constant dense<0.000000e+00> : vector<256x256xf32>
    %128 = tpu.matmul %126, %127, %cst_71 {dimension_numbers = #tpu.dot_dimension_numbers<[1], [0], [0], [1], [0, 0, 1, 1], [], []>} : vector<256x256xbf16>, vector<256x256xbf16>, vector<256x256xf32> -> vector<256x256xf32>
    %c0_72 = arith.constant 0 : index
    %c0_73 = arith.constant 0 : index
    %129 = vector.load %arg18[%c0_72, %c0_73] : memref<1x256xf32, #tpu.memory_space<vmem>>, vector<1x256xf32>
    %130 = vector.broadcast %129 : vector<1x256xf32> to vector<256x256xf32>
    %131 = arith.addf %128, %130 : vector<256x256xf32>
    %cst_74 = arith.constant 0.000000e+00 : f32
    %132 = vector.broadcast %cst_74 : f32 to vector<256x256xf32>
    %133 = arith.cmpf ogt, %131, %132 : vector<256x256xf32>
    %134 = math.exp %131 : vector<256x256xf32>
    %cst_75 = arith.constant 1.000000e+00 : f32
    %135 = vector.broadcast %cst_75 : f32 to vector<256x256xf32>
    %136 = arith.subf %134, %135 : vector<256x256xf32>
    %cst_76 = arith.constant 1.67326319 : f32
    %137 = vector.broadcast %cst_76 : f32 to vector<256x256xf32>
    %138 = arith.mulf %137, %136 : vector<256x256xf32>
    %139 = arith.select %133, %131, %138 : vector<256x256xi1>, vector<256x256xf32>
    %cst_77 = arith.constant 1.05070102 : f32
    %140 = vector.broadcast %cst_77 : f32 to vector<256x256xf32>
    %141 = arith.mulf %140, %139 : vector<256x256xf32>
    %c0_78 = arith.constant 0 : index
    %c0_79 = arith.constant 0 : index
    %142 = vector.load %arg19[%c0_78, %c0_79] : memref<1x256xf32, #tpu.memory_space<vmem>>, vector<1x256xf32>
    %143 = vector.broadcast %142 : vector<1x256xf32> to vector<256x256xf32>
    %144 = arith.mulf %141, %143 : vector<256x256xf32>
    %cst_80 = arith.constant dense<0.000000e+00> : vector<256xf32>
    %145 = vector.multi_reduction <add>, %144, %cst_80 [1] : vector<256x256xf32> to vector<256xf32>
    %146 = vector.shape_cast %145 : vector<256xf32> to vector<256x1xf32>
    %c0_81 = arith.constant 0 : index
    %c0_82 = arith.constant 0 : index
    %147 = vector.load %arg20[%c0_81, %c0_82] : memref<1x1xf32, #tpu.memory_space<vmem>>, vector<1x1xf32>
    %148 = vector.broadcast %147 : vector<1x1xf32> to vector<256x1xf32>
    %149 = arith.addf %146, %148 : vector<256x1xf32>
    %150 = arith.negf %149 : vector<256x1xf32>
    %151 = math.exp %150 : vector<256x1xf32>
    %cst_83 = arith.constant 1.000000e+00 : f32
    %152 = vector.broadcast %cst_83 : f32 to vector<256x1xf32>
    %153 = arith.addf %152, %151 : vector<256x1xf32>
    %154 = arith.divf %152, %153 : vector<256x1xf32>
    %155 = vector.extract_strided_slice %154 {offsets = [0, 0], sizes = [128, 1], strides = [1, 1]} : vector<256x1xf32> to vector<128x1xf32>
    %156 = vector.extract_strided_slice %154 {offsets = [128, 0], sizes = [128, 1], strides = [1, 1]} : vector<256x1xf32> to vector<128x1xf32>
    %cst_84 = arith.constant 9.99999996E-13 : f32
    %157 = vector.broadcast %cst_84 : f32 to vector<128x1xf32>
    %158 = arith.addf %155, %157 : vector<128x1xf32>
    %159 = math.log %158 : vector<128x1xf32>
    %cst_85 = arith.constant 1.000000e+00 : f32
    %160 = vector.broadcast %cst_85 : f32 to vector<128x1xf32>
    %161 = arith.subf %160, %156 : vector<128x1xf32>
    %cst_86 = arith.constant 9.99999996E-13 : f32
    %162 = vector.broadcast %cst_86 : f32 to vector<128x1xf32>
    %163 = arith.addf %161, %162 : vector<128x1xf32>
    %164 = math.log %163 : vector<128x1xf32>
    %165 = arith.addf %159, %164 : vector<128x1xf32>
    %166 = vector.shape_cast %165 : vector<128x1xf32> to vector<1x128x1xf32>
    %cst_87 = arith.constant dense<0.000000e+00> : vector<1xf32>
    %167 = vector.multi_reduction <add>, %166, %cst_87 [1, 2] : vector<1x128x1xf32> to vector<1xf32>
    %168 = vector.shape_cast %167 : vector<1xf32> to vector<1x1x1xf32>
    %169 = vector.extract %168[0, 0, 0] : f32 from vector<1x1x1xf32>
    %cst_88 = arith.constant 9.99999996E-13 : f32
    %170 = vector.broadcast %cst_88 : f32 to vector<128x1xf32>
    %171 = arith.addf %156, %170 : vector<128x1xf32>
    %cst_89 = arith.constant 9.99999996E-13 : f32
    %172 = vector.broadcast %cst_89 : f32 to vector<128x1xf32>
    %173 = arith.addf %171, %172 : vector<128x1xf32>
    %174 = math.log %173 : vector<128x1xf32>
    %175 = vector.shape_cast %174 : vector<128x1xf32> to vector<1x128x1xf32>
    %cst_90 = arith.constant dense<0.000000e+00> : vector<1xf32>
    %176 = vector.multi_reduction <add>, %175, %cst_90 [1, 2] : vector<1x128x1xf32> to vector<1xf32>
    %177 = vector.shape_cast %176 : vector<1xf32> to vector<1x1x1xf32>
    %178 = vector.extract %177[0, 0, 0] : f32 from vector<1x1x1xf32>
    %179 = tpu.iota {dimensions = array<i32: 0>} : vector<8x128xi32>
    %180 = tpu.iota {dimensions = array<i32: 1>} : vector<8x128xi32>
    %c0_i32 = arith.constant 0 : i32
    %181 = vector.broadcast %c0_i32 : i32 to vector<8x128xi32>
    %182 = arith.cmpi eq, %179, %181 : vector<8x128xi32>
    %c0_i32_91 = arith.constant 0 : i32
    %183 = vector.broadcast %c0_i32_91 : i32 to vector<8x128xi32>
    %184 = arith.cmpi eq, %180, %183 : vector<8x128xi32>
    %185 = arith.andi %182, %184 : vector<8x128xi1>
    %c1_i32 = arith.constant 1 : i32
    %186 = vector.broadcast %c1_i32 : i32 to vector<8x128xi32>
    %187 = arith.cmpi eq, %180, %186 : vector<8x128xi32>
    %188 = arith.andi %182, %187 : vector<8x128xi1>
    %c2_i32 = arith.constant 2 : i32
    %189 = vector.broadcast %c2_i32 : i32 to vector<8x128xi32>
    %190 = arith.cmpi eq, %180, %189 : vector<8x128xi32>
    %191 = arith.andi %182, %190 : vector<8x128xi1>
    %cst_92 = arith.constant 0.000000e+00 : f32
    %192 = vector.broadcast %178 : f32 to vector<8x128xf32>
    %193 = vector.broadcast %cst_92 : f32 to vector<8x128xf32>
    %194 = arith.select %191, %192, %193 : vector<8x128xi1>, vector<8x128xf32>
    %195 = vector.broadcast %169 : f32 to vector<8x128xf32>
    %196 = arith.select %188, %195, %194 : vector<8x128xi1>, vector<8x128xf32>
    %197 = vector.broadcast %107 : f32 to vector<8x128xf32>
    %198 = arith.select %185, %197, %196 : vector<8x128xi1>, vector<8x128xf32>
    %c0_93 = arith.constant 0 : index
    %c0_94 = arith.constant 0 : index
    %199 = vector.load %arg22[%c0_93, %c0_94] : memref<8x128xf32, #tpu.memory_space<vmem>>, vector<8x128xf32>
    tpu.vector_store %arg22[%c0_93, %c0_94], %198 {strides = array<i32>} : memref<8x128xf32, #tpu.memory_space<vmem>>, vector<8x128xf32>,
    return
  }
  func.func @transform_0(%arg0: i32) -> (i32, i32) {
    %c0_i32 = arith.constant 0 : i32
    %c0_i32_0 = arith.constant 0 : i32
    return %arg0, %c0_i32 : i32, i32
  }
  func.func @transform_1(%arg0: i32) -> (i32, i32) {
    %c0_i32 = arith.constant 0 : i32
    %c0_i32_0 = arith.constant 0 : i32
    return %arg0, %c0_i32 : i32, i32
  }
  func.func @transform_2(%arg0: i32) -> (i32, i32) {
    %c0_i32 = arith.constant 0 : i32
    %c0_i32_0 = arith.constant 0 : i32
    %c0_i32_1 = arith.constant 0 : i32
    return %c0_i32, %c0_i32_0 : i32, i32
  }
  func.func @transform_3(%arg0: i32) -> (i32, i32) {
    %c0_i32 = arith.constant 0 : i32
    %c0_i32_0 = arith.constant 0 : i32
    %c0_i32_1 = arith.constant 0 : i32
    return %c0_i32, %c0_i32_0 : i32, i32
  }
  func.func @transform_4(%arg0: i32) -> (i32, i32) {
    %c0_i32 = arith.constant 0 : i32
    %c0_i32_0 = arith.constant 0 : i32
    %c0_i32_1 = arith.constant 0 : i32
    return %c0_i32, %c0_i32_0 : i32, i32
  }
  func.func @transform_5(%arg0: i32) -> (i32, i32) {
    %c0_i32 = arith.constant 0 : i32
    %c0_i32_0 = arith.constant 0 : i32
    %c0_i32_1 = arith.constant 0 : i32
    return %c0_i32, %c0_i32_0 : i32, i32
  }
  func.func @transform_6(%arg0: i32) -> (i32, i32) {
    %c0_i32 = arith.constant 0 : i32
    %c0_i32_0 = arith.constant 0 : i32
    %c0_i32_1 = arith.constant 0 : i32
    return %c0_i32, %c0_i32_0 : i32, i32
  }
  func.func @transform_7(%arg0: i32) -> (i32, i32) {
    %c0_i32 = arith.constant 0 : i32
    %c0_i32_0 = arith.constant 0 : i32
    %c0_i32_1 = arith.constant 0 : i32
    return %c0_i32, %c0_i32_0 : i32, i32
  }
  func.func @transform_8(%arg0: i32) -> (i32, i32) {
    %c0_i32 = arith.constant 0 : i32
    %c0_i32_0 = arith.constant 0 : i32
    %c0_i32_1 = arith.constant 0 : i32
    return %c0_i32, %c0_i32_0 : i32, i32
  }
  func.func @transform_9(%arg0: i32) -> (i32, i32) {
    %c0_i32 = arith.constant 0 : i32
    %c0_i32_0 = arith.constant 0 : i32
    %c0_i32_1 = arith.constant 0 : i32
    return %c0_i32, %c0_i32_0 : i32, i32
  }
  func.func @transform_10(%arg0: i32) -> (i32, i32) {
    %c0_i32 = arith.constant 0 : i32
    %c0_i32_0 = arith.constant 0 : i32
    %c0_i32_1 = arith.constant 0 : i32
    return %c0_i32, %c0_i32_0 : i32, i32
  }
  func.func @transform_11(%arg0: i32) -> (i32, i32) {
    %c0_i32 = arith.constant 0 : i32
    %c0_i32_0 = arith.constant 0 : i32
    %c0_i32_1 = arith.constant 0 : i32
    return %c0_i32, %c0_i32_0 : i32, i32
  }
  func.func @transform_12(%arg0: i32) -> (i32, i32) {
    %c0_i32 = arith.constant 0 : i32
    %c0_i32_0 = arith.constant 0 : i32
    %c0_i32_1 = arith.constant 0 : i32
    return %c0_i32, %c0_i32_0 : i32, i32
  }
  func.func @transform_13(%arg0: i32) -> (i32, i32) {
    %c0_i32 = arith.constant 0 : i32
    %c0_i32_0 = arith.constant 0 : i32
    %c0_i32_1 = arith.constant 0 : i32
    return %c0_i32, %c0_i32_0 : i32, i32
  }
  func.func @transform_14(%arg0: i32) -> (i32, i32) {
    %c0_i32 = arith.constant 0 : i32
    %c0_i32_0 = arith.constant 0 : i32
    %c0_i32_1 = arith.constant 0 : i32
    return %c0_i32, %c0_i32_0 : i32, i32
  }
  func.func @transform_15(%arg0: i32) -> (i32, i32) {
    %c0_i32 = arith.constant 0 : i32
    %c0_i32_0 = arith.constant 0 : i32
    %c0_i32_1 = arith.constant 0 : i32
    return %c0_i32, %c0_i32_0 : i32, i32
  }
  func.func @transform_16(%arg0: i32) -> (i32, i32) {
    %c0_i32 = arith.constant 0 : i32
    %c0_i32_0 = arith.constant 0 : i32
    %c0_i32_1 = arith.constant 0 : i32
    return %c0_i32, %c0_i32_0 : i32, i32
  }
  func.func @transform_17(%arg0: i32) -> (i32, i32) {
    %c0_i32 = arith.constant 0 : i32
    %c0_i32_0 = arith.constant 0 : i32
    %c0_i32_1 = arith.constant 0 : i32
    return %c0_i32, %c0_i32_0 : i32, i32
  }
  func.func @transform_18(%arg0: i32) -> (i32, i32) {
    %c0_i32 = arith.constant 0 : i32
    %c0_i32_0 = arith.constant 0 : i32
    %c0_i32_1 = arith.constant 0 : i32
    return %c0_i32, %c0_i32_0 : i32, i32
  }
  func.func @transform_19(%arg0: i32) -> (i32, i32) {
    %c0_i32 = arith.constant 0 : i32
    %c0_i32_0 = arith.constant 0 : i32
    %c0_i32_1 = arith.constant 0 : i32
    return %c0_i32, %c0_i32_0 : i32, i32
  }
  func.func @transform_20(%arg0: i32) -> (i32, i32) {
    %c0_i32 = arith.constant 0 : i32
    %c0_i32_0 = arith.constant 0 : i32
    return %arg0, %c0_i32 : i32, i32
  }
  func.func @transform_21(%arg0: i32) -> (i32, i32) {
    %c0_i32 = arith.constant 0 : i32
    %c0_i32_0 = arith.constant 0 : i32
    return %arg0, %c0_i32 : i32, i32
  }
}

</mosaic_0001>

<bundles_post_ra>
// kernel: aae_forward.1
= control target key start
LH: loop header
LB: loop body
LE: loop exit
PB: predicated region body
PF: predicated region fallthrough
CT: control target
= control target key end

     0   :  { %s16198_s0 = inlined_call_operand.vmem [shape: f32[256,512], index: 0, kind: input, shape index: {}]   ;;  %s16199_s1 = inlined_call_operand.vmem [shape: bf16[256,256], index: 1, kind: input, shape index: {}]   ;;  %s16200_s2 = inlined_call_operand.vmem [shape: bf16[512,256], index: 2, kind: input, shape index: {}]   ;;  %s16201_s3 = inlined_call_operand.vmem [shape: f32[1,256], index: 3, kind: input, shape index: {}]   ;;  %s16202_s4 = inlined_call_operand.vmem [shape: bf16[256,256], index: 4, kind: input, shape index: {}]   ;;  %s16203_s5 = inlined_call_operand.vmem [shape: f32[1,256], index: 5, kind: input, shape index: {}]   ;;  %s16204_s6 = inlined_call_operand.vmem [shape: bf16[256,256], index: 6, kind: input, shape index: {}]   ;;  %s16205_s7 = inlined_call_operand.vmem [shape: f32[1,256], index: 7, kind: input, shape index: {}]   ;;  %s16206_s8 = inlined_call_operand.vmem [shape: bf16[256,256], index: 8, kind: input, shape index: {}]   ;;  %s16207_s9 = inlined_call_operand.vmem [shape: f32[1,256], index: 9, kind: input, shape index: {}]   ;;  %s16208_s10 = inlined_call_operand.vmem [shape: bf16[256,256], index: 10, kind: input, shape index: {}]   ;;  %s16209_s11 = inlined_call_operand.vmem [shape: f32[1,256], index: 11, kind: input, shape index: {}]   ;;  %s16210_s12 = inlined_call_operand.vmem [shape: bf16[256,512], index: 12, kind: input, shape index: {}]   ;;  %s16211_s13 = inlined_call_operand.vmem [shape: f32[1,512], index: 13, kind: input, shape index: {}]   ;;  %s16212_s14 = inlined_call_operand.vmem [shape: bf16[256,256], index: 14, kind: input, shape index: {}]   ;;  %s16213_s15 = inlined_call_operand.vmem [shape: f32[1,256], index: 15, kind: input, shape index: {}]   ;;  %s16214_s16 = inlined_call_operand.vmem [shape: bf16[256,256], index: 16, kind: input, shape index: {}]   ;;  %s16215_s17 = inlined_call_operand.vmem [shape: f32[1,256], index: 17, kind: input, shape index: {}]   ;;  %s16216_s18 = inlined_call_operand.vmem [shape: f32[1,256], index: 18, kind: input, shape index: {}]   ;;  %s16217_s19 = inlined_call_operand.<no memory space> [shape: f32[1,1], index: 19, kind: input, shape index: {}]   ;;  %s16218_s20 = inlined_call_operand.hbm [shape: f32[256,512], index: 20, kind: output, shape index: {0}]   ;;  %s16219_s21 = inlined_call_operand.vmem [shape: f32[16,128], index: 21, kind: output, shape index: {1}]  }
   0x1   :  { %16322 = sst [smem:[#allocation86_spill]] %s16198_s0  ;;  %v27_v0 = vstv %s16217_s19 }
   0x2   :  { %16323 = sst [smem:[#allocation87_spill]] %s16199_s1  ;;  %28 = vst [vmem:[#allocation2] sm:$0x1] %v27_v0 }
   0x3   :  { %16324 = sst [smem:[#allocation88_spill]] %s16200_s2 }
   0x4   :  { %16325 = sst [smem:[#allocation89_spill]] %s16201_s3 }
   0x5   :  { %16326 = sst [smem:[#allocation90_spill]] %s16202_s4 }
   0x6   :  { %16327 = sst [smem:[#allocation91_spill]] %s16203_s5 }
   0x7   :  { %29 = vsyncpa [#allocation4], 0 }
   0x8   :  { %31 = vsyncpa [#allocation4 + $0x1], 0  ;;  %s11223_s26 = smov 0   ;;  %s11225_s27 = smov 0  }
   0x9   :  { %s11227_s3 = smov 0   ;;  %s11229_s28 = smov 0  }
   0xa LB: > { %16328 = sst [smem:[#allocation6_spill]] %s11093_s26  ;;  %s11244_s19 = sadd.s32 4294967295, %s11105_s28   ;;  %s11105_s28 = sphi %s11229_s28, %s16690_s28   ;;  %s11101_s3 = sphi %s11227_s3, %s16692_s3   ;;  %s11097_s27 = sphi %s11225_s27, %s16694_s27   ;;  %s11093_s26 = sphi %s11223_s26, %s16693_s26  }
   0xb   : > { %16329 = sst [smem:[#allocation7_spill]] %s11101_s3  ;;  %s8405_s29 = sadd.s32 4294967294, %s11105_s28  }
   0xc   : > { %16330 = sst [smem:[#allocation8_spill]] %s11105_s28  ;;  %s11248_s0 = sadd.s32 1, %s11105_s28  }
   0xd   : > { %16331 = sst [smem:[#allocation9_spill]] %s11248_s0  ;;  %s474_s4 = sadd.s32 1, %s11101_s3 }
   0xe   : > { %s471_s30 = ssub.s32 %s11105_s28, %s11248_s0  ;;  %p484_p0 = scmp.ne.s32.totalorder %s11101_s3, %s11097_s27 }
   0xf   : > { %p472_p1 = scmp.eq.s32.totalorder %s471_s30, 0  ;;  %p485_p2 = scmp.eq.s32.totalorder %s11244_s19, 1 }
  0x10   : > { %p490_p3 = scmp.ne.s32.totalorder %s11097_s27, %s11093_s26  ;;  %p491_p4 = scmp.eq.s32.totalorder %s8405_s29, 1 }
  0x11   : > { %s11259_s5 = scalar_select %p472_p1, %s11101_s3, %s474_s4  }
  0x12   : > { %p11261_p5 = por %p485_p2, %p484_p0  ;;  %p11265_p6 = por %p491_p4, %p490_p3 }
  0x13   : > { %16332 = sst [smem:[#allocation10_spill]] %s11259_s5  ;;  %p8408_p7 = scmp.ge.s32.totalorder %s11105_s28, 1 }
  0x14   : > { %s16334_s23 = scalar_select %p11265_p6, 1, 0 }
  0x15   : > { %p609_p8 = scmp.lt.s32.totalorder %s11105_s28, 3 }
  0x16   : > { %16335 = sst [smem:[#allocation11_spill]] %s16334_s23 }
  0x17   : > { %p610_p9 = pnand %p8408_p7, %p609_p8 }
  0x19   : > { %613 = sbr.rel (%p610_p9) target bundleno = 2740 (0xab4), region = 100 }
  0x20   : > { %s16336_s2 = sld [smem:[#allocation88_spill]]  ;;  %s8410_s1 = sshll.u32 %s11244_s19, 4 }
  0x21   : > { %p681_p10 = scmp.lt.s32.totalorder %s8410_s1, 31  ;;  %s16337_s26 = sld [smem:[#allocation86_spill]] }
  0x22   : > { %s16338_s0 = sld [smem:[#allocation90_spill]]  ;;  %s16341_s24 = sld [smem:[#allocation89_spill]] }
  0x23   : > { %s16696_s1 = smov (!%p681_p10, %s8410_s1), 31  ;;  %s16344_s30 = sld [smem:[#allocation87_spill]] }
  0x24   : > { %s9112_s25 = sshll.u32 %s16696_s1, 5  ;;  %s671_s4 = sand.u32 1, %s11097_s27  }
  0x25   : > { %s11107_s3 = smov [#allocation3]  }
  0x26   : > { %v9227_v1 = vld [vmem:[%s16336_s2 + $0x4] ss:$8 sps:$4 sm:$0xff]   ;;  %v9229_v2 = vld [vmem:[%s16336_s2] ss:$8 sps:$4 sm:$0xff]   ;;  %v9230_v3 = vld [vmem:[%s16336_s2 + $0x14] ss:$8 sps:$4 sm:$0xff]  }
  0x27   : > { %1257 = vmatprep.subr.bf16.mxu0 %v9227_v1  ;;  %v9232_v4 = vld [vmem:[%s16336_s2 + $0x10] ss:$8 sps:$4 sm:$0xff]   ;;  %v9233_v5 = vld [vmem:[%s16336_s2 + $0x24] ss:$8 sps:$4 sm:$0xff]   ;;  %v9235_v6 = vld [vmem:[%s16336_s2 + $0x20] ss:$8 sps:$4 sm:$0xff]   ;;  %s11311_s28 = scalar_lea.vmem %s16337_s26, %s9112_s25 }
  0x28   : > { %1258 = vmatpush1.bf16.msra.mxu0 %v9229_v2  ;;  %v9236_v7 = vld [vmem:[%s16336_s2 + $0x34] ss:$8 sps:$4 sm:$0xff]   ;;  %v9238_v8 = vld [vmem:[%s16336_s2 + $0x30] ss:$8 sps:$4 sm:$0xff]   ;;  %v9239_v9 = vld [vmem:[%s16336_s2 + $0x44] ss:$8 sps:$4 sm:$0xff]  }
  0x29   : > { %1259 = vmatprep.subr.bf16.mxu0 %v9230_v3  ;;  %v9241_v10 = vld [vmem:[%s16336_s2 + $0x40] ss:$8 sps:$4 sm:$0xff]   ;;  %v9242_v11 = vld [vmem:[%s16336_s2 + $0x54] ss:$8 sps:$4 sm:$0xff]   ;;  %v9244_v12 = vld [vmem:[%s16336_s2 + $0x50] ss:$8 sps:$4 sm:$0xff]  }
  0x2a   : > { %v9245_v13 = vld [vmem:[%s16336_s2 + $0x64] ss:$8 sps:$4 sm:$0xff]   ;;  %v9247_v17 = vld [vmem:[%s16336_s2 + $0x60] ss:$8 sps:$4 sm:$0xff]   ;;  %v9248_v18 = vld [vmem:[%s16336_s2 + $0x74] ss:$8 sps:$4 sm:$0xff]  }
  0x2b   : > { %v700_v14 = vld [vmem:[%s11311_s28 + $0x8] sm:$0xff]  ;;  %v9250_v19 = vld [vmem:[%s16336_s2 + $0x70] ss:$8 sps:$4 sm:$0xff]   ;;  %v9254_v22 = vld [vmem:[%s16336_s2 + $0x94] ss:$8 sps:$4 sm:$0xff]   ;;  %s13404_s26 = sshll.u32 %s671_s4, 9 }
  0x2c   : > { %1260 = vmatpush1.bf16.msra.mxu0 %v9232_v4  ;;  %v704_v15 = vld [vmem:[%s11311_s28 + $0x28] sm:$0xff]  ;;  %v9256_v23 = vld [vmem:[%s16336_s2 + $0x90] ss:$8 sps:$4 sm:$0xff]   ;;  %v9260_v26 = vld [vmem:[%s16336_s2 + $0xb4] ss:$8 sps:$4 sm:$0xff]  }
  0x2d   : > { %1261 = vmatprep.subr.bf16.mxu0 %v9233_v5  ;;  %v895_v16 = vpack.c.bf16 %v704_v15, %v700_v14  ;;  %v9251_v20 = vld [vmem:[%s16336_s2 + $0x84] ss:$8 sps:$4 sm:$0xff]   ;;  %v9253_v21 = vld [vmem:[%s16336_s2 + $0x80] ss:$8 sps:$4 sm:$0xff]   ;;  %v9262_v27 = vld [vmem:[%s16336_s2 + $0xb0] ss:$8 sps:$4 sm:$0xff]  }
  0x2e   : > { %v9257_v24 = vld [vmem:[%s16336_s2 + $0xa4] ss:$8 sps:$4 sm:$0xff]   ;;  %v9259_v25 = vld [vmem:[%s16336_s2 + $0xa0] ss:$8 sps:$4 sm:$0xff]   ;;  %v9266_v30 = vld [vmem:[%s16336_s2 + $0xd4] ss:$8 sps:$4 sm:$0xff]  }
  0x2f   : > { %1289 = vmatprep.mubr.bf16.mxu0 %v895_v16  ;;  %v9263_v28 = vld [vmem:[%s16336_s2 + $0xc4] ss:$8 sps:$4 sm:$0xff]   ;;  %v9265_v29 = vld [vmem:[%s16336_s2 + $0xc0] ss:$8 sps:$4 sm:$0xff]   ;;  %v9268_v31 = vld [vmem:[%s16336_s2 + $0xd0] ss:$8 sps:$4 sm:$0xff]  }
  0x30   : > { %1262 = vmatpush1.bf16.msra.mxu0 %v9235_v6  ;;  %v9269_v32 = vld [vmem:[%s16336_s2 + $0xe4] ss:$8 sps:$4 sm:$0xff]   ;;  %v9271_v33 = vld [vmem:[%s16336_s2 + $0xe0] ss:$8 sps:$4 sm:$0xff]   ;;  %v9272_v34 = vld [vmem:[%s16336_s2 + $0xf4] ss:$8 sps:$4 sm:$0xff]  }
  0x31   : > { %1263 = vmatprep.subr.bf16.mxu0 %v9236_v7  ;;  %v9274_v35 = vld [vmem:[%s16336_s2 + $0xf0] ss:$8 sps:$4 sm:$0xff]   ;;  %v699_v36 = vld [vmem:[%s11311_s28] sm:$0xff]  ;;  %v708_v39 = vld [vmem:[%s11311_s28 + $0x48] sm:$0xff] }
  0x32   : > { %v703_v37 = vld [vmem:[%s11311_s28 + $0x20] sm:$0xff]  ;;  %v712_v40 = vld [vmem:[%s11311_s28 + $0x68] sm:$0xff]  ;;  %v9280_v44 = vld [vmem:[%s16336_s2 + $0x114] ss:$8 sps:$4 sm:$0xff]  }
  0x33   : > { %v9277_v38 = vld [vmem:[%s16336_s2 + $0x104] ss:$8 sps:$4 sm:$0xff]   ;;  %v894_v41 = vpack.c.bf16 %v703_v37, %v699_v36  ;;  %v9275_v42 = vld [vmem:[%s16336_s2 + $0x100] ss:$8 sps:$4 sm:$0xff]   ;;  %v899_v43 = vpack.c.bf16 %v712_v40, %v708_v39  ;;  %v9278_v45 = vld [vmem:[%s16336_s2 + $0x110] ss:$8 sps:$4 sm:$0xff]  }
  0x34   : > { %1264 = vmatpush1.bf16.msra.mxu0 %v9238_v8  ;;  %v707_v46 = vld [vmem:[%s11311_s28 + $0x40] sm:$0xff]  ;;  %v716_v49 = vld [vmem:[%s11311_s28 + $0x88] sm:$0xff]  ;;  %v9286_v54 = vld [vmem:[%s16336_s2 + $0x134] ss:$8 sps:$4 sm:$0xff]  }
  0x35   : > { %1265 = vmatprep.subr.bf16.mxu0 %v9239_v9  ;;  %v711_v47 = vld [vmem:[%s11311_s28 + $0x60] sm:$0xff]  ;;  %v720_v50 = vld [vmem:[%s11311_s28 + $0xa8] sm:$0xff]  ;;  %v9284_v55 = vld [vmem:[%s16336_s2 + $0x130] ss:$8 sps:$4 sm:$0xff]  }
  0x36   : > { %v9283_v48 = vld [vmem:[%s16336_s2 + $0x124] ss:$8 sps:$4 sm:$0xff]   ;;  %v898_v51 = vpack.c.bf16 %v711_v47, %v707_v46  ;;  %v9281_v52 = vld [vmem:[%s16336_s2 + $0x120] ss:$8 sps:$4 sm:$0xff]   ;;  %v903_v53 = vpack.c.bf16 %v720_v50, %v716_v49  ;;  %v9292_v0 = vld [vmem:[%s16336_s2 + $0x154] ss:$8 sps:$4 sm:$0xff]  }
  0x37   : > { %v715_v56 = vld [vmem:[%s11311_s28 + $0x80] sm:$0xff]  ;;  %v724_v59 = vld [vmem:[%s11311_s28 + $0xc8] sm:$0xff]  ;;  %v9290_v1 = vld [vmem:[%s16336_s2 + $0x150] ss:$8 sps:$4 sm:$0xff]  }
  0x38   : > { %1266 = vmatpush1.bf16.msra.mxu0 %v9241_v10  ;;  %v719_v57 = vld [vmem:[%s11311_s28 + $0xa0] sm:$0xff]  ;;  %v728_v60 = vld [vmem:[%s11311_s28 + $0xe8] sm:$0xff]  ;;  %v9326_v9 = vld [vmem:[%s16338_s0 + $0x14] ss:$8 sps:$4 sm:$0xff]  }
  0x39   : > { %1267 = vmatprep.subr.bf16.mxu0 %v9242_v11  ;;  %v9289_v58 = vld [vmem:[%s16336_s2 + $0x144] ss:$8 sps:$4 sm:$0xff]   ;;  %v902_v61 = vpack.c.bf16 %v719_v57, %v715_v56  ;;  %v9287_v62 = vld [vmem:[%s16336_s2 + $0x140] ss:$8 sps:$4 sm:$0xff]   ;;  %v907_v63 = vpack.c.bf16 %v728_v60, %v724_v59  ;;  %v9328_v11 = vld [vmem:[%s16338_s0 + $0x10] ss:$8 sps:$4 sm:$0xff]  }
  0x3a   : > { %v723_v2 = vld [vmem:[%s11311_s28 + $0xc0] sm:$0xff]  ;;  %v732_v7 = vld [vmem:[%s11311_s28 + $0x108] sm:$0xff]  ;;  %v9298_v14 = vld [vmem:[%s16336_s2 + $0x174] ss:$8 sps:$4 sm:$0xff]  }
  0x3b   : > { %v727_v3 = vld [vmem:[%s11311_s28 + $0xe0] sm:$0xff]  ;;  %v736_v8 = vld [vmem:[%s11311_s28 + $0x128] sm:$0xff]  ;;  %v9296_v16 = vld [vmem:[%s16336_s2 + $0x170] ss:$8 sps:$4 sm:$0xff]  }
  0x3c   : > { %1268 = vmatpush1.bf16.msra.mxu0 %v9244_v12  ;;  %v9295_v4 = vld [vmem:[%s16336_s2 + $0x164] ss:$8 sps:$4 sm:$0xff]   ;;  %v9325_v6 = vld [vmem:[%s16338_s0] ss:$8 sps:$4 sm:$0xff]   ;;  %v906_v10 = vpack.c.bf16 %v727_v3, %v723_v2  ;;  %v9314_v59 = vld [vmem:[%s16336_s2 + $0x1d0] ss:$8 sps:$4 sm:$0xff]  }
  0x3d   : > { %1269 = vmatprep.subr.bf16.mxu0 %v9245_v13  ;;  %v9323_v5 = vld [vmem:[%s16338_s0 + $0x4] ss:$8 sps:$4 sm:$0xff]   ;;  %v9293_v12 = vld [vmem:[%s16336_s2 + $0x160] ss:$8 sps:$4 sm:$0xff]   ;;  %v911_v13 = vpack.c.bf16 %v736_v8, %v732_v7  ;;  %v9322_v3 = vld [vmem:[%s16336_s2 + $0x1f4] ss:$8 sps:$4 sm:$0xff]  }
  0x3e   : > { %1894 = vmatprep.subr.bf16.mxu1 %v9323_v5  ;;  %v9329_v15 = vld [vmem:[%s16338_s0 + $0x24] ss:$8 sps:$4 sm:$0xff]   ;;  %v9305_v39 = vld [vmem:[%s16336_s2 + $0x1a0] ss:$8 sps:$4 sm:$0xff]   ;;  %v9320_v5 = vld [vmem:[%s16336_s2 + $0x1f0] ss:$8 sps:$4 sm:$0xff]  }
  0x3f   : > { %1895 = vmatpush1.bf16.msra.mxu1 %v9325_v6  ;;  %v748_v36 = vld [vmem:[%s11311_s28 + $0x188] sm:$0xff]  ;;  %v747_v46 = vld [vmem:[%s11311_s28 + $0x180] sm:$0xff]  ;;  %v701_v6 = vld [vmem:[%s11311_s28 + $0x10] sm:$0xff] }
  0x40   : > { %1270 = vmatpush1.bf16.msra.mxu0 %v9247_v17  ;;  %1896 = vmatprep.subr.bf16.mxu1 %v9326_v9  ;;  %v731_v17 = vld [vmem:[%s11311_s28 + $0x100] sm:$0xff]  ;;  %v752_v37 = vld [vmem:[%s11311_s28 + $0x1a8] sm:$0xff]  ;;  %v705_v7 = vld [vmem:[%s11311_s28 + $0x30] sm:$0xff] }
  0x41   : > { %1271 = vmatprep.subr.bf16.mxu0 %v9248_v18  ;;  %v735_v18 = vld [vmem:[%s11311_s28 + $0x120] sm:$0xff]  ;;  %v756_v50 = vld [vmem:[%s11311_s28 + $0x1c8] sm:$0xff]  ;;  %v710_v8 = vld [vmem:[%s11311_s28 + $0x58] sm:$0xff] }
  0x42   : > { %v751_v47 = vld [vmem:[%s11311_s28 + $0x1a0] sm:$0xff]  ;;  %v714_v9 = vld [vmem:[%s11311_s28 + $0x78] sm:$0xff] }
  0x43   : > { %1897 = vmatpush1.bf16.msra.mxu1 %v9328_v11  ;;  %v9313_v49 = vld [vmem:[%s16336_s2 + $0x1c4] ss:$8 sps:$4 sm:$0xff]   ;;  %v901_v11 = vpack.c.bf16 %v714_v9, %v710_v8 }
  0x44   : > { %1272 = vmatpush1.bf16.msra.mxu0 %v9250_v19  ;;  %v9331_v19 = vld [vmem:[%s16338_s0 + $0x20] ss:$8 sps:$4 sm:$0xff]   ;;  %1898 = vmatprep.subr.bf16.mxu1 %v9329_v15  ;;  %v9347_v56 = vld [vmem:[%s16338_s0 + $0x84] ss:$8 sps:$4 sm:$0xff]   ;;  %v722_v15 = vld [vmem:[%s11311_s28 + $0xb8] sm:$0xff] }
  0x45   : > { %1273 = vmatprep.subr.bf16.mxu0 %v9251_v20  ;;  %v9301_v20 = vld [vmem:[%s16336_s2 + $0x184] ss:$8 sps:$4 sm:$0xff]  }
  0x46   : > { %v755_v60 = vld [vmem:[%s11311_s28 + $0x1c0] sm:$0xff] }
  0x47   : > { %1899 = vmatpush1.bf16.msra.mxu1 %v9331_v19  ;;  %v721_v19 = vld [vmem:[%s11311_s28 + $0xb0] sm:$0xff] }
  0x48   : > { %1274 = vmatpush1.bf16.msra.mxu0 %v9253_v21  ;;  %v9332_v21 = vld [vmem:[%s16338_s0 + $0x34] ss:$8 sps:$4 sm:$0xff]  }
  0x49   : > { %1275 = vmatprep.subr.bf16.mxu0 %v9254_v22  ;;  %v740_v22 = vld [vmem:[%s11311_s28 + $0x148] sm:$0xff]  ;;  %1900 = vmatprep.subr.bf16.mxu1 %v9332_v21  ;;  %v730_v21 = vld [vmem:[%s11311_s28 + $0xf8] sm:$0xff] }
  0x4c   : > { %1276 = vmatpush1.bf16.msra.mxu0 %v9256_v23  ;;  %v744_v23 = vld [vmem:[%s11311_s28 + $0x168] sm:$0xff] }
  0x4d   : > { %1277 = vmatprep.subr.bf16.mxu0 %v9257_v24  ;;  %v9299_v24 = vld [vmem:[%s16336_s2 + $0x180] ss:$8 sps:$4 sm:$0xff]  }
  0x50   : > { %1278 = vmatpush1.bf16.msra.mxu0 %v9259_v25  ;;  %v910_v25 = vpack.c.bf16 %v735_v18, %v731_v17  ;;  %v717_v18 = vld [vmem:[%s11311_s28 + $0x90] sm:$0xff] }
  0x51   : > { %1279 = vmatprep.subr.bf16.mxu0 %v9260_v26  ;;  %v9304_v26 = vld [vmem:[%s16336_s2 + $0x194] ss:$8 sps:$4 sm:$0xff]  }
  0x54   : > { %1280 = vmatpush1.bf16.msra.mxu0 %v9262_v27  ;;  %v9334_v27 = vld [vmem:[%s16338_s0 + $0x30] ss:$8 sps:$4 sm:$0xff]  }
  0x55   : > { %1281 = vmatprep.subr.bf16.mxu0 %v9263_v28  ;;  %v9335_v28 = vld [vmem:[%s16338_s0 + $0x44] ss:$8 sps:$4 sm:$0xff]   ;;  %1901 = vmatpush1.bf16.msra.mxu1 %v9334_v27  ;;  %v738_v27 = vld [vmem:[%s11311_s28 + $0x138] sm:$0xff] }
  0x56   : > { %1902 = vmatprep.subr.bf16.mxu1 %v9335_v28 }
  0x58   : > { %1282 = vmatpush1.bf16.msra.mxu0 %v9265_v29  ;;  %v915_v29 = vpack.c.bf16 %v744_v23, %v740_v22  ;;  %v904_v22 = vpack.c.bf16 %v721_v19, %v717_v18 }
  0x59   : > { %1283 = vmatprep.subr.bf16.mxu0 %v9266_v30  ;;  %v9337_v30 = vld [vmem:[%s16338_s0 + $0x40] ss:$8 sps:$4 sm:$0xff]  }
  0x5a   : > { %1903 = vmatpush1.bf16.msra.mxu1 %v9337_v30  ;;  %v733_v30 = vld [vmem:[%s11311_s28 + $0x110] sm:$0xff] }
  0x5c   : > { %1284 = vmatpush1.bf16.msra.mxu0 %v9268_v31  ;;  %v9302_v31 = vld [vmem:[%s16336_s2 + $0x190] ss:$8 sps:$4 sm:$0xff]  }
  0x5d   : > { %1285 = vmatprep.subr.bf16.mxu0 %v9269_v32  ;;  %v739_v32 = vld [vmem:[%s11311_s28 + $0x140] sm:$0xff] }
  0x60   : > { %1286 = vmatpush1.bf16.msra.mxu0 %v9271_v33  ;;  %v743_v33 = vld [vmem:[%s11311_s28 + $0x160] sm:$0xff] }
  0x61   : > { %1287 = vmatprep.subr.bf16.mxu0 %v9272_v34  ;;  %v9338_v34 = vld [vmem:[%s16338_s0 + $0x54] ss:$8 sps:$4 sm:$0xff]   ;;  %v914_v40 = vpack.c.bf16 %v743_v33, %v739_v32 }
  0x62   : > { %1904 = vmatprep.subr.bf16.mxu1 %v9338_v34  ;;  %v742_v32 = vld [vmem:[%s11311_s28 + $0x158] sm:$0xff] }
  0x63   : > { %v746_v33 = vld [vmem:[%s11311_s28 + $0x178] sm:$0xff] }
  0x64   : > { %1288 = vmatpush1.bf16.msra.mxu0 %v9274_v35  ;;  %v9307_v35 = vld [vmem:[%s16336_s2 + $0x1a4] ss:$8 sps:$4 sm:$0xff]  }
  0x65   : > { %1370 = vmatprep.subr.bf16.mxu0 %v9277_v38  ;;  %v9340_v38 = vld [vmem:[%s16338_s0 + $0x50] ss:$8 sps:$4 sm:$0xff]  }
  0x66   : > { %1905 = vmatpush1.bf16.msra.mxu1 %v9340_v38  ;;  %v750_v38 = vld [vmem:[%s11311_s28 + $0x198] sm:$0xff] }
  0x67   : > { %1290 = vmatmul.mubr.bf16.vlgmr.msra.gmra.mrb[0].mxu0 %v894_v41  ;;  %v9310_v41 = vld [vmem:[%s16336_s2 + $0x1b4] ss:$8 sps:$4 sm:$0xff]  }
  0x68   : > { %1371 = vmatpush1.bf16.msra.mxu0 %v9275_v42  ;;  %1299 = vmatprep.mubr.bf16.mxu0 %v899_v43  ;;  %v9341_v42 = vld [vmem:[%s16338_s0 + $0x64] ss:$8 sps:$4 sm:$0xff]   ;;  %v919_v43 = vpack.c.bf16 %v752_v37, %v748_v36  ;;  %v741_v36 = vld [vmem:[%s11311_s28 + $0x150] sm:$0xff] }
  0x69   : > { %1372 = vmatprep.subr.bf16.mxu0 %v9280_v44  ;;  %v9343_v44 = vld [vmem:[%s16338_s0 + $0x60] ss:$8 sps:$4 sm:$0xff]   ;;  %1906 = vmatprep.subr.bf16.mxu1 %v9341_v42  ;;  %v745_v37 = vld [vmem:[%s11311_s28 + $0x170] sm:$0xff] }
  0x6a   : > { %1907 = vmatpush1.bf16.msra.mxu1 %v9343_v44  ;;  %v749_v42 = vld [vmem:[%s11311_s28 + $0x190] sm:$0xff]  ;;  %v758_v44 = vld [vmem:[%s11311_s28 + $0x1d8] sm:$0xff] }
  0x6c   : > { %1373 = vmatpush1.bf16.msra.mxu0 %v9278_v45  ;;  %v9308_v45 = vld [vmem:[%s16336_s2 + $0x1b0] ss:$8 sps:$4 sm:$0xff]  }
  0x6d   : > { %1374 = vmatprep.subr.bf16.mxu0 %v9283_v48  ;;  %v9344_v48 = vld [vmem:[%s16338_s0 + $0x74] ss:$8 sps:$4 sm:$0xff]  }
  0x6e   : > { %1908 = vmatprep.subr.bf16.mxu1 %v9344_v48  ;;  %v757_v48 = vld [vmem:[%s11311_s28 + $0x1d0] sm:$0xff] }
  0x6f   : > { %1300 = vmatmul.mubr.bf16.gmra.mrb[4].mxu0 %v898_v51  ;;  %v760_v51 = vld [vmem:[%s11311_s28 + $0x1e8] sm:$0xff] }
  0x70   : > { %1375 = vmatpush1.bf16.msra.mxu0 %v9281_v52  ;;  %1309 = vmatprep.mubr.bf16.mxu0 %v903_v53  ;;  %v9346_v52 = vld [vmem:[%s16338_s0 + $0x70] ss:$8 sps:$4 sm:$0xff]   ;;  %v9311_v53 = vld [vmem:[%s16336_s2 + $0x1c0] ss:$8 sps:$4 sm:$0xff]   ;;  %v923_v57 = vpack.c.bf16 %v760_v51, %v756_v50  ;;  %v9350_v51 = vld [vmem:[%s16338_s0 + $0x94] ss:$8 sps:$4 sm:$0xff]  }
  0x71   : > { %1376 = vmatprep.subr.bf16.mxu0 %v9286_v54  ;;  %v918_v54 = vpack.c.bf16 %v751_v47, %v747_v46  ;;  %1909 = vmatpush1.bf16.msra.mxu1 %v9346_v52  ;;  %v9352_v52 = vld [vmem:[%s16338_s0 + $0x90] ss:$8 sps:$4 sm:$0xff]  }
  0x72   : > { %1910 = vmatprep.subr.bf16.mxu1 %v9347_v56  ;;  %v9358_v56 = vld [vmem:[%s16338_s0 + $0xb0] ss:$8 sps:$4 sm:$0xff]  }
  0x74   : > { %1377 = vmatpush1.bf16.msra.mxu0 %v9284_v55  ;;  %v9316_v55 = vld [vmem:[%s16336_s2 + $0x1d4] ss:$8 sps:$4 sm:$0xff]  }
  0x75   : > { %1378 = vmatprep.subr.bf16.mxu0 %v9289_v58  ;;  %v9349_v58 = vld [vmem:[%s16338_s0 + $0x80] ss:$8 sps:$4 sm:$0xff]  }
  0x76   : > { %1911 = vmatpush1.bf16.msra.mxu1 %v9349_v58  ;;  %v9361_v58 = vld [vmem:[%s16338_s0 + $0xc0] ss:$8 sps:$4 sm:$0xff]  }
  0x77   : > { %1310 = vmatmul.mubr.bf16.gmra.mrb[8].mxu0 %v902_v61  ;;  %v759_v61 = vld [vmem:[%s11311_s28 + $0x1e0] sm:$0xff]  ;;  %1912 = vmatprep.subr.bf16.mxu1 %v9350_v51 }
  0x78   : > { %1379 = vmatpush1.bf16.msra.mxu0 %v9287_v62  ;;  %1319 = vmatprep.mubr.bf16.mxu0 %v907_v63  ;;  %v9319_v62 = vld [vmem:[%s16336_s2 + $0x1e4] ss:$8 sps:$4 sm:$0xff]   ;;  %v702_v63 = vld [vmem:[%s11311_s28 + $0x18] sm:$0xff]  ;;  %v922_v2 = vpack.c.bf16 %v759_v61, %v755_v60 }
  0x79   : > { %1380 = vmatprep.subr.bf16.mxu0 %v9292_v0  ;;  %v706_v0 = vld [vmem:[%s11311_s28 + $0x38] sm:$0xff]  ;;  %v9365_v61 = vld [vmem:[%s16338_s0 + $0xe4] ss:$8 sps:$4 sm:$0xff]  }
  0x7a   : > { %1913 = vmatpush1.bf16.msra.mxu1 %v9352_v52  ;;  %v9364_v60 = vld [vmem:[%s16338_s0 + $0xd0] ss:$8 sps:$4 sm:$0xff]  }
  0x7c   : > { %1381 = vmatpush1.bf16.msra.mxu0 %v9290_v1  ;;  %v9317_v1 = vld [vmem:[%s16336_s2 + $0x1e0] ss:$8 sps:$4 sm:$0xff]   ;;  %s9113_s2 = sshll.u32 %s16696_s1, 3 }
  0x7d   : > { %1382 = vmatprep.subr.bf16.mxu0 %v9295_v4  ;;  %v897_v4 = vpack.c.bf16 %v706_v0, %v702_v63  ;;  %v9368_v63 = vld [vmem:[%s16338_s0 + $0xf4] ss:$8 sps:$4 sm:$0xff]   ;;  %v9370_v0 = vld [vmem:[%s16338_s0 + $0xf0] ss:$8 sps:$4 sm:$0xff]  }
  0x7f   : > { %1320 = vmatmul.mubr.bf16.gmra.mrb[12].mxu0 %v906_v10  ;;  %v896_v10 = vpack.c.bf16 %v705_v7, %v701_v6 }
  0x80   : > { %1383 = vmatpush1.bf16.msra.mxu0 %v9293_v12  ;;  %1329 = vmatprep.mubr.bf16.mxu0 %v911_v13  ;;  %v709_v12 = vld [vmem:[%s11311_s28 + $0x50] sm:$0xff] }
  0x81   : > { %1384 = vmatprep.subr.bf16.mxu0 %v9298_v14  ;;  %v713_v13 = vld [vmem:[%s11311_s28 + $0x70] sm:$0xff]  ;;  %v718_v14 = vld [vmem:[%s11311_s28 + $0x98] sm:$0xff] }
  0x82   : > { %v905_v17 = vpack.c.bf16 %v722_v15, %v718_v14 }
  0x84   : > { %1385 = vmatpush1.bf16.msra.mxu0 %v9296_v16  ;;  %v900_v16 = vpack.c.bf16 %v713_v13, %v709_v12 }
  0x85   : > { %1386 = vmatprep.subr.bf16.mxu0 %v9301_v20  ;;  %v726_v20 = vld [vmem:[%s11311_s28 + $0xd8] sm:$0xff] }
  0x86   : > { %v909_v23 = vpack.c.bf16 %v730_v21, %v726_v20 }
  0x87   : > { %1330 = vmatmul.mubr.bf16.gmra.mrb[16].mxu0 %v910_v25  ;;  %v729_v25 = vld [vmem:[%s11311_s28 + $0xf0] sm:$0xff] }
  0x88   : > { %1387 = vmatpush1.bf16.msra.mxu0 %v9299_v24  ;;  %1339 = vmatprep.mubr.bf16.mxu0 %v915_v29  ;;  %v725_v24 = vld [vmem:[%s11311_s28 + $0xd0] sm:$0xff] }
  0x89   : > { %1388 = vmatprep.subr.bf16.mxu0 %v9304_v26  ;;  %v734_v26 = vld [vmem:[%s11311_s28 + $0x118] sm:$0xff]  ;;  %v908_v28 = vpack.c.bf16 %v729_v25, %v725_v24 }
  0x8a   : > { %v913_v29 = vpack.c.bf16 %v738_v27, %v734_v26 }
  0x8c   : > { %1389 = vmatpush1.bf16.msra.mxu0 %v9302_v31  ;;  %v737_v31 = vld [vmem:[%s11311_s28 + $0x130] sm:$0xff] }
  0x8d   : > { %1390 = vmatprep.subr.bf16.mxu0 %v9307_v35  ;;  %v912_v34 = vpack.c.bf16 %v737_v31, %v733_v30  ;;  %v917_v35 = vpack.c.bf16 %v746_v33, %v742_v32 }
  0x8f   : > { %1340 = vmatmul.mubr.bf16.gmra.mrb[20].mxu0 %v914_v40  ;;  %v916_v40 = vpack.c.bf16 %v745_v37, %v741_v36 }
  0x90   : > { %1391 = vmatpush1.bf16.msra.mxu0 %v9305_v39  ;;  %1349 = vmatprep.mubr.bf16.mxu0 %v919_v43  ;;  %v754_v39 = vld [vmem:[%s11311_s28 + $0x1b8] sm:$0xff]  ;;  %v753_v43 = vld [vmem:[%s11311_s28 + $0x1b0] sm:$0xff] }
  0x91   : > { %1392 = vmatprep.subr.bf16.mxu0 %v9310_v41  ;;  %v921_v41 = vpack.c.bf16 %v754_v39, %v750_v38  ;;  %v920_v46 = vpack.c.bf16 %v753_v43, %v749_v42 }
  0x94   : > { %1393 = vmatpush1.bf16.msra.mxu0 %v9308_v45  ;;  %v762_v45 = vld [vmem:[%s11311_s28 + $0x1f8] sm:$0xff] }
  0x95   : > { %1394 = vmatprep.subr.bf16.mxu0 %v9313_v49  ;;  %v925_v47 = vpack.c.bf16 %v762_v45, %v758_v44  ;;  %v761_v49 = vld [vmem:[%s11311_s28 + $0x1f0] sm:$0xff] }
  0x96   : > { %v924_v50 = vpack.c.bf16 %v761_v49, %v757_v48 }
  0x97   : > { %1350 = vmatmul.mubr.bf16.gmra.mrb[24].mxu0 %v918_v54  ;;  %v9355_v54 = vld [vmem:[%s16338_s0 + $0xa0] ss:$8 sps:$4 sm:$0xff]  }
  0x98   : > { %1395 = vmatpush1.bf16.msra.mxu0 %v9311_v53  ;;  %1359 = vmatprep.mubr.bf16.mxu0 %v923_v57  ;;  %v9353_v53 = vld [vmem:[%s16338_s0 + $0xa4] ss:$8 sps:$4 sm:$0xff]  }
  0x99   : > { %1396 = vmatprep.subr.bf16.mxu0 %v9316_v55  ;;  %1914 = vmatprep.subr.bf16.mxu1 %v9353_v53  ;;  %v9356_v55 = vld [vmem:[%s16338_s0 + $0xb4] ss:$8 sps:$4 sm:$0xff]   ;;  %v9359_v57 = vld [vmem:[%s16338_s0 + $0xc4] ss:$8 sps:$4 sm:$0xff]  }
  0x9a   : > { %1915 = vmatpush1.bf16.msra.mxu1 %v9355_v54 }
  0x9b   : > { %1916 = vmatprep.subr.bf16.mxu1 %v9356_v55 }
  0x9c   : > { %1397 = vmatpush1.bf16.msra.mxu0 %v9314_v59  ;;  %v9362_v59 = vld [vmem:[%s16338_s0 + $0xd4] ss:$8 sps:$4 sm:$0xff]  }
  0x9d   : > { %1398 = vmatprep.subr.bf16.mxu0 %v9319_v62  ;;  %v9367_v62 = vld [vmem:[%s16338_s0 + $0xe0] ss:$8 sps:$4 sm:$0xff]   ;;  %s16343_s0 = sld [smem:[#allocation91_spill]] }
  0x9e   : > { %1917 = vmatpush1.bf16.msra.mxu1 %v9358_v56 }
  0x9f   : > { %1360 = vmatmul.mubr.bf16.gmra.mrb[28].mxu0 %v922_v2  ;;  %1918 = vmatprep.subr.bf16.mxu1 %v9359_v57  ;;  %v16230_v2 = vlaneseq }
  0xa0   : > { %1399 = vmatpush1.bf16.msra.mxu0 %v9317_v1  ;;  %1402 = vmatprep.mubr.bf16.mxu0 %v897_v4  ;;  %v9373_v1 = vld [vmem:[%s16204_s6 + $0x4] ss:$8 sps:$4 sm:$0xff]  }
  0xa1   : > { %1400 = vmatprep.subr.bf16.mxu0 %v9322_v3  ;;  %v11636_v3 = vshrl.u32 %v16230_v2, 7  ;;  %v11002_v2 = vld [vmem:[%s11311_s28 + $0x160] sm:$0xff] }
  0xa2   : > { %1919 = vmatpush1.bf16.msra.mxu1 %v9361_v58 }
  0xa3   : > { %1920 = vmatprep.subr.bf16.mxu1 %v9362_v59  ;;  %16339 = vst [vmem:[#allocation12_spill] sm:$0xff] %v11636_v3  ;;  %v11639_v4 = vsub.s32 0, %v11636_v3  ;;  %v11645_v6 = vsub.s32 1, %v11636_v3 }
  0xa4   : > { %1401 = vmatpush1.bf16.msra.mxu0 %v9320_v5  ;;  %v827_v5 = vld [vmem:[%s16341_s24] sm:$0x3]  ;;  %s12917_s24 = scalar_lea.vmem %s16344_s30, %s9113_s2  ;;  %s9115_s30 = sshll.u32 %s11244_s19, 13 }
  0xa5   : > { %16340 = vst [vmem:[#allocation13_spill] sm:$0xff] %v11639_v4  ;;  %16342 = vst [vmem:[#allocation14_spill] sm:$0xff] %v11645_v6  ;;  %v11648_v7 = vrot.slane %v827_v5, %v11639_v4  ;;  %v11651_v8 = vrot.slane %v827_v5, %v11645_v6 }
  0xa6   : > { %1921 = vmatpush1.bf16.msra.mxu1 %v9364_v60 }
  0xa7   : > { %1403 = vmatmul.mubr.bf16.vlgmr.msra.gmra.mrb[0].mxu0 %v896_v10  ;;  %1922 = vmatprep.subr.bf16.mxu1 %v9365_v61 }
  0xa8   : > { %1412 = vmatprep.mubr.bf16.mxu0 %v901_v11 }
  0xaa   : > { %1923 = vmatpush1.bf16.msra.mxu1 %v9367_v62 }
  0xab   : > { %1924 = vmatprep.subr.bf16.mxu1 %v9368_v63 }
  0xae   : > { %1925 = vmatpush1.bf16.msra.mxu1 %v9370_v0 }
  0xaf   : > { %1413 = vmatmul.mubr.bf16.gmra.mrb[4].mxu0 %v900_v16  ;;  %2418 = vmatprep.subr.bf16.mxu1 %v9373_v1 }
  0xb0   : > { %1422 = vmatprep.mubr.bf16.mxu0 %v905_v17 }
  0xb7   : > { %1423 = vmatmul.mubr.bf16.gmra.mrb[8].mxu0 %v904_v22 }
  0xb8   : > { %1432 = vmatprep.mubr.bf16.mxu0 %v909_v23 }
  0xbf   : > { %1433 = vmatmul.mubr.bf16.gmra.mrb[12].mxu0 %v908_v28 }
  0xc0   : > { %1442 = vmatprep.mubr.bf16.mxu0 %v913_v29 }
  0xc7   : > { %1443 = vmatmul.mubr.bf16.gmra.mrb[16].mxu0 %v912_v34 }
  0xc8   : > { %1452 = vmatprep.mubr.bf16.mxu0 %v917_v35 }
  0xcf   : > { %1453 = vmatmul.mubr.bf16.gmra.mrb[20].mxu0 %v916_v40 }
  0xd0   : > { %1462 = vmatprep.mubr.bf16.mxu0 %v921_v41 }
  0xd7   : > { %1463 = vmatmul.mubr.bf16.gmra.mrb[24].mxu0 %v920_v46 }
  0xd8   : > { %1472 = vmatprep.mubr.bf16.mxu0 %v925_v47 }
  0xdf   : > { %1473 = vmatmul.mubr.bf16.gmra.mrb[28].mxu0 %v924_v50 }
 0x17a   : > { %v1404_v9 = vpop.f32.mrb[0].mxu0 }
 0x17b   : > { %v9116_v10 = vadd.f32 %v1404_v9, %v11648_v7  ;;  %v1406_v11 = vpop.f32.mrb[1].mxu0 }
 0x17c   : > { %v11655_v12 = vadd.f32 %v1406_v11, %v11651_v8  ;;  %v1408_v13 = vpop.f32.mrb[2].mxu0 }
 0x17d   : > { %v1515_v14 = vmul.f32 1.442695, %v9116_v10  ;;  %v11658_v15 = vadd.f32 %v1408_v13, %v11648_v7  ;;  %v1410_v16 = vpop.f32.mrb[3].mxu0  ;;  %vm1483_vm0 = vcmp.gt.f32.partialorder %v9116_v10, 0.0 }
 0x17e   : > { %v1517_v17 = vmul.f32 1.442695, %v11655_v12  ;;  %v11662_v18 = vadd.f32 %v1410_v16, %v11651_v8  ;;  %vm1484_vm1 = vcmp.gt.f32.partialorder %v11655_v12, 0.0 }
 0x17f   : > { %9731 = vpow2.f32 %v1515_v14  ;;  %v1519_v19 = vmul.f32 1.442695, %v11658_v15  ;;  %vm1485_vm2 = vcmp.gt.f32.partialorder %v11658_v15, 0.0 }
 0x180   : > { %9733 = vpow2.f32 %v1517_v17  ;;  %v1521_v20 = vmul.f32 1.442695, %v11662_v18  ;;  %vm1486_vm3 = vcmp.gt.f32.partialorder %v11662_v18, 0.0 }
 0x181   : > { %9735 = vpow2.f32 %v1519_v19 }
 0x182   : > { %9737 = vpow2.f32 %v1521_v20  ;;  %v1414_v21 = vpop.f32.mrb[4].mxu0 }
 0x183   : > { %v11667_v22 = vadd.f32 %v1414_v21, %v11648_v7  ;;  %v1416_v23 = vpop.f32.mrb[5].mxu0 }
 0x184   : > { %v11670_v24 = vadd.f32 %v1416_v23, %v11651_v8  ;;  %v1418_v25 = vpop.f32.mrb[6].mxu0 }
 0x185   : > { %v1523_v26 = vmul.f32 1.442695, %v11667_v22  ;;  %v11674_v27 = vadd.f32 %v1418_v25, %v11648_v7  ;;  %v1420_v28 = vpop.f32.mrb[7].mxu0  ;;  %vm1487_vm4 = vcmp.gt.f32.partialorder %v11667_v22, 0.0 }
 0x186   : > { %v1525_v29 = vmul.f32 1.442695, %v11670_v24  ;;  %v11678_v30 = vadd.f32 %v1420_v28, %v11651_v8  ;;  %vm1488_vm5 = vcmp.gt.f32.partialorder %v11670_v24, 0.0 }
 0x187   : > { %9739 = vpow2.f32 %v1523_v26  ;;  %v1527_v31 = vmul.f32 1.442695, %v11674_v27  ;;  %vm1489_vm6 = vcmp.gt.f32.partialorder %v11674_v27, 0.0 }
 0x188   : > { %9741 = vpow2.f32 %v1525_v29  ;;  %v1529_v32 = vmul.f32 1.442695, %v11678_v30  ;;  %vm1490_vm7 = vcmp.gt.f32.partialorder %v11678_v30, 0.0 }
 0x189   : > { %v9732_v33 = vpop.eup %9731  ;;  %9743 = vpow2.f32 %v1527_v31 }
 0x18a   : > { %v9734_v34 = vpop.eup %9733  ;;  %v8481_v35 = vadd.f32 -1.0, %v9732_v33  ;;  %9745 = vpow2.f32 %v1529_v32  ;;  %v1424_v36 = vpop.f32.mrb[8].mxu0 }
 0x18b   : > { %v9736_v37 = vpop.eup %9735  ;;  %v11683_v38 = vadd.f32 %v1424_v36, %v11648_v7  ;;  %v1426_v39 = vpop.f32.mrb[9].mxu0  ;;  %v8482_v48 = vadd.f32 -1.0, %v9734_v34 }
 0x18c   : > { %v9738_v40 = vpop.eup %9737  ;;  %v1611_v41 = vmul.f32 1.6732632, %v8481_v35  ;;  %v8483_v42 = vadd.f32 -1.0, %v9736_v37  ;;  %v11686_v43 = vadd.f32 %v1426_v39, %v11651_v8  ;;  %v1428_v44 = vpop.f32.mrb[10].mxu0 }
 0x18d   : > { %v1531_v45 = vmul.f32 1.442695, %v11683_v38  ;;  %v11690_v46 = vadd.f32 %v1428_v44, %v11648_v7  ;;  %v1430_v47 = vpop.f32.mrb[11].mxu0  ;;  %v8484_v50 = vadd.f32 -1.0, %v9738_v40  ;;  %v1612_v56 = vmul.f32 1.6732632, %v8482_v48 }
 0x18e   : > { %v1533_v49 = vmul.f32 1.442695, %v11686_v43  ;;  %v1643_v52 = vsel %vm1483_vm0, %v9116_v10, %v1611_v41  ;;  %v1613_v53 = vmul.f32 1.6732632, %v8483_v42  ;;  %v11698_v54 = vadd.f32 %v1430_v47, %v11651_v8 }
 0x18f   : > { %9747 = vpow2.f32 %v1531_v45  ;;  %v1535_v51 = vmul.f32 1.442695, %v11690_v46  ;;  %v1614_v61 = vmul.f32 1.6732632, %v8484_v50  ;;  %v1675_v63 = vmul.f32 1.050701, %v1643_v52 }
 0x190   : > { %9749 = vpow2.f32 %v1533_v49  ;;  %v1537_v59 = vmul.f32 1.442695, %v11698_v54  ;;  %v1645_v10 = vsel %vm1485_vm2, %v11658_v15, %v1613_v53  ;;  %v1644_v20 = vsel %vm1484_vm1, %v11655_v12, %v1612_v56  ;;  %v9371_v49 = vld [vmem:[%s16204_s6] ss:$8 sps:$4 sm:$0xff]   ;;  %v9376_v53 = vld [vmem:[%s16204_s6 + $0x14] ss:$8 sps:$4 sm:$0xff]  }
 0x191   : > { %v9740_v55 = vpop.eup %9739  ;;  %9751 = vpow2.f32 %v1535_v51  ;;  %vm1492_vm8 = vcmp.gt.f32.partialorder %v11686_v43, 0.0  ;;  %v1646_v25 = vsel %vm1486_vm3, %v11662_v18, %v1614_v61  ;;  %v1677_v31 = vmul.f32 1.050701, %v1645_v10 }
 0x192   : > { %v9742_v57 = vpop.eup %9741  ;;  %v8485_v58 = vadd.f32 -1.0, %v9740_v55  ;;  %v1434_v60 = vpop.f32.mrb[12].mxu0  ;;  %9753 = vpow2.f32 %v1537_v59  ;;  %vm1491_vm9 = vcmp.gt.f32.partialorder %v11683_v38, 0.0  ;;  %v1676_v32 = vmul.f32 1.050701, %v1644_v20 }
 0x193   : > { %v9744_v62 = vpop.eup %9743  ;;  %v8486_v0 = vadd.f32 -1.0, %v9742_v57  ;;  %v11706_v1 = vadd.f32 %v1434_v60, %v11648_v7  ;;  %v1436_v5 = vpop.f32.mrb[13].mxu0  ;;  %v1707_v51 = vpack.c.bf16 %v1677_v31, %v1675_v63  ;;  %vm1493_vm10 = vcmp.gt.f32.partialorder %v11690_v46, 0.0 }
 0x194   : > { %v9746_v9 = vpop.eup %9745  ;;  %v8487_v11 = vadd.f32 -1.0, %v9744_v62  ;;  %v11712_v13 = vadd.f32 %v1436_v5, %v11651_v8  ;;  %v1438_v14 = vpop.f32.mrb[14].mxu0  ;;  %v1615_v21 = vmul.f32 1.6732632, %v8485_v58  ;;  %vm1494_vm11 = vcmp.gt.f32.partialorder %v11698_v54, 0.0 }
 0x195   : > { %v1616_v16 = vmul.f32 1.6732632, %v8486_v0  ;;  %v8488_v17 = vadd.f32 -1.0, %v9746_v9  ;;  %v1539_v19 = vmul.f32 1.442695, %v11706_v1  ;;  %v1440_v15 = vpop.f32.mrb[15].mxu0  ;;  %v11728_v12 = vadd.f32 %v1438_v14, %v11648_v7 }
 0x196   : > { %v1541_v23 = vmul.f32 1.442695, %v11712_v13  ;;  %v1617_v28 = vmul.f32 1.6732632, %v8487_v11  ;;  %v11734_v35 = vadd.f32 %v1440_v15, %v11651_v8  ;;  %v1647_v37 = vsel %vm1487_vm4, %v11667_v22, %v1615_v21  ;;  %v9374_v62 = vld [vmem:[%s16204_s6 + $0x10] ss:$8 sps:$4 sm:$0xff]  }
 0x197   : > { %v1648_v26 = vsel %vm1488_vm5, %v11670_v24, %v1616_v16  ;;  %v1618_v29 = vmul.f32 1.6732632, %v8488_v17  ;;  %9755 = vpow2.f32 %v1539_v19  ;;  %v1678_v24 = vmul.f32 1.050701, %v1646_v25  ;;  %v9379_v9 = vld [vmem:[%s16204_s6 + $0x24] ss:$8 sps:$4 sm:$0xff]  }
 0x198   : > { %9757 = vpow2.f32 %v1541_v23  ;;  %v1680_v34 = vmul.f32 1.050701, %v1648_v26  ;;  %v1543_v41 = vmul.f32 1.442695, %v11728_v12  ;;  %v1649_v44 = vsel %vm1489_vm6, %v11674_v27, %v1617_v28 }
 0x199   : > { %v9748_v33 = vpop.eup %9747  ;;  %v1650_v18 = vsel %vm1490_vm7, %v11678_v30, %v1618_v29  ;;  %v1545_v30 = vmul.f32 1.442695, %v11734_v35  ;;  %v1708_v47 = vpack.c.bf16 %v1678_v24, %v1676_v32  ;;  %vm1495_vm12 = vcmp.gt.f32.partialorder %v11706_v1, 0.0  ;;  %v9377_v32 = vld [vmem:[%s16204_s6 + $0x20] ss:$8 sps:$4 sm:$0xff]  }
 0x19a   : > { %v9750_v36 = vpop.eup %9749  ;;  %v1682_v39 = vmul.f32 1.050701, %v1650_v18  ;;  %v8489_v40 = vadd.f32 -1.0, %v9748_v33  ;;  %v1444_v48 = vpop.f32.mrb[16].mxu0  ;;  %9759 = vpow2.f32 %v1543_v41  ;;  %v1679_v10 = vmul.f32 1.050701, %v1647_v37 }
 0x19b   : > { %v9752_v42 = vpop.eup %9751  ;;  %v8490_v45 = vadd.f32 -1.0, %v9750_v36  ;;  %v1446_v52 = vpop.f32.mrb[17].mxu0  ;;  %9761 = vpow2.f32 %v1545_v30  ;;  %1926 = vmatprep.mubr.bf16.mxu1 %v1708_v47  ;;  %v11751_v27 = vadd.f32 %v1444_v48, %v11648_v7  ;;  %v1681_v11 = vmul.f32 1.050701, %v1649_v44  ;;  %v9382_v37 = vld [vmem:[%s16204_s6 + $0x34] ss:$8 sps:$4 sm:$0xff]  }
 0x19c   : > { %v1619_v50 = vmul.f32 1.6732632, %v8489_v40  ;;  %v8491_v22 = vadd.f32 -1.0, %v9752_v42  ;;  %v11754_v56 = vadd.f32 %v1446_v52, %v11651_v8  ;;  %v1448_v57 = vpop.f32.mrb[18].mxu0  ;;  %v9754_v58 = vpop.eup %9753  ;;  %1927 = vmatmul.mubr.bf16.vlgmr.msra.gmra.mrb[0].mxu1 %v1707_v51  ;;  %v1710_v61 = vpack.c.bf16 %v1682_v39, %v1680_v34 }
 0x19d   : > { %v1620_v55 = vmul.f32 1.6732632, %v8490_v45  ;;  %v11759_v59 = vadd.f32 %v1448_v57, %v11648_v7  ;;  %v1450_v60 = vpop.f32.mrb[19].mxu0  ;;  %v8492_v5 = vadd.f32 -1.0, %v9754_v58  ;;  %2419 = vmatpush1.bf16.msra.mxu1 %v9371_v49  ;;  %v1547_v14 = vmul.f32 1.442695, %v11751_v27 }
 0x19e   : > { %v1621_v0 = vmul.f32 1.6732632, %v8491_v22  ;;  %1936 = vmatprep.mubr.bf16.mxu1 %v1710_v61  ;;  %2420 = vmatprep.subr.bf16.mxu1 %v9376_v53  ;;  %v1549_v19 = vmul.f32 1.442695, %v11754_v56  ;;  %v11777_v20 = vadd.f32 %v1450_v60, %v11651_v8  ;;  %vm1496_vm13 = vcmp.gt.f32.partialorder %v11712_v13, 0.0 }
 0x19f   : > { %v1652_v63 = vsel %vm1492_vm8, %v11686_v43, %v1620_v55  ;;  %v1651_v43 = vsel %vm1491_vm9, %v11683_v38, %v1619_v50  ;;  %v1622_v17 = vmul.f32 1.6732632, %v8492_v5  ;;  %9763 = vpow2.f32 %v1547_v14  ;;  %v9380_v45 = vld [vmem:[%s16204_s6 + $0x30] ss:$8 sps:$4 sm:$0xff]   ;;  %v9385_v49 = vld [vmem:[%s16204_s6 + $0x44] ss:$8 sps:$4 sm:$0xff]  }
 0x1a0   : > { %v1684_v23 = vmul.f32 1.050701, %v1652_v63  ;;  %v1551_v25 = vmul.f32 1.442695, %v11759_v59  ;;  %v1653_v28 = vsel %vm1493_vm10, %v11690_v46, %v1621_v0  ;;  %9765 = vpow2.f32 %v1549_v19 }
 0x1a1   : > { %v9756_v16 = vpop.eup %9755  ;;  %v1654_v38 = vsel %vm1494_vm11, %v11698_v54, %v1622_v17  ;;  %2421 = vmatpush1.bf16.msra.mxu1 %v9374_v62  ;;  %v1553_v18 = vmul.f32 1.442695, %v11777_v20  ;;  %v1709_v46 = vpack.c.bf16 %v1681_v11, %v1679_v10  ;;  %v1685_v40 = vmul.f32 1.050701, %v1653_v28  ;;  %v9386_v28 = vld [vmem:[%s16204_s6 + $0x50] ss:$8 sps:$4 sm:$0xff]  }
 0x1a2   : > { %v9758_v21 = vpop.eup %9757  ;;  %v8493_v15 = vadd.f32 -1.0, %v9756_v16  ;;  %v1454_v26 = vpop.f32.mrb[20].mxu0  ;;  %v1686_v33 = vmul.f32 1.050701, %v1654_v38  ;;  %9767 = vpow2.f32 %v1551_v25  ;;  %2422 = vmatprep.subr.bf16.mxu1 %v9379_v9  ;;  %v1683_v47 = vmul.f32 1.050701, %v1651_v43 }
 0x1a3   : > { %v8494_v29 = vadd.f32 -1.0, %v9758_v21  ;;  %v1456_v31 = vpop.f32.mrb[21].mxu0  ;;  %v11792_v24 = vadd.f32 %v1454_v26, %v11648_v7  ;;  %9769 = vpow2.f32 %v1553_v18  ;;  %vm1497_vm14 = vcmp.gt.f32.partialorder %v11728_v12, 0.0  ;;  %v9383_v16 = vld [vmem:[%s16204_s6 + $0x40] ss:$8 sps:$4 sm:$0xff]  }
 0x1a4   : > { %v1623_v34 = vmul.f32 1.6732632, %v8493_v15  ;;  %v11795_v54 = vadd.f32 %v1456_v31, %v11651_v8  ;;  %v1458_v36 = vpop.f32.mrb[22].mxu0  ;;  %v9760_v39 = vpop.eup %9759  ;;  %v1712_v44 = vpack.c.bf16 %v1686_v33, %v1684_v23  ;;  %vm1498_vm15 = vcmp.gt.f32.partialorder %v11734_v35, 0.0  ;;  %1937 = vmatmul.mubr.bf16.gmra.mrb[4].mxu1 %v1709_v46  ;;  %v9388_v21 = vld [vmem:[%s16204_s6 + $0x54] ss:$8 sps:$4 sm:$0xff]  }
 0x1a5   : > { %v11801_v41 = vadd.f32 %v1458_v36, %v11648_v7  ;;  %v1460_v42 = vpop.f32.mrb[23].mxu0  ;;  %v9762_v30 = vpop.eup %9761  ;;  %v8495_v48 = vadd.f32 -1.0, %v9760_v39  ;;  %v1624_v22 = vmul.f32 1.6732632, %v8494_v29  ;;  %v1555_v52 = vmul.f32 1.442695, %v11792_v24  ;;  %2423 = vmatpush1.bf16.msra.mxu1 %v9377_v32 }
 0x1a6   : > { %v1655_v50 = vsel %vm1495_vm12, %v11706_v1, %v1623_v34  ;;  %v8496_v51 = vadd.f32 -1.0, %v9762_v30  ;;  %1946 = vmatprep.mubr.bf16.mxu1 %v1712_v44  ;;  %vm1499_vm0 = vcmp.gt.f32.partialorder %v11751_v27, 0.0  ;;  %v1557_v55 = vmul.f32 1.442695, %v11795_v54  ;;  %2424 = vmatprep.subr.bf16.mxu1 %v9382_v37  ;;  %v9391_v39 = vld [vmem:[%s16204_s6 + $0x64] ss:$8 sps:$4 sm:$0xff]  }
 0x1a7   : > { %v1625_v53 = vmul.f32 1.6732632, %v8495_v48  ;;  %v11818_v57 = vadd.f32 %v1460_v42, %v11651_v8  ;;  %9771 = vpow2.f32 %v1555_v52  ;;  %v1559_v60 = vmul.f32 1.442695, %v11801_v41 }
 0x1a8   : > { %v1626_v58 = vmul.f32 1.6732632, %v8496_v51  ;;  %v1711_v1 = vpack.c.bf16 %v1685_v40, %v1683_v47  ;;  %v11821_v62 = vmul.f32 1.050701, %v1655_v50  ;;  %vm1500_vm1 = vcmp.gt.f32.partialorder %v11754_v56, 0.0 }
 0x1a9   : > { %9773 = vpow2.f32 %v1557_v55  ;;  %v1561_v63 = vmul.f32 1.442695, %v11818_v57  ;;  %v9764_v5 = vpop.eup %9763  ;;  %v1656_v9 = vsel %vm1496_vm13, %v11712_v13, %v1624_v22  ;;  %2425 = vmatpush1.bf16.msra.mxu1 %v9380_v45  ;;  %v1657_v17 = vsel %vm1497_vm14, %v11728_v12, %v1625_v53 }
 0x1aa   : > { %v1464_v61 = vpop.f32.mrb[24].mxu0  ;;  %v1658_v10 = vsel %vm1498_vm15, %v11734_v35, %v1626_v58  ;;  %9775 = vpow2.f32 %v1559_v60  ;;  %v9766_v43 = vpop.eup %9765  ;;  %v8497_v13 = vadd.f32 -1.0, %v9764_v5  ;;  %vm1501_vm2 = vcmp.gt.f32.partialorder %v11759_v59, 0.0  ;;  %2426 = vmatprep.subr.bf16.mxu1 %v9385_v49 }
 0x1ab   : > { %v1466_v0 = vpop.f32.mrb[25].mxu0  ;;  %v11832_v11 = vadd.f32 %v1464_v61, %v11648_v7  ;;  %9777 = vpow2.f32 %v1561_v63  ;;  %v1690_v15 = vmul.f32 1.050701, %v1658_v10  ;;  %v8498_v25 = vadd.f32 -1.0, %v9766_v43  ;;  %v9394_v61 = vld [vmem:[%s16204_s6 + $0x74] ss:$8 sps:$4 sm:$0xff]  }
 0x1ac   : > { %v1468_v14 = vpop.f32.mrb[26].mxu0  ;;  %v11842_v35 = vadd.f32 %v1466_v0, %v11651_v8  ;;  %v9768_v23 = vpop.eup %9767  ;;  %v1627_v38 = vmul.f32 1.6732632, %v8497_v13  ;;  %vm1502_vm3 = vcmp.gt.f32.partialorder %v11777_v20, 0.0  ;;  %1947 = vmatmul.mubr.bf16.gmra.mrb[8].mxu1 %v1711_v1  ;;  %v1689_v33 = vmul.f32 1.050701, %v1657_v17 }
 0x1ad   : > { %v1470_v19 = vpop.f32.mrb[27].mxu0  ;;  %v1563_v26 = vmul.f32 1.442695, %v11832_v11  ;;  %v11849_v12 = vadd.f32 %v1468_v14, %v11648_v7  ;;  %v8499_v29 = vadd.f32 -1.0, %v9768_v23  ;;  %v9770_v32 = vpop.eup %9769  ;;  %v1628_v34 = vmul.f32 1.6732632, %v8498_v25  ;;  %2427 = vmatpush1.bf16.msra.mxu1 %v9383_v16 }
 0x1ae   : > { %v1565_v31 = vmul.f32 1.442695, %v11842_v35  ;;  %v1688_v46 = vmul.f32 1.050701, %v1656_v9  ;;  %v1659_v36 = vsel %vm1499_vm0, %v11751_v27, %v1627_v38  ;;  %v8500_v37 = vadd.f32 -1.0, %v9770_v32  ;;  %2428 = vmatprep.subr.bf16.mxu1 %v9388_v21 }
 0x1af   : > { %9779 = vpow2.f32 %v1563_v26  ;;  %v1567_v18 = vmul.f32 1.442695, %v11849_v12  ;;  %vm1503_vm4 = vcmp.gt.f32.partialorder %v11792_v24, 0.0  ;;  %v1660_v40 = vsel %vm1500_vm1, %v11754_v56, %v1628_v34  ;;  %v9389_v27 = vld [vmem:[%s16204_s6 + $0x60] ss:$8 sps:$4 sm:$0xff]  }
 0x1b0   : > { %9781 = vpow2.f32 %v1565_v31  ;;  %v1629_v42 = vmul.f32 1.6732632, %v8499_v29  ;;  %v11868_v44 = vadd.f32 %v1470_v19, %v11651_v8  ;;  %v1630_v30 = vmul.f32 1.6732632, %v8500_v37  ;;  %v9392_v9 = vld [vmem:[%s16204_s6 + $0x70] ss:$8 sps:$4 sm:$0xff]  }
 0x1b1   : > { %9783 = vpow2.f32 %v1567_v18  ;;  %vm1504_vm5 = vcmp.gt.f32.partialorder %v11795_v54, 0.0  ;;  %vm1505_vm6 = vcmp.gt.f32.partialorder %v11801_v41, 0.0  ;;  %v1714_v47 = vpack.c.bf16 %v1690_v15, %v1688_v46  ;;  %v9772_v49 = vpop.eup %9771  ;;  %2429 = vmatpush1.bf16.msra.mxu1 %v9386_v28 }
 0x1b2   : > { %v1474_v45 = vpop.f32.mrb[28].mxu0  ;;  %v11875_v50 = vmul.f32 1.050701, %v1659_v36  ;;  %vm1506_vm7 = vcmp.gt.f32.partialorder %v11818_v57, 0.0  ;;  %v1569_v56 = vmul.f32 1.442695, %v11868_v44  ;;  %v1713_v22 = vpack.c.bf16 %v1689_v33, %v11821_v62  ;;  %2430 = vmatprep.subr.bf16.mxu1 %v9391_v39 }
 0x1b3   : > { %v1476_v48 = vpop.f32.mrb[29].mxu0  ;;  %v9774_v52 = vpop.eup %9773  ;;  %v11880_v53 = vmul.f32 1.050701, %v1660_v40  ;;  %v8501_v55 = vadd.f32 -1.0, %v9772_v49  ;;  %1956 = vmatprep.mubr.bf16.mxu1 %v1714_v47  ;;  %v11883_v58 = vadd.f32 %v1474_v45, %v11648_v7  ;;  %v1661_v63 = vsel %vm1501_vm2, %v11759_v59, %v1629_v42  ;;  %v9397_v59 = vld [vmem:[%s16204_s6 + $0x84] ss:$8 sps:$4 sm:$0xff]  }
 0x1b4   : > { %v1478_v51 = vpop.f32.mrb[30].mxu0  ;;  %v11886_v60 = vadd.f32 %v1476_v48, %v11651_v8  ;;  %v9776_v62 = vpop.eup %9775  ;;  %v1662_v0 = vsel %vm1502_vm3, %v11777_v20, %v1630_v30  ;;  %v8502_v5 = vadd.f32 -1.0, %v9774_v52  ;;  %9785 = vpow2.f32 %v1569_v56  ;;  %1957 = vmatmul.mubr.bf16.gmra.mrb[12].mxu1 %v1713_v22  ;;  %v9395_v36 = vld [vmem:[%s16204_s6 + $0x80] ss:$8 sps:$4 sm:$0xff]  }
 0x1b5   : > { %v1480_v1 = vpop.f32.mrb[31].mxu0  ;;  %v9778_v10 = vpop.eup %9777  ;;  %v1631_v14 = vmul.f32 1.6732632, %v8501_v55  ;;  %v8503_v16 = vadd.f32 -1.0, %v9776_v62  ;;  %v1571_v43 = vmul.f32 1.442695, %v11883_v58  ;;  %v11902_v17 = vadd.f32 %v1478_v51, %v11648_v7  ;;  %2431 = vmatpush1.bf16.msra.mxu1 %v9389_v27 }
 0x1b6   : > { %v1632_v20 = vmul.f32 1.6732632, %v8502_v5  ;;  %v8504_v13 = vadd.f32 -1.0, %v9778_v10  ;;  %vm1507_vm8 = vcmp.gt.f32.partialorder %v11832_v11, 0.0  ;;  %v1573_v19 = vmul.f32 1.442695, %v11886_v60  ;;  %2432 = vmatprep.subr.bf16.mxu1 %v9394_v61 }
 0x1b7   : > { %v1693_v21 = vmul.f32 1.050701, %v1661_v63  ;;  %v1694_v23 = vmul.f32 1.050701, %v1662_v0  ;;  %v1633_v15 = vmul.f32 1.6732632, %v8503_v16  ;;  %9787 = vpow2.f32 %v1571_v43 }
 0x1b8   : > { %v1663_v7 = vsel %vm1503_vm4, %v11792_v24, %v1631_v14  ;;  %v1664_v26 = vsel %vm1504_vm5, %v11795_v54, %v1632_v20  ;;  %v1634_v28 = vmul.f32 1.6732632, %v8504_v13  ;;  %9789 = vpow2.f32 %v1573_v19 }
 0x1b9   : > { %v9780_v25 = vpop.eup %9779  ;;  %v1696_v29 = vmul.f32 1.050701, %v1664_v26  ;;  %v1665_v31 = vsel %vm1505_vm6, %v11801_v41, %v1633_v15  ;;  %v1575_v33 = vmul.f32 1.442695, %v11902_v17  ;;  %v9147_v54 = vadd.f32 %v1480_v1, %v11651_v8  ;;  %2433 = vmatpush1.bf16.msra.mxu1 %v9392_v9 }
 0x1ba   : > { %v9782_v38 = vpop.eup %9781  ;;  %v8505_v32 = vadd.f32 -1.0, %v9780_v25  ;;  %v1697_v18 = vmul.f32 1.050701, %v1665_v31  ;;  %v1666_v24 = vsel %vm1506_vm7, %v11818_v57, %v1634_v28  ;;  %2434 = vmatprep.subr.bf16.mxu1 %v9397_v59  ;;  %v1695_v40 = vmul.f32 1.050701, %v1663_v7 }
 0x1bb   : > { %v9784_v34 = vpop.eup %9783  ;;  %v8506_v46 = vadd.f32 -1.0, %v9782_v38  ;;  %v1698_v37 = vmul.f32 1.050701, %v1666_v24  ;;  %9791 = vpow2.f32 %v1575_v33  ;;  %v1577_v45 = vmul.f32 1.442695, %v9147_v54 }
 0x1bc   : > { %v1635_v39 = vmul.f32 1.6732632, %v8505_v32  ;;  %v8507_v41 = vadd.f32 -1.0, %v9784_v34  ;;  %v1716_v27 = vpack.c.bf16 %v1694_v23, %v11880_v53  ;;  %v1715_v30 = vpack.c.bf16 %v1693_v21, %v11875_v50  ;;  %v9400_v28 = vld [vmem:[%s16204_s6 + $0x94] ss:$8 sps:$4 sm:$0xff]  }
 0x1bd   : > { %v1636_v42 = vmul.f32 1.6732632, %v8506_v46  ;;  %v1718_v47 = vpack.c.bf16 %v1698_v37, %v1696_v29  ;;  %vm1509_vm9 = vcmp.gt.f32.partialorder %v11849_v12, 0.0  ;;  %9793 = vpow2.f32 %v1577_v45  ;;  %2435 = vmatpush1.bf16.msra.mxu1 %v9395_v36  ;;  %v9401_v38 = vld [vmem:[%s16204_s6 + $0xa0] ss:$8 sps:$4 sm:$0xff]  }
 0x1be   : > { %v1667_v57 = vsel %vm1507_vm8, %v11832_v11, %v1635_v39  ;;  %v1637_v8 = vmul.f32 1.6732632, %v8507_v41  ;;  %v9786_v48 = vpop.eup %9785  ;;  %1966 = vmatprep.mubr.bf16.mxu1 %v1716_v27  ;;  %v1717_v49 = vpack.c.bf16 %v1697_v18, %v1695_v40  ;;  %vm1508_vm10 = vcmp.gt.f32.partialorder %v11842_v35, 0.0  ;;  %2436 = vmatprep.subr.bf16.mxu1 %v9400_v28  ;;  %v9406_v29 = vld [vmem:[%s16204_s6 + $0xb4] ss:$8 sps:$4 sm:$0xff]  }
 0x1bf   : > { %v8508_v22 = vadd.f32 -1.0, %v9786_v48  ;;  %1967 = vmatmul.mubr.bf16.gmra.mrb[16].mxu1 %v1715_v30  ;;  %v1699_v51 = vmul.f32 1.050701, %v1667_v57  ;;  %v1668_v50 = vsel %vm1508_vm10, %v11842_v35, %v1636_v42  ;;  %vm1510_vm11 = vcmp.gt.f32.partialorder %v11868_v44, 0.0  ;;  %v9404_v31 = vld [vmem:[%s16204_s6 + $0xb0] ss:$8 sps:$4 sm:$0xff]  }
 0x1c0   : > { %v1669_v56 = vsel %vm1509_vm9, %v11849_v12, %v1637_v8  ;;  %1976 = vmatprep.mubr.bf16.mxu1 %v1718_v47  ;;  %v1700_v12 = vmul.f32 1.050701, %v1668_v50  ;;  %vm1511_vm12 = vcmp.gt.f32.partialorder %v11883_v58, 0.0  ;;  %vm1513_vm13 = vcmp.gt.f32.partialorder %v11902_v17, 0.0  ;;  %v9409_v32 = vld [vmem:[%s16204_s6 + $0xc4] ss:$8 sps:$4 sm:$0xff]  }
 0x1c1   : > { %v1701_v52 = vmul.f32 1.050701, %v1669_v56  ;;  %v9788_v11 = vpop.eup %9787  ;;  %v1638_v53 = vmul.f32 1.6732632, %v8508_v22  ;;  %vm1512_vm14 = vcmp.gt.f32.partialorder %v11886_v60, 0.0  ;;  %vm1514_vm15 = vcmp.gt.f32.partialorder %v9147_v54, 0.0 }
 0x1c2   : > { %v9790_v55 = vpop.eup %9789  ;;  %v8509_v1 = vadd.f32 -1.0, %v9788_v11  ;;  %v9407_v33 = vld [vmem:[%s16204_s6 + $0xc0] ss:$8 sps:$4 sm:$0xff]   ;;  %v9412_v34 = vld [vmem:[%s16204_s6 + $0xd4] ss:$8 sps:$4 sm:$0xff]  }
 0x1c3   : > { %v1719_v61 = vpack.c.bf16 %v1701_v52, %v1699_v51  ;;  %v1670_v62 = vsel %vm1510_vm11, %v11868_v44, %v1638_v53  ;;  %v8510_v63 = vadd.f32 -1.0, %v9790_v55  ;;  %v9410_v18 = vld [vmem:[%s16204_s6 + $0xd0] ss:$8 sps:$4 sm:$0xff]   ;;  %v9415_v24 = vld [vmem:[%s16204_s6 + $0xe4] ss:$8 sps:$4 sm:$0xff]  }
 0x1c4   : > { %v1702_v0 = vmul.f32 1.050701, %v1670_v62  ;;  %v1639_v5 = vmul.f32 1.6732632, %v8509_v1  ;;  %v9413_v46 = vld [vmem:[%s16204_s6 + $0xe0] ss:$8 sps:$4 sm:$0xff]  }
 0x1c5   : > { %v9792_v9 = vpop.eup %9791  ;;  %v1640_v16 = vmul.f32 1.6732632, %v8510_v63  ;;  %v9416_v36 = vld [vmem:[%s16204_s6 + $0xf0] ss:$8 sps:$4 sm:$0xff]   ;;  %v9419_v37 = vld [vmem:[%s16206_s8] ss:$8 sps:$4 sm:$0xff]  }
 0x1c6   : > { %v8511_v10 = vadd.f32 -1.0, %v9792_v9  ;;  %v1720_v14 = vpack.c.bf16 %v1702_v0, %v1700_v12  ;;  %v1671_v43 = vsel %vm1511_vm12, %v11883_v58, %v1639_v5  ;;  %v9421_v39 = vld [vmem:[%s16206_s8 + $0x4] ss:$8 sps:$4 sm:$0xff]   ;;  %v9424_v41 = vld [vmem:[%s16206_s8 + $0x14] ss:$8 sps:$4 sm:$0xff]  }
 0x1c7   : > { %1977 = vmatmul.mubr.bf16.gmra.mrb[20].mxu1 %v1717_v49  ;;  %v9794_v35 = vpop.eup %9793  ;;  %v1703_v13 = vmul.f32 1.050701, %v1671_v43  ;;  %v1672_v19 = vsel %vm1512_vm14, %v11886_v60, %v1640_v16  ;;  %v9403_v60 = vld [vmem:[%s16204_s6 + $0xa4] ss:$8 sps:$4 sm:$0xff]   ;;  %2849 = vmatprep.subr.bf16.mxu0 %v9421_v39  ;;  %v9422_v40 = vld [vmem:[%s16206_s8 + $0x10] ss:$8 sps:$4 sm:$0xff]  }
 0x1c8   : > { %v1641_v59 = vmul.f32 1.6732632, %v8511_v10  ;;  %1986 = vmatprep.mubr.bf16.mxu1 %v1720_v14  ;;  %v8512_v20 = vadd.f32 -1.0, %v9794_v35  ;;  %v1704_v7 = vmul.f32 1.050701, %v1672_v19  ;;  %2850 = vmatpush1.bf16.msra.mxu0 %v9419_v37 }
 0x1c9   : > { %2851 = vmatprep.subr.bf16.mxu0 %v9424_v41  ;;  %v9427_v42 = vld [vmem:[%s16206_s8 + $0x24] ss:$8 sps:$4 sm:$0xff]   ;;  %v9425_v45 = vld [vmem:[%s16206_s8 + $0x20] ss:$8 sps:$4 sm:$0xff]   ;;  %v9430_v27 = vld [vmem:[%s16206_s8 + $0x34] ss:$8 sps:$4 sm:$0xff]  }
 0x1ca   : > { %v1673_v44 = vsel %vm1513_vm13, %v11902_v17, %v1641_v59  ;;  %v1642_v23 = vmul.f32 1.6732632, %v8512_v20  ;;  %v9398_v17 = vld [vmem:[%s16204_s6 + $0x90] ss:$8 sps:$4 sm:$0xff]   ;;  %v9433_v8 = vld [vmem:[%s16206_s8 + $0x44] ss:$8 sps:$4 sm:$0xff]  }
 0x1cb   : > { %v1705_v21 = vmul.f32 1.050701, %v1673_v44  ;;  %2437 = vmatpush1.bf16.msra.mxu1 %v9398_v17  ;;  %v9428_v57 = vld [vmem:[%s16206_s8 + $0x30] ss:$8 sps:$4 sm:$0xff]   ;;  %v9431_v30 = vld [vmem:[%s16206_s8 + $0x40] ss:$8 sps:$4 sm:$0xff]  }
 0x1cc   : > { %v1674_v15 = vsel %vm1514_vm15, %v9147_v54, %v1642_v23  ;;  %2438 = vmatprep.subr.bf16.mxu1 %v9403_v60  ;;  %v9418_v54 = vld [vmem:[%s16204_s6 + $0xf4] ss:$8 sps:$4 sm:$0xff]   ;;  %2852 = vmatpush1.bf16.msra.mxu0 %v9422_v40  ;;  %v9434_v48 = vld [vmem:[%s16206_s8 + $0x50] ss:$8 sps:$4 sm:$0xff]   ;;  %v9439_v49 = vld [vmem:[%s16206_s8 + $0x64] ss:$8 sps:$4 sm:$0xff]  }
 0x1cd   : > { %v1721_v25 = vpack.c.bf16 %v1705_v21, %v1703_v13  ;;  %v1706_v26 = vmul.f32 1.050701, %v1674_v15  ;;  %2853 = vmatprep.subr.bf16.mxu0 %v9427_v42  ;;  %v9436_v47 = vld [vmem:[%s16206_s8 + $0x54] ss:$8 sps:$4 sm:$0xff]   ;;  %v9437_v56 = vld [vmem:[%s16206_s8 + $0x60] ss:$8 sps:$4 sm:$0xff]  }
 0x1ce   : > { %v9442_v22 = vld [vmem:[%s16206_s8 + $0x74] ss:$8 sps:$4 sm:$0xff]   ;;  %v860_v51 = vld [vmem:[%s16343_s0] sm:$0x3]  ;;  %v9440_v52 = vld [vmem:[%s16206_s8 + $0x70] ss:$8 sps:$4 sm:$0xff]  }
 0x1cf   : > { %1987 = vmatmul.mubr.bf16.gmra.mrb[24].mxu1 %v1719_v61  ;;  %v1722_v58 = vpack.c.bf16 %v1706_v26, %v1704_v7  ;;  %v9445_v11 = vld [vmem:[%s16206_s8 + $0x84] ss:$8 sps:$4 sm:$0xff]   ;;  %v12040_v50 = vrot.slane %v860_v51, %v11639_v4  ;;  %v12043_v53 = vrot.slane %v860_v51, %v11645_v6  ;;  %v9443_v55 = vld [vmem:[%s16206_s8 + $0x80] ss:$8 sps:$4 sm:$0xff]   ;;  %v9448_v61 = vld [vmem:[%s16206_s8 + $0x94] ss:$8 sps:$4 sm:$0xff]  }
 0x1d0   : > { %2439 = vmatpush1.bf16.msra.mxu1 %v9401_v38  ;;  %2854 = vmatpush1.bf16.msra.mxu0 %v9425_v45  ;;  %v9446_v14 = vld [vmem:[%s16206_s8 + $0x90] ss:$8 sps:$4 sm:$0xff]   ;;  %v9451_v43 = vld [vmem:[%s16206_s8 + $0xa4] ss:$8 sps:$4 sm:$0xff]   ;;  %v9449_v44 = vld [vmem:[%s16206_s8 + $0xa0] ss:$8 sps:$4 sm:$0xff]  }
 0x1d1   : > { %1996 = vmatprep.mubr.bf16.mxu1 %v1722_v58  ;;  %2440 = vmatprep.subr.bf16.mxu1 %v9406_v29  ;;  %v9454_v13 = vld [vmem:[%s16206_s8 + $0xb4] ss:$8 sps:$4 sm:$0xff]   ;;  %v9452_v7 = vld [vmem:[%s16206_s8 + $0xb0] ss:$8 sps:$4 sm:$0xff]   ;;  %v9457_v17 = vld [vmem:[%s16206_s8 + $0xc4] ss:$8 sps:$4 sm:$0xff]  }
 0x1d2   : > { %2855 = vmatprep.subr.bf16.mxu0 %v9430_v27 }
 0x1d4   : > { %2441 = vmatpush1.bf16.msra.mxu1 %v9404_v31  ;;  %2856 = vmatpush1.bf16.msra.mxu0 %v9428_v57 }
 0x1d5   : > { %2442 = vmatprep.subr.bf16.mxu1 %v9409_v32  ;;  %2857 = vmatprep.subr.bf16.mxu0 %v9433_v8  ;;  %v9458_v8 = vld [vmem:[%s16206_s8 + $0xd0] ss:$8 sps:$4 sm:$0xff]  }
 0x1d7   : > { %1997 = vmatmul.mubr.bf16.gmra.mrb[28].mxu1 %v1721_v25 }
 0x1d8   : > { %2443 = vmatpush1.bf16.msra.mxu1 %v9407_v33  ;;  %2858 = vmatpush1.bf16.msra.mxu0 %v9431_v30  ;;  %v9455_v33 = vld [vmem:[%s16206_s8 + $0xc0] ss:$8 sps:$4 sm:$0xff]  }
 0x1d9   : > { %2444 = vmatprep.subr.bf16.mxu1 %v9412_v34  ;;  %2859 = vmatprep.subr.bf16.mxu0 %v9436_v47 }
 0x1dc   : > { %2445 = vmatpush1.bf16.msra.mxu1 %v9410_v18  ;;  %2860 = vmatpush1.bf16.msra.mxu0 %v9434_v48 }
 0x1dd   : > { %2446 = vmatprep.subr.bf16.mxu1 %v9415_v24  ;;  %2861 = vmatprep.subr.bf16.mxu0 %v9439_v49  ;;  %v9460_v24 = vld [vmem:[%s16206_s8 + $0xd4] ss:$8 sps:$4 sm:$0xff]  }
 0x1e0   : > { %2447 = vmatpush1.bf16.msra.mxu1 %v9413_v46  ;;  %2862 = vmatpush1.bf16.msra.mxu0 %v9437_v56 }
 0x1e1   : > { %2448 = vmatprep.subr.bf16.mxu1 %v9418_v54  ;;  %2863 = vmatprep.subr.bf16.mxu0 %v9442_v22 }
 0x1e4   : > { %2449 = vmatpush1.bf16.msra.mxu1 %v9416_v36  ;;  %2864 = vmatpush1.bf16.msra.mxu0 %v9440_v52 }
 0x1e5   : > { %2865 = vmatprep.subr.bf16.mxu0 %v9445_v11 }
 0x1e8   : > { %2866 = vmatpush1.bf16.msra.mxu0 %v9443_v55 }
 0x1e9   : > { %2867 = vmatprep.subr.bf16.mxu0 %v9448_v61 }
 0x1ec   : > { %2868 = vmatpush1.bf16.msra.mxu0 %v9446_v14 }
 0x1ed   : > { %2869 = vmatprep.subr.bf16.mxu0 %v9451_v43 }
 0x1f0   : > { %2870 = vmatpush1.bf16.msra.mxu0 %v9449_v44 }
 0x1f1   : > { %2871 = vmatprep.subr.bf16.mxu0 %v9454_v13 }
 0x1f4   : > { %2872 = vmatpush1.bf16.msra.mxu0 %v9452_v7 }
 0x1f5   : > { %2873 = vmatprep.subr.bf16.mxu0 %v9457_v17 }
 0x1f8   : > { %2874 = vmatpush1.bf16.msra.mxu0 %v9455_v33 }
 0x1f9   : > { %2875 = vmatprep.subr.bf16.mxu0 %v9460_v24 }
 0x1fc   : > { %2876 = vmatpush1.bf16.msra.mxu0 %v9458_v8 }
 0x26f   : > { %v1928_v1 = vpop.f32.mrb[0].mxu1 }
 0x270   : > { %v12052_v62 = vadd.f32 %v1928_v1, %v12040_v50  ;;  %v1930_v63 = vpop.f32.mrb[1].mxu1 }
 0x271   : > { %v12055_v12 = vadd.f32 %v1930_v63, %v12043_v53  ;;  %v1932_v0 = vpop.f32.mrb[2].mxu1 }
 0x272   : > { %v2039_v5 = vmul.f32 1.442695, %v12052_v62  ;;  %v12059_v9 = vadd.f32 %v1932_v0, %v12040_v50  ;;  %v1934_v10 = vpop.f32.mrb[3].mxu1  ;;  %vm2007_vm0 = vcmp.gt.f32.partialorder %v12052_v62, 0.0 }
 0x273   : > { %v2041_v16 = vmul.f32 1.442695, %v12055_v12  ;;  %v12066_v35 = vadd.f32 %v1934_v10, %v12043_v53  ;;  %vm2008_vm1 = vcmp.gt.f32.partialorder %v12055_v12, 0.0 }
 0x274   : > { %9795 = vpow2.f32 %v2039_v5  ;;  %v2043_v59 = vmul.f32 1.442695, %v12059_v9  ;;  %vm2009_vm2 = vcmp.gt.f32.partialorder %v12059_v9, 0.0 }
 0x275   : > { %9797 = vpow2.f32 %v2041_v16  ;;  %v2045_v20 = vmul.f32 1.442695, %v12066_v35  ;;  %vm2010_vm3 = vcmp.gt.f32.partialorder %v12066_v35, 0.0 }
 0x276   : > { %9799 = vpow2.f32 %v2043_v59 }
 0x277   : > { %9801 = vpow2.f32 %v2045_v20  ;;  %v1938_v19 = vpop.f32.mrb[4].mxu1 }
 0x278   : > { %v12080_v21 = vadd.f32 %v1938_v19, %v12040_v50  ;;  %v1940_v23 = vpop.f32.mrb[5].mxu1 }
 0x279   : > { %v12083_v15 = vadd.f32 %v1940_v23, %v12043_v53  ;;  %v1942_v25 = vpop.f32.mrb[6].mxu1 }
 0x27a   : > { %v2047_v26 = vmul.f32 1.442695, %v12080_v21  ;;  %v12090_v58 = vadd.f32 %v1942_v25, %v12040_v50  ;;  %v1944_v28 = vpop.f32.mrb[7].mxu1  ;;  %vm2011_vm4 = vcmp.gt.f32.partialorder %v12080_v21, 0.0 }
 0x27b   : > { %v2049_v60 = vmul.f32 1.442695, %v12083_v15  ;;  %v12097_v38 = vadd.f32 %v1944_v28, %v12043_v53  ;;  %vm2012_vm5 = vcmp.gt.f32.partialorder %v12083_v15, 0.0 }
 0x27c   : > { %9803 = vpow2.f32 %v2047_v26  ;;  %v2051_v29 = vmul.f32 1.442695, %v12090_v58  ;;  %vm2013_vm6 = vcmp.gt.f32.partialorder %v12090_v58, 0.0 }
 0x27d   : > { %9805 = vpow2.f32 %v2049_v60  ;;  %v2053_v32 = vmul.f32 1.442695, %v12097_v38  ;;  %vm2014_vm7 = vcmp.gt.f32.partialorder %v12097_v38, 0.0 }
 0x27e   : > { %v9796_v31 = vpop.eup %9795  ;;  %9807 = vpow2.f32 %v2051_v29 }
 0x27f   : > { %v9798_v34 = vpop.eup %9797  ;;  %v8545_v18 = vadd.f32 -1.0, %v9796_v31  ;;  %9809 = vpow2.f32 %v2053_v32  ;;  %v1948_v36 = vpop.f32.mrb[8].mxu1 }
 0x280   : > { %v9800_v46 = vpop.eup %9799  ;;  %v8546_v54 = vadd.f32 -1.0, %v9798_v34  ;;  %v12108_v40 = vadd.f32 %v1948_v36, %v12040_v50  ;;  %v1950_v42 = vpop.f32.mrb[9].mxu1 }
 0x281   : > { %v9802_v37 = vpop.eup %9801  ;;  %v2135_v39 = vmul.f32 1.6732632, %v8545_v18  ;;  %v8547_v41 = vadd.f32 -1.0, %v9800_v46  ;;  %v12112_v27 = vadd.f32 %v1950_v42, %v12043_v53  ;;  %v1952_v57 = vpop.f32.mrb[10].mxu1 }
 0x282   : > { %v8548_v45 = vadd.f32 -1.0, %v9802_v37  ;;  %v2055_v48 = vmul.f32 1.442695, %v12108_v40  ;;  %v1954_v49 = vpop.f32.mrb[11].mxu1  ;;  %v2136_v56 = vmul.f32 1.6732632, %v8546_v54  ;;  %v12130_v1 = vadd.f32 %v1952_v57, %v12040_v50 }
 0x283   : > { %v2167_v30 = vsel %vm2007_vm0, %v12052_v62, %v2135_v39  ;;  %v2137_v47 = vmul.f32 1.6732632, %v8547_v41  ;;  %v2057_v52 = vmul.f32 1.442695, %v12112_v27  ;;  %v12133_v61 = vadd.f32 %v1954_v49, %v12043_v53 }
 0x284   : > { %v2138_v51 = vmul.f32 1.6732632, %v8548_v45  ;;  %9811 = vpow2.f32 %v2055_v48  ;;  %v12125_v11 = vmul.f32 1.050701, %v2167_v30  ;;  %v2168_v0 = vsel %vm2008_vm1, %v12055_v12, %v2136_v56 }
 0x285   : > { %v2169_v22 = vsel %vm2009_vm2, %v12059_v9, %v2137_v47  ;;  %9813 = vpow2.f32 %v2057_v52  ;;  %v2059_v10 = vmul.f32 1.442695, %v12130_v1  ;;  %v2061_v20 = vmul.f32 1.442695, %v12133_v61 }
 0x286   : > { %v12127_v55 = vmul.f32 1.050701, %v2169_v22  ;;  %v9804_v62 = vpop.eup %9803  ;;  %v2170_v43 = vsel %vm2010_vm3, %v12066_v35, %v2138_v51  ;;  %v2200_v26 = vmul.f32 1.050701, %v2168_v0  ;;  %vm2015_vm8 = vcmp.gt.f32.partialorder %v12108_v40, 0.0 }
 0x287   : > { %v9806_v63 = vpop.eup %9805  ;;  %v8549_v9 = vadd.f32 -1.0, %v9804_v62  ;;  %v1958_v14 = vpop.f32.mrb[12].mxu1  ;;  %9815 = vpow2.f32 %v2059_v10  ;;  %v2202_v60 = vmul.f32 1.050701, %v2170_v43  ;;  %vm2017_vm9 = vcmp.gt.f32.partialorder %v12130_v1, 0.0 }
 0x288   : > { %v2231_v5 = vpack.c.bf16 %v12127_v55, %v12125_v11  ;;  %v9808_v16 = vpop.eup %9807  ;;  %v8550_v59 = vadd.f32 -1.0, %v9806_v63  ;;  %v12149_v44 = vadd.f32 %v1958_v14, %v12040_v50  ;;  %v1960_v13 = vpop.f32.mrb[13].mxu1  ;;  %9817 = vpow2.f32 %v2061_v20 }
 0x289   : > { %v9810_v12 = vpop.eup %9809  ;;  %v2139_v19 = vmul.f32 1.6732632, %v8549_v9  ;;  %v8551_v23 = vadd.f32 -1.0, %v9808_v16  ;;  %v12152_v25 = vadd.f32 %v1960_v13, %v12043_v53  ;;  %v1962_v7 = vpop.f32.mrb[14].mxu1  ;;  %v2232_v8 = vpack.c.bf16 %v2202_v60, %v2200_v26 }
 0x28a   : > { %v2140_v28 = vmul.f32 1.6732632, %v8550_v59  ;;  %v8552_v17 = vadd.f32 -1.0, %v9810_v12  ;;  %v1964_v35 = vpop.f32.mrb[15].mxu1  ;;  %v2063_v32 = vmul.f32 1.442695, %v12149_v44 }
 0x28b   : > { %v2171_v29 = vsel %vm2011_vm4, %v12080_v21, %v2139_v19  ;;  %v2141_v31 = vmul.f32 1.6732632, %v8551_v23  ;;  %v2065_v24 = vmul.f32 1.442695, %v12152_v25  ;;  %v12168_v21 = vadd.f32 %v1962_v7, %v12040_v50  ;;  %2450 = vmatprep.mubr.bf16.mxu1 %v2232_v8 }
 0x28c   : > { %v12158_v33 = vmul.f32 1.050701, %v2171_v29  ;;  %v2172_v34 = vsel %vm2012_vm5, %v12083_v15, %v2140_v28  ;;  %v2142_v18 = vmul.f32 1.6732632, %v8552_v17  ;;  %9819 = vpow2.f32 %v2063_v32  ;;  %2451 = vmatmul.mubr.bf16.vlgmr.msra.gmra.mrb[32].mxu1 %v2231_v5 }
 0x28d   : > { %v2204_v46 = vmul.f32 1.050701, %v2172_v34  ;;  %v2173_v54 = vsel %vm2013_vm6, %v12090_v58, %v2141_v31  ;;  %9821 = vpow2.f32 %v2065_v24  ;;  %v12174_v15 = vadd.f32 %v1964_v35, %v12043_v53 }
 0x28e   : > { %v9812_v36 = vpop.eup %9811  ;;  %v2205_v37 = vmul.f32 1.050701, %v2173_v54  ;;  %v2174_v39 = vsel %vm2014_vm7, %v12097_v38, %v2142_v18  ;;  %v2067_v45 = vmul.f32 1.442695, %v12168_v21  ;;  %vm2016_vm10 = vcmp.gt.f32.partialorder %v12112_v27, 0.0 }
 0x28f   : > { %v2206_v41 = vmul.f32 1.050701, %v2174_v39  ;;  %v8553_v42 = vadd.f32 -1.0, %v9812_v36  ;;  %v9814_v57 = vpop.eup %9813  ;;  %v2069_v58 = vmul.f32 1.442695, %v12174_v15  ;;  %vm2018_vm11 = vcmp.gt.f32.partialorder %v12133_v61, 0.0 }
 0x290   : > { %v2233_v30 = vpack.c.bf16 %v2205_v37, %v12158_v33  ;;  %9823 = vpow2.f32 %v2067_v45  ;;  %v8554_v51 = vadd.f32 -1.0, %v9814_v57  ;;  %vm2019_vm12 = vcmp.gt.f32.partialorder %v12149_v44, 0.0 }
 0x291   : > { %v2234_v48 = vpack.c.bf16 %v2206_v41, %v2204_v46  ;;  %v2143_v49 = vmul.f32 1.6732632, %v8553_v42  ;;  %9825 = vpow2.f32 %v2069_v58  ;;  %v9816_v22 = vpop.eup %9815  ;;  %vm2020_vm13 = vcmp.gt.f32.partialorder %v12152_v25, 0.0 }
 0x292   : > { %v1968_v47 = vpop.f32.mrb[16].mxu1  ;;  %v9818_v55 = vpop.eup %9817  ;;  %v8555_v62 = vadd.f32 -1.0, %v9816_v22  ;;  %v2144_v59 = vmul.f32 1.6732632, %v8554_v51  ;;  %vm2021_vm14 = vcmp.gt.f32.partialorder %v12168_v21, 0.0  ;;  %vm2022_vm15 = vcmp.gt.f32.partialorder %v12174_v15, 0.0 }
 0x293   : > { %v12180_v38 = vadd.f32 %v1968_v47, %v12040_v50  ;;  %v1970_v56 = vpop.f32.mrb[17].mxu1  ;;  %2460 = vmatprep.mubr.bf16.mxu1 %v2234_v48  ;;  %v8556_v0 = vadd.f32 -1.0, %v9818_v55  ;;  %v2175_v14 = vsel %vm2015_vm8, %v12108_v40, %v2143_v49 }
 0x294   : > { %v12183_v52 = vadd.f32 %v1970_v56, %v12043_v53  ;;  %v1972_v11 = vpop.f32.mrb[18].mxu1  ;;  %v2145_v16 = vmul.f32 1.6732632, %v8555_v62  ;;  %v12198_v40 = vmul.f32 1.050701, %v2175_v14  ;;  %2461 = vmatmul.mubr.bf16.gmra.mrb[36].mxu1 %v2233_v30  ;;  %v2176_v54 = vsel %vm2016_vm10, %v12112_v27, %v2144_v59 }
 0x295   : > { %v2071_v63 = vmul.f32 1.442695, %v12180_v38  ;;  %v1974_v10 = vpop.f32.mrb[19].mxu1  ;;  %v12190_v5 = vadd.f32 %v1972_v11, %v12040_v50  ;;  %v2146_v19 = vmul.f32 1.6732632, %v8556_v0  ;;  %vm2023_vm0 = vcmp.gt.f32.partialorder %v12180_v38, 0.0 }
 0x296   : > { %v2073_v9 = vmul.f32 1.442695, %v12183_v52  ;;  %v9820_v43 = vpop.eup %9819  ;;  %v12194_v20 = vadd.f32 %v1974_v10, %v12043_v53  ;;  %v2177_v12 = vsel %vm2017_vm9, %v12130_v1, %v2145_v16  ;;  %v2208_v47 = vmul.f32 1.050701, %v2176_v54 }
 0x297   : > { %9827 = vpow2.f32 %v2071_v63  ;;  %v9822_v13 = vpop.eup %9821  ;;  %v2075_v23 = vmul.f32 1.442695, %v12190_v5  ;;  %v12200_v7 = vmul.f32 1.050701, %v2177_v12  ;;  %v8557_v1 = vadd.f32 -1.0, %v9820_v43 }
 0x298   : > { %9829 = vpow2.f32 %v2073_v9  ;;  %v8558_v26 = vadd.f32 -1.0, %v9822_v13  ;;  %v2077_v17 = vmul.f32 1.442695, %v12194_v20  ;;  %v2178_v34 = vsel %vm2018_vm11, %v12133_v61, %v2146_v19 }
 0x299   : > { %9831 = vpow2.f32 %v2075_v23  ;;  %v2235_v32 = vpack.c.bf16 %v12200_v7, %v12198_v40  ;;  %v2210_v45 = vmul.f32 1.050701, %v2178_v34  ;;  %v2147_v30 = vmul.f32 1.6732632, %v8557_v1 }
 0x29a   : > { %v1978_v28 = vpop.f32.mrb[20].mxu1  ;;  %v9824_v35 = vpop.eup %9823  ;;  %v2148_v60 = vmul.f32 1.6732632, %v8558_v26  ;;  %9833 = vpow2.f32 %v2077_v17  ;;  %vm2024_vm1 = vcmp.gt.f32.partialorder %v12183_v52, 0.0  ;;  %vm2025_vm2 = vcmp.gt.f32.partialorder %v12190_v5, 0.0 }
 0x29b   : > { %v12207_v29 = vadd.f32 %v1978_v28, %v12040_v50  ;;  %v1980_v31 = vpop.f32.mrb[21].mxu1  ;;  %v9826_v33 = vpop.eup %9825  ;;  %v8559_v18 = vadd.f32 -1.0, %v9824_v35  ;;  %v2236_v0 = vpack.c.bf16 %v2210_v45, %v2208_v47  ;;  %v2179_v14 = vsel %vm2019_vm12, %v12149_v44, %v2147_v30 }
 0x29c   : > { %v12213_v24 = vadd.f32 %v1980_v31, %v12043_v53  ;;  %v1982_v46 = vpop.f32.mrb[22].mxu1  ;;  %v8560_v36 = vadd.f32 -1.0, %v9826_v33  ;;  %v2180_v39 = vsel %vm2020_vm13, %v12152_v25, %v2148_v60  ;;  %vm2026_vm3 = vcmp.gt.f32.partialorder %v12194_v20, 0.0 }
 0x29d   : > { %v1984_v37 = vpop.f32.mrb[23].mxu1  ;;  %v2149_v41 = vmul.f32 1.6732632, %v8559_v18  ;;  %v2079_v61 = vmul.f32 1.442695, %v12207_v29  ;;  %v12223_v42 = vadd.f32 %v1982_v46, %v12040_v50  ;;  %2470 = vmatprep.mubr.bf16.mxu1 %v2236_v0  ;;  %vm2027_vm4 = vcmp.gt.f32.partialorder %v12207_v29, 0.0 }
 0x29e   : > { %v2150_v57 = vmul.f32 1.6732632, %v8560_v36  ;;  %v2081_v58 = vmul.f32 1.442695, %v12213_v24  ;;  %v12227_v27 = vadd.f32 %v1984_v37, %v12043_v53  ;;  %v2212_v48 = vmul.f32 1.050701, %v2180_v39  ;;  %2471 = vmatmul.mubr.bf16.gmra.mrb[40].mxu1 %v2235_v32 }
 0x29f   : > { %9835 = vpow2.f32 %v2079_v61  ;;  %v2083_v25 = vmul.f32 1.442695, %v12223_v42  ;;  %v2181_v51 = vsel %vm2021_vm14, %v12168_v21, %v2149_v41  ;;  %v2211_v7 = vmul.f32 1.050701, %v2179_v14 }
 0x2a0   : > { %v2182_v49 = vsel %vm2022_vm15, %v12174_v15, %v2150_v57  ;;  %9837 = vpow2.f32 %v2081_v58  ;;  %v2085_v63 = vmul.f32 1.442695, %v12227_v27  ;;  %v2213_v13 = vmul.f32 1.050701, %v2181_v51 }
 0x2a1   : > { %v9828_v8 = vpop.eup %9827  ;;  %v2214_v11 = vmul.f32 1.050701, %v2182_v49  ;;  %9839 = vpow2.f32 %v2083_v25  ;;  %vm2028_vm5 = vcmp.gt.f32.partialorder %v12213_v24, 0.0  ;;  %vm2029_vm6 = vcmp.gt.f32.partialorder %v12223_v42, 0.0 }
 0x2a2   : > { %v1988_v56 = vpop.f32.mrb[24].mxu1  ;;  %v9830_v22 = vpop.eup %9829  ;;  %v8561_v55 = vadd.f32 -1.0, %v9828_v8  ;;  %9841 = vpow2.f32 %v2085_v63  ;;  %v2237_v33 = vpack.c.bf16 %v2213_v13, %v2211_v7  ;;  %vm2030_vm7 = vcmp.gt.f32.partialorder %v12227_v27, 0.0 }
 0x2a3   : > { %v1990_v62 = vpop.f32.mrb[25].mxu1  ;;  %v12238_v9 = vadd.f32 %v1988_v56, %v12040_v50  ;;  %v9832_v10 = vpop.eup %9831  ;;  %v2238_v59 = vpack.c.bf16 %v2214_v11, %v2212_v48  ;;  %v8562_v12 = vadd.f32 -1.0, %v9830_v22 }
 0x2a4   : > { %v1992_v15 = vpop.f32.mrb[26].mxu1  ;;  %v12245_v21 = vadd.f32 %v1990_v62, %v12043_v53  ;;  %v8563_v19 = vadd.f32 -1.0, %v9832_v10  ;;  %v9834_v23 = vpop.eup %9833  ;;  %v2151_v40 = vmul.f32 1.6732632, %v8561_v55 }
 0x2a5   : > { %v12248_v16 = vadd.f32 %v1992_v15, %v12040_v50  ;;  %v1994_v43 = vpop.f32.mrb[27].mxu1  ;;  %v2087_v44 = vmul.f32 1.442695, %v12238_v9  ;;  %v8564_v28 = vadd.f32 -1.0, %v9834_v23  ;;  %2480 = vmatprep.mubr.bf16.mxu1 %v2238_v59  ;;  %v2152_v60 = vmul.f32 1.6732632, %v8562_v12 }
 0x2a6   : > { %v2153_v26 = vmul.f32 1.6732632, %v8563_v19  ;;  %v2089_v17 = vmul.f32 1.442695, %v12245_v21  ;;  %v12258_v1 = vadd.f32 %v1994_v43, %v12043_v53  ;;  %v2183_v46 = vsel %vm2023_vm0, %v12180_v38, %v2151_v40  ;;  %2481 = vmatmul.mubr.bf16.gmra.mrb[44].mxu1 %v2237_v33 }
 0x2a7   : > { %9843 = vpow2.f32 %v2087_v44  ;;  %v2091_v35 = vmul.f32 1.442695, %v12248_v16  ;;  %v2154_v32 = vmul.f32 1.6732632, %v8564_v28  ;;  %v2184_v30 = vsel %vm2024_vm1, %v12183_v52, %v2152_v60 }
 0x2a8   : > { %v2185_v31 = vsel %vm2025_vm2, %v12190_v5, %v2153_v26  ;;  %9845 = vpow2.f32 %v2089_v17  ;;  %v2093_v54 = vmul.f32 1.442695, %v12258_v1  ;;  %v2216_v62 = vmul.f32 1.050701, %v2184_v30 }
 0x2a9   : > { %v9836_v18 = vpop.eup %9835  ;;  %v2186_v39 = vsel %vm2026_vm3, %v12194_v20, %v2154_v32  ;;  %9847 = vpow2.f32 %v2091_v35  ;;  %v2217_v57 = vmul.f32 1.050701, %v2185_v31  ;;  %v2215_v0 = vmul.f32 1.050701, %v2183_v46 }
 0x2aa   : > { %v1998_v34 = vpop.f32.mrb[28].mxu1  ;;  %v9838_v37 = vpop.eup %9837  ;;  %v8565_v5 = vadd.f32 -1.0, %v9836_v18  ;;  %9849 = vpow2.f32 %v2093_v54  ;;  %v2218_v48 = vmul.f32 1.050701, %v2186_v39  ;;  %vm2031_vm8 = vcmp.gt.f32.partialorder %v12238_v9, 0.0 }
 0x2ab   : > { %v2000_v36 = vpop.f32.mrb[29].mxu1  ;;  %v12270_v41 = vadd.f32 %v1998_v34, %v12040_v50  ;;  %v9840_v45 = vpop.eup %9839  ;;  %v8566_v38 = vadd.f32 -1.0, %v9838_v37  ;;  %v2239_v19 = vpack.c.bf16 %v2217_v57, %v2215_v0  ;;  %vm2032_vm9 = vcmp.gt.f32.partialorder %v12245_v21, 0.0 }
 0x2ac   : > { %v2002_v61 = vpop.f32.mrb[30].mxu1  ;;  %v12273_v58 = vadd.f32 %v2000_v36, %v12043_v53  ;;  %v2155_v25 = vmul.f32 1.6732632, %v8565_v5  ;;  %v8567_v20 = vadd.f32 -1.0, %v9840_v45  ;;  %v9842_v51 = vpop.eup %9841  ;;  %v2240_v59 = vpack.c.bf16 %v2218_v48, %v2216_v62 }
 0x2ad   : > { %v2004_v8 = vpop.f32.mrb[31].mxu1  ;;  %v2095_v47 = vmul.f32 1.442695, %v12270_v41  ;;  %v2156_v49 = vmul.f32 1.6732632, %v8566_v38  ;;  %v12281_v22 = vadd.f32 %v2002_v61, %v12040_v50  ;;  %v8568_v63 = vadd.f32 -1.0, %v9842_v51 }
 0x2ae   : > { %v2097_v56 = vmul.f32 1.442695, %v12273_v58  ;;  %v2187_v11 = vsel %vm2027_vm4, %v12207_v29, %v2155_v25  ;;  %v2157_v55 = vmul.f32 1.6732632, %v8567_v20  ;;  %v12287_v52 = vadd.f32 %v2004_v8, %v12043_v53  ;;  %2490 = vmatprep.mubr.bf16.mxu1 %v2240_v59  ;;  %v9473_v59 = vld [vmem:[%s16208_s10 + $0x20] ss:$8 sps:$4 sm:$0xff]  }
 0x2af   : > { %9851 = vpow2.f32 %v2095_v47  ;;  %v2188_v50 = vsel %vm2028_vm5, %v12213_v24, %v2156_v49  ;;  %v2099_v29 = vmul.f32 1.442695, %v12281_v22  ;;  %v2219_v14 = vmul.f32 1.050701, %v2187_v11  ;;  %2491 = vmatmul.mubr.bf16.gmra.mrb[48].mxu1 %v2239_v19  ;;  %v9481_v19 = vld [vmem:[%s16208_s10 + $0x44] ss:$8 sps:$4 sm:$0xff]  }
 0x2b0   : > { %9853 = vpow2.f32 %v2097_v56  ;;  %v2189_v15 = vsel %vm2029_vm6, %v12223_v42, %v2157_v55  ;;  %v2158_v43 = vmul.f32 1.6732632, %v8568_v63  ;;  %v2101_v12 = vmul.f32 1.442695, %v12287_v52 }
 0x2b1   : > { %v9844_v10 = vpop.eup %9843  ;;  %v2221_v53 = vmul.f32 1.050701, %v2189_v15  ;;  %9855 = vpow2.f32 %v2099_v29  ;;  %v2220_v40 = vmul.f32 1.050701, %v2188_v50  ;;  %vm2033_vm10 = vcmp.gt.f32.partialorder %v12248_v16, 0.0 }
 0x2b2   : > { %v8569_v13 = vadd.f32 -1.0, %v9844_v10  ;;  %v9846_v23 = vpop.eup %9845  ;;  %v2190_v24 = vsel %vm2030_vm7, %v12227_v27, %v2158_v43  ;;  %9857 = vpow2.f32 %v2101_v12  ;;  %vm2034_vm11 = vcmp.gt.f32.partialorder %v12258_v1, 0.0  ;;  %v9466_v15 = vld [vmem:[%s16206_s8 + $0xf4] ss:$8 sps:$4 sm:$0xff]   ;;  %v9467_v29 = vld [vmem:[%s16208_s10] ss:$8 sps:$4 sm:$0xff]  }
 0x2b3   : > { %v2241_v42 = vpack.c.bf16 %v2221_v53, %v2219_v14  ;;  %v9848_v44 = vpop.eup %9847  ;;  %v2222_v7 = vmul.f32 1.050701, %v2190_v24  ;;  %v8570_v28 = vadd.f32 -1.0, %v9846_v23  ;;  %vm2035_vm12 = vcmp.gt.f32.partialorder %v12270_v41, 0.0  ;;  %v9469_v10 = vld [vmem:[%s16208_s10 + $0x4] ss:$8 sps:$4 sm:$0xff]  }
 0x2b4   : > { %v2159_v26 = vmul.f32 1.6732632, %v8569_v13  ;;  %v9850_v17 = vpop.eup %9849  ;;  %v8571_v35 = vadd.f32 -1.0, %v9848_v44  ;;  %vm2036_vm13 = vcmp.gt.f32.partialorder %v12273_v58, 0.0  ;;  %vm2037_vm14 = vcmp.gt.f32.partialorder %v12281_v22, 0.0  ;;  %3373 = vmatprep.subr.bf16.mxu1 %v9469_v10 }
 0x2b5   : > { %v2160_v60 = vmul.f32 1.6732632, %v8570_v28  ;;  %v8572_v31 = vadd.f32 -1.0, %v9850_v17  ;;  %v2242_v32 = vpack.c.bf16 %v2222_v7, %v2220_v40  ;;  %vm2038_vm15 = vcmp.gt.f32.partialorder %v12287_v52, 0.0  ;;  %v9472_v14 = vld [vmem:[%s16208_s10 + $0x14] ss:$8 sps:$4 sm:$0xff]   ;;  %3374 = vmatpush1.bf16.msra.mxu1 %v9467_v29 }
 0x2b6   : > { %v2191_v33 = vsel %vm2031_vm8, %v12238_v9, %v2159_v26  ;;  %v2161_v27 = vmul.f32 1.6732632, %v8571_v35  ;;  %v9470_v53 = vld [vmem:[%s16208_s10 + $0x10] ss:$8 sps:$4 sm:$0xff]   ;;  %3375 = vmatprep.subr.bf16.mxu1 %v9472_v14  ;;  %v9475_v43 = vld [vmem:[%s16208_s10 + $0x24] ss:$8 sps:$4 sm:$0xff]  }
 0x2b7   : > { %v2192_v18 = vsel %vm2032_vm9, %v12245_v21, %v2160_v60  ;;  %v2162_v46 = vmul.f32 1.6732632, %v8572_v31  ;;  %2500 = vmatprep.mubr.bf16.mxu1 %v2242_v32  ;;  %v2223_v39 = vmul.f32 1.050701, %v2191_v33  ;;  %v9478_v13 = vld [vmem:[%s16208_s10 + $0x34] ss:$8 sps:$4 sm:$0xff]  }
 0x2b8   : > { %v2193_v36 = vsel %vm2033_vm10, %v12248_v16, %v2161_v27  ;;  %v2224_v45 = vmul.f32 1.050701, %v2192_v18  ;;  %2501 = vmatmul.mubr.bf16.gmra.mrb[52].mxu1 %v2241_v42  ;;  %v9476_v12 = vld [vmem:[%s16208_s10 + $0x30] ss:$8 sps:$4 sm:$0xff]   ;;  %v9479_v23 = vld [vmem:[%s16208_s10 + $0x40] ss:$8 sps:$4 sm:$0xff]  }
 0x2b9   : > { %v9852_v34 = vpop.eup %9851  ;;  %v2225_v5 = vmul.f32 1.050701, %v2193_v36  ;;  %v2194_v9 = vsel %vm2034_vm11, %v12258_v1, %v2162_v46  ;;  %3376 = vmatpush1.bf16.msra.mxu1 %v9470_v53  ;;  %v9484_v40 = vld [vmem:[%s16208_s10 + $0x54] ss:$8 sps:$4 sm:$0xff]   ;;  %v9482_v24 = vld [vmem:[%s16208_s10 + $0x50] ss:$8 sps:$4 sm:$0xff]  }
 0x2ba   : > { %v9854_v54 = vpop.eup %9853  ;;  %v8573_v37 = vadd.f32 -1.0, %v9852_v34  ;;  %v2226_v57 = vmul.f32 1.050701, %v2194_v9  ;;  %3377 = vmatprep.subr.bf16.mxu1 %v9475_v43  ;;  %v9487_v42 = vld [vmem:[%s16208_s10 + $0x64] ss:$8 sps:$4 sm:$0xff]  }
 0x2bb   : > { %v8574_v61 = vadd.f32 -1.0, %v9854_v54  ;;  %v9856_v8 = vpop.eup %9855  ;;  %v2243_v21 = vpack.c.bf16 %v2225_v5, %v2223_v39  ;;  %v9485_v44 = vld [vmem:[%s16208_s10 + $0x60] ss:$8 sps:$4 sm:$0xff]   ;;  %v9490_v7 = vld [vmem:[%s16208_s10 + $0x74] ss:$8 sps:$4 sm:$0xff]  }
 0x2bc   : > { %v2163_v38 = vmul.f32 1.6732632, %v8573_v37  ;;  %v8575_v25 = vadd.f32 -1.0, %v9856_v8  ;;  %v2244_v20 = vpack.c.bf16 %v2226_v57, %v2224_v45  ;;  %v9858_v47 = vpop.eup %9857  ;;  %v9488_v26 = vld [vmem:[%s16208_s10 + $0x70] ss:$8 sps:$4 sm:$0xff]  }
 0x2bd   : > { %v2164_v30 = vmul.f32 1.6732632, %v8574_v61  ;;  %v8576_v49 = vadd.f32 -1.0, %v9858_v47  ;;  %3378 = vmatpush1.bf16.msra.mxu1 %v9473_v59  ;;  %v9493_v28 = vld [vmem:[%s16208_s10 + $0x84] ss:$8 sps:$4 sm:$0xff]  }
 0x2be   : > { %v2195_v16 = vsel %vm2035_vm12, %v12270_v41, %v2163_v38  ;;  %v2165_v48 = vmul.f32 1.6732632, %v8575_v25  ;;  %2510 = vmatprep.mubr.bf16.mxu1 %v2244_v20  ;;  %3379 = vmatprep.subr.bf16.mxu1 %v9478_v13  ;;  %v9491_v17 = vld [vmem:[%s16208_s10 + $0x80] ss:$8 sps:$4 sm:$0xff]  }
 0x2bf   : > { %v2196_v1 = vsel %vm2036_vm13, %v12273_v58, %v2164_v30  ;;  %v2166_v51 = vmul.f32 1.6732632, %v8576_v49  ;;  %v2227_v11 = vmul.f32 1.050701, %v2195_v16  ;;  %v9461_v58 = vld [vmem:[%s16206_s8 + $0xe0] ss:$8 sps:$4 sm:$0xff]  }
 0x2c0   : > { %v2197_v56 = vsel %vm2037_vm14, %v12281_v22, %v2165_v48  ;;  %v2228_v63 = vmul.f32 1.050701, %v2196_v1  ;;  %2511 = vmatmul.mubr.bf16.gmra.mrb[56].mxu1 %v2243_v21  ;;  %v9463_v22 = vld [vmem:[%s16206_s8 + $0xe4] ss:$8 sps:$4 sm:$0xff]   ;;  %v893_v35 = vld [vmem:[%s16205_s7] sm:$0x3] }
 0x2c1   : > { %v2229_v55 = vmul.f32 1.050701, %v2197_v56  ;;  %v2198_v62 = vsel %vm2038_vm15, %v12287_v52, %v2166_v51  ;;  %2877 = vmatprep.subr.bf16.mxu0 %v9463_v22  ;;  %v9464_v52 = vld [vmem:[%s16206_s8 + $0xf0] ss:$8 sps:$4 sm:$0xff]   ;;  %3380 = vmatpush1.bf16.msra.mxu1 %v9476_v12  ;;  %v12387_v60 = vrot.slane %v893_v35, %v11639_v4  ;;  %v12390_v32 = vrot.slane %v893_v35, %v11645_v6 }
 0x2c2   : > { %v2230_v41 = vmul.f32 1.050701, %v2198_v62  ;;  %2878 = vmatpush1.bf16.msra.mxu0 %v9461_v58  ;;  %3381 = vmatprep.subr.bf16.mxu1 %v9481_v19 }
 0x2c3   : > { %v2245_v0 = vpack.c.bf16 %v2229_v55, %v2227_v11  ;;  %2879 = vmatprep.subr.bf16.mxu0 %v9466_v15 }
 0x2c4   : > { %v2246_v50 = vpack.c.bf16 %v2230_v41, %v2228_v63 }
 0x2c5   : > { %3382 = vmatpush1.bf16.msra.mxu1 %v9479_v23 }
 0x2c6   : > { %2520 = vmatprep.mubr.bf16.mxu1 %v2246_v50  ;;  %2880 = vmatpush1.bf16.msra.mxu0 %v9464_v52 }
 0x2c7   : > { %3383 = vmatprep.subr.bf16.mxu1 %v9484_v40 }
 0x2c8   : > { %2521 = vmatmul.mubr.bf16.gmra.mrb[60].mxu1 %v2245_v0 }
 0x2c9   : > { %3384 = vmatpush1.bf16.msra.mxu1 %v9482_v24 }
 0x2ca   : > { %3385 = vmatprep.subr.bf16.mxu1 %v9487_v42 }
 0x2cd   : > { %3386 = vmatpush1.bf16.msra.mxu1 %v9485_v44 }
 0x2ce   : > { %3387 = vmatprep.subr.bf16.mxu1 %v9490_v7 }
 0x2d1   : > { %3388 = vmatpush1.bf16.msra.mxu1 %v9488_v26 }
 0x2d2   : > { %3389 = vmatprep.subr.bf16.mxu1 %v9493_v28 }
 0x2d5   : > { %3390 = vmatpush1.bf16.msra.mxu1 %v9491_v17 }
 0x35f   : > { %v2452_v31 = vpop.f32.mrb[32].mxu1 }
 0x360   : > { %v2454_v33 = vpop.f32.mrb[33].mxu1  ;;  %v2453_v34 = vadd.f32 %v2452_v31, %v12387_v60 }
 0x361   : > { %v2456_v27 = vpop.f32.mrb[34].mxu1  ;;  %v2455_v54 = vadd.f32 %v2454_v33, %v12390_v32 }
 0x362   : > { %v2457_v18 = vadd.f32 %v2456_v27, %v12387_v60  ;;  %v2458_v46 = vpop.f32.mrb[35].mxu1 }
 0x363   : > { %v2459_v36 = vadd.f32 %v2458_v46, %v12390_v32 }
 0x364   : > { %v12396_v37 = vpack.c.bf16 %v2457_v18, %v2453_v34 }
 0x365   : > { %v12398_v39 = vpack.c.bf16 %v2459_v36, %v2455_v54 }
 0x367   : > { %v2462_v5 = vpop.f32.mrb[36].mxu1  ;;  %2881 = vmatprep.mubr.bf16.mxu0 %v12398_v39 }
 0x368   : > { %v2464_v9 = vpop.f32.mrb[37].mxu1  ;;  %2882 = vmatmul.mubr.bf16.vlgmr.msra.gmra.mrb[32].mxu0 %v12396_v37  ;;  %v2463_v45 = vadd.f32 %v2462_v5, %v12387_v60 }
 0x369   : > { %v2466_v61 = vpop.f32.mrb[38].mxu1  ;;  %v2465_v8 = vadd.f32 %v2464_v9, %v12390_v32 }
 0x36a   : > { %v2467_v57 = vadd.f32 %v2466_v61, %v12387_v60  ;;  %v2468_v38 = vpop.f32.mrb[39].mxu1 }
 0x36b   : > { %v2469_v21 = vadd.f32 %v2468_v38, %v12390_v32 }
 0x36c   : > { %v12406_v30 = vpack.c.bf16 %v2467_v57, %v2463_v45 }
 0x36d   : > { %v12408_v25 = vpack.c.bf16 %v2469_v21, %v2465_v8 }
 0x36f   : > { %2891 = vmatprep.mubr.bf16.mxu0 %v12408_v25 }
 0x370   : > { %2892 = vmatmul.mubr.bf16.gmra.mrb[36].mxu0 %v12406_v30 }
 0x371   : > { %v2472_v20 = vpop.f32.mrb[40].mxu1 }
 0x372   : > { %v2474_v47 = vpop.f32.mrb[41].mxu1  ;;  %v2473_v48 = vadd.f32 %v2472_v20, %v12387_v60 }
 0x373   : > { %v2476_v16 = vpop.f32.mrb[42].mxu1  ;;  %v2475_v56 = vadd.f32 %v2474_v47, %v12390_v32 }
 0x374   : > { %v2477_v49 = vadd.f32 %v2476_v16, %v12387_v60  ;;  %v2478_v1 = vpop.f32.mrb[43].mxu1 }
 0x375   : > { %v2479_v51 = vadd.f32 %v2478_v1, %v12390_v32 }
 0x376   : > { %v12416_v11 = vpack.c.bf16 %v2477_v49, %v2473_v48 }
 0x377   : > { %v12418_v55 = vpack.c.bf16 %v2479_v51, %v2475_v56  ;;  %v9496_v56 = vld [vmem:[%s16208_s10 + $0x94] ss:$8 sps:$4 sm:$0xff]   ;;  %v9497_v51 = vld [vmem:[%s16208_s10 + $0xa0] ss:$8 sps:$4 sm:$0xff]  }
 0x378   : > { %3391 = vmatprep.subr.bf16.mxu1 %v9496_v56 }
 0x379   : > { %v2482_v62 = vpop.f32.mrb[44].mxu1  ;;  %2901 = vmatprep.mubr.bf16.mxu0 %v12418_v55 }
 0x37a   : > { %v2484_v63 = vpop.f32.mrb[45].mxu1  ;;  %2902 = vmatmul.mubr.bf16.gmra.mrb[40].mxu0 %v12416_v11  ;;  %v2483_v0 = vadd.f32 %v2482_v62, %v12387_v60  ;;  %v9502_v62 = vld [vmem:[%s16208_s10 + $0xb4] ss:$8 sps:$4 sm:$0xff]  }
 0x37b   : > { %v2486_v41 = vpop.f32.mrb[46].mxu1  ;;  %v2485_v22 = vadd.f32 %v2484_v63, %v12390_v32  ;;  %v9500_v63 = vld [vmem:[%s16208_s10 + $0xb0] ss:$8 sps:$4 sm:$0xff]  }
 0x37c   : > { %v2487_v50 = vadd.f32 %v2486_v41, %v12387_v60  ;;  %v2488_v58 = vpop.f32.mrb[47].mxu1  ;;  %v9505_v41 = vld [vmem:[%s16208_s10 + $0xc4] ss:$8 sps:$4 sm:$0xff]  }
 0x37d   : > { %v2489_v52 = vadd.f32 %v2488_v58, %v12390_v32  ;;  %v9506_v58 = vld [vmem:[%s16208_s10 + $0xd0] ss:$8 sps:$4 sm:$0xff]  }
 0x37e   : > { %v12426_v15 = vpack.c.bf16 %v2487_v50, %v2483_v0  ;;  %v9503_v0 = vld [vmem:[%s16208_s10 + $0xc0] ss:$8 sps:$4 sm:$0xff]   ;;  %v9508_v50 = vld [vmem:[%s16208_s10 + $0xd4] ss:$8 sps:$4 sm:$0xff]  }
 0x37f   : > { %v12428_v29 = vpack.c.bf16 %v2489_v52, %v2485_v22  ;;  %v9511_v22 = vld [vmem:[%s16208_s10 + $0xe4] ss:$8 sps:$4 sm:$0xff]   ;;  %v9509_v52 = vld [vmem:[%s16208_s10 + $0xe0] ss:$8 sps:$4 sm:$0xff]  }
 0x381   : > { %2911 = vmatprep.mubr.bf16.mxu0 %v12428_v29 }
 0x382   : > { %v2492_v10 = vpop.f32.mrb[48].mxu1  ;;  %2912 = vmatmul.mubr.bf16.gmra.mrb[44].mxu0 %v12426_v15 }
 0x383   : > { %v2494_v14 = vpop.f32.mrb[49].mxu1  ;;  %v2493_v43 = vadd.f32 %v2492_v10, %v12387_v60  ;;  %v9514_v10 = vld [vmem:[%s16208_s10 + $0xf4] ss:$8 sps:$4 sm:$0xff]  }
 0x384   : > { %v2496_v53 = vpop.f32.mrb[50].mxu1  ;;  %v2495_v12 = vadd.f32 %v2494_v14, %v12390_v32  ;;  %v9512_v14 = vld [vmem:[%s16208_s10 + $0xf0] ss:$8 sps:$4 sm:$0xff]  }
 0x385   : > { %v2497_v59 = vadd.f32 %v2496_v53, %v12387_v60  ;;  %v2498_v13 = vpop.f32.mrb[51].mxu1  ;;  %v9515_v53 = vld [vmem:[%s16210_s12] ss:$16 sps:$4 sm:$0xff]  }
 0x386   : > { %v2499_v19 = vadd.f32 %v2498_v13, %v12390_v32  ;;  %v9523_v13 = vld [vmem:[%s16210_s12 + $0x24] ss:$16 sps:$4 sm:$0xff]  }
 0x387   : > { %v12436_v23 = vpack.c.bf16 %v2497_v59, %v2493_v43  ;;  %v9517_v43 = vld [vmem:[%s16210_s12 + $0x4] ss:$16 sps:$4 sm:$0xff]   ;;  %v9520_v59 = vld [vmem:[%s16210_s12 + $0xc] ss:$16 sps:$4 sm:$0xff]  }
 0x388   : > { %v12438_v40 = vpack.c.bf16 %v2499_v19, %v2495_v12  ;;  %4067 = vmatprep.subr.bf16.mxu0 %v9517_v43  ;;  %v9521_v12 = vld [vmem:[%s16210_s12 + $0x20] ss:$16 sps:$4 sm:$0xff]   ;;  %v9529_v19 = vld [vmem:[%s16210_s12 + $0x44] ss:$16 sps:$4 sm:$0xff]  }
 0x389   : > { %4068 = vmatpush1.bf16.msra.mxu0 %v9515_v53 }
 0x38a   : > { %2921 = vmatprep.mubr.bf16.mxu0 %v12438_v40  ;;  %4069 = vmatprep.subr.bf16.mxu0 %v9523_v13 }
 0x38b   : > { %v2502_v24 = vpop.f32.mrb[52].mxu1  ;;  %2922 = vmatmul.mubr.bf16.gmra.mrb[48].mxu0 %v12436_v23 }
 0x38c   : > { %v2504_v42 = vpop.f32.mrb[53].mxu1  ;;  %v2503_v7 = vadd.f32 %v2502_v24, %v12387_v60  ;;  %v9527_v24 = vld [vmem:[%s16210_s12 + $0x40] ss:$16 sps:$4 sm:$0xff]  }
 0x38d   : > { %v2506_v44 = vpop.f32.mrb[54].mxu1  ;;  %v2505_v17 = vadd.f32 %v2504_v42, %v12390_v32  ;;  %4070 = vmatpush1.bf16.msra.mxu0 %v9521_v12  ;;  %v9535_v42 = vld [vmem:[%s16210_s12 + $0x64] ss:$16 sps:$4 sm:$0xff]  }
 0x38e   : > { %v2507_v26 = vadd.f32 %v2506_v44, %v12387_v60  ;;  %v2508_v28 = vpop.f32.mrb[55].mxu1  ;;  %4071 = vmatprep.subr.bf16.mxu0 %v9529_v19  ;;  %v9533_v44 = vld [vmem:[%s16210_s12 + $0x60] ss:$16 sps:$4 sm:$0xff]  }
 0x38f   : > { %v2509_v35 = vadd.f32 %v2508_v28, %v12390_v32  ;;  %v9547_v28 = vld [vmem:[%s16210_s12 + $0xa4] ss:$16 sps:$4 sm:$0xff]  }
 0x390   : > { %v12446_v31 = vpack.c.bf16 %v2507_v26, %v2503_v7  ;;  %v9541_v7 = vld [vmem:[%s16210_s12 + $0x84] ss:$16 sps:$4 sm:$0xff]   ;;  %v9539_v26 = vld [vmem:[%s16210_s12 + $0x80] ss:$16 sps:$4 sm:$0xff]  }
 0x391   : > { %v12448_v33 = vpack.c.bf16 %v2509_v35, %v2505_v17  ;;  %4072 = vmatpush1.bf16.msra.mxu0 %v9527_v24  ;;  %v9545_v17 = vld [vmem:[%s16210_s12 + $0xa0] ss:$16 sps:$4 sm:$0xff]   ;;  %v9553_v35 = vld [vmem:[%s16210_s12 + $0xc4] ss:$16 sps:$4 sm:$0xff]  }
 0x392   : > { %4073 = vmatprep.subr.bf16.mxu0 %v9535_v42 }
 0x393   : > { %v2512_v27 = vpop.f32.mrb[56].mxu1  ;;  %2931 = vmatprep.mubr.bf16.mxu0 %v12448_v33 }
 0x394   : > { %v2514_v34 = vpop.f32.mrb[57].mxu1  ;;  %2932 = vmatmul.mubr.bf16.gmra.mrb[52].mxu0 %v12446_v31  ;;  %v2513_v46 = vadd.f32 %v2512_v27, %v12387_v60  ;;  %v9551_v27 = vld [vmem:[%s16210_s12 + $0xc0] ss:$16 sps:$4 sm:$0xff]  }
 0x395   : > { %v2516_v18 = vpop.f32.mrb[58].mxu1  ;;  %v2515_v5 = vadd.f32 %v2514_v34, %v12390_v32  ;;  %4074 = vmatpush1.bf16.msra.mxu0 %v9533_v44  ;;  %v9559_v34 = vld [vmem:[%s16210_s12 + $0xe4] ss:$16 sps:$4 sm:$0xff]  }
 0x396   : > { %v2517_v54 = vadd.f32 %v2516_v18, %v12387_v60  ;;  %v2518_v36 = vpop.f32.mrb[59].mxu1  ;;  %4075 = vmatprep.subr.bf16.mxu0 %v9541_v7  ;;  %v2563_v18 = vld [vmem:[%s16207_s9] sm:$0x3] }
 0x397   : > { %v2519_v9 = vadd.f32 %v2518_v36, %v12390_v32  ;;  %v12572_v36 = vrot.slane %v2563_v18, %v11639_v4 }
 0x398   : > { %v12456_v61 = vpack.c.bf16 %v2517_v54, %v2513_v46  ;;  %v9557_v46 = vld [vmem:[%s16210_s12 + $0xe0] ss:$16 sps:$4 sm:$0xff]   ;;  %v9565_v54 = vld [vmem:[%s16210_s12 + $0x104] ss:$16 sps:$4 sm:$0xff]  }
 0x399   : > { %v12458_v45 = vpack.c.bf16 %v2519_v9, %v2515_v5  ;;  %4076 = vmatpush1.bf16.msra.mxu0 %v9539_v26  ;;  %v12575_v5 = vrot.slane %v2563_v18, %v11645_v6  ;;  %v9563_v9 = vld [vmem:[%s16210_s12 + $0x100] ss:$16 sps:$4 sm:$0xff]  }
 0x39a   : > { %4077 = vmatprep.subr.bf16.mxu0 %v9547_v28 }
 0x39b   : > { %v2522_v57 = vpop.f32.mrb[60].mxu1  ;;  %2941 = vmatprep.mubr.bf16.mxu0 %v12458_v45 }
 0x39c   : > { %v2524_v38 = vpop.f32.mrb[61].mxu1  ;;  %2942 = vmatmul.mubr.bf16.gmra.mrb[56].mxu0 %v12456_v61  ;;  %v2523_v21 = vadd.f32 %v2522_v57, %v12387_v60 }
 0x39d   : > { %v2526_v8 = vpop.f32.mrb[62].mxu1  ;;  %v2525_v16 = vadd.f32 %v2524_v38, %v12390_v32  ;;  %4078 = vmatpush1.bf16.msra.mxu0 %v9545_v17 }
 0x39e   : > { %v2527_v20 = vadd.f32 %v2526_v8, %v12387_v60  ;;  %v2528_v47 = vpop.f32.mrb[63].mxu1  ;;  %v9494_v60 = vld [vmem:[%s16208_s10 + $0x90] ss:$8 sps:$4 sm:$0xff]   ;;  %4079 = vmatprep.subr.bf16.mxu0 %v9553_v35 }
 0x39f   : > { %v2529_v48 = vadd.f32 %v2528_v47, %v12390_v32  ;;  %3392 = vmatpush1.bf16.msra.mxu1 %v9494_v60  ;;  %v9499_v32 = vld [vmem:[%s16208_s10 + $0xa4] ss:$8 sps:$4 sm:$0xff]  }
 0x3a0   : > { %v12466_v49 = vpack.c.bf16 %v2527_v20, %v2523_v21  ;;  %3393 = vmatprep.subr.bf16.mxu1 %v9499_v32 }
 0x3a1   : > { %v12468_v1 = vpack.c.bf16 %v2529_v48, %v2525_v16  ;;  %4080 = vmatpush1.bf16.msra.mxu0 %v9551_v27 }
 0x3a2   : > { %4081 = vmatprep.subr.bf16.mxu0 %v9559_v34 }
 0x3a3   : > { %2951 = vmatprep.mubr.bf16.mxu0 %v12468_v1  ;;  %3394 = vmatpush1.bf16.msra.mxu1 %v9497_v51 }
 0x3a4   : > { %2952 = vmatmul.mubr.bf16.gmra.mrb[60].mxu0 %v12466_v49  ;;  %3395 = vmatprep.subr.bf16.mxu1 %v9502_v62 }
 0x3a5   : > { %4082 = vmatpush1.bf16.msra.mxu0 %v9557_v46 }
 0x3a6   : > { %4083 = vmatprep.subr.bf16.mxu0 %v9565_v54 }
 0x3a7   : > { %3396 = vmatpush1.bf16.msra.mxu1 %v9500_v63 }
 0x3a8   : > { %3397 = vmatprep.subr.bf16.mxu1 %v9505_v41 }
 0x3a9   : > { %4084 = vmatpush1.bf16.msra.mxu0 %v9563_v9 }
 0x3ab   : > { %3398 = vmatpush1.bf16.msra.mxu1 %v9503_v0 }
 0x3ac   : > { %3399 = vmatprep.subr.bf16.mxu1 %v9508_v50 }
 0x3af   : > { %3400 = vmatpush1.bf16.msra.mxu1 %v9506_v58 }
 0x3b0   : > { %3401 = vmatprep.subr.bf16.mxu1 %v9511_v22 }
 0x3b3   : > { %3402 = vmatpush1.bf16.msra.mxu1 %v9509_v52 }
 0x3b4   : > { %3403 = vmatprep.subr.bf16.mxu1 %v9514_v10 }
 0x3b7   : > { %3404 = vmatpush1.bf16.msra.mxu1 %v9512_v14 }
 0x3b8   : > { %4180 = vmatprep.subr.bf16.mxu1 %v9520_v59 }
 0x43b   : > { %v2883_v57 = vpop.f32.mrb[32].mxu0 }
 0x43c   : > { %v2884_v38 = vadd.f32 %v2883_v57, %v12572_v36  ;;  %v2885_v8 = vpop.f32.mrb[33].mxu0 }
 0x43d   : > { %v2886_v21 = vadd.f32 %v2885_v8, %v12575_v5  ;;  %v2887_v20 = vpop.f32.mrb[34].mxu0 }
 0x43e   : > { %v2994_v47 = vmul.f32 1.442695, %v2884_v38  ;;  %v2888_v16 = vadd.f32 %v2887_v20, %v12572_v36  ;;  %v2889_v48 = vpop.f32.mrb[35].mxu0  ;;  %vm2962_vm0 = vcmp.gt.f32.partialorder %v2884_v38, 0.0 }
 0x43f   : > { %v2996_v56 = vmul.f32 1.442695, %v2886_v21  ;;  %v2890_v60 = vadd.f32 %v2889_v48, %v12575_v5  ;;  %vm2963_vm1 = vcmp.gt.f32.partialorder %v2886_v21, 0.0 }
 0x440   : > { %9859 = vpow2.f32 %v2994_v47  ;;  %v2998_v32 = vmul.f32 1.442695, %v2888_v16  ;;  %vm2964_vm2 = vcmp.gt.f32.partialorder %v2888_v16, 0.0 }
 0x441   : > { %9861 = vpow2.f32 %v2996_v56  ;;  %v3000_v51 = vmul.f32 1.442695, %v2890_v60  ;;  %vm2965_vm3 = vcmp.gt.f32.partialorder %v2890_v60, 0.0 }
 0x442   : > { %9863 = vpow2.f32 %v2998_v32 }
 0x443   : > { %9865 = vpow2.f32 %v3000_v51  ;;  %v2893_v62 = vpop.f32.mrb[36].mxu0 }
 0x444   : > { %v12585_v63 = vadd.f32 %v2893_v62, %v12572_v36  ;;  %v2895_v41 = vpop.f32.mrb[37].mxu0 }
 0x445   : > { %v12588_v0 = vadd.f32 %v2895_v41, %v12575_v5  ;;  %v2897_v50 = vpop.f32.mrb[38].mxu0 }
 0x446   : > { %v3002_v58 = vmul.f32 1.442695, %v12585_v63  ;;  %v12592_v22 = vadd.f32 %v2897_v50, %v12572_v36  ;;  %v2899_v52 = vpop.f32.mrb[39].mxu0  ;;  %vm2966_vm4 = vcmp.gt.f32.partialorder %v12585_v63, 0.0 }
 0x447   : > { %v3004_v10 = vmul.f32 1.442695, %v12588_v0  ;;  %v12596_v14 = vadd.f32 %v2899_v52, %v12575_v5  ;;  %vm2967_vm5 = vcmp.gt.f32.partialorder %v12588_v0, 0.0 }
 0x448   : > { %9867 = vpow2.f32 %v3002_v58  ;;  %v3006_v53 = vmul.f32 1.442695, %v12592_v22  ;;  %vm2968_vm6 = vcmp.gt.f32.partialorder %v12592_v22, 0.0 }
 0x449   : > { %9869 = vpow2.f32 %v3004_v10  ;;  %v3008_v43 = vmul.f32 1.442695, %v12596_v14  ;;  %vm2969_vm7 = vcmp.gt.f32.partialorder %v12596_v14, 0.0 }
 0x44a   : > { %v9860_v59 = vpop.eup %9859  ;;  %9871 = vpow2.f32 %v3006_v53 }
 0x44b   : > { %v9862_v13 = vpop.eup %9861  ;;  %v8641_v12 = vadd.f32 -1.0, %v9860_v59  ;;  %9873 = vpow2.f32 %v3008_v43 }
 0x44c   : > { %v9864_v19 = vpop.eup %9863  ;;  %v8642_v24 = vadd.f32 -1.0, %v9862_v13 }
 0x44d   : > { %v9866_v42 = vpop.eup %9865  ;;  %v3090_v44 = vmul.f32 1.6732632, %v8641_v12  ;;  %v8643_v7 = vadd.f32 -1.0, %v9864_v19  ;;  %v2903_v17 = vpop.f32.mrb[40].mxu0 }
 0x44e   : > { %v3091_v26 = vmul.f32 1.6732632, %v8642_v24  ;;  %v8644_v28 = vadd.f32 -1.0, %v9866_v42  ;;  %v12601_v34 = vadd.f32 %v2903_v17, %v12572_v36  ;;  %v2905_v18 = vpop.f32.mrb[41].mxu0 }
 0x44f   : > { %v3122_v35 = vsel %vm2962_vm0, %v2884_v38, %v3090_v44  ;;  %v3092_v27 = vmul.f32 1.6732632, %v8643_v7  ;;  %v12604_v54 = vadd.f32 %v2905_v18, %v12575_v5  ;;  %v2907_v9 = vpop.f32.mrb[42].mxu0  ;;  %v9526_v18 = vld [vmem:[%s16210_s12 + $0x2c] ss:$16 sps:$4 sm:$0xff]  }
 0x450   : > { %v3093_v46 = vmul.f32 1.6732632, %v8644_v28  ;;  %v3123_v57 = vsel %vm2963_vm1, %v2886_v21, %v3091_v26  ;;  %v3010_v20 = vmul.f32 1.442695, %v12601_v34  ;;  %v2909_v38 = vpop.f32.mrb[43].mxu0  ;;  %v12610_v58 = vadd.f32 %v2907_v9, %v12572_v36 }
 0x451   : > { %v3124_v8 = vsel %vm2964_vm2, %v2888_v16, %v3092_v27  ;;  %v3154_v48 = vmul.f32 1.050701, %v3122_v35  ;;  %v3012_v51 = vmul.f32 1.442695, %v12604_v54  ;;  %v3155_v16 = vmul.f32 1.050701, %v3123_v57 }
 0x452   : > { %v9868_v47 = vpop.eup %9867  ;;  %v3156_v56 = vmul.f32 1.050701, %v3124_v8  ;;  %v3125_v32 = vsel %vm2965_vm3, %v2890_v60, %v3093_v46  ;;  %9875 = vpow2.f32 %v3010_v20  ;;  %v12613_v53 = vadd.f32 %v2909_v38, %v12575_v5  ;;  %v9518_v28 = vld [vmem:[%s16210_s12 + $0x8] ss:$16 sps:$4 sm:$0xff]  }
 0x453   : > { %v9870_v62 = vpop.eup %9869  ;;  %v3157_v41 = vmul.f32 1.050701, %v3125_v32  ;;  %v8645_v50 = vadd.f32 -1.0, %v9868_v47  ;;  %9877 = vpow2.f32 %v3012_v51  ;;  %v3014_v60 = vmul.f32 1.442695, %v12610_v58 }
 0x454   : > { %v9872_v21 = vpop.eup %9871  ;;  %v3186_v52 = vpack.c.bf16 %v3156_v56, %v3154_v48  ;;  %v8646_v10 = vadd.f32 -1.0, %v9870_v62  ;;  %v3016_v24 = vmul.f32 1.442695, %v12613_v53  ;;  %v9524_v57 = vld [vmem:[%s16210_s12 + $0x28] ss:$16 sps:$4 sm:$0xff]   ;;  %vm2970_vm8 = vcmp.gt.f32.partialorder %v12601_v34, 0.0 }
 0x455   : > { %v9874_v43 = vpop.eup %9873  ;;  %v3094_v59 = vmul.f32 1.6732632, %v8645_v50  ;;  %v8647_v13 = vadd.f32 -1.0, %v9872_v21  ;;  %9879 = vpow2.f32 %v3014_v60  ;;  %v2913_v7 = vpop.f32.mrb[44].mxu0  ;;  %v3187_v26 = vpack.c.bf16 %v3157_v41, %v3155_v16 }
 0x456   : > { %v3095_v12 = vmul.f32 1.6732632, %v8646_v10  ;;  %v8648_v19 = vadd.f32 -1.0, %v9874_v43  ;;  %9881 = vpow2.f32 %v3016_v24  ;;  %v2915_v27 = vpop.f32.mrb[45].mxu0  ;;  %v12632_v46 = vadd.f32 %v2913_v7, %v12572_v36 }
 0x457   : > { %v3126_v42 = vsel %vm2966_vm4, %v12585_v63, %v3094_v59  ;;  %v3096_v44 = vmul.f32 1.6732632, %v8647_v13  ;;  %v12635_v9 = vadd.f32 %v2915_v27, %v12575_v5  ;;  %3405 = vmatprep.mubr.bf16.mxu1 %v3187_v26  ;;  %vm2972_vm9 = vcmp.gt.f32.partialorder %v12610_v58, 0.0 }
 0x458   : > { %v3127_v17 = vsel %vm2967_vm5, %v12588_v0, %v3095_v12  ;;  %v3097_v35 = vmul.f32 1.6732632, %v8648_v19  ;;  %v2917_v0 = vpop.f32.mrb[46].mxu0  ;;  %v3158_v8 = vmul.f32 1.050701, %v3126_v42  ;;  %3406 = vmatmul.mubr.bf16.vlgmr.msra.gmra.mrb[64].mxu1 %v3186_v52  ;;  %vm2973_vm10 = vcmp.gt.f32.partialorder %v12613_v53, 0.0 }
 0x459   : > { %v3128_v63 = vsel %vm2968_vm6, %v12592_v22, %v3096_v44  ;;  %v12642_v22 = vadd.f32 %v2917_v0, %v12572_v36  ;;  %v2919_v47 = vpop.f32.mrb[47].mxu0  ;;  %v3159_v48 = vmul.f32 1.050701, %v3127_v17  ;;  %v3018_v32 = vmul.f32 1.442695, %v12632_v46  ;;  %4181 = vmatpush1.bf16.msra.mxu1 %v9518_v28 }
 0x45a   : > { %v3160_v20 = vmul.f32 1.050701, %v3128_v63  ;;  %v3129_v38 = vsel %vm2969_vm7, %v12596_v14, %v3097_v35  ;;  %v3020_v51 = vmul.f32 1.442695, %v12635_v9  ;;  %v12648_v41 = vadd.f32 %v2919_v47, %v12575_v5  ;;  %4182 = vmatprep.subr.bf16.mxu1 %v9526_v18  ;;  %v9532_v14 = vld [vmem:[%s16210_s12 + $0x4c] ss:$16 sps:$4 sm:$0xff]  }
 0x45b   : > { %v3161_v56 = vmul.f32 1.050701, %v3129_v38  ;;  %v3022_v62 = vmul.f32 1.442695, %v12642_v22  ;;  %9883 = vpow2.f32 %v3018_v32  ;;  %v9530_v12 = vld [vmem:[%s16210_s12 + $0x48] ss:$16 sps:$4 sm:$0xff]  }
 0x45c   : > { %v9876_v50 = vpop.eup %9875  ;;  %v3188_v16 = vpack.c.bf16 %v3160_v20, %v3158_v8  ;;  %9885 = vpow2.f32 %v3020_v51  ;;  %v3024_v10 = vmul.f32 1.442695, %v12648_v41  ;;  %v9538_v44 = vld [vmem:[%s16210_s12 + $0x6c] ss:$16 sps:$4 sm:$0xff]   ;;  %v9542_v32 = vld [vmem:[%s16210_s12 + $0x88] ss:$16 sps:$4 sm:$0xff]  }
 0x45d   : > { %v3189_v21 = vpack.c.bf16 %v3161_v56, %v3159_v48  ;;  %v8649_v52 = vadd.f32 -1.0, %v9876_v50  ;;  %v9878_v59 = vpop.eup %9877  ;;  %9887 = vpow2.f32 %v3022_v62  ;;  %4183 = vmatpush1.bf16.msra.mxu1 %v9524_v57  ;;  %v9536_v57 = vld [vmem:[%s16210_s12 + $0x68] ss:$16 sps:$4 sm:$0xff]   ;;  %v9544_v38 = vld [vmem:[%s16210_s12 + $0x8c] ss:$16 sps:$4 sm:$0xff]   ;;  %vm2971_vm11 = vcmp.gt.f32.partialorder %v12604_v54, 0.0 }
 0x45e   : > { %v2923_v43 = vpop.f32.mrb[48].mxu0  ;;  %9889 = vpow2.f32 %v3024_v10  ;;  %4184 = vmatprep.subr.bf16.mxu1 %v9532_v14  ;;  %v8650_v27 = vadd.f32 -1.0, %v9878_v59  ;;  %v9550_v14 = vld [vmem:[%s16210_s12 + $0xac] ss:$16 sps:$4 sm:$0xff]   ;;  %vm2974_vm12 = vcmp.gt.f32.partialorder %v12632_v46, 0.0  ;;  %vm2975_vm13 = vcmp.gt.f32.partialorder %v12635_v9, 0.0 }
 0x45f   : > { %v12655_v13 = vadd.f32 %v2923_v43, %v12572_v36  ;;  %v2925_v60 = vpop.f32.mrb[49].mxu0  ;;  %3415 = vmatprep.mubr.bf16.mxu1 %v3189_v21  ;;  %v3098_v19 = vmul.f32 1.6732632, %v8649_v52  ;;  %v9880_v7 = vpop.eup %9879  ;;  %vm2976_vm14 = vcmp.gt.f32.partialorder %v12642_v22, 0.0  ;;  %vm2977_vm15 = vcmp.gt.f32.partialorder %v12648_v41, 0.0 }
 0x460   : > { %v12661_v24 = vadd.f32 %v2925_v60, %v12575_v5  ;;  %v2927_v42 = vpop.f32.mrb[50].mxu0  ;;  %v9882_v35 = vpop.eup %9881  ;;  %v8651_v18 = vadd.f32 -1.0, %v9880_v7  ;;  %3416 = vmatmul.mubr.bf16.gmra.mrb[68].mxu1 %v3188_v16 }
 0x461   : > { %v3026_v26 = vmul.f32 1.442695, %v12655_v13  ;;  %v12668_v28 = vadd.f32 %v2927_v42, %v12572_v36  ;;  %v2929_v17 = vpop.f32.mrb[51].mxu0  ;;  %v8652_v0 = vadd.f32 -1.0, %v9882_v35  ;;  %4185 = vmatpush1.bf16.msra.mxu1 %v9530_v12  ;;  %v3130_v8 = vsel %vm2970_vm8, %v12601_v34, %v3098_v19 }
 0x462   : > { %v3028_v63 = vmul.f32 1.442695, %v12661_v24  ;;  %v3100_v20 = vmul.f32 1.6732632, %v8651_v18  ;;  %4186 = vmatprep.subr.bf16.mxu1 %v9538_v44  ;;  %v12682_v56 = vadd.f32 %v2929_v17, %v12575_v5  ;;  %v3099_v34 = vmul.f32 1.6732632, %v8650_v27 }
 0x463   : > { %9891 = vpow2.f32 %v3026_v26  ;;  %v3101_v47 = vmul.f32 1.6732632, %v8652_v0  ;;  %v3030_v48 = vmul.f32 1.442695, %v12668_v28  ;;  %v12692_v21 = vmul.f32 1.050701, %v3130_v8 }
 0x464   : > { %9893 = vpow2.f32 %v3028_v63  ;;  %v3132_v51 = vsel %vm2972_vm9, %v12610_v58, %v3100_v20  ;;  %v3032_v59 = vmul.f32 1.442695, %v12682_v56  ;;  %v9548_v26 = vld [vmem:[%s16210_s12 + $0xa8] ss:$16 sps:$4 sm:$0xff]   ;;  %v3131_v35 = vsel %vm2971_vm11, %v12604_v54, %v3099_v34  ;;  %v9556_v63 = vld [vmem:[%s16210_s12 + $0xcc] ss:$16 sps:$4 sm:$0xff]  }
 0x465   : > { %v9884_v50 = vpop.eup %9883  ;;  %v12694_v16 = vmul.f32 1.050701, %v3132_v51  ;;  %v3133_v52 = vsel %vm2973_vm10, %v12613_v53, %v3101_v47  ;;  %9895 = vpow2.f32 %v3030_v48  ;;  %4187 = vmatpush1.bf16.msra.mxu1 %v9536_v57  ;;  %v3163_v51 = vmul.f32 1.050701, %v3131_v35 }
 0x466   : > { %v9886_v43 = vpop.eup %9885  ;;  %v8653_v58 = vadd.f32 -1.0, %v9884_v50  ;;  %4188 = vmatprep.subr.bf16.mxu1 %v9544_v38  ;;  %v3165_v27 = vmul.f32 1.050701, %v3133_v52  ;;  %9897 = vpow2.f32 %v3032_v59  ;;  %vm2978_vm0 = vcmp.gt.f32.partialorder %v12655_v13, 0.0  ;;  %v9554_v59 = vld [vmem:[%s16210_s12 + $0xc8] ss:$16 sps:$4 sm:$0xff]  }
 0x467   : > { %v2933_v62 = vpop.f32.mrb[52].mxu0  ;;  %v9888_v19 = vpop.eup %9887  ;;  %v8654_v42 = vadd.f32 -1.0, %v9886_v43  ;;  %v3190_v7 = vpack.c.bf16 %v12694_v16, %v12692_v21  ;;  %vm2979_vm1 = vcmp.gt.f32.partialorder %v12661_v24, 0.0  ;;  %vm2980_vm2 = vcmp.gt.f32.partialorder %v12668_v28, 0.0 }
 0x468   : > { %v2935_v10 = vpop.f32.mrb[53].mxu0  ;;  %v12700_v60 = vadd.f32 %v2933_v62, %v12572_v36  ;;  %v9890_v17 = vpop.eup %9889  ;;  %v8655_v18 = vadd.f32 -1.0, %v9888_v19  ;;  %v3102_v0 = vmul.f32 1.6732632, %v8653_v58  ;;  %v3191_v58 = vpack.c.bf16 %v3165_v27, %v3163_v51 }
 0x469   : > { %v2937_v12 = vpop.f32.mrb[54].mxu0  ;;  %v12704_v53 = vadd.f32 %v2935_v10, %v12575_v5  ;;  %v8656_v57 = vadd.f32 -1.0, %v9890_v17  ;;  %4189 = vmatpush1.bf16.msra.mxu1 %v9542_v32  ;;  %v3103_v38 = vmul.f32 1.6732632, %v8654_v42  ;;  %vm2981_vm3 = vcmp.gt.f32.partialorder %v12682_v56, 0.0 }
 0x46a   : > { %v2939_v44 = vpop.f32.mrb[55].mxu0  ;;  %v3034_v8 = vmul.f32 1.442695, %v12700_v60  ;;  %v12717_v20 = vadd.f32 %v2937_v12, %v12572_v36  ;;  %v3104_v47 = vmul.f32 1.6732632, %v8655_v18  ;;  %4190 = vmatprep.subr.bf16.mxu1 %v9550_v14  ;;  %v3134_v10 = vsel %vm2974_vm12, %v12632_v46, %v3102_v0  ;;  %3425 = vmatprep.mubr.bf16.mxu1 %v3191_v58 }
 0x46b   : > { %v3036_v48 = vmul.f32 1.442695, %v12704_v53  ;;  %v3105_v34 = vmul.f32 1.6732632, %v8656_v57  ;;  %v12734_v43 = vadd.f32 %v2939_v44, %v12575_v5  ;;  %v9562_v44 = vld [vmem:[%s16210_s12 + $0xec] ss:$16 sps:$4 sm:$0xff]   ;;  %3426 = vmatmul.mubr.bf16.gmra.mrb[72].mxu1 %v3190_v7 }
 0x46c   : > { %9899 = vpow2.f32 %v3034_v8  ;;  %v3136_v62 = vsel %vm2976_vm14, %v12642_v22, %v3104_v47  ;;  %v3038_v16 = vmul.f32 1.442695, %v12717_v20  ;;  %v3135_v22 = vsel %vm2975_vm13, %v12635_v9, %v3103_v38  ;;  %v9560_v18 = vld [vmem:[%s16210_s12 + $0xe8] ss:$16 sps:$4 sm:$0xff]   ;;  %v9568_v7 = vld [vmem:[%s16210_s12 + $0x10c] ss:$16 sps:$4 sm:$0xff]  }
 0x46d   : > { %v9892_v54 = vpop.eup %9891  ;;  %9901 = vpow2.f32 %v3036_v48  ;;  %v3137_v21 = vsel %vm2977_vm15, %v12648_v41, %v3105_v34  ;;  %4191 = vmatpush1.bf16.msra.mxu1 %v9548_v26  ;;  %v12739_v19 = vmul.f32 1.050701, %v3136_v62  ;;  %v3040_v27 = vmul.f32 1.442695, %v12734_v43 }
 0x46e   : > { %v9894_v32 = vpop.eup %9893  ;;  %v8657_v14 = vadd.f32 -1.0, %v9892_v54  ;;  %4192 = vmatprep.subr.bf16.mxu1 %v9556_v63  ;;  %9903 = vpow2.f32 %v3038_v16  ;;  %v3169_v26 = vmul.f32 1.050701, %v3137_v21  ;;  %v3166_v8 = vmul.f32 1.050701, %v3134_v10 }
 0x46f   : > { %v2943_v50 = vpop.f32.mrb[56].mxu0  ;;  %v9896_v12 = vpop.eup %9895  ;;  %v8658_v17 = vadd.f32 -1.0, %v9894_v32  ;;  %v3167_v38 = vmul.f32 1.050701, %v3135_v22  ;;  %9905 = vpow2.f32 %v3040_v27  ;;  %v9566_v22 = vld [vmem:[%s16210_s12 + $0x108] ss:$16 sps:$4 sm:$0xff]  }
 0x470   : > { %v2945_v52 = vpop.f32.mrb[57].mxu0  ;;  %v12742_v46 = vadd.f32 %v2943_v50, %v12572_v36  ;;  %v8659_v35 = vadd.f32 -1.0, %v9896_v12  ;;  %v3106_v63 = vmul.f32 1.6732632, %v8657_v14  ;;  %v9898_v57 = vpop.eup %9897  ;;  %v3192_v32 = vpack.c.bf16 %v12739_v19, %v3166_v8 }
 0x471   : > { %v2947_v41 = vpop.f32.mrb[58].mxu0  ;;  %v12745_v42 = vadd.f32 %v2945_v52, %v12575_v5  ;;  %4193 = vmatpush1.bf16.msra.mxu1 %v9554_v59  ;;  %v8660_v48 = vadd.f32 -1.0, %v9898_v57  ;;  %v3107_v51 = vmul.f32 1.6732632, %v8658_v17  ;;  %v3193_v50 = vpack.c.bf16 %v3169_v26, %v3167_v38 }
 0x472   : > { %v2949_v9 = vpop.f32.mrb[59].mxu0  ;;  %v3042_v0 = vmul.f32 1.442695, %v12742_v46  ;;  %v3108_v47 = vmul.f32 1.6732632, %v8659_v35  ;;  %v12759_v34 = vadd.f32 %v2947_v41, %v12572_v36  ;;  %4194 = vmatprep.subr.bf16.mxu1 %v9562_v44  ;;  %v3138_v16 = vsel %vm2978_vm0, %v12655_v13, %v3106_v63 }
 0x473   : > { %v3044_v54 = vmul.f32 1.442695, %v12745_v42  ;;  %v12765_v62 = vadd.f32 %v2949_v9, %v12575_v5  ;;  %v3109_v52 = vmul.f32 1.6732632, %v8660_v48  ;;  %3435 = vmatprep.mubr.bf16.mxu1 %v3193_v50  ;;  %vm2982_vm4 = vcmp.gt.f32.partialorder %v12700_v60, 0.0 }
 0x474   : > { %9907 = vpow2.f32 %v3042_v0  ;;  %v3140_v41 = vsel %vm2980_vm2, %v12668_v28, %v3108_v47  ;;  %v3046_v12 = vmul.f32 1.442695, %v12759_v34  ;;  %v3139_v28 = vsel %vm2979_vm1, %v12661_v24, %v3107_v51  ;;  %3436 = vmatmul.mubr.bf16.gmra.mrb[76].mxu1 %v3192_v32 }
 0x475   : > { %9909 = vpow2.f32 %v3044_v54  ;;  %v3048_v19 = vmul.f32 1.442695, %v12765_v62  ;;  %4195 = vmatpush1.bf16.msra.mxu1 %v9560_v18  ;;  %v3141_v13 = vsel %vm2981_vm3, %v12682_v56, %v3109_v52  ;;  %v3172_v63 = vmul.f32 1.050701, %v3140_v41 }
 0x476   : > { %v9900_v14 = vpop.eup %9899  ;;  %4196 = vmatprep.subr.bf16.mxu1 %v9568_v7  ;;  %9911 = vpow2.f32 %v3046_v12  ;;  %v3173_v0 = vmul.f32 1.050701, %v3141_v13  ;;  %vm2984_vm5 = vcmp.gt.f32.partialorder %v12717_v20, 0.0  ;;  %v3170_v38 = vmul.f32 1.050701, %v3138_v16 }
 0x477   : > { %v2953_v21 = vpop.f32.mrb[60].mxu0  ;;  %v9902_v58 = vpop.eup %9901  ;;  %v8661_v59 = vadd.f32 -1.0, %v9900_v14  ;;  %9913 = vpow2.f32 %v3048_v19  ;;  %v3171_v47 = vmul.f32 1.050701, %v3139_v28  ;;  %vm2983_vm6 = vcmp.gt.f32.partialorder %v12704_v53, 0.0 }
 0x478   : > { %v2955_v10 = vpop.f32.mrb[61].mxu0  ;;  %v8662_v9 = vadd.f32 -1.0, %v9902_v58  ;;  %v12782_v44 = vadd.f32 %v2953_v21, %v12572_v36  ;;  %v9904_v56 = vpop.eup %9903  ;;  %v3194_v52 = vpack.c.bf16 %v3172_v63, %v3170_v38  ;;  %vm2985_vm7 = vcmp.gt.f32.partialorder %v12734_v43, 0.0 }
 0x479   : > { %v12785_v26 = vadd.f32 %v2955_v10, %v12575_v5  ;;  %v2957_v17 = vpop.f32.mrb[62].mxu0  ;;  %v3110_v35 = vmul.f32 1.6732632, %v8661_v59  ;;  %v8663_v8 = vadd.f32 -1.0, %v9904_v56  ;;  %4197 = vmatpush1.bf16.msra.mxu1 %v9566_v22  ;;  %v9906_v48 = vpop.eup %9905  ;;  %v3195_v14 = vpack.c.bf16 %v3173_v0, %v3171_v47 }
 0x47a   : > { %v12791_v27 = vadd.f32 %v2957_v17, %v12572_v36  ;;  %v2959_v18 = vpop.f32.mrb[63].mxu0  ;;  %v3050_v57 = vmul.f32 1.442695, %v12782_v44  ;;  %v3111_v36 = vmul.f32 1.6732632, %v8662_v9  ;;  %v8664_v32 = vadd.f32 -1.0, %v9906_v48 }
 0x47b   : > { %v3052_v24 = vmul.f32 1.442695, %v12785_v26  ;;  %v3142_v54 = vsel %vm2982_vm4, %v12700_v60, %v3110_v35  ;;  %v3112_v7 = vmul.f32 1.6732632, %v8663_v8  ;;  %v12800_v21 = vadd.f32 %v2959_v18, %v12575_v5  ;;  %3445 = vmatprep.mubr.bf16.mxu1 %v3195_v14 }
 0x47c   : > { %9915 = vpow2.f32 %v3050_v57  ;;  %v3054_v51 = vmul.f32 1.442695, %v12791_v27  ;;  %v3174_v22 = vmul.f32 1.050701, %v3142_v54  ;;  %v3143_v58 = vsel %vm2983_vm6, %v12704_v53, %v3111_v36  ;;  %3446 = vmatmul.mubr.bf16.gmra.mrb[80].mxu1 %v3194_v52 }
 0x47d   : > { %9917 = vpow2.f32 %v3052_v24  ;;  %v3144_v16 = vsel %vm2984_vm5, %v12717_v20, %v3112_v7  ;;  %v3113_v59 = vmul.f32 1.6732632, %v8664_v32  ;;  %v3056_v12 = vmul.f32 1.442695, %v12800_v21 }
 0x47e   : > { %v9908_v50 = vpop.eup %9907  ;;  %9919 = vpow2.f32 %v3054_v51  ;;  %v3176_v41 = vmul.f32 1.050701, %v3144_v16  ;;  %v3175_v17 = vmul.f32 1.050701, %v3143_v58  ;;  %vm2986_vm8 = vcmp.gt.f32.partialorder %v12742_v46, 0.0 }
 0x47f   : > { %v8665_v10 = vadd.f32 -1.0, %v9908_v50  ;;  %v9910_v60 = vpop.eup %9909  ;;  %v3145_v19 = vsel %vm2985_vm7, %v12734_v43, %v3113_v59  ;;  %9921 = vpow2.f32 %v3056_v12  ;;  %vm2987_vm9 = vcmp.gt.f32.partialorder %v12745_v42, 0.0 }
 0x480   : > { %v8666_v5 = vadd.f32 -1.0, %v9910_v60  ;;  %v3196_v9 = vpack.c.bf16 %v3176_v41, %v3174_v22  ;;  %v9912_v20 = vpop.eup %9911  ;;  %v3177_v28 = vmul.f32 1.050701, %v3145_v19  ;;  %vm2988_vm10 = vcmp.gt.f32.partialorder %v12759_v34, 0.0 }
 0x481   : > { %v3114_v13 = vmul.f32 1.6732632, %v8665_v10  ;;  %v9914_v18 = vpop.eup %9913  ;;  %v8667_v53 = vadd.f32 -1.0, %v9912_v20  ;;  %vm2989_vm11 = vcmp.gt.f32.partialorder %v12765_v62, 0.0  ;;  %vm2990_vm12 = vcmp.gt.f32.partialorder %v12782_v44, 0.0 }
 0x482   : > { %v3115_v35 = vmul.f32 1.6732632, %v8666_v5  ;;  %v8668_v56 = vadd.f32 -1.0, %v9914_v18  ;;  %v3197_v63 = vpack.c.bf16 %v3177_v28, %v3175_v17  ;;  %vm2992_vm13 = vcmp.gt.f32.partialorder %v12791_v27, 0.0  ;;  %v9569_v17 = vld [vmem:[%s16210_s12 + $0x120] ss:$16 sps:$4 sm:$0xff]  }
 0x483   : > { %v3146_v57 = vsel %vm2986_vm8, %v12742_v46, %v3114_v13  ;;  %v3116_v43 = vmul.f32 1.6732632, %v8667_v53  ;;  %vm2991_vm14 = vcmp.gt.f32.partialorder %v12785_v26, 0.0  ;;  %vm2993_vm15 = vcmp.gt.f32.partialorder %v12800_v21, 0.0  ;;  %v9577_v28 = vld [vmem:[%s16210_s12 + $0x144] ss:$16 sps:$4 sm:$0xff]  }
 0x484   : > { %v3147_v24 = vsel %vm2987_vm9, %v12745_v42, %v3115_v35  ;;  %v3117_v38 = vmul.f32 1.6732632, %v8668_v56  ;;  %3455 = vmatprep.mubr.bf16.mxu1 %v3197_v63  ;;  %v3178_v7 = vmul.f32 1.050701, %v3146_v57  ;;  %v9580_v35 = vld [vmem:[%s16210_s12 + $0x14c] ss:$16 sps:$4 sm:$0xff]  }
 0x485   : > { %v3148_v36 = vsel %vm2988_vm10, %v12759_v34, %v3116_v43  ;;  %v3179_v32 = vmul.f32 1.050701, %v3147_v24  ;;  %3456 = vmatmul.mubr.bf16.gmra.mrb[84].mxu1 %v3196_v9  ;;  %v9575_v18 = vld [vmem:[%s16210_s12 + $0x140] ss:$16 sps:$4 sm:$0xff]   ;;  %v9578_v53 = vld [vmem:[%s16210_s12 + $0x148] ss:$16 sps:$4 sm:$0xff]  }
 0x486   : > { %v9916_v0 = vpop.eup %9915  ;;  %v3180_v51 = vmul.f32 1.050701, %v3148_v36  ;;  %v3149_v46 = vsel %vm2989_vm11, %v12765_v62, %v3117_v38  ;;  %v9583_v56 = vld [vmem:[%s16210_s12 + $0x164] ss:$16 sps:$4 sm:$0xff]   ;;  %v9586_v63 = vld [vmem:[%s16210_s12 + $0x16c] ss:$16 sps:$4 sm:$0xff]  }
 0x487   : > { %v9918_v8 = vpop.eup %9917  ;;  %v8669_v47 = vadd.f32 -1.0, %v9916_v0  ;;  %v3181_v14 = vmul.f32 1.050701, %v3149_v46  ;;  %v9581_v0 = vld [vmem:[%s16210_s12 + $0x160] ss:$16 sps:$4 sm:$0xff]  }
 0x488   : > { %v8670_v48 = vadd.f32 -1.0, %v9918_v8  ;;  %v9920_v54 = vpop.eup %9919  ;;  %v3198_v42 = vpack.c.bf16 %v3180_v51, %v3178_v7  ;;  %v9584_v57 = vld [vmem:[%s16210_s12 + $0x168] ss:$16 sps:$4 sm:$0xff]   ;;  %v9589_v43 = vld [vmem:[%s16210_s12 + $0x184] ss:$16 sps:$4 sm:$0xff]  }
 0x489   : > { %v3118_v50 = vmul.f32 1.6732632, %v8669_v47  ;;  %v8671_v52 = vadd.f32 -1.0, %v9920_v54  ;;  %v3199_v60 = vpack.c.bf16 %v3181_v14, %v3179_v32  ;;  %v9922_v22 = vpop.eup %9921  ;;  %v9592_v8 = vld [vmem:[%s16210_s12 + $0x18c] ss:$16 sps:$4 sm:$0xff]  }
 0x48a   : > { %v3119_v10 = vmul.f32 1.6732632, %v8670_v48  ;;  %v8672_v41 = vadd.f32 -1.0, %v9922_v22  ;;  %v9587_v24 = vld [vmem:[%s16210_s12 + $0x180] ss:$16 sps:$4 sm:$0xff]  }
 0x48b   : > { %v3150_v16 = vsel %vm2990_vm12, %v12782_v44, %v3118_v50  ;;  %v3120_v34 = vmul.f32 1.6732632, %v8671_v52  ;;  %3465 = vmatprep.mubr.bf16.mxu1 %v3199_v60  ;;  %v9590_v38 = vld [vmem:[%s16210_s12 + $0x188] ss:$16 sps:$4 sm:$0xff]   ;;  %v9595_v47 = vld [vmem:[%s16210_s12 + $0x1a4] ss:$16 sps:$4 sm:$0xff]  }
 0x48c   : > { %v3182_v62 = vmul.f32 1.050701, %v3150_v16  ;;  %v3151_v5 = vsel %vm2991_vm14, %v12785_v26, %v3119_v10  ;;  %v3121_v12 = vmul.f32 1.6732632, %v8672_v41  ;;  %v9574_v26 = vld [vmem:[%s16210_s12 + $0x12c] ss:$16 sps:$4 sm:$0xff]  }
 0x48d   : > { %v3152_v58 = vsel %vm2992_vm13, %v12791_v27, %v3120_v34  ;;  %3466 = vmatmul.mubr.bf16.gmra.mrb[88].mxu1 %v3198_v42  ;;  %v3183_v13 = vmul.f32 1.050701, %v3151_v5  ;;  %v9571_v27 = vld [vmem:[%s16210_s12 + $0x124] ss:$16 sps:$4 sm:$0xff]   ;;  %4198 = vmatprep.subr.bf16.mxu1 %v9574_v26  ;;  %v9598_v36 = vld [vmem:[%s16210_s12 + $0x1ac] ss:$16 sps:$4 sm:$0xff]  }
 0x48e   : > { %v3184_v59 = vmul.f32 1.050701, %v3152_v58  ;;  %v3153_v19 = vsel %vm2993_vm15, %v12800_v21, %v3121_v12  ;;  %v9572_v21 = vld [vmem:[%s16210_s12 + $0x128] ss:$16 sps:$4 sm:$0xff]   ;;  %4085 = vmatprep.subr.bf16.mxu0 %v9571_v27  ;;  %v9593_v48 = vld [vmem:[%s16210_s12 + $0x1a0] ss:$16 sps:$4 sm:$0xff]  }
 0x48f   : > { %v3185_v9 = vmul.f32 1.050701, %v3153_v19  ;;  %4086 = vmatpush1.bf16.msra.mxu0 %v9569_v17  ;;  %4199 = vmatpush1.bf16.msra.mxu1 %v9572_v21  ;;  %v9596_v54 = vld [vmem:[%s16210_s12 + $0x1a8] ss:$16 sps:$4 sm:$0xff]   ;;  %v9601_v7 = vld [vmem:[%s16210_s12 + $0x1c4] ss:$16 sps:$4 sm:$0xff]  }
 0x490   : > { %v3200_v44 = vpack.c.bf16 %v3184_v59, %v3182_v62  ;;  %4087 = vmatprep.subr.bf16.mxu0 %v9577_v28  ;;  %4200 = vmatprep.subr.bf16.mxu1 %v9580_v35  ;;  %v9604_v51 = vld [vmem:[%s16210_s12 + $0x1cc] ss:$16 sps:$4 sm:$0xff]   ;;  %v9599_v46 = vld [vmem:[%s16210_s12 + $0x1c0] ss:$16 sps:$4 sm:$0xff]   ;;  %v9602_v50 = vld [vmem:[%s16210_s12 + $0x1c8] ss:$16 sps:$4 sm:$0xff]  }
 0x491   : > { %v3201_v20 = vpack.c.bf16 %v3185_v9, %v3183_v13  ;;  %v9607_v32 = vld [vmem:[%s16210_s12 + $0x1e4] ss:$16 sps:$4 sm:$0xff]   ;;  %v9610_v14 = vld [vmem:[%s16210_s12 + $0x1ec] ss:$16 sps:$4 sm:$0xff]   ;;  %v9605_v52 = vld [vmem:[%s16210_s12 + $0x1e0] ss:$16 sps:$4 sm:$0xff]  }
 0x492   : > { %v9608_v42 = vld [vmem:[%s16210_s12 + $0x1e8] ss:$16 sps:$4 sm:$0xff]   ;;  %v9613_v16 = vld [vmem:[%s16212_s14 + $0x4] ss:$8 sps:$4 sm:$0xff]   ;;  %v2596_v10 = vld [vmem:[%s16209_s11] sm:$0x3] }
 0x493   : > { %3475 = vmatprep.mubr.bf16.mxu1 %v3201_v20  ;;  %4088 = vmatpush1.bf16.msra.mxu0 %v9575_v18  ;;  %v12923_v34 = vrot.slane %v2596_v10, %v11639_v4  ;;  %v12926_v60 = vrot.slane %v2596_v10, %v11645_v6 }
 0x494   : > { %4201 = vmatpush1.bf16.msra.mxu1 %v9578_v53  ;;  %4089 = vmatprep.subr.bf16.mxu0 %v9583_v56 }
 0x495   : > { %3476 = vmatmul.mubr.bf16.gmra.mrb[92].mxu1 %v3200_v44  ;;  %4202 = vmatprep.subr.bf16.mxu1 %v9586_v63 }
 0x497   : > { %4090 = vmatpush1.bf16.msra.mxu0 %v9581_v0 }
 0x498   : > { %4203 = vmatpush1.bf16.msra.mxu1 %v9584_v57  ;;  %4091 = vmatprep.subr.bf16.mxu0 %v9589_v43 }
 0x499   : > { %4204 = vmatprep.subr.bf16.mxu1 %v9592_v8 }
 0x49b   : > { %4092 = vmatpush1.bf16.msra.mxu0 %v9587_v24 }
 0x49c   : > { %4205 = vmatpush1.bf16.msra.mxu1 %v9590_v38  ;;  %4093 = vmatprep.subr.bf16.mxu0 %v9595_v47 }
 0x49d   : > { %4206 = vmatprep.subr.bf16.mxu1 %v9598_v36 }
 0x49f   : > { %4094 = vmatpush1.bf16.msra.mxu0 %v9593_v48 }
 0x4a0   : > { %4207 = vmatpush1.bf16.msra.mxu1 %v9596_v54  ;;  %4095 = vmatprep.subr.bf16.mxu0 %v9601_v7 }
 0x4a1   : > { %4208 = vmatprep.subr.bf16.mxu1 %v9604_v51 }
 0x4a3   : > { %4096 = vmatpush1.bf16.msra.mxu0 %v9599_v46 }
 0x4a4   : > { %4209 = vmatpush1.bf16.msra.mxu1 %v9602_v50  ;;  %4097 = vmatprep.subr.bf16.mxu0 %v9607_v32 }
 0x4a5   : > { %4210 = vmatprep.subr.bf16.mxu1 %v9610_v14 }
 0x4a7   : > { %4098 = vmatpush1.bf16.msra.mxu0 %v9605_v52 }
 0x4a8   : > { %4211 = vmatpush1.bf16.msra.mxu1 %v9608_v42  ;;  %6073 = vmatprep.subr.bf16.mxu0 %v9613_v16 }
 0x52b   : > { %v3407_v22 = vpop.f32.mrb[64].mxu1 }
 0x52c   : > { %v3408_v58 = vadd.f32 %v3407_v22, %v12923_v34  ;;  %v3409_v41 = vpop.f32.mrb[65].mxu1 }
 0x52d   : > { %v3410_v62 = vadd.f32 %v3409_v41, %v12926_v60  ;;  %v3411_v59 = vpop.f32.mrb[66].mxu1 }
 0x52e   : > { %v3518_v5 = vmul.f32 1.442695, %v3408_v58  ;;  %v3412_v12 = vadd.f32 %v3411_v59, %v12923_v34  ;;  %v3413_v44 = vpop.f32.mrb[67].mxu1  ;;  %vm3486_vm0 = vcmp.gt.f32.partialorder %v3408_v58, 0.0 }
 0x52f   : > { %v3520_v19 = vmul.f32 1.442695, %v3410_v62  ;;  %v3414_v13 = vadd.f32 %v3413_v44, %v12926_v60  ;;  %vm3487_vm1 = vcmp.gt.f32.partialorder %v3410_v62, 0.0 }
 0x530   : > { %9923 = vpow2.f32 %v3518_v5  ;;  %v3522_v9 = vmul.f32 1.442695, %v3412_v12  ;;  %vm3488_vm2 = vcmp.gt.f32.partialorder %v3412_v12, 0.0 }
 0x531   : > { %9925 = vpow2.f32 %v3520_v19  ;;  %v3524_v20 = vmul.f32 1.442695, %v3414_v13  ;;  %vm3489_vm3 = vcmp.gt.f32.partialorder %v3414_v13, 0.0 }
 0x532   : > { %9927 = vpow2.f32 %v3522_v9 }
 0x533   : > { %9929 = vpow2.f32 %v3524_v20  ;;  %v3417_v27 = vpop.f32.mrb[68].mxu1 }
 0x534   : > { %v12933_v26 = vadd.f32 %v3417_v27, %v12923_v34  ;;  %v3419_v17 = vpop.f32.mrb[69].mxu1 }
 0x535   : > { %v12936_v21 = vadd.f32 %v3419_v17, %v12926_v60  ;;  %v3421_v28 = vpop.f32.mrb[70].mxu1 }
 0x536   : > { %v3526_v35 = vmul.f32 1.442695, %v12933_v26  ;;  %v12940_v18 = vadd.f32 %v3421_v28, %v12923_v34  ;;  %v3423_v53 = vpop.f32.mrb[71].mxu1  ;;  %vm3490_vm4 = vcmp.gt.f32.partialorder %v12933_v26, 0.0 }
 0x537   : > { %v3528_v56 = vmul.f32 1.442695, %v12936_v21  ;;  %v12944_v63 = vadd.f32 %v3423_v53, %v12926_v60  ;;  %v9616_v53 = vld [vmem:[%s16212_s14 + $0x14] ss:$8 sps:$4 sm:$0xff]   ;;  %vm3491_vm5 = vcmp.gt.f32.partialorder %v12936_v21, 0.0 }
 0x538   : > { %9931 = vpow2.f32 %v3526_v35  ;;  %v3530_v0 = vmul.f32 1.442695, %v12940_v18  ;;  %vm3492_vm6 = vcmp.gt.f32.partialorder %v12940_v18, 0.0 }
 0x539   : > { %9933 = vpow2.f32 %v3528_v56  ;;  %v3532_v57 = vmul.f32 1.442695, %v12944_v63  ;;  %vm3493_vm7 = vcmp.gt.f32.partialorder %v12944_v63, 0.0 }
 0x53a   : > { %v9924_v43 = vpop.eup %9923  ;;  %9935 = vpow2.f32 %v3530_v0 }
 0x53b   : > { %v9926_v8 = vpop.eup %9925  ;;  %v8705_v24 = vadd.f32 -1.0, %v9924_v43  ;;  %9937 = vpow2.f32 %v3532_v57 }
 0x53c   : > { %v9928_v38 = vpop.eup %9927  ;;  %v8706_v47 = vadd.f32 -1.0, %v9926_v8 }
 0x53d   : > { %v9930_v36 = vpop.eup %9929  ;;  %v3614_v48 = vmul.f32 1.6732632, %v8705_v24  ;;  %v8707_v54 = vadd.f32 -1.0, %v9928_v38 }
 0x53e   : > { %v3615_v7 = vmul.f32 1.6732632, %v8706_v47  ;;  %v8708_v51 = vadd.f32 -1.0, %v9930_v36  ;;  %v3427_v27 = vpop.f32.mrb[72].mxu1 }
 0x53f   : > { %v3646_v46 = vsel %vm3486_vm0, %v3408_v58, %v3614_v48  ;;  %v3616_v50 = vmul.f32 1.6732632, %v8707_v54  ;;  %v9611_v58 = vld [vmem:[%s16212_s14] ss:$8 sps:$4 sm:$0xff]   ;;  %v12952_v28 = vadd.f32 %v3427_v27, %v12923_v34  ;;  %v3429_v35 = vpop.f32.mrb[73].mxu1 }
 0x540   : > { %v3647_v32 = vsel %vm3487_vm1, %v3410_v62, %v3615_v7  ;;  %v3617_v14 = vmul.f32 1.6732632, %v8708_v51  ;;  %v3678_v16 = vmul.f32 1.050701, %v3646_v46  ;;  %v12959_v57 = vadd.f32 %v3429_v35, %v12926_v60  ;;  %v3431_v43 = vpop.f32.mrb[74].mxu1 }
 0x541   : > { %v3648_v52 = vsel %vm3488_vm2, %v3412_v12, %v3616_v50  ;;  %v3679_v59 = vmul.f32 1.050701, %v3647_v32  ;;  %v3534_v24 = vmul.f32 1.442695, %v12952_v28  ;;  %v3433_v38 = vpop.f32.mrb[75].mxu1  ;;  %v12974_v46 = vadd.f32 %v3431_v43, %v12923_v34 }
 0x542   : > { %v9932_v42 = vpop.eup %9931  ;;  %v3680_v10 = vmul.f32 1.050701, %v3648_v52  ;;  %v3649_v22 = vsel %vm3489_vm3, %v3414_v13, %v3617_v14  ;;  %v3536_v7 = vmul.f32 1.442695, %v12959_v57  ;;  %v9614_v51 = vld [vmem:[%s16212_s14 + $0x10] ss:$8 sps:$4 sm:$0xff]   ;;  %v12977_v50 = vadd.f32 %v3433_v38, %v12926_v60 }
 0x543   : > { %v9934_v41 = vpop.eup %9933  ;;  %v3681_v5 = vmul.f32 1.050701, %v3649_v22  ;;  %v8709_v44 = vadd.f32 -1.0, %v9932_v42  ;;  %9939 = vpow2.f32 %v3534_v24  ;;  %v3538_v42 = vmul.f32 1.442695, %v12974_v46 }
 0x544   : > { %v9936_v19 = vpop.eup %9935  ;;  %v3710_v9 = vpack.c.bf16 %v3680_v10, %v3678_v16  ;;  %v8710_v20 = vadd.f32 -1.0, %v9934_v41  ;;  %9941 = vpow2.f32 %v3536_v7  ;;  %v3540_v16 = vmul.f32 1.442695, %v12977_v50  ;;  %v9617_v41 = vld [vmem:[%s16212_s14 + $0x20] ss:$8 sps:$4 sm:$0xff]  }
 0x545   : > { %v9938_v62 = vpop.eup %9937  ;;  %v3618_v17 = vmul.f32 1.6732632, %v8709_v44  ;;  %v8711_v12 = vadd.f32 -1.0, %v9936_v19  ;;  %v3711_v13 = vpack.c.bf16 %v3681_v5, %v3679_v59  ;;  %9943 = vpow2.f32 %v3538_v42  ;;  %v9622_v44 = vld [vmem:[%s16212_s14 + $0x34] ss:$8 sps:$4 sm:$0xff]  }
 0x546   : > { %v3619_v56 = vmul.f32 1.6732632, %v8710_v20  ;;  %v8712_v0 = vadd.f32 -1.0, %v9938_v62  ;;  %9945 = vpow2.f32 %v3540_v16  ;;  %v9628_v7 = vld [vmem:[%s16212_s14 + $0x54] ss:$8 sps:$4 sm:$0xff]   ;;  %vm3494_vm8 = vcmp.gt.f32.partialorder %v12952_v28, 0.0 }
 0x547   : > { %v3620_v8 = vmul.f32 1.6732632, %v8711_v12  ;;  %4099 = vmatprep.mubr.bf16.mxu0 %v3711_v13  ;;  %4212 = vmatprep.mubr.bf16.mxu1 %v3711_v13  ;;  %v3650_v47 = vsel %vm3490_vm4, %v12933_v26, %v3618_v17  ;;  %v9620_v12 = vld [vmem:[%s16212_s14 + $0x30] ss:$8 sps:$4 sm:$0xff]   ;;  %v9625_v13 = vld [vmem:[%s16212_s14 + $0x44] ss:$8 sps:$4 sm:$0xff]  }
 0x548   : > { %v3651_v36 = vsel %vm3491_vm5, %v12936_v21, %v3619_v56  ;;  %v3621_v48 = vmul.f32 1.6732632, %v8712_v0  ;;  %4100 = vmatmul.mubr.bf16.vlgmr.msra.gmra.mrb[64].mxu0 %v3710_v9  ;;  %4213 = vmatmul.mubr.bf16.vlgmr.msra.gmra.mrb[96].mxu1 %v3710_v9  ;;  %v3682_v32 = vmul.f32 1.050701, %v3650_v47  ;;  %v9623_v47 = vld [vmem:[%s16212_s14 + $0x40] ss:$8 sps:$4 sm:$0xff]  }
 0x549   : > { %v3652_v54 = vsel %vm3492_vm6, %v12940_v18, %v3620_v8  ;;  %6074 = vmatpush1.bf16.msra.mxu0 %v9611_v58  ;;  %v9619_v18 = vld [vmem:[%s16212_s14 + $0x24] ss:$8 sps:$4 sm:$0xff]   ;;  %v3683_v14 = vmul.f32 1.050701, %v3651_v36  ;;  %vm3495_vm9 = vcmp.gt.f32.partialorder %v12959_v57, 0.0  ;;  %vm3496_vm10 = vcmp.gt.f32.partialorder %v12974_v46, 0.0 }
 0x54a   : > { %v3684_v26 = vmul.f32 1.050701, %v3652_v54  ;;  %v3653_v21 = vsel %vm3493_vm7, %v12944_v63, %v3621_v48  ;;  %6075 = vmatprep.subr.bf16.mxu0 %v9616_v53  ;;  %v3437_v63 = vpop.f32.mrb[76].mxu1  ;;  %vm3497_vm11 = vcmp.gt.f32.partialorder %v12977_v50, 0.0 }
 0x54b   : > { %v3685_v52 = vmul.f32 1.050701, %v3653_v21  ;;  %v12988_v59 = vadd.f32 %v3437_v63, %v12923_v34  ;;  %v3439_v5 = vpop.f32.mrb[77].mxu1  ;;  %v9631_v63 = vld [vmem:[%s16212_s14 + $0x64] ss:$8 sps:$4 sm:$0xff]  }
 0x54c   : > { %v3712_v22 = vpack.c.bf16 %v3684_v26, %v3682_v32  ;;  %v12994_v19 = vadd.f32 %v3439_v5, %v12926_v60  ;;  %v3441_v9 = vpop.f32.mrb[78].mxu1 }
 0x54d   : > { %6076 = vmatpush1.bf16.msra.mxu0 %v9614_v51  ;;  %v3713_v10 = vpack.c.bf16 %v3685_v52, %v3683_v14  ;;  %v3542_v20 = vmul.f32 1.442695, %v12988_v59  ;;  %v12998_v27 = vadd.f32 %v3441_v9, %v12923_v34  ;;  %v3443_v58 = vpop.f32.mrb[79].mxu1  ;;  %v9940_v53 = vpop.eup %9939  ;;  %v9626_v14 = vld [vmem:[%s16212_s14 + $0x50] ss:$8 sps:$4 sm:$0xff]   ;;  %vm3498_vm12 = vcmp.gt.f32.partialorder %v12988_v59, 0.0 }
 0x54e   : > { %6077 = vmatprep.subr.bf16.mxu0 %v9619_v18  ;;  %v3544_v62 = vmul.f32 1.442695, %v12994_v19  ;;  %v13002_v17 = vadd.f32 %v3443_v58, %v12926_v60  ;;  %v9942_v43 = vpop.eup %9941  ;;  %v8713_v8 = vadd.f32 -1.0, %v9940_v53  ;;  %v9629_v9 = vld [vmem:[%s16212_s14 + $0x60] ss:$8 sps:$4 sm:$0xff]   ;;  %vm3499_vm13 = vcmp.gt.f32.partialorder %v12994_v19, 0.0 }
 0x54f   : > { %4109 = vmatprep.mubr.bf16.mxu0 %v3713_v10  ;;  %4222 = vmatprep.mubr.bf16.mxu1 %v3713_v10  ;;  %9947 = vpow2.f32 %v3542_v20  ;;  %v3546_v35 = vmul.f32 1.442695, %v12998_v27  ;;  %v3447_v0 = vpop.f32.mrb[80].mxu1  ;;  %v8714_v36 = vadd.f32 -1.0, %v9942_v43  ;;  %v9944_v18 = vpop.eup %9943  ;;  %vm3500_vm14 = vcmp.gt.f32.partialorder %v12998_v27, 0.0 }
 0x550   : > { %4110 = vmatmul.mubr.bf16.gmra.mrb[68].mxu0 %v3712_v22  ;;  %4223 = vmatmul.mubr.bf16.gmra.mrb[100].mxu1 %v3712_v22  ;;  %9949 = vpow2.f32 %v3544_v62  ;;  %v3548_v56 = vmul.f32 1.442695, %v13002_v17  ;;  %v13013_v24 = vadd.f32 %v3447_v0, %v12923_v34  ;;  %v3449_v38 = vpop.f32.mrb[81].mxu1  ;;  %v9946_v52 = vpop.eup %9945  ;;  %v3622_v42 = vmul.f32 1.6732632, %v8713_v8 }
 0x551   : > { %6078 = vmatpush1.bf16.msra.mxu0 %v9617_v41  ;;  %9951 = vpow2.f32 %v3546_v35  ;;  %v13019_v48 = vadd.f32 %v3449_v38, %v12926_v60  ;;  %v3451_v54 = vpop.f32.mrb[82].mxu1  ;;  %v8715_v16 = vadd.f32 -1.0, %v9944_v18  ;;  %v3623_v10 = vmul.f32 1.6732632, %v8714_v36 }
 0x552   : > { %6079 = vmatprep.subr.bf16.mxu0 %v9622_v44  ;;  %9953 = vpow2.f32 %v3548_v56  ;;  %v3550_v51 = vmul.f32 1.442695, %v13013_v24  ;;  %v13026_v26 = vadd.f32 %v3451_v54, %v12923_v34  ;;  %v3453_v21 = vpop.f32.mrb[83].mxu1  ;;  %v8716_v22 = vadd.f32 -1.0, %v9946_v52  ;;  %v9637_v52 = vld [vmem:[%s16212_s14 + $0x84] ss:$8 sps:$4 sm:$0xff]  }
 0x553   : > { %v3552_v32 = vmul.f32 1.442695, %v13019_v48  ;;  %v3624_v5 = vmul.f32 1.6732632, %v8715_v16  ;;  %v13037_v44 = vadd.f32 %v3453_v21, %v12926_v60  ;;  %v3654_v0 = vsel %vm3494_vm8, %v12952_v28, %v3622_v42 }
 0x554   : > { %9955 = vpow2.f32 %v3550_v51  ;;  %v3554_v41 = vmul.f32 1.442695, %v13026_v26  ;;  %v3625_v58 = vmul.f32 1.6732632, %v8716_v22  ;;  %v3655_v43 = vsel %vm3495_vm9, %v12959_v57, %v3623_v10 }
 0x555   : > { %6080 = vmatpush1.bf16.msra.mxu0 %v9620_v12  ;;  %9957 = vpow2.f32 %v3552_v32  ;;  %v3656_v54 = vsel %vm3496_vm10, %v12974_v46, %v3624_v5  ;;  %vm3501_vm15 = vcmp.gt.f32.partialorder %v13002_v17, 0.0  ;;  %vm3502_vm0 = vcmp.gt.f32.partialorder %v13013_v24, 0.0 }
 0x556   : > { %6081 = vmatprep.subr.bf16.mxu0 %v9625_v13  ;;  %9959 = vpow2.f32 %v3554_v41  ;;  %v3556_v13 = vmul.f32 1.442695, %v13037_v44  ;;  %v3688_v42 = vmul.f32 1.050701, %v3656_v54  ;;  %v3686_v22 = vmul.f32 1.050701, %v3654_v0 }
 0x557   : > { %v3687_v41 = vmul.f32 1.050701, %v3655_v43  ;;  %vm3503_vm1 = vcmp.gt.f32.partialorder %v13019_v48, 0.0  ;;  %vm3504_vm2 = vcmp.gt.f32.partialorder %v13026_v26, 0.0  ;;  %vm3505_vm3 = vcmp.gt.f32.partialorder %v13037_v44, 0.0 }
 0x558   : > { %v3457_v62 = vpop.f32.mrb[84].mxu1  ;;  %9961 = vpow2.f32 %v3556_v13 }
 0x559   : > { %6082 = vmatpush1.bf16.msra.mxu0 %v9623_v47  ;;  %v9948_v20 = vpop.eup %9947  ;;  %v3459_v53 = vpop.f32.mrb[85].mxu1  ;;  %v13051_v8 = vadd.f32 %v3457_v62, %v12923_v34  ;;  %v9634_v47 = vld [vmem:[%s16212_s14 + $0x74] ss:$8 sps:$4 sm:$0xff]  }
 0x55a   : > { %6083 = vmatprep.subr.bf16.mxu0 %v9628_v7  ;;  %v9950_v12 = vpop.eup %9949  ;;  %v8717_v35 = vadd.f32 -1.0, %v9948_v20  ;;  %v3461_v38 = vpop.f32.mrb[86].mxu1  ;;  %v3657_v7 = vsel %vm3497_vm11, %v12977_v50, %v3625_v58  ;;  %v13064_v46 = vadd.f32 %v3459_v53, %v12926_v60 }
 0x55b   : > { %v9952_v56 = vpop.eup %9951  ;;  %v8718_v28 = vadd.f32 -1.0, %v9950_v12  ;;  %v3463_v57 = vpop.f32.mrb[87].mxu1  ;;  %v3558_v32 = vmul.f32 1.442695, %v13051_v8  ;;  %v13067_v50 = vadd.f32 %v3461_v38, %v12923_v34  ;;  %v3689_v16 = vmul.f32 1.050701, %v3657_v7 }
 0x55c   : > { %v9954_v36 = vpop.eup %9953  ;;  %v3626_v51 = vmul.f32 1.6732632, %v8717_v35  ;;  %v8719_v21 = vadd.f32 -1.0, %v9952_v56  ;;  %v3560_v5 = vmul.f32 1.442695, %v13064_v46  ;;  %v13086_v38 = vadd.f32 %v3463_v57, %v12926_v60 }
 0x55d   : > { %6084 = vmatpush1.bf16.msra.mxu0 %v9626_v14  ;;  %v8720_v18 = vadd.f32 -1.0, %v9954_v36  ;;  %v9632_v14 = vld [vmem:[%s16212_s14 + $0x70] ss:$8 sps:$4 sm:$0xff]   ;;  %9963 = vpow2.f32 %v3558_v32  ;;  %v3627_v58 = vmul.f32 1.6732632, %v8718_v28  ;;  %v3714_v36 = vpack.c.bf16 %v3688_v42, %v3686_v22 }
 0x55e   : > { %6085 = vmatprep.subr.bf16.mxu0 %v9631_v63  ;;  %v9956_v10 = vpop.eup %9955  ;;  %v3628_v62 = vmul.f32 1.6732632, %v8719_v21  ;;  %9965 = vpow2.f32 %v3560_v5  ;;  %v3562_v56 = vmul.f32 1.442695, %v13067_v50  ;;  %v9640_v57 = vld [vmem:[%s16212_s14 + $0x94] ss:$8 sps:$4 sm:$0xff]  }
 0x55f   : > { %v3629_v63 = vmul.f32 1.6732632, %v8720_v18  ;;  %v9958_v20 = vpop.eup %9957  ;;  %v8721_v12 = vadd.f32 -1.0, %v9956_v10  ;;  %v3659_v21 = vsel %vm3499_vm13, %v12994_v19, %v3627_v58  ;;  %vm3506_vm4 = vcmp.gt.f32.partialorder %v13051_v8, 0.0  ;;  %v9643_v10 = vld [vmem:[%s16212_s14 + $0xa4] ss:$8 sps:$4 sm:$0xff]  }
 0x560   : > { %v3467_v35 = vpop.f32.mrb[88].mxu1  ;;  %v8722_v53 = vadd.f32 -1.0, %v9958_v20  ;;  %v9960_v43 = vpop.eup %9959  ;;  %9967 = vpow2.f32 %v3562_v56  ;;  %v3660_v18 = vsel %vm3500_vm14, %v12998_v27, %v3628_v62  ;;  %v3564_v32 = vmul.f32 1.442695, %v13086_v38 }
 0x561   : > { %6086 = vmatpush1.bf16.msra.mxu0 %v9629_v9  ;;  %v3658_v9 = vsel %vm3498_vm12, %v12988_v59, %v3626_v51  ;;  %v3661_v13 = vsel %vm3501_vm15, %v13002_v17, %v3629_v63  ;;  %v3469_v0 = vpop.f32.mrb[89].mxu1  ;;  %v3630_v59 = vmul.f32 1.6732632, %v8721_v12  ;;  %v9635_v17 = vld [vmem:[%s16212_s14 + $0x80] ss:$8 sps:$4 sm:$0xff]   ;;  %v8723_v7 = vadd.f32 -1.0, %v9960_v43 }
 0x562   : > { %6087 = vmatprep.subr.bf16.mxu0 %v9634_v47  ;;  %v3715_v47 = vpack.c.bf16 %v3689_v16, %v3687_v41  ;;  %v3471_v54 = vpop.f32.mrb[90].mxu1  ;;  %v13093_v28 = vadd.f32 %v3467_v35, %v12923_v34  ;;  %v9962_v42 = vpop.eup %9961  ;;  %v3690_v16 = vmul.f32 1.050701, %v3658_v9  ;;  %v3693_v19 = vmul.f32 1.050701, %v3661_v13 }
 0x563   : > { %v3473_v51 = vpop.f32.mrb[91].mxu1  ;;  %v3662_v27 = vsel %vm3502_vm0, %v13013_v24, %v3630_v59  ;;  %v3631_v63 = vmul.f32 1.6732632, %v8722_v53  ;;  %v3632_v22 = vmul.f32 1.6732632, %v8723_v7  ;;  %v8724_v41 = vadd.f32 -1.0, %v9962_v42 }
 0x564   : > { %4119 = vmatprep.mubr.bf16.mxu0 %v3715_v47  ;;  %4232 = vmatprep.mubr.bf16.mxu1 %v3715_v47  ;;  %9969 = vpow2.f32 %v3564_v32  ;;  %v3566_v5 = vmul.f32 1.442695, %v13093_v28  ;;  %v3691_v20 = vmul.f32 1.050701, %v3659_v21  ;;  %v3692_v9 = vmul.f32 1.050701, %v3660_v18 }
 0x565   : > { %6088 = vmatpush1.bf16.msra.mxu0 %v9632_v14  ;;  %v13107_v14 = vadd.f32 %v3469_v0, %v12926_v60  ;;  %4233 = vmatmul.mubr.bf16.gmra.mrb[104].mxu1 %v3714_v36  ;;  %v13121_v62 = vadd.f32 %v3471_v54, %v12923_v34  ;;  %v3633_v12 = vmul.f32 1.6732632, %v8724_v41  ;;  %vm3507_vm5 = vcmp.gt.f32.partialorder %v13064_v46, 0.0  ;;  %v9641_v7 = vld [vmem:[%s16212_s14 + $0xa0] ss:$8 sps:$4 sm:$0xff]  }
 0x566   : > { %6089 = vmatprep.subr.bf16.mxu0 %v9637_v52  ;;  %v9638_v52 = vld [vmem:[%s16212_s14 + $0x90] ss:$8 sps:$4 sm:$0xff]   ;;  %4120 = vmatmul.mubr.bf16.gmra.mrb[72].mxu0 %v3714_v36  ;;  %9971 = vpow2.f32 %v3566_v5  ;;  %v13125_v35 = vadd.f32 %v3473_v51, %v12926_v60  ;;  %v3694_v53 = vmul.f32 1.050701, %v3662_v27  ;;  %v3663_v59 = vsel %vm3503_vm1, %v13019_v48, %v3631_v63 }
 0x567   : > { %v3568_v58 = vmul.f32 1.442695, %v13107_v14  ;;  %v9964_v24 = vpop.eup %9963  ;;  %v3570_v0 = vmul.f32 1.442695, %v13121_v62  ;;  %v3664_v47 = vsel %vm3504_vm2, %v13026_v26, %v3632_v22  ;;  %v3717_v54 = vpack.c.bf16 %v3693_v19, %v3691_v20  ;;  %v9646_v26 = vld [vmem:[%s16212_s14 + $0xb4] ss:$8 sps:$4 sm:$0xff]  }
 0x568   : > { %v3477_v13 = vpop.f32.mrb[92].mxu1  ;;  %v8725_v56 = vadd.f32 -1.0, %v9964_v24  ;;  %v3572_v36 = vmul.f32 1.442695, %v13125_v35  ;;  %v9966_v51 = vpop.eup %9965  ;;  %v3716_v48 = vpack.c.bf16 %v3692_v9, %v3690_v16  ;;  %v3696_v19 = vmul.f32 1.050701, %v3664_v47 }
 0x569   : > { %6090 = vmatpush1.bf16.msra.mxu0 %v9635_v17  ;;  %9973 = vpow2.f32 %v3568_v58  ;;  %v3479_v43 = vpop.f32.mrb[93].mxu1  ;;  %v8726_v32 = vadd.f32 -1.0, %v9966_v51  ;;  %4129 = vmatprep.mubr.bf16.mxu0 %v3717_v54  ;;  %v9649_v22 = vld [vmem:[%s16212_s14 + $0xc4] ss:$8 sps:$4 sm:$0xff]   ;;  %vm3508_vm6 = vcmp.gt.f32.partialorder %v13067_v50, 0.0  ;;  %vm3509_vm7 = vcmp.gt.f32.partialorder %v13086_v38, 0.0 }
 0x56a   : > { %6091 = vmatprep.subr.bf16.mxu0 %v9640_v57  ;;  %v3481_v17 = vpop.f32.mrb[94].mxu1  ;;  %v3665_v57 = vsel %vm3505_vm3, %v13037_v44, %v3633_v12  ;;  %v3634_v21 = vmul.f32 1.6732632, %v8725_v56  ;;  %9975 = vpow2.f32 %v3570_v0  ;;  %4242 = vmatprep.mubr.bf16.mxu1 %v3717_v54  ;;  %v13148_v42 = vadd.f32 %v3479_v43, %v12926_v60  ;;  %v9968_v44 = vpop.eup %9967  ;;  %v9647_v54 = vld [vmem:[%s16212_s14 + $0xc0] ss:$8 sps:$4 sm:$0xff]  }
 0x56b   : > { %v3483_v18 = vpop.f32.mrb[95].mxu1  ;;  %9977 = vpow2.f32 %v3572_v36  ;;  %v13154_v27 = vadd.f32 %v3481_v17, %v12923_v34  ;;  %v3697_v41 = vmul.f32 1.050701, %v3665_v57  ;;  %v3635_v5 = vmul.f32 1.6732632, %v8726_v32 }
 0x56c   : > { %v3666_v16 = vsel %vm3506_vm4, %v13051_v8, %v3634_v21  ;;  %v13157_v63 = vadd.f32 %v3483_v18, %v12926_v60  ;;  %v8727_v8 = vadd.f32 -1.0, %v9968_v44  ;;  %v3695_v20 = vmul.f32 1.050701, %v3663_v59 }
 0x56d   : > { %6092 = vmatpush1.bf16.msra.mxu0 %v9638_v52  ;;  %v13145_v52 = vadd.f32 %v3477_v13, %v12923_v34  ;;  %4243 = vmatmul.mubr.bf16.gmra.mrb[108].mxu1 %v3716_v48  ;;  %v3576_v60 = vmul.f32 1.442695, %v13148_v42  ;;  %v3698_v58 = vmul.f32 1.050701, %v3666_v16  ;;  %v3578_v12 = vmul.f32 1.442695, %v13154_v27 }
 0x56e   : > { %6093 = vmatprep.subr.bf16.mxu0 %v9643_v10  ;;  %4130 = vmatmul.mubr.bf16.gmra.mrb[76].mxu0 %v3716_v48  ;;  %v9644_v10 = vld [vmem:[%s16212_s14 + $0xb0] ss:$8 sps:$4 sm:$0xff]   ;;  %v9970_v9 = vpop.eup %9969  ;;  %v3636_v24 = vmul.f32 1.6732632, %v8727_v8  ;;  %v3667_v13 = vsel %vm3507_vm5, %v13064_v46, %v3635_v5  ;;  %v3580_v0 = vmul.f32 1.442695, %v13157_v63  ;;  %v3719_v47 = vpack.c.bf16 %v3697_v41, %v3695_v20 }
 0x56f   : > { %v3574_v34 = vmul.f32 1.442695, %v13145_v52  ;;  %v8728_v56 = vadd.f32 -1.0, %v9970_v9  ;;  %v3718_v36 = vpack.c.bf16 %v3696_v19, %v3694_v53  ;;  %v9652_v46 = vld [vmem:[%s16212_s14 + $0xd4] ss:$8 sps:$4 sm:$0xff]   ;;  %vm3510_vm8 = vcmp.gt.f32.partialorder %v13093_v28, 0.0 }
 0x570   : > { %v9972_v43 = vpop.eup %9971  ;;  %v3668_v59 = vsel %vm3508_vm6, %v13067_v50, %v3636_v24  ;;  %4139 = vmatprep.mubr.bf16.mxu0 %v3719_v47  ;;  %4252 = vmatprep.mubr.bf16.mxu1 %v3719_v47  ;;  %v3699_v21 = vmul.f32 1.050701, %v3667_v13  ;;  %vm3511_vm9 = vcmp.gt.f32.partialorder %v13107_v14, 0.0  ;;  %v9655_v8 = vld [vmem:[%s16212_s14 + $0xe4] ss:$8 sps:$4 sm:$0xff]   ;;  %vm3512_vm10 = vcmp.gt.f32.partialorder %v13121_v62, 0.0 }
 0x571   : > { %6094 = vmatpush1.bf16.msra.mxu0 %v9641_v7  ;;  %9979 = vpow2.f32 %v3574_v34  ;;  %v3700_v7 = vmul.f32 1.050701, %v3668_v59  ;;  %v3637_v51 = vmul.f32 1.6732632, %v8728_v56  ;;  %v8729_v57 = vadd.f32 -1.0, %v9972_v43 }
 0x572   : > { %6095 = vmatprep.subr.bf16.mxu0 %v9646_v26  ;;  %9981 = vpow2.f32 %v3576_v60  ;;  %vm3513_vm11 = vcmp.gt.f32.partialorder %v13125_v35, 0.0  ;;  %v9658_v47 = vld [vmem:[%s16212_s14 + $0xf4] ss:$8 sps:$4 sm:$0xff]   ;;  %vm3514_vm12 = vcmp.gt.f32.partialorder %v13145_v52, 0.0  ;;  %vm3515_vm13 = vcmp.gt.f32.partialorder %v13148_v42, 0.0 }
 0x573   : > { %v9974_v17 = vpop.eup %9973  ;;  %9983 = vpow2.f32 %v3578_v12  ;;  %v3669_v48 = vsel %vm3509_vm7, %v13086_v38, %v3637_v51  ;;  %v3638_v18 = vmul.f32 1.6732632, %v8729_v57  ;;  %v3720_v26 = vpack.c.bf16 %v3700_v7, %v3698_v58  ;;  %v9653_v12 = vld [vmem:[%s16212_s14 + $0xe0] ss:$8 sps:$4 sm:$0xff]   ;;  %v9656_v51 = vld [vmem:[%s16212_s14 + $0xf0] ss:$8 sps:$4 sm:$0xff]  }
 0x574   : > { %v8730_v50 = vadd.f32 -1.0, %v9974_v17  ;;  %9985 = vpow2.f32 %v3580_v0  ;;  %v9976_v53 = vpop.eup %9975  ;;  %v3701_v44 = vmul.f32 1.050701, %v3669_v48  ;;  %vm3516_vm14 = vcmp.gt.f32.partialorder %v13154_v27, 0.0 }
 0x575   : > { %6096 = vmatpush1.bf16.msra.mxu0 %v9644_v10  ;;  %4253 = vmatmul.mubr.bf16.gmra.mrb[112].mxu1 %v3718_v36  ;;  %v9978_v32 = vpop.eup %9977  ;;  %v8731_v16 = vadd.f32 -1.0, %v9976_v53  ;;  %v3670_v41 = vsel %vm3510_vm8, %v13093_v28, %v3638_v18  ;;  %vm3517_vm15 = vcmp.gt.f32.partialorder %v13157_v63, 0.0 }
 0x576   : > { %6097 = vmatprep.subr.bf16.mxu0 %v9649_v22  ;;  %4140 = vmatmul.mubr.bf16.gmra.mrb[80].mxu0 %v3718_v36  ;;  %v3639_v19 = vmul.f32 1.6732632, %v8730_v50  ;;  %v8732_v10 = vadd.f32 -1.0, %v9978_v32  ;;  %v9650_v22 = vld [vmem:[%s16212_s14 + $0xd0] ss:$8 sps:$4 sm:$0xff]   ;;  %v3721_v5 = vpack.c.bf16 %v3701_v44, %v3699_v21 }
 0x577   : > { %v3640_v38 = vmul.f32 1.6732632, %v8731_v16  ;;  %v3702_v9 = vmul.f32 1.050701, %v3670_v41  ;;  %v9662_v16 = vld [vmem:[%s12917_s24 + $0x14] ss:$8 sps:$4 sm:$0xff]  }
 0x578   : > { %v3671_v20 = vsel %vm3511_vm9, %v13107_v14, %v3639_v19  ;;  %v3641_v34 = vmul.f32 1.6732632, %v8732_v10  ;;  %4149 = vmatprep.mubr.bf16.mxu0 %v3721_v5  ;;  %4262 = vmatprep.mubr.bf16.mxu1 %v3721_v5  ;;  %v9664_v10 = vld [vmem:[%s12917_s24 + $0x10] ss:$8 sps:$4 sm:$0xff]   ;;  %v9667_v41 = vld [vmem:[%s12917_s24 + $0x20] ss:$8 sps:$4 sm:$0xff]  }
 0x579   : > { %6098 = vmatpush1.bf16.msra.mxu0 %v9647_v54  ;;  %v3672_v60 = vsel %vm3512_vm10, %v13121_v62, %v3640_v38  ;;  %v3703_v13 = vmul.f32 1.050701, %v3671_v20  ;;  %v9668_v38 = vld [vmem:[%s12917_s24 + $0x34] ss:$8 sps:$4 sm:$0xff]   ;;  %v9670_v5 = vld [vmem:[%s12917_s24 + $0x30] ss:$8 sps:$4 sm:$0xff]  }
 0x57a   : > { %6099 = vmatprep.subr.bf16.mxu0 %v9652_v46  ;;  %v3704_v58 = vmul.f32 1.050701, %v3672_v60  ;;  %v3673_v24 = vsel %vm3513_vm11, %v13125_v35, %v3641_v34  ;;  %v9673_v20 = vld [vmem:[%s12917_s24 + $0x40] ss:$8 sps:$4 sm:$0xff]   ;;  %v9674_v34 = vld [vmem:[%s12917_s24 + $0x54] ss:$8 sps:$4 sm:$0xff]  }
 0x57b   : > { %v9980_v28 = vpop.eup %9979  ;;  %v3705_v56 = vmul.f32 1.050701, %v3673_v24  ;;  %v9676_v60 = vld [vmem:[%s12917_s24 + $0x50] ss:$8 sps:$4 sm:$0xff]  }
 0x57c   : > { %v9982_v14 = vpop.eup %9981  ;;  %v8733_v0 = vadd.f32 -1.0, %v9980_v28  ;;  %v3722_v59 = vpack.c.bf16 %v3704_v58, %v3702_v9  ;;  %v9677_v28 = vld [vmem:[%s12917_s24 + $0x64] ss:$8 sps:$4 sm:$0xff]   ;;  %v9679_v9 = vld [vmem:[%s12917_s24 + $0x60] ss:$8 sps:$4 sm:$0xff]  }
 0x57d   : > { %6100 = vmatpush1.bf16.msra.mxu0 %v9650_v22  ;;  %v9984_v62 = vpop.eup %9983  ;;  %v8734_v43 = vadd.f32 -1.0, %v9982_v14  ;;  %4263 = vmatmul.mubr.bf16.gmra.mrb[116].mxu1 %v3720_v26  ;;  %v3723_v46 = vpack.c.bf16 %v3705_v56, %v3703_v13  ;;  %v9665_v22 = vld [vmem:[%s12917_s24 + $0x24] ss:$8 sps:$4 sm:$0xff]   ;;  %v9680_v58 = vld [vmem:[%s12917_s24 + $0x74] ss:$8 sps:$4 sm:$0xff]  }
 0x57e   : > { %6101 = vmatprep.subr.bf16.mxu0 %v9655_v8  ;;  %4150 = vmatmul.mubr.bf16.gmra.mrb[84].mxu0 %v3720_v26  ;;  %v9986_v35 = vpop.eup %9985  ;;  %v3642_v36 = vmul.f32 1.6732632, %v8733_v0  ;;  %v8735_v54 = vadd.f32 -1.0, %v9984_v62  ;;  %v9671_v8 = vld [vmem:[%s12917_s24 + $0x44] ss:$8 sps:$4 sm:$0xff]  }
 0x57f   : > { %v3643_v17 = vmul.f32 1.6732632, %v8734_v43  ;;  %v8736_v7 = vadd.f32 -1.0, %v9986_v35  ;;  %4159 = vmatprep.mubr.bf16.mxu0 %v3723_v46  ;;  %4272 = vmatprep.mubr.bf16.mxu1 %v3723_v46  ;;  %v9682_v24 = vld [vmem:[%s12917_s24 + $0x70] ss:$8 sps:$4 sm:$0xff]  }
 0x580   : > { %v3674_v57 = vsel %vm3514_vm12, %v13145_v52, %v3642_v36  ;;  %v3644_v50 = vmul.f32 1.6732632, %v8735_v54  ;;  %v10986_v54 = vld [vmem:[%s11311_s28 + $0x60] sm:$0xff]  ;;  %v11013_v36 = vld [vmem:[%s11311_s28 + $0x10] sm:$0xff] }
 0x581   : > { %6102 = vmatpush1.bf16.msra.mxu0 %v9653_v12  ;;  %v3675_v53 = vsel %vm3515_vm13, %v13148_v42, %v3643_v17  ;;  %v3645_v21 = vmul.f32 1.6732632, %v8736_v7  ;;  %v3706_v18 = vmul.f32 1.050701, %v3674_v57  ;;  %v13290_v46 = vadd.f32 1e-12, %v10986_v54 }
 0x582   : > { %6103 = vmatprep.subr.bf16.mxu0 %v9658_v47  ;;  %v3676_v48 = vsel %vm3516_vm14, %v13154_v27, %v3644_v50  ;;  %v3707_v32 = vmul.f32 1.050701, %v3675_v53  ;;  %v9661_v27 = vld [vmem:[%s12917_s24 + $0x4] ss:$8 sps:$4 sm:$0xff]  }
 0x583   : > { %v3708_v26 = vmul.f32 1.050701, %v3676_v48  ;;  %v3677_v52 = vsel %vm3517_vm15, %v13157_v63, %v3645_v21  ;;  %v9659_v63 = vld [vmem:[%s12917_s24] ss:$8 sps:$4 sm:$0xff]   ;;  %s13436_s24 = scalar_lea.vmem [#allocation3], %s13404_s26  ;;  %s16144_s26 = scalar_lea.hbm %s16218_s20, %s9115_s30 }
 0x584   : > { %v3709_v44 = vmul.f32 1.050701, %v3677_v52  ;;  %v10987_v57 = vld [vmem:[%s11311_s28 + $0x88] sm:$0xff]  ;;  %s8304_s0 = sshll.u32 %s13436_s24, 4  ;;  %s16146_s0 = int_to_ptr.vmem [resolvable:$true] %s8304_s0 }
 0x585   : > { %6104 = vmatpush1.bf16.msra.mxu0 %v9656_v51  ;;  %4273 = vmatmul.mubr.bf16.gmra.mrb[120].mxu1 %v3722_v59  ;;  %v3724_v42 = vpack.c.bf16 %v3708_v26, %v3706_v18  ;;  %v13294_v50 = vadd.f32 1e-12, %v10987_v57  ;;  %v10988_v26 = vld [vmem:[%s11311_s28 + $0xa8] sm:$0xff]  ;;  %s11043_s25 = scalar_lea.vmem %s16146_s0, 8192 }
 0x586   : > { %4160 = vmatmul.mubr.bf16.gmra.mrb[88].mxu0 %v3722_v59  ;;  %v3725_v19 = vpack.c.bf16 %v3709_v44, %v3707_v32  ;;  %v13299_v52 = vadd.f32 1e-12, %v10988_v26  ;;  %v10989_v32 = vld [vmem:[%s11311_s28 + $0x80] sm:$0xff]  ;;  %p11044_p11 = scmp.ne.s32.totalorder %s16146_s0, %s11043_s25 }
 0x587   : > { %16346 = vst [vmem:[#allocation16_spill] sm:$0xff] %v13294_v50  ;;  %v13302_v44 = vadd.f32 1e-12, %v10989_v32  ;;  %v10994_v26 = vld [vmem:[%s11311_s28 + $0xe0] sm:$0xff] }
 0x588   : > { %4169 = vmatprep.mubr.bf16.mxu0 %v3725_v19  ;;  %4282 = vmatprep.mubr.bf16.mxu1 %v3725_v19  ;;  %16347 = vst [vmem:[#allocation17_spill] sm:$0xff] %v13299_v52  ;;  %v13329_v32 = vadd.f32 1e-12, %v10994_v26  ;;  %p11045_p12 = pnand %p11044_p11, %p11261_p5 }
 0x589   : > { %16348 = vst [vmem:[#allocation18_spill] sm:$0xff] %v13302_v44 }
 0x58a   : > { %16353 = vst [vmem:[#allocation23_spill] sm:$0xff] %v13329_v32  ;;  %p11046_p13 = pneg %p11045_p12 }
 0x58d   : > { %4283 = vmatmul.mubr.bf16.gmra.mrb[124].mxu1 %v3724_v42 }
 0x58e   : > { %4170 = vmatmul.mubr.bf16.gmra.mrb[92].mxu0 %v3724_v42 }
 0x58f   : > { %6105 = vmatprep.mubr.bf16.mxu0 %v9661_v27 }
 0x596   : > { %6106 = vmatmul.mubr.bf16.vlgmr.msra.gmra.mrb[96].mxu0 %v9659_v63 }
 0x597   : > { %6115 = vmatprep.mubr.bf16.mxu0 %v9662_v16 }
 0x59e   : > { %6116 = vmatmul.mubr.bf16.gmra.mrb[100].mxu0 %v9664_v10 }
 0x59f   : > { %6125 = vmatprep.mubr.bf16.mxu0 %v9665_v22 }
 0x5a6   : > { %6126 = vmatmul.mubr.bf16.gmra.mrb[104].mxu0 %v9667_v41 }
 0x5a7   : > { %6135 = vmatprep.mubr.bf16.mxu0 %v9668_v38 }
 0x5ae   : > { %6136 = vmatmul.mubr.bf16.gmra.mrb[108].mxu0 %v9670_v5 }
 0x5af   : > { %6145 = vmatprep.mubr.bf16.mxu0 %v9671_v8 }
 0x5b6   : > { %6146 = vmatmul.mubr.bf16.gmra.mrb[112].mxu0 %v9673_v20 }
 0x5b7   : > { %6155 = vmatprep.mubr.bf16.mxu0 %v9674_v34 }
 0x5be   : > { %6156 = vmatmul.mubr.bf16.gmra.mrb[116].mxu0 %v9676_v60 }
 0x5bf   : > { %6165 = vmatprep.mubr.bf16.mxu0 %v9677_v28  ;;  %v13433_v28 = vadd.f32 1e-12, %v11013_v36 }
 0x5c6   : > { %6166 = vmatmul.mubr.bf16.gmra.mrb[120].mxu0 %v9679_v9  ;;  %v10990_v9 = vld [vmem:[%s11311_s28 + $0xa0] sm:$0xff] }
 0x5c7   : > { %6175 = vmatprep.mubr.bf16.mxu0 %v9680_v58  ;;  %v13312_v58 = vadd.f32 1e-12, %v10990_v9  ;;  %v10996_v9 = vld [vmem:[%s11311_s28 + $0x128] sm:$0xff] }
 0x5c9   : > { %16349 = vst [vmem:[#allocation19_spill] sm:$0xff] %v13312_v58 }
 0x5ce   : > { %6176 = vmatmul.mubr.bf16.gmra.mrb[124].mxu0 %v9682_v24 }
 0x5cf   : > { %6185 = vmatprep.mubr.bf16.mxu0 %v12398_v39  ;;  %v10979_v39 = vld [vmem:[%s11311_s28 + $0x8] sm:$0xff] }
 0x5d6   : > { %6186 = vmatmul.mubr.bf16.gmra.mrb[128].mxu0 %v12396_v37  ;;  %v3737_v37 = vsub.s32 2, %v11636_v3 }
 0x5d7   : > { %6195 = vmatprep.mubr.bf16.mxu0 %v12408_v25  ;;  %v2661_v25 = vld [vmem:[%s16211_s13] sm:$0xf] }
 0x5d8   : > { %v13274_v14 = vrot.slane %v2661_v25, %v11639_v4  ;;  %v13276_v13 = vrot.slane %v2661_v25, %v3737_v37  ;;  %v13279_v56 = vrot.slane %v2661_v25, %v11645_v6  ;;  %v11009_v37 = vld [vmem:[%s11311_s28 + $0x1c0] sm:$0xff] }
 0x5de   : > { %6196 = vmatmul.mubr.bf16.gmra.mrb[132].mxu0 %v12406_v30  ;;  %v13249_v30 = vadd.f32 1e-12, %v10979_v39  ;;  %v11008_v39 = vld [vmem:[%s11311_s28 + $0x1e8] sm:$0xff] }
 0x5df   : > { %6205 = vmatprep.mubr.bf16.mxu0 %v12418_v55  ;;  %v10980_v55 = vld [vmem:[%s11311_s28 + $0x28] sm:$0xff] }
 0x5e6   : > { %6206 = vmatmul.mubr.bf16.gmra.mrb[136].mxu0 %v12416_v11  ;;  %v3741_v11 = vsub.s32 3, %v11636_v3 }
 0x5e7   : > { %6215 = vmatprep.mubr.bf16.mxu0 %v12428_v29  ;;  %v10981_v29 = vld [vmem:[%s11311_s28] sm:$0xff] }
 0x5e8   : > { %v13281_v0 = vrot.slane %v2661_v25, %v3741_v11  ;;  %v11011_v11 = vld [vmem:[%s11311_s28 + $0x18] sm:$0xff] }
 0x5ee   : > { %6216 = vmatmul.mubr.bf16.gmra.mrb[140].mxu0 %v12426_v15  ;;  %v13256_v15 = vadd.f32 1e-12, %v10980_v55  ;;  %v10991_v55 = vld [vmem:[%s11311_s28 + $0xc8] sm:$0xff] }
 0x5ef   : > { %6225 = vmatprep.mubr.bf16.mxu0 %v12438_v40  ;;  %v10982_v40 = vld [vmem:[%s11311_s28 + $0x20] sm:$0xff] }
 0x5f6   : > { %6226 = vmatmul.mubr.bf16.gmra.mrb[144].mxu0 %v12436_v23  ;;  %v13259_v23 = vadd.f32 1e-12, %v10981_v29  ;;  %v13318_v29 = vadd.f32 1e-12, %v10991_v55  ;;  %v11005_v55 = vld [vmem:[%s11311_s28 + $0x180] sm:$0xff] }
 0x5f7   : > { %6235 = vmatprep.mubr.bf16.mxu0 %v12448_v33  ;;  %v10983_v33 = vld [vmem:[%s11311_s28 + $0x48] sm:$0xff] }
 0x5f8   : > { %16350 = vst [vmem:[#allocation20_spill] sm:$0xff] %v13318_v29 }
 0x5fe   : > { %6236 = vmatmul.mubr.bf16.gmra.mrb[148].mxu0 %v12446_v31  ;;  %v13262_v31 = vadd.f32 1e-12, %v10982_v40 }
 0x5ff   : > { %6245 = vmatprep.mubr.bf16.mxu0 %v12458_v45  ;;  %v10984_v45 = vld [vmem:[%s11311_s28 + $0x68] sm:$0xff] }
 0x606   : > { %6246 = vmatmul.mubr.bf16.gmra.mrb[152].mxu0 %v12456_v61  ;;  %v13265_v61 = vadd.f32 1e-12, %v10983_v33  ;;  %v10992_v33 = vld [vmem:[%s11311_s28 + $0xe8] sm:$0xff] }
 0x607   : > { %6255 = vmatprep.mubr.bf16.mxu0 %v12468_v1  ;;  %v10985_v1 = vld [vmem:[%s11311_s28 + $0x40] sm:$0xff] }
 0x608   : > { %v13271_v12 = vadd.f32 1e-12, %v10985_v1 }
 0x60e   : > { %6256 = vmatmul.mubr.bf16.gmra.mrb[156].mxu0 %v12466_v49  ;;  %v13268_v49 = vadd.f32 1e-12, %v10984_v45  ;;  %v13321_v45 = vadd.f32 1e-12, %v10992_v33  ;;  %v10997_v33 = vld [vmem:[%s11311_s28 + $0x100] sm:$0xff] }
 0x610   : > { %16345 = vst [vmem:[#allocation15_spill] sm:$0xff] %v13268_v49  ;;  %16351 = vst [vmem:[#allocation21_spill] sm:$0xff] %v13321_v45 }
 0x61b   : > { %v4101_v17 = vpop.f32.mrb[64].mxu0  ;;  %v4214_v7 = vpop.f32.mrb[96].mxu1 }
 0x61c   : > { %v4102_v53 = vadd.f32 %v4101_v17, %v13274_v14  ;;  %v4215_v21 = vadd.f32 %v4214_v7, %v13276_v13  ;;  %v4103_v48 = vpop.f32.mrb[65].mxu0  ;;  %v4216_v18 = vpop.f32.mrb[97].mxu1  ;;  %v10993_v7 = vld [vmem:[%s11311_s28 + $0xc0] sm:$0xff] }
 0x61d   : > { %v4104_v42 = vadd.f32 %v4103_v48, %v13279_v56  ;;  %v4217_v19 = vadd.f32 %v4216_v18, %v13281_v0  ;;  %v4105_v27 = vpop.f32.mrb[66].mxu0  ;;  %v4218_v63 = vpop.f32.mrb[98].mxu1  ;;  %v13324_v57 = vadd.f32 1e-12, %v10993_v7 }
 0x61e   : > { %v8801_v16 = vmul.f32 -1.442695, %v4102_v53  ;;  %v8803_v10 = vmul.f32 -1.442695, %v4215_v21  ;;  %v4106_v22 = vadd.f32 %v4105_v27, %v13274_v14  ;;  %v4219_v41 = vadd.f32 %v4218_v63, %v13276_v13  ;;  %v4107_v38 = vpop.f32.mrb[67].mxu0  ;;  %v4220_v5 = vpop.f32.mrb[99].mxu1 }
 0x61f   : > { %v8802_v8 = vmul.f32 -1.442695, %v4104_v42  ;;  %v8804_v20 = vmul.f32 -1.442695, %v4217_v19  ;;  %v4108_v34 = vadd.f32 %v4107_v38, %v13279_v56  ;;  %v4221_v60 = vadd.f32 %v4220_v5, %v13281_v0  ;;  %16352 = vst [vmem:[#allocation22_spill] sm:$0xff] %v13324_v57 }
 0x620   : > { %9987 = vpow2.f32 %v8801_v16  ;;  %v8805_v24 = vmul.f32 -1.442695, %v4106_v22  ;;  %v8807_v25 = vmul.f32 -1.442695, %v4219_v41 }
 0x621   : > { %9989 = vpow2.f32 %v8803_v10  ;;  %v8806_v40 = vmul.f32 -1.442695, %v4108_v34  ;;  %v8808_v1 = vmul.f32 -1.442695, %v4221_v60  ;;  %v10995_v34 = vld [vmem:[%s11311_s28 + $0x108] sm:$0xff] }
 0x622   : > { %9991 = vpow2.f32 %v8802_v8  ;;  %v13342_v60 = vadd.f32 1e-12, %v10995_v34 }
 0x623   : > { %9993 = vpow2.f32 %v8804_v20  ;;  %v4111_v54 = vpop.f32.mrb[68].mxu0  ;;  %v4224_v17 = vpop.f32.mrb[100].mxu1 }
 0x624   : > { %9995 = vpow2.f32 %v8805_v24  ;;  %v4112_v53 = vadd.f32 %v4111_v54, %v13274_v14  ;;  %v4225_v21 = vadd.f32 %v4224_v17, %v13276_v13  ;;  %v4113_v48 = vpop.f32.mrb[69].mxu0  ;;  %v4226_v18 = vpop.f32.mrb[101].mxu1  ;;  %16354 = vst [vmem:[#allocation24_spill] sm:$0xff] %v13342_v60  ;;  %v13345_v24 = vadd.f32 1e-12, %v10996_v9  ;;  %v11006_v17 = vld [vmem:[%s11311_s28 + $0x1a0] sm:$0xff] }
 0x625   : > { %9997 = vpow2.f32 %v8807_v25  ;;  %v4114_v42 = vadd.f32 %v4113_v48, %v13279_v56  ;;  %v4227_v19 = vadd.f32 %v4226_v18, %v13281_v0  ;;  %v4115_v27 = vpop.f32.mrb[70].mxu0  ;;  %v13333_v63 = vpop.f32.mrb[102].mxu1  ;;  %v13350_v54 = vadd.f32 1e-12, %v10997_v33  ;;  %v10999_v18 = vld [vmem:[%s11311_s28 + $0x148] sm:$0xff]  ;;  %v11001_v33 = vld [vmem:[%s11311_s28 + $0x140] sm:$0xff] }
 0x626   : > { %9999 = vpow2.f32 %v8806_v40  ;;  %v8809_v16 = vmul.f32 -1.442695, %v4112_v53  ;;  %v8811_v10 = vmul.f32 -1.442695, %v4225_v21  ;;  %v4116_v22 = vadd.f32 %v4115_v27, %v13274_v14  ;;  %v13336_v41 = vpop.f32.mrb[71].mxu0  ;;  %v13338_v38 = vpop.f32.mrb[103].mxu1 }
 0x627   : > { %10001 = vpow2.f32 %v8808_v1  ;;  %v8810_v8 = vmul.f32 -1.442695, %v4114_v42  ;;  %v8812_v20 = vmul.f32 -1.442695, %v4227_v19  ;;  %16355 = vst [vmem:[#allocation25_spill] sm:$0xff] %v13345_v24  ;;  %16356 = vst [vmem:[#allocation26_spill] sm:$0xff] %v13350_v54 }
 0x628   : > { %10003 = vpow2.f32 %v8809_v16  ;;  %v8813_v25 = vmul.f32 -1.442695, %v4116_v22  ;;  %v10998_v53 = vld [vmem:[%s11311_s28 + $0x120] sm:$0xff]  ;;  %v13358_v26 = vadd.f32 1e-12, %v10999_v18  ;;  %v11000_v42 = vld [vmem:[%s11311_s28 + $0x168] sm:$0xff] }
 0x629   : > { %10005 = vpow2.f32 %v8811_v10  ;;  %v13355_v21 = vadd.f32 1e-12, %v10998_v53  ;;  %v13361_v19 = vadd.f32 1e-12, %v11000_v42  ;;  %v13367_v53 = vadd.f32 1e-12, %v11001_v33 }
 0x62a   : > { %v9988_v1 = vpop.eup %9987  ;;  %10007 = vpow2.f32 %v8810_v8  ;;  %16358 = vst [vmem:[#allocation28_spill] sm:$0xff] %v13358_v26  ;;  %v9683_v33 = vld [vmem:[%s16214_s16] ss:$8 sps:$4 sm:$0xff]   ;;  %v13391_v22 = vadd.f32 1e-12, %v11006_v17  ;;  %v4118_v17 = vadd.f32 %v13336_v41, %v13279_v56 }
 0x62b   : > { %16357 = vst [vmem:[#allocation27_spill] sm:$0xff] %v13355_v21  ;;  %v9990_v48 = vpop.eup %9989  ;;  %16359 = vst [vmem:[#allocation29_spill] sm:$0xff] %v13361_v19  ;;  %v4485_v27 = vadd.f32 1.0, %v9988_v1  ;;  %10009 = vpow2.f32 %v8812_v20  ;;  %v9685_v20 = vld [vmem:[%s16214_s16 + $0x4] ss:$8 sps:$4 sm:$0xff]  }
 0x62c   : > { %v9992_v16 = vpop.eup %9991  ;;  %v4487_v34 = vadd.f32 1.0, %v9990_v48  ;;  %10011 = vpow2.f32 %v8813_v25  ;;  %16360 = vst [vmem:[#allocation30_spill] sm:$0xff] %v13367_v53  ;;  %v13374_v48 = vadd.f32 1e-12, %v11002_v2  ;;  %6950 = vmatprep.subr.bf16.mxu1 %v9685_v20  ;;  %v11003_v2 = vld [vmem:[%s11311_s28 + $0x188] sm:$0xff]  ;;  %16365 = vst [vmem:[#allocation35_spill] sm:$0xff] %v13391_v22 }
 0x62d   : > { %v9994_v9 = vpop.eup %9993  ;;  %10013 = vrcp.f32 %v4485_v27  ;;  %v4486_v18 = vadd.f32 1.0, %v9992_v16  ;;  %v13382_v8 = vadd.f32 1e-12, %v11003_v2  ;;  %6951 = vmatpush1.bf16.msra.mxu1 %v9683_v33  ;;  %v13388_v16 = vadd.f32 1e-12, %v11005_v55 }
 0x62e   : > { %v9996_v1 = vpop.eup %9995  ;;  %16361 = vst [vmem:[#allocation31_spill] sm:$0xff] %v13374_v48  ;;  %10015 = vrcp.f32 %v4487_v34  ;;  %v4488_v25 = vadd.f32 1.0, %v9994_v9  ;;  %v11004_v34 = vld [vmem:[%s11311_s28 + $0x1a8] sm:$0xff]  ;;  %v8814_v41 = vmul.f32 -1.442695, %v4118_v17  ;;  %v11015_v48 = vld [vmem:[%s11311_s28 + $0x50] sm:$0xff] }
 0x62f   : > { %v9998_v27 = vpop.eup %9997  ;;  %10017 = vrcp.f32 %v4486_v18  ;;  %v4489_v10 = vadd.f32 1.0, %v9996_v1  ;;  %16362 = vst [vmem:[#allocation32_spill] sm:$0xff] %v13382_v8  ;;  %v13385_v9 = vadd.f32 1e-12, %v11004_v34  ;;  %16364 = vst [vmem:[#allocation34_spill] sm:$0xff] %v13388_v16 }
 0x630   : > { %v10000_v42 = vpop.eup %9999  ;;  %10019 = vrcp.f32 %v4488_v25  ;;  %v4491_v40 = vadd.f32 1.0, %v9998_v27  ;;  %v4229_v25 = vadd.f32 %v13333_v63, %v13276_v13  ;;  %v9688_v63 = vld [vmem:[%s16214_s16 + $0x14] ss:$8 sps:$4 sm:$0xff]   ;;  %v13487_v26 = vadd.f32 1e-12, %v11015_v48 }
 0x631   : > { %16363 = vst [vmem:[#allocation33_spill] sm:$0xff] %v13385_v9  ;;  %v10002_v7 = vpop.eup %10001  ;;  %10021 = vrcp.f32 %v4489_v10  ;;  %v4490_v18 = vadd.f32 1.0, %v10000_v42  ;;  %v9686_v42 = vld [vmem:[%s16214_s16 + $0x10] ss:$8 sps:$4 sm:$0xff]   ;;  %6952 = vmatprep.subr.bf16.mxu1 %v9688_v63 }
 0x632   : > { %v10004_v20 = vpop.eup %10003  ;;  %10023 = vrcp.f32 %v4491_v40  ;;  %v4492_v2 = vadd.f32 1.0, %v10002_v7  ;;  %v8815_v1 = vmul.f32 -1.442695, %v4229_v25  ;;  %6953 = vmatpush1.bf16.msra.mxu1 %v9686_v42 }
 0x633   : > { %v10006_v33 = vpop.eup %10005  ;;  %10025 = vrcp.f32 %v4490_v18  ;;  %v4493_v55 = vadd.f32 1.0, %v10004_v20 }
 0x634   : > { %v10008_v34 = vpop.eup %10007  ;;  %10027 = vrcp.f32 %v4492_v2  ;;  %v4495_v40 = vadd.f32 1.0, %v10006_v33  ;;  %v11007_v2 = vld [vmem:[%s11311_s28 + $0x1c8] sm:$0xff] }
 0x635   : > { %v10010_v7 = vpop.eup %10009  ;;  %10029 = vrcp.f32 %v4493_v55  ;;  %v4494_v20 = vadd.f32 1.0, %v10008_v34  ;;  %v13415_v33 = vadd.f32 1e-12, %v11007_v2  ;;  %v13418_v55 = vadd.f32 1e-12, %v11008_v39 }
 0x636   : > { %v10012_v10 = vpop.eup %10011  ;;  %10031 = vrcp.f32 %v4495_v40  ;;  %v4496_v27 = vadd.f32 1.0, %v10010_v7  ;;  %v13421_v2 = vadd.f32 1e-12, %v11009_v37  ;;  %v11010_v40 = vld [vmem:[%s11311_s28 + $0x1e0] sm:$0xff]  ;;  %v13427_v39 = vadd.f32 1e-12, %v11011_v11 }
 0x637   : > { %16366 = vst [vmem:[#allocation36_spill] sm:$0xff] %v13415_v33  ;;  %v10014_v18 = vpop.eup %10013  ;;  %16367 = vst [vmem:[#allocation37_spill] sm:$0xff] %v13418_v55  ;;  %10033 = vrcp.f32 %v4494_v20  ;;  %v4497_v34 = vadd.f32 1.0, %v10012_v10  ;;  %v13424_v7 = vadd.f32 1e-12, %v11010_v40  ;;  %v11012_v20 = vld [vmem:[%s11311_s28 + $0x38] sm:$0xff] }
 0x638   : > { %v10016_v5 = vpop.eup %10015  ;;  %16368 = vst [vmem:[#allocation38_spill] sm:$0xff] %v13421_v2  ;;  %v4677_v25 = vadd.f32 1e-12, %v10014_v18  ;;  %10035 = vrcp.f32 %v4496_v27  ;;  %v13430_v10 = vadd.f32 1e-12, %v11012_v20  ;;  %v11014_v18 = vld [vmem:[%s11311_s28 + $0x30] sm:$0xff] }
 0x639   : > { %16369 = vst [vmem:[#allocation39_spill] sm:$0xff] %v13424_v7  ;;  %v10018_v63 = vpop.eup %10017  ;;  %v4679_v17 = vadd.f32 1e-12, %v10016_v5  ;;  %10037 = vrcp.f32 %v4497_v34  ;;  %v13440_v40 = vadd.f32 1e-12, %v11014_v18  ;;  %v13444_v43 = vpop.f32.mrb[72].mxu0 }
 0x63a   : > { %v10020_v42 = vpop.eup %10019  ;;  %4741 = vst [vmem:[%s13436_s24] sm:$0xff] %v4677_v25  ;;  %v4805_v37 = vadd.f32 1e-12, %v4677_v25  ;;  %v4678_v27 = vadd.f32 1e-12, %v10018_v63  ;;  %10039 = vpow2.f32 %v8815_v1  ;;  %v13447_v47 = vpop.f32.mrb[104].mxu1 }
 0x63b   : > { %v10022_v11 = vpop.eup %10021  ;;  %4743 = vst [vmem:[%s13436_s24 + $0x10] sm:$0xff] %v4679_v17  ;;  %v4807_v5 = vadd.f32 1e-12, %v4679_v17  ;;  %v4680_v34 = vadd.f32 1e-12, %v10020_v42  ;;  %10041 = vpow2.f32 %v8814_v41 }
 0x63c   : > { %v10024_v36 = vpop.eup %10023  ;;  %10043 = vlog2.f32 %v4805_v37  ;;  %v5125_v20 = vsub.f32 1.0, %v4805_v37  ;;  %4742 = vst [vmem:[%s13436_s24 + $0x8] sm:$0xff] %v4678_v27  ;;  %v4806_v35 = vadd.f32 1e-12, %v4678_v27  ;;  %v4681_v51 = vadd.f32 1e-12, %v10022_v11 }
 0x63d   : > { %v10026_v25 = vpop.eup %10025  ;;  %10045 = vlog2.f32 %v4807_v5  ;;  %v5127_v1 = vsub.f32 1.0, %v4807_v5  ;;  %4744 = vst [vmem:[%s13436_s24 + $0x18] sm:$0xff] %v4680_v34  ;;  %v4808_v63 = vadd.f32 1e-12, %v4680_v34  ;;  %v4683_v18 = vadd.f32 1e-12, %v10024_v36 }
 0x63e   : > { %v10028_v17 = vpop.eup %10027  ;;  %10047 = vlog2.f32 %v5125_v20  ;;  %v5126_v41 = vsub.f32 1.0, %v4806_v35  ;;  %4745 = vst [vmem:[%s13436_s24 + $0x20] sm:$0xff] %v4681_v51  ;;  %v4809_v42 = vadd.f32 1e-12, %v4681_v51  ;;  %v4682_v37 = vadd.f32 1e-12, %v10026_v25 }
 0x63f   : > { %v13450_v27 = vpop.f32.mrb[73].mxu0  ;;  %v10030_v11 = vpop.eup %10029  ;;  %10049 = vlog2.f32 %v5127_v1  ;;  %v5128_v62 = vsub.f32 1.0, %v4808_v63  ;;  %4747 = vst [vmem:[%s13436_s24 + $0x30] sm:$0xff] %v4683_v18  ;;  %v4811_v5 = vadd.f32 1e-12, %v4683_v18 }
 0x640   : > { %v4684_v59 = vadd.f32 1e-12, %v10028_v17  ;;  %v13453_v34 = vpop.f32.mrb[105].mxu1  ;;  %v10032_v36 = vpop.eup %10031  ;;  %10051 = vlog2.f32 %v4806_v35  ;;  %4746 = vst [vmem:[%s13436_s24 + $0x28] sm:$0xff] %v4682_v37  ;;  %v13457_v20 = vadd.f32 1e-12, %v4682_v37 }
 0x641   : > { %v4685_v51 = vadd.f32 1e-12, %v10030_v11  ;;  %v13459_v25 = vpop.f32.mrb[74].mxu0  ;;  %v10034_v9 = vpop.eup %10033  ;;  %10053 = vlog2.f32 %v5126_v41  ;;  %v5129_v1 = vsub.f32 1.0, %v4809_v42  ;;  %v4687_v17 = vadd.f32 1e-12, %v10032_v36 }
 0x642   : > { %4748 = vst [vmem:[%s13436_s24 + $0x38] sm:$0xff] %v4684_v59  ;;  %v13462_v18 = vadd.f32 1e-12, %v4684_v59  ;;  %v13464_v22 = vpop.f32.mrb[106].mxu1  ;;  %v10036_v8 = vpop.eup %10035  ;;  %10055 = vlog2.f32 %v4808_v63  ;;  %v4686_v37 = vadd.f32 1e-12, %v10034_v9 }
 0x643   : > { %4749 = vst [vmem:[%s13436_s24 + $0x40] sm:$0xff] %v4685_v51  ;;  %v13468_v35 = vadd.f32 1e-12, %v4685_v51  ;;  %v13470_v11 = vpop.f32.mrb[75].mxu0  ;;  %v10038_v41 = vpop.eup %10037  ;;  %10057 = vlog2.f32 %v5128_v62  ;;  %v5131_v6 = vsub.f32 1.0, %v4811_v5  ;;  %4751 = vst [vmem:[%s13436_s24 + $0x50] sm:$0xff] %v4687_v17 }
 0x644   : > { %v13473_v59 = vadd.f32 1e-12, %v4687_v17  ;;  %v4688_v36 = vadd.f32 1e-12, %v10036_v8  ;;  %v13475_v16 = vpop.f32.mrb[107].mxu1  ;;  %v10040_v3 = vpop.eup %10039  ;;  %10059 = vlog2.f32 %v4809_v42  ;;  %4750 = vst [vmem:[%s13436_s24 + $0x48] sm:$0xff] %v4686_v37  ;;  %v13501_v17 = vadd.f32 %v13338_v38, %v13281_v0 }
 0x645   : > { %v13479_v51 = vadd.f32 1e-12, %v4686_v37  ;;  %v4689_v9 = vadd.f32 1e-12, %v10038_v41  ;;  %v13481_v19 = vpop.f32.mrb[76].mxu0  ;;  %v13483_v62 = vpop.eup %10041  ;;  %10061 = vlog2.f32 %v5129_v1  ;;  %v5130_v8 = vsub.f32 1.0, %v13457_v20 }
 0x646   : > { %4752 = vst [vmem:[%s13436_s24 + $0x58] sm:$0xff] %v4688_v36  ;;  %v13491_v63 = vpop.f32.mrb[108].mxu1  ;;  %v13493_v42 = vpop.f32.mrb[77].mxu0  ;;  %10063 = vlog2.f32 %v4811_v5  ;;  %v5132_v41 = vsub.f32 1.0, %v13462_v18  ;;  %v13496_v53 = vadd.f32 1e-12, %v4688_v36 }
 0x647   : > { %v10044_v37 = vpop.eup %10043  ;;  %4753 = vst [vmem:[%s13436_s24 + $0x60] sm:$0xff] %v4689_v9  ;;  %v13503_v48 = vpop.f32.mrb[109].mxu1  ;;  %10065 = vlog2.f32 %v5131_v6  ;;  %v5133_v21 = vsub.f32 1.0, %v13468_v35  ;;  %v13515_v32 = vadd.f32 1.0, %v10040_v3  ;;  %v13519_v7 = vadd.f32 1e-12, %v4689_v9 }
 0x648   : > { %v13505_v1 = vpop.f32.mrb[78].mxu0  ;;  %v10046_v4 = vpop.eup %10045  ;;  %v4934_v24 = vmul.f32 0.6931472, %v10044_v37  ;;  %10067 = vlog2.f32 %v13457_v20 }
 0x649   : > { %v13509_v60 = vpop.f32.mrb[110].mxu1  ;;  %v13511_v36 = vpop.f32.mrb[79].mxu0  ;;  %v4938_v45 = vmul.f32 0.6931472, %v10046_v4  ;;  %10069 = vlog2.f32 %v5130_v8  ;;  %v16375_v8 = vsub.f32 1.0, %v13259_v23 }
 0x64a   : > { %16370 = vst [vmem:[#allocation40_spill] sm:$0xff] %v13509_v60  ;;  %16371 = vst [vmem:[#allocation41_spill] sm:$0xff] %v13511_v36  ;;  %v10048_v54 = vpop.eup %10047  ;;  %v13517_v29 = vpop.f32.mrb[111].mxu1  ;;  %v5061_v6 = vmax.f32 %v4934_v24, -100.0  ;;  %10071 = vlog2.f32 %v13462_v18  ;;  %v16385_v36 = vsub.f32 1.0, %v13262_v31 }
 0x64b   : > { %16372 = vst [vmem:[#allocation42_spill] sm:$0xff] %v13517_v29  ;;  %v10050_v37 = vpop.eup %10049  ;;  %v5190_v57 = vmul.f32 0.6931472, %v10048_v54  ;;  %v5063_v2 = vmax.f32 %v4938_v45, -100.0  ;;  %10073 = vlog2.f32 %v5132_v41  ;;  %v13526_v9 = vpop.f32.mrb[80].mxu0 }
 0x64c   : > { %v10052_v5 = vpop.eup %10051  ;;  %v5194_v52 = vmul.f32 0.6931472, %v10050_v37  ;;  %v5381_v3 = vmul.f32 %v5061_v6, %v13259_v23  ;;  %10075 = vlog2.f32 %v13468_v35  ;;  %16373 = vst [vmem:[#allocation43_spill] sm:$0xff] %v13526_v9  ;;  %v13528_v45 = vpop.f32.mrb[112].mxu1 }
 0x64d   : > { %v10054_v20 = vpop.eup %10053  ;;  %v5317_v58 = vmax.f32 %v5190_v57, -100.0  ;;  %v4936_v38 = vmul.f32 0.6931472, %v10052_v5  ;;  %v5383_v24 = vmul.f32 %v5063_v2, %v13433_v28  ;;  %16374 = vst [vmem:[#allocation44_spill] sm:$0xff] %v13528_v45  ;;  %10077 = vlog2.f32 %v5133_v21  ;;  %v13532_v5 = vpop.f32.mrb[81].mxu0 }
 0x64e   : > { %v10056_v50 = vpop.eup %10055  ;;  %v5319_v44 = vmax.f32 %v5194_v52, -100.0  ;;  %v5192_v54 = vmul.f32 0.6931472, %v10054_v20  ;;  %16376 = vst [vmem:[#allocation45_spill] sm:$0xff] %v13532_v5  ;;  %v13534_v41 = vpop.f32.mrb[113].mxu1  ;;  %v16378_v2 = vsub.f32 1.0, %v13433_v28  ;;  %10079 = vlog2.f32 %v13473_v59 }
 0x64f   : > { %v10058_v18 = vpop.eup %10057  ;;  %v5509_v37 = vmul.f32 %v16375_v8, %v5317_v58  ;;  %v5062_v57 = vmax.f32 %v4936_v38, -100.0  ;;  %v4940_v4 = vmul.f32 0.6931472, %v10056_v50  ;;  %16377 = vst [vmem:[#allocation46_spill] sm:$0xff] %v13534_v41  ;;  %v13539_v45 = vpop.f32.mrb[82].mxu0 }
 0x650   : > { %v10060_v52 = vpop.eup %10059  ;;  %v5511_v6 = vmul.f32 %v16378_v2, %v5319_v44  ;;  %v5318_v35 = vmax.f32 %v5192_v54, -100.0  ;;  %v5196_v20 = vmul.f32 0.6931472, %v10058_v18  ;;  %16379 = vst [vmem:[#allocation47_spill] sm:$0xff] %v13539_v45  ;;  %v13541_v9 = vpop.f32.mrb[114].mxu1  ;;  %v16383_v54 = vsub.f32 1.0, %v13249_v30 }
 0x651   : > { %16380 = vst [vmem:[#allocation48_spill] sm:$0xff] %v13541_v9  ;;  %v10062_v23 = vpop.eup %10061  ;;  %v5573_v58 = vadd.f32 %v5509_v37, %v5381_v3  ;;  %v5382_v50 = vmul.f32 %v5062_v57, %v13249_v30  ;;  %v5064_v21 = vmax.f32 %v4940_v4, -100.0  ;;  %v4942_v38 = vmul.f32 0.6931472, %v10060_v52  ;;  %v13544_v8 = vpop.f32.mrb[83].mxu0 }
 0x652   : > { %16381 = vst [vmem:[#allocation49_spill] sm:$0xff] %v13544_v8  ;;  %v13546_v41 = vpop.f32.mrb[115].mxu1  ;;  %v10064_v28 = vpop.eup %10063  ;;  %v5575_v44 = vadd.f32 %v5511_v6, %v5383_v24  ;;  %v5510_v18 = vmul.f32 %v16383_v54, %v5318_v35  ;;  %v5320_v2 = vmax.f32 %v5196_v20, -100.0  ;;  %v5198_v5 = vmul.f32 0.6931472, %v10062_v23 }
 0x653   : > { %16382 = vst [vmem:[#allocation50_spill] sm:$0xff] %v13546_v41  ;;  %v9689_v9 = vld [vmem:[%s16214_s16 + $0x20] ss:$8 sps:$4 sm:$0xff]   ;;  %v10066_v3 = vpop.eup %10065  ;;  %v5637_v37 = vsub.f32 0.0, %v5573_v58  ;;  %v5384_v4 = vmul.f32 %v5064_v21, %v13427_v39  ;;  %v5065_v57 = vmax.f32 %v4942_v38, -100.0  ;;  %v16384_v35 = vsub.f32 1.0, %v13427_v39 }
 0x654   : > { %v4946_v52 = vmul.f32 0.6931472, %v10064_v28  ;;  %v9691_v41 = vld [vmem:[%s16214_s16 + $0x24] ss:$8 sps:$4 sm:$0xff]   ;;  %v10068_v24 = vpop.eup %10067  ;;  %v5639_v6 = vsub.f32 0.0, %v5575_v44  ;;  %v5574_v30 = vadd.f32 %v5510_v18, %v5382_v50  ;;  %v5321_v23 = vmax.f32 %v5198_v5, -100.0 }
 0x655   : > { %v5512_v20 = vmul.f32 %v16384_v35, %v5320_v2  ;;  %v10070_v54 = vpop.eup %10069  ;;  %v5385_v8 = vmul.f32 %v5065_v57, %v13262_v31  ;;  %v5202_v58 = vmul.f32 0.6931472, %v10066_v3  ;;  %v4944_v29 = vmul.f32 0.6931472, %v10068_v24  ;;  %6954 = vmatprep.subr.bf16.mxu1 %v9691_v41  ;;  %v13562_v50 = vpop.f32.mrb[84].mxu0 }
 0x656   : > { %v5067_v45 = vmax.f32 %v4946_v52, -100.0  ;;  %v10072_v21 = vpop.eup %10071  ;;  %v5638_v38 = vsub.f32 0.0, %v5574_v30  ;;  %v5513_v60 = vmul.f32 %v16385_v36, %v5321_v23  ;;  %v5200_v49 = vmul.f32 0.6931472, %v10070_v54  ;;  %6955 = vmatpush1.bf16.msra.mxu1 %v9689_v9 }
 0x657   : > { %v5576_v28 = vadd.f32 %v5512_v20, %v5384_v4  ;;  %v10074_v39 = vpop.eup %10073  ;;  %v5323_v44 = vmax.f32 %v5202_v58, -100.0  ;;  %v5066_v18 = vmax.f32 %v4944_v29, -100.0  ;;  %v4948_v2 = vmul.f32 0.6931472, %v10072_v21 }
 0x658   : > { %v5387_v5 = vmul.f32 %v5067_v45, %v13440_v40  ;;  %v10076_v57 = vpop.eup %10075  ;;  %v5701_v3 = vadd.f32 %v5638_v38, %v5637_v37  ;;  %v5577_v41 = vadd.f32 %v5513_v60, %v5385_v8  ;;  %v5322_v24 = vmax.f32 %v5200_v49, -100.0 }
 0x659   : > { %v5640_v52 = vsub.f32 0.0, %v5576_v28  ;;  %v10078_v30 = vpop.eup %10077  ;;  %v16386_v4 = vsub.f32 1.0, %v13440_v40  ;;  %v5386_v36 = vmul.f32 %v5066_v18, %v13256_v15  ;;  %v5068_v9 = vmax.f32 %v4948_v2, -100.0 }
 0x65a   : > { %v5204_v35 = vmul.f32 0.6931472, %v10074_v39  ;;  %v10080_v20 = vpop.eup %10079  ;;  %v5702_v23 = vadd.f32 %v5701_v3, %v5639_v6  ;;  %v5641_v54 = vsub.f32 0.0, %v5577_v41  ;;  %v16387_v45 = vsub.f32 1.0, %v13256_v15 }
 0x65b   : > { %v5515_v31 = vmul.f32 %v16386_v4, %v5323_v44  ;;  %v4950_v58 = vmul.f32 0.6931472, %v10076_v57  ;;  %v5388_v60 = vmul.f32 %v5068_v9, %v13430_v10  ;;  %v5206_v49 = vmul.f32 0.6931472, %v10078_v30 }
 0x65c   : > { %v5514_v29 = vmul.f32 %v16387_v45, %v5322_v24  ;;  %v5324_v37 = vmax.f32 %v5204_v35, -100.0  ;;  %v5703_v8 = vadd.f32 %v5702_v23, %v5640_v52  ;;  %v4954_v28 = vmul.f32 0.6931472, %v10080_v20 }
 0x65d   : > { %v5579_v21 = vadd.f32 %v5515_v31, %v5387_v5  ;;  %v5069_v40 = vmax.f32 %v4950_v58, -100.0  ;;  %v16388_v44 = vsub.f32 1.0, %v13430_v10  ;;  %v5325_v39 = vmax.f32 %v5206_v49, -100.0 }
 0x65e   : > { %v5578_v38 = vadd.f32 %v5514_v29, %v5386_v36  ;;  %v16389_v6 = vsub.f32 1.0, %v13473_v59  ;;  %v4122_v15 = vadd.f32 %v13444_v43, %v13274_v14  ;;  %v5704_v2 = vadd.f32 %v5703_v8, %v5641_v54 }
 0x65f   : > { %v5516_v18 = vmul.f32 %v16388_v44, %v5324_v37  ;;  %v5389_v57 = vmul.f32 %v5069_v40, %v13271_v12  ;;  %v5071_v3 = vmax.f32 %v4954_v28, -100.0  ;;  %v16390_v52 = vsub.f32 1.0, %v13271_v12  ;;  %v11017_v40 = vld [vmem:[%s11311_s28 + $0x78] sm:$0xff] }
 0x660   : > { %10081 = vlog2.f32 %v16389_v6  ;;  %v5642_v5 = vsub.f32 0.0, %v5578_v38  ;;  %v5137_v10 = vsub.f32 1.0, %v13519_v7  ;;  %v5643_v30 = vsub.f32 0.0, %v5579_v21 }
 0x661   : > { %v5580_v41 = vadd.f32 %v5516_v18, %v5388_v60  ;;  %v5517_v24 = vmul.f32 %v16390_v52, %v5325_v39  ;;  %10083 = vlog2.f32 %v13479_v51  ;;  %v13583_v59 = vmul.f32 %v5071_v3, %v13487_v26  ;;  %v13619_v39 = vpop.f32.mrb[116].mxu1 }
 0x662   : > { %v5705_v4 = vadd.f32 %v5704_v2, %v5642_v5  ;;  %v16391_v43 = vsub.f32 1.0, %v13479_v51  ;;  %v4498_v36 = vadd.f32 1.0, %v13483_v62  ;;  %v4235_v12 = vadd.f32 %v13447_v47, %v13276_v13  ;;  %v11018_v5 = vld [vmem:[%s11311_s28 + $0x70] sm:$0xff] }
 0x663   : > { %v5581_v31 = vadd.f32 %v5517_v24, %v5389_v57  ;;  %v5644_v35 = vsub.f32 0.0, %v5580_v41  ;;  %v16392_v20 = vsub.f32 1.0, %v13496_v53  ;;  %v4124_v23 = vadd.f32 %v13450_v27, %v13279_v56  ;;  %v11016_v27 = vld [vmem:[%s11311_s28 + $0x58] sm:$0xff] }
 0x664   : > { %10085 = vlog2.f32 %v16391_v43  ;;  %v5706_v9 = vadd.f32 %v5705_v4, %v5643_v30  ;;  %v8816_v51 = vmul.f32 -1.442695, %v13501_v17  ;;  %v8817_v54 = vmul.f32 -1.442695, %v4122_v15 }
 0x665   : > { %10087 = vlog2.f32 %v13496_v53  ;;  %v4237_v62 = vadd.f32 %v13453_v34, %v13281_v0  ;;  %v5645_v29 = vsub.f32 0.0, %v5581_v31  ;;  %v4126_v47 = vadd.f32 %v13459_v25, %v13274_v14 }
 0x666   : > { %10089 = vlog2.f32 %v16392_v20  ;;  %v5707_v45 = vadd.f32 %v5706_v9, %v5644_v35  ;;  %v8819_v58 = vmul.f32 -1.442695, %v4235_v12  ;;  %v13606_v17 = vadd.f32 1e-12, %v11016_v27 }
 0x667   : > { %10091 = vlog2.f32 %v13519_v7  ;;  %v4239_v7 = vadd.f32 %v13464_v22, %v13276_v13  ;;  %v8818_v34 = vmul.f32 -1.442695, %v4124_v23  ;;  %v8820_v25 = vmul.f32 -1.442695, %v4237_v62 }
 0x668   : > { %10093 = vlog2.f32 %v5137_v10  ;;  %v13608_v21 = vadd.f32 %v5707_v45, %v5645_v29  ;;  %v5455_v49 = vsub.f32 1.0, %v13487_v26  ;;  %v8821_v22 = vmul.f32 -1.442695, %v4126_v47 }
 0x669   : > { %10095 = vrcp.f32 %v13515_v32  ;;  %v4128_v32 = vadd.f32 %v13470_v11, %v13279_v56  ;;  %v13615_v28 = vadd.f32 1e-12, %v11017_v40  ;;  %v8823_v44 = vmul.f32 -1.442695, %v4239_v7 }
 0x66a   : > { %10097 = vrcp.f32 %v4498_v36  ;;  %v10082_v37 = vpop.eup %10081  ;;  %v4241_v18 = vadd.f32 %v13475_v16, %v13281_v0  ;;  %v5456_v11 = vsub.f32 1.0, %v13606_v17  ;;  %v13623_v57 = vadd.f32 1e-12, %v11018_v5  ;;  %v13625_v36 = vpop.f32.mrb[85].mxu0 }
 0x66b   : > { %10099 = vpow2.f32 %v8816_v51  ;;  %v5210_v8 = vmul.f32 0.6931472, %v10082_v37  ;;  %v10084_v38 = vpop.eup %10083  ;;  %v8822_v41 = vmul.f32 -1.442695, %v4128_v32  ;;  %v9694_v51 = vld [vmem:[%s16214_s16 + $0x34] ss:$8 sps:$4 sm:$0xff]  }
 0x66c   : > { %10101 = vpow2.f32 %v8817_v54  ;;  %v4952_v26 = vmul.f32 0.6931472, %v10084_v38  ;;  %v8824_v31 = vmul.f32 -1.442695, %v4241_v18  ;;  %v16393_v62 = vsub.f32 1.0, %v13265_v61  ;;  %6956 = vmatprep.subr.bf16.mxu1 %v9694_v51  ;;  %v13641_v38 = vpop.f32.mrb[86].mxu0 }
 0x66d   : > { %10103 = vpow2.f32 %v8819_v58  ;;  %v5327_v15 = vmax.f32 %v5210_v8, -100.0  ;;  %v13634_v58 = vpop.f32.mrb[117].mxu1  ;;  %v5460_v27 = vsub.f32 1.0, %v13615_v28  ;;  %v13657_v51 = vpop.f32.mrb[87].mxu0 }
 0x66e   : > { %v10086_v6 = vpop.eup %10085  ;;  %10105 = vpow2.f32 %v8818_v34  ;;  %v5070_v10 = vmax.f32 %v4952_v26, -100.0 }
 0x66f   : > { %v10088_v2 = vpop.eup %10087  ;;  %v5208_v3 = vmul.f32 0.6931472, %v10086_v6  ;;  %10107 = vpow2.f32 %v8820_v25  ;;  %v5519_v24 = vmul.f32 %v5455_v49, %v5327_v15 }
 0x670   : > { %v10090_v52 = vpop.eup %10089  ;;  %v4956_v30 = vmul.f32 0.6931472, %v10088_v2  ;;  %10109 = vpow2.f32 %v8821_v22  ;;  %v5390_v35 = vmul.f32 %v5070_v10, %v13265_v61  ;;  %v16394_v2 = vsub.f32 1.0, %v13290_v46 }
 0x671   : > { %v10092_v16 = vpop.eup %10091  ;;  %v5326_v4 = vmax.f32 %v5208_v3, -100.0  ;;  %v5212_v43 = vmul.f32 0.6931472, %v10090_v52  ;;  %10111 = vpow2.f32 %v8823_v44  ;;  %v5583_v9 = vadd.f32 %v5519_v24, %v13583_v59  ;;  %v9692_v59 = vld [vmem:[%s16214_s16 + $0x30] ss:$8 sps:$4 sm:$0xff]  }
 0x672   : > { %v10094_v12 = vpop.eup %10093  ;;  %v5072_v20 = vmax.f32 %v4956_v30, -100.0  ;;  %v4958_v23 = vmul.f32 0.6931472, %v10092_v16  ;;  %10113 = vpow2.f32 %v8822_v41  ;;  %6957 = vmatpush1.bf16.msra.mxu1 %v9692_v59  ;;  %v11019_v41 = vld [vmem:[%s11311_s28 + $0x98] sm:$0xff]  ;;  %v13651_v30 = vpop.f32.mrb[118].mxu1  ;;  %v4132_v59 = vadd.f32 %v13481_v19, %v13274_v14 }
 0x673   : > { %v10096_v54 = vpop.eup %10095  ;;  %v5518_v45 = vmul.f32 %v16393_v62, %v5326_v4  ;;  %v5328_v29 = vmax.f32 %v5212_v43, -100.0  ;;  %v5214_v47 = vmul.f32 0.6931472, %v10094_v12  ;;  %10115 = vpow2.f32 %v8824_v31  ;;  %v11020_v12 = vld [vmem:[%s11311_s28 + $0xb8] sm:$0xff] }
 0x674   : > { %v10098_v7 = vpop.eup %10097  ;;  %v5392_v34 = vmul.f32 %v5072_v20, %v13606_v17  ;;  %v5073_v37 = vmax.f32 %v4958_v23, -100.0  ;;  %v4691_v25 = vadd.f32 1e-12, %v10096_v54  ;;  %v13649_v52 = vadd.f32 1e-12, %v11019_v41 }
 0x675   : > { %v10100_v61 = vpop.eup %10099  ;;  %v5582_v32 = vadd.f32 %v5518_v45, %v5390_v35  ;;  %v5520_v49 = vmul.f32 %v5456_v11, %v5328_v29  ;;  %v5329_v8 = vmax.f32 %v5214_v47, -100.0  ;;  %v4690_v22 = vadd.f32 1e-12, %v10098_v7  ;;  %v13659_v29 = vpop.f32.mrb[119].mxu1 }
 0x676   : > { %v10102_v40 = vpop.eup %10101  ;;  %v5393_v44 = vmul.f32 %v5073_v37, %v13290_v46  ;;  %4755 = vst [vmem:[%s13436_s24 + $0x70] sm:$0xff] %v4691_v25  ;;  %v4819_v18 = vadd.f32 1e-12, %v4691_v25  ;;  %v4500_v6 = vadd.f32 1.0, %v10100_v61  ;;  %v5647_v24 = vsub.f32 0.0, %v5583_v9  ;;  %v11021_v61 = vld [vmem:[%s11311_s28 + $0x90] sm:$0xff] }
 0x677   : > { %v10104_v17 = vpop.eup %10103  ;;  %v5646_v15 = vsub.f32 0.0, %v5582_v32  ;;  %v5584_v26 = vadd.f32 %v5520_v49, %v5392_v34  ;;  %v5521_v5 = vmul.f32 %v16394_v2, %v5329_v8  ;;  %4754 = vst [vmem:[%s13436_s24 + $0x68] sm:$0xff] %v4690_v22  ;;  %v4818_v11 = vadd.f32 1e-12, %v4690_v22 }
 0x678   : > { %v10106_v3 = vpop.eup %10105  ;;  %10117 = vlog2.f32 %v4819_v18  ;;  %v5139_v10 = vsub.f32 1.0, %v4819_v18  ;;  %v4501_v31 = vadd.f32 1.0, %v10102_v40  ;;  %v13655_v35 = vadd.f32 1e-12, %v11020_v12  ;;  %v13692_v12 = vpop.f32.mrb[88].mxu0 }
 0x679   : > { %v10108_v16 = vpop.eup %10107  ;;  %v5709_v4 = vadd.f32 %v13608_v21, %v5646_v15  ;;  %v5585_v43 = vadd.f32 %v5521_v5, %v5393_v44  ;;  %10119 = vlog2.f32 %v4818_v11  ;;  %v5138_v20 = vsub.f32 1.0, %v4818_v11  ;;  %v9695_v44 = vld [vmem:[%s16214_s16 + $0x40] ss:$8 sps:$4 sm:$0xff]   ;;  %v9697_v15 = vld [vmem:[%s16214_s16 + $0x44] ss:$8 sps:$4 sm:$0xff]   ;;  %v11022_v11 = vld [vmem:[%s11311_s28 + $0xb0] sm:$0xff] }
 0x67a   : > { %v10110_v46 = vpop.eup %10109  ;;  %10121 = vlog2.f32 %v5139_v10  ;;  %v4503_v23 = vadd.f32 1.0, %v10104_v17  ;;  %v5648_v62 = vsub.f32 0.0, %v5584_v26  ;;  %v4502_v45 = vadd.f32 1.0, %v10106_v3  ;;  %6958 = vmatprep.subr.bf16.mxu1 %v9697_v15  ;;  %v11023_v10 = vld [vmem:[%s11311_s28 + $0xd8] sm:$0xff] }
 0x67b   : > { %v10112_v9 = vpop.eup %10111  ;;  %v5710_v54 = vadd.f32 %v5709_v4, %v5647_v24  ;;  %10123 = vrcp.f32 %v4500_v6  ;;  %v5459_v21 = vsub.f32 1.0, %v13623_v57  ;;  %v4504_v47 = vadd.f32 1.0, %v10108_v16  ;;  %6959 = vmatpush1.bf16.msra.mxu1 %v9695_v44 }
 0x67c   : > { %10125 = vlog2.f32 %v5138_v20  ;;  %v10114_v7 = vpop.eup %10113  ;;  %v5649_v37 = vsub.f32 0.0, %v5585_v43  ;;  %v4505_v25 = vadd.f32 1.0, %v10110_v46  ;;  %v13665_v32 = vadd.f32 1e-12, %v11021_v61  ;;  %v13694_v20 = vpop.f32.mrb[120].mxu1 }
 0x67d   : > { %v5711_v34 = vadd.f32 %v5710_v54, %v5648_v62  ;;  %10127 = vrcp.f32 %v4501_v31  ;;  %v4507_v49 = vadd.f32 1.0, %v10112_v9  ;;  %v4245_v8 = vadd.f32 %v13491_v63, %v13276_v13  ;;  %v10116_v18 = vpop.eup %10115 }
 0x67e   : > { %10129 = vrcp.f32 %v4503_v23  ;;  %v4506_v40 = vadd.f32 1.0, %v10114_v7  ;;  %v4134_v19 = vadd.f32 %v13493_v42, %v13279_v56  ;;  %v5464_v6 = vsub.f32 1.0, %v13649_v52 }
 0x67f   : > { %v13669_v22 = vadd.f32 %v5711_v34, %v5649_v37  ;;  %10131 = vrcp.f32 %v4502_v45  ;;  %v4247_v63 = vadd.f32 %v13503_v48, %v13281_v0  ;;  %v4508_v42 = vadd.f32 1.0, %v10116_v18 }
 0x680   : > { %10133 = vrcp.f32 %v4504_v47  ;;  %v8825_v26 = vmul.f32 -1.442695, %v4132_v59  ;;  %v4136_v2 = vadd.f32 %v13505_v1, %v13274_v14  ;;  %v13686_v3 = vadd.f32 1e-12, %v11022_v11  ;;  %v11024_v47 = vld [vmem:[%s11311_s28 + $0xf8] sm:$0xff] }
 0x681   : > { %10135 = vrcp.f32 %v4505_v25  ;;  %v5463_v41 = vsub.f32 1.0, %v13665_v32  ;;  %v8827_v24 = vmul.f32 -1.442695, %v4245_v8  ;;  %v13690_v16 = vadd.f32 1e-12, %v11023_v10 }
 0x682   : > { %v10118_v5 = vpop.eup %10117  ;;  %10137 = vrcp.f32 %v4507_v49  ;;  %v8826_v43 = vmul.f32 -1.442695, %v4134_v19  ;;  %v8828_v46 = vmul.f32 -1.442695, %v4247_v63  ;;  %v8829_v62 = vmul.f32 -1.442695, %v4136_v2 }
 0x683   : > { %v10120_v48 = vpop.eup %10119  ;;  %v4962_v4 = vmul.f32 0.6931472, %v10118_v5  ;;  %10139 = vrcp.f32 %v4506_v40  ;;  %v13697_v59 = vadd.f32 1e-12, %v11024_v47  ;;  %v16395_v40 = vld [vmem:[#allocation15_spill] sm:$0xff]  ;;  %v16397_v47 = vld [vmem:[#allocation40_spill] sm:$0xff] }
 0x684   : > { %v10122_v31 = vpop.eup %10121  ;;  %v4960_v1 = vmul.f32 0.6931472, %v10120_v48  ;;  %10141 = vrcp.f32 %v4508_v42 }
 0x685   : > { %v10124_v23 = vpop.eup %10123  ;;  %v5075_v9 = vmax.f32 %v4962_v4, -100.0  ;;  %v5218_v54 = vmul.f32 0.6931472, %v10122_v31  ;;  %10143 = vpow2.f32 %v8825_v26  ;;  %v16396_v4 = vsub.f32 1.0, %v16395_v40 }
 0x686   : > { %v10126_v45 = vpop.eup %10125  ;;  %v5074_v7 = vmax.f32 %v4960_v1, -100.0  ;;  %v4692_v34 = vadd.f32 1e-12, %v10124_v23  ;;  %10145 = vpow2.f32 %v8827_v24 }
 0x687   : > { %v10128_v37 = vpop.eup %10127  ;;  %v5331_v25 = vmax.f32 %v5218_v54, -100.0  ;;  %v5395_v61 = vmul.f32 %v5075_v9, %v13623_v57  ;;  %v5216_v49 = vmul.f32 0.6931472, %v10126_v45  ;;  %10147 = vpow2.f32 %v8826_v43  ;;  %v13709_v9 = vpop.f32.mrb[89].mxu0 }
 0x688   : > { %v10130_v8 = vpop.eup %10129  ;;  %v5394_v19 = vmul.f32 %v5074_v7, %v16395_v40  ;;  %4756 = vst [vmem:[%s13436_s24 + $0x78] sm:$0xff] %v4692_v34  ;;  %v4820_v44 = vadd.f32 1e-12, %v4692_v34  ;;  %v4693_v18 = vadd.f32 1e-12, %v10128_v37  ;;  %10149 = vpow2.f32 %v8828_v46 }
 0x689   : > { %v10132_v63 = vpop.eup %10131  ;;  %v5523_v15 = vmul.f32 %v5459_v21, %v5331_v25  ;;  %v5330_v42 = vmax.f32 %v5216_v49, -100.0  ;;  %v4695_v26 = vadd.f32 1e-12, %v10130_v8  ;;  %10151 = vpow2.f32 %v8829_v62 }
 0x68a   : > { %v10134_v2 = vpop.eup %10133  ;;  %10153 = vlog2.f32 %v4820_v44  ;;  %v5140_v5 = vsub.f32 1.0, %v4820_v44  ;;  %4757 = vst [vmem:[%s13436_s24 + $0x80] sm:$0xff] %v4693_v18  ;;  %v4821_v11 = vadd.f32 1e-12, %v4693_v18  ;;  %v4694_v24 = vadd.f32 1e-12, %v10132_v63 }
 0x68b   : > { %v10136_v48 = vpop.eup %10135  ;;  %v5587_v10 = vadd.f32 %v5523_v15, %v5395_v61  ;;  %v5522_v43 = vmul.f32 %v16396_v4, %v5330_v42  ;;  %4759 = vst [vmem:[%s13436_s24 + $0x90] sm:$0xff] %v4695_v26  ;;  %v4823_v31 = vadd.f32 1e-12, %v4695_v26  ;;  %v4696_v57 = vadd.f32 1e-12, %v10134_v2  ;;  %v16398_v42 = vld [vmem:[#allocation41_spill] sm:$0xff] }
 0x68c   : > { %v10138_v21 = vpop.eup %10137  ;;  %10155 = vlog2.f32 %v5140_v5  ;;  %v5141_v1 = vsub.f32 1.0, %v4821_v11  ;;  %4758 = vst [vmem:[%s13436_s24 + $0x88] sm:$0xff] %v4694_v24  ;;  %v4822_v46 = vadd.f32 1e-12, %v4694_v24  ;;  %v4697_v23 = vadd.f32 1e-12, %v10136_v48 }
 0x68d   : > { %v10140_v54 = vpop.eup %10139  ;;  %v5586_v62 = vadd.f32 %v5522_v43, %v5394_v19  ;;  %10157 = vlog2.f32 %v4821_v11  ;;  %v5143_v45 = vsub.f32 1.0, %v4823_v31  ;;  %4760 = vst [vmem:[%s13436_s24 + $0x98] sm:$0xff] %v4696_v57  ;;  %v4249_v7 = vadd.f32 %v16397_v47, %v13276_v13  ;;  %v13715_v19 = vpop.f32.mrb[121].mxu1  ;;  %v9700_v2 = vld [vmem:[%s16214_s16 + $0x54] ss:$8 sps:$4 sm:$0xff]  }
 0x68e   : > { %v10142_v34 = vpop.eup %10141  ;;  %10159 = vlog2.f32 %v5141_v1  ;;  %v5142_v37 = vsub.f32 1.0, %v4822_v46  ;;  %v4824_v25 = vadd.f32 1e-12, %v4696_v57  ;;  %4761 = vst [vmem:[%s13436_s24 + $0xa0] sm:$0xff] %v4697_v23  ;;  %v4825_v61 = vadd.f32 1e-12, %v4697_v23  ;;  %6960 = vmatprep.subr.bf16.mxu1 %v9700_v2 }
 0x68f   : > { %v10144_v49 = vpop.eup %10143  ;;  %v5650_v8 = vsub.f32 0.0, %v5586_v62  ;;  %10161 = vlog2.f32 %v4823_v31  ;;  %v4699_v40 = vadd.f32 1e-12, %v10138_v21  ;;  %v4698_v44 = vadd.f32 1e-12, %v10140_v54  ;;  %v13735_v54 = vpop.f32.mrb[90].mxu0 }
 0x690   : > { %v10146_v18 = vpop.eup %10145  ;;  %10163 = vlog2.f32 %v5143_v45  ;;  %v5144_v63 = vsub.f32 1.0, %v4824_v25  ;;  %v4700_v15 = vadd.f32 1e-12, %v10142_v34  ;;  %v4138_v26 = vadd.f32 %v16398_v42, %v13279_v56  ;;  %v9698_v4 = vld [vmem:[%s16214_s16 + $0x50] ss:$8 sps:$4 sm:$0xff]  }
 0x691   : > { %v10148_v5 = vpop.eup %10147  ;;  %v5651_v11 = vsub.f32 0.0, %v5587_v10  ;;  %v5713_v24 = vadd.f32 %v13669_v22, %v5650_v8  ;;  %10165 = vlog2.f32 %v4822_v46  ;;  %4763 = vst [vmem:[%s13436_s24 + $0xb0] sm:$0xff] %v4699_v40  ;;  %v4827_v48 = vadd.f32 1e-12, %v4699_v40  ;;  %4762 = vst [vmem:[%s13436_s24 + $0xa8] sm:$0xff] %v4698_v44  ;;  %v11025_v10 = vld [vmem:[%s11311_s28 + $0xd0] sm:$0xff]  ;;  %6961 = vmatpush1.bf16.msra.mxu1 %v9698_v4 }
 0x692   : > { %v10150_v43 = vpop.eup %10149  ;;  %10167 = vlog2.f32 %v5142_v37  ;;  %v5145_v57 = vsub.f32 1.0, %v4825_v61  ;;  %v4826_v21 = vadd.f32 1e-12, %v4698_v44  ;;  %4764 = vst [vmem:[%s13436_s24 + $0xb8] sm:$0xff] %v4700_v15  ;;  %v13731_v23 = vadd.f32 1e-12, %v11025_v10 }
 0x693   : > { %v10152_v1 = vpop.eup %10151  ;;  %v13733_v22 = vadd.f32 %v5713_v24, %v5651_v11  ;;  %10169 = vlog2.f32 %v4824_v25  ;;  %v4828_v46 = vadd.f32 1e-12, %v4700_v15  ;;  %v5147_v45 = vsub.f32 1.0, %v4827_v48  ;;  %v16399_v8 = vld [vmem:[#allocation42_spill] sm:$0xff]  ;;  %v16400_v44 = vld [vmem:[#allocation43_spill] sm:$0xff] }
 0x694   : > { %v10154_v62 = vpop.eup %10153  ;;  %10171 = vlog2.f32 %v5144_v63  ;;  %v13737_v47 = vmul.f32 -1.442695, %v4249_v7  ;;  %v13739_v34 = vmul.f32 -1.442695, %v4138_v26  ;;  %v13743_v40 = vadd.f32 %v16399_v8, %v13281_v0 }
 0x695   : > { %v4964_v37 = vmul.f32 0.6931472, %v10154_v62  ;;  %10173 = vlog2.f32 %v4825_v61  ;;  %v13747_v25 = vadd.f32 %v16400_v44, %v13274_v14  ;;  %v5146_v42 = vsub.f32 1.0, %v4826_v21 }
 0x696   : > { %v10156_v15 = vpop.eup %10155  ;;  %10175 = vlog2.f32 %v5145_v57  ;;  %v4509_v2 = vadd.f32 1.0, %v10144_v49  ;;  %v13749_v63 = vadd.f32 1.0, %v10146_v18  ;;  %v5148_v24 = vsub.f32 1.0, %v4828_v46 }
 0x697   : > { %v10158_v7 = vpop.eup %10157  ;;  %v5076_v11 = vmax.f32 %v4964_v37, -100.0  ;;  %v5220_v26 = vmul.f32 0.6931472, %v10156_v15  ;;  %10177 = vlog2.f32 %v4827_v48  ;;  %v13751_v10 = vadd.f32 1.0, %v10148_v5 }
 0x698   : > { %v10160_v61 = vpop.eup %10159  ;;  %v4966_v4 = vmul.f32 0.6931472, %v10158_v7  ;;  %10179 = vlog2.f32 %v5147_v45  ;;  %v13753_v62 = vadd.f32 1.0, %v10150_v43  ;;  %v13756_v37 = vadd.f32 1.0, %v10152_v1  ;;  %v16401_v7 = vld [vmem:[#allocation18_spill] sm:$0xff] }
 0x699   : > { %v10162_v8 = vpop.eup %10161  ;;  %v5332_v44 = vmax.f32 %v5220_v26, -100.0  ;;  %v5396_v57 = vmul.f32 %v5076_v11, %v13615_v28  ;;  %v5222_v60 = vmul.f32 0.6931472, %v10160_v61  ;;  %10181 = vlog2.f32 %v4826_v21 }
 0x69a   : > { %v10164_v49 = vpop.eup %10163  ;;  %v5077_v18 = vmax.f32 %v4966_v4, -100.0  ;;  %v4970_v53 = vmul.f32 0.6931472, %v10162_v8  ;;  %10183 = vlog2.f32 %v5146_v42  ;;  %v16402_v4 = vsub.f32 1.0, %v16401_v7 }
 0x69b   : > { %v10166_v48 = vpop.eup %10165  ;;  %v5524_v45 = vmul.f32 %v5460_v27, %v5332_v44  ;;  %v5333_v5 = vmax.f32 %v5222_v60, -100.0  ;;  %v5226_v15 = vmul.f32 0.6931472, %v10164_v49  ;;  %10185 = vlog2.f32 %v4828_v46 }
 0x69c   : > { %v10168_v43 = vpop.eup %10167  ;;  %v5397_v26 = vmul.f32 %v5077_v18, %v16401_v7  ;;  %v5079_v17 = vmax.f32 %v4970_v53, -100.0  ;;  %v4968_v11 = vmul.f32 0.6931472, %v10166_v48  ;;  %10187 = vlog2.f32 %v5148_v24 }
 0x69d   : > { %v10170_v21 = vpop.eup %10169  ;;  %v5588_v61 = vadd.f32 %v5524_v45, %v5396_v57  ;;  %v5525_v42 = vmul.f32 %v16402_v4, %v5333_v5  ;;  %v5335_v1 = vmax.f32 %v5226_v15, -100.0  ;;  %v5224_v8 = vmul.f32 0.6931472, %v10168_v43  ;;  %v16403_v57 = vld [vmem:[#allocation16_spill] sm:$0xff] }
 0x69e   : > { %v10172_v31 = vpop.eup %10171  ;;  %v5399_v28 = vmul.f32 %v5079_v17, %v13665_v32  ;;  %v5078_v27 = vmax.f32 %v4968_v11, -100.0  ;;  %v4972_v60 = vmul.f32 0.6931472, %v10170_v21  ;;  %10189 = vrcp.f32 %v4509_v2 }
 0x69f   : > { %v10174_v46 = vpop.eup %10173  ;;  %v5652_v44 = vsub.f32 0.0, %v5588_v61  ;;  %v5589_v49 = vadd.f32 %v5525_v42, %v5397_v26  ;;  %v5527_v53 = vmul.f32 %v5463_v41, %v5335_v1  ;;  %v5334_v24 = vmax.f32 %v5224_v8, -100.0 }
 0x6a0   : > { %v10176_v18 = vpop.eup %10175  ;;  %v5398_v48 = vmul.f32 %v5078_v27, %v16403_v57  ;;  %v5080_v45 = vmax.f32 %v4972_v60, -100.0  ;;  %v5228_v5 = vmul.f32 0.6931472, %v10172_v31  ;;  %v4974_v15 = vmul.f32 0.6931472, %v10174_v46  ;;  %v13771_v60 = vpop.f32.mrb[122].mxu1 }
 0x6a1   : > { %v10178_v43 = vpop.eup %10177  ;;  %v5715_v7 = vadd.f32 %v13733_v22, %v5652_v44  ;;  %v5653_v17 = vsub.f32 0.0, %v5589_v49  ;;  %v5591_v11 = vadd.f32 %v5527_v53, %v5399_v28  ;;  %v16404_v2 = vsub.f32 1.0, %v16403_v57  ;;  %v16405_v44 = vld [vmem:[#allocation19_spill] sm:$0xff] }
 0x6a2   : > { %v10180_v61 = vpop.eup %10179  ;;  %v5336_v26 = vmax.f32 %v5228_v5, -100.0  ;;  %v5400_v32 = vmul.f32 %v5080_v45, %v13649_v52  ;;  %v5081_v41 = vmax.f32 %v4974_v15, -100.0  ;;  %v5230_v4 = vmul.f32 0.6931472, %v10176_v18 }
 0x6a3   : > { %v5526_v21 = vmul.f32 %v16404_v2, %v5334_v24  ;;  %v10182_v42 = vpop.eup %10181  ;;  %v5716_v1 = vadd.f32 %v5715_v7, %v5653_v17  ;;  %v5655_v8 = vsub.f32 0.0, %v5591_v11  ;;  %v4978_v31 = vmul.f32 0.6931472, %v10178_v43  ;;  %v13778_v2 = vpop.f32.mrb[91].mxu0 }
 0x6a4   : > { %v10184_v46 = vpop.eup %10183  ;;  %v5528_v22 = vmul.f32 %v5464_v6, %v5336_v26  ;;  %v5337_v28 = vmax.f32 %v5230_v4, -100.0  ;;  %v5401_v49 = vmul.f32 %v5081_v41, %v16405_v44  ;;  %v5234_v53 = vmul.f32 0.6931472, %v10180_v61 }
 0x6a5   : > { %v5590_v27 = vadd.f32 %v5526_v21, %v5398_v48  ;;  %v10186_v24 = vpop.eup %10185  ;;  %v5083_v45 = vmax.f32 %v4978_v31, -100.0  ;;  %v4976_v5 = vmul.f32 0.6931472, %v10182_v42  ;;  %v5232_v18 = vmul.f32 0.6931472, %v10184_v46  ;;  %v16408_v46 = vld [vmem:[#allocation17_spill] sm:$0xff] }
 0x6a6   : > { %v10188_v15 = vpop.eup %10187  ;;  %v5592_v7 = vadd.f32 %v5528_v22, %v5400_v32  ;;  %v16406_v48 = vsub.f32 1.0, %v16405_v44  ;;  %v5339_v17 = vmax.f32 %v5234_v53, -100.0  ;;  %v4980_v11 = vmul.f32 0.6931472, %v10186_v24 }
 0x6a7   : > { %v5654_v57 = vsub.f32 0.0, %v5590_v27  ;;  %v5403_v6 = vmul.f32 %v5083_v45, %v13686_v3  ;;  %v5082_v21 = vmax.f32 %v4976_v5, -100.0  ;;  %v5338_v26 = vmax.f32 %v5232_v18, -100.0 }
 0x6a8   : > { %v5529_v43 = vmul.f32 %v16406_v48, %v5337_v28  ;;  %v10190_v61 = vpop.eup %10189  ;;  %v5656_v41 = vsub.f32 0.0, %v5592_v7  ;;  %v16407_v42 = vsub.f32 1.0, %v13686_v3  ;;  %v5084_v32 = vmax.f32 %v4980_v11, -100.0  ;;  %v16411_v48 = vld [vmem:[#allocation45_spill] sm:$0xff] }
 0x6a9   : > { %v5717_v52 = vadd.f32 %v5716_v1, %v5654_v57  ;;  %v5402_v22 = vmul.f32 %v5082_v21, %v16408_v46  ;;  %v16409_v28 = vsub.f32 1.0, %v16408_v46  ;;  %v5236_v53 = vmul.f32 0.6931472, %v10188_v15 }
 0x6aa   : > { %v5593_v4 = vadd.f32 %v5529_v43, %v5401_v49  ;;  %v5531_v27 = vmul.f32 %v16407_v42, %v5339_v17  ;;  %v5404_v57 = vmul.f32 %v5084_v32, %v13655_v35  ;;  %v4701_v45 = vadd.f32 1e-12, %v10190_v61  ;;  %v16414_v42 = vld [vmem:[#allocation47_spill] sm:$0xff] }
 0x6ab   : > { %v5718_v31 = vadd.f32 %v5717_v52, %v5655_v8  ;;  %v5530_v44 = vmul.f32 %v16409_v28, %v5338_v26  ;;  %v5340_v7 = vmax.f32 %v5236_v53, -100.0  ;;  %10191 = vrcp.f32 %v13749_v63  ;;  %v16410_v8 = vld [vmem:[#allocation44_spill] sm:$0xff]  ;;  %v11026_v28 = vld [vmem:[%s11311_s28 + $0xf0] sm:$0xff] }
 0x6ac   : > { %v5657_v1 = vsub.f32 0.0, %v5593_v4  ;;  %v5595_v24 = vadd.f32 %v5531_v27, %v5403_v6  ;;  %4765 = vst [vmem:[%s13436_s24 + $0xc0] sm:$0xff] %v4701_v45  ;;  %v4829_v3 = vadd.f32 1e-12, %v4701_v45  ;;  %10193 = vrcp.f32 %v13751_v10  ;;  %v16413_v10 = vld [vmem:[#allocation46_spill] sm:$0xff] }
 0x6ad   : > { %v5719_v5 = vadd.f32 %v5718_v31, %v5656_v41  ;;  %v5594_v18 = vadd.f32 %v5530_v44, %v5402_v22  ;;  %v4255_v49 = vadd.f32 %v16410_v8, %v13276_v13  ;;  %v4144_v15 = vadd.f32 %v16411_v48, %v13279_v56  ;;  %v11028_v48 = vld [vmem:[%s11311_s28 + $0x138] sm:$0xff] }
 0x6ae   : > { %v16412_v11 = vsub.f32 1.0, %v13655_v35  ;;  %10195 = vrcp.f32 %v13753_v62  ;;  %v5149_v6 = vsub.f32 1.0, %v4829_v3  ;;  %v8832_v63 = vmul.f32 -1.442695, %v13743_v40  ;;  %v16415_v40 = vld [vmem:[#allocation48_spill] sm:$0xff]  ;;  %v11032_v22 = vld [vmem:[%s11311_s28 + $0x178] sm:$0xff] }
 0x6af   : > { %v5720_v43 = vadd.f32 %v5719_v5, %v5657_v1  ;;  %v5658_v17 = vsub.f32 0.0, %v5594_v18  ;;  %10197 = vlog2.f32 %v4829_v3  ;;  %v4257_v21 = vadd.f32 %v16413_v10, %v13281_v0  ;;  %v9703_v10 = vld [vmem:[%s16214_s16 + $0x64] ss:$8 sps:$4 sm:$0xff]  }
 0x6b0   : > { %v5532_v52 = vmul.f32 %v16412_v11, %v5340_v7  ;;  %v5659_v26 = vsub.f32 0.0, %v5595_v24  ;;  %10199 = vrcp.f32 %v13756_v37  ;;  %v8833_v4 = vmul.f32 -1.442695, %v13747_v25  ;;  %v11027_v7 = vld [vmem:[%s11311_s28 + $0x118] sm:$0xff]  ;;  %6962 = vmatprep.subr.bf16.mxu1 %v9703_v10 }
 0x6b1   : > { %v5721_v61 = vadd.f32 %v5720_v43, %v5658_v17  ;;  %10201 = vlog2.f32 %v5149_v6  ;;  %v8835_v35 = vmul.f32 -1.442695, %v4255_v49  ;;  %v4146_v62 = vadd.f32 %v16414_v42, %v13274_v14  ;;  %v13825_v17 = vpop.f32.mrb[123].mxu1 }
 0x6b2   : > { %v5596_v41 = vadd.f32 %v5532_v52, %v5404_v57  ;;  %10203 = vpow2.f32 %v13737_v47  ;;  %v4259_v31 = vadd.f32 %v16415_v40, %v13276_v13  ;;  %v13809_v44 = vadd.f32 1e-12, %v11026_v28  ;;  %v11029_v52 = vld [vmem:[%s11311_s28 + $0x110] sm:$0xff] }
 0x6b3   : > { %v5722_v32 = vadd.f32 %v5721_v61, %v5659_v26  ;;  %10205 = vpow2.f32 %v13739_v34  ;;  %v8834_v25 = vmul.f32 -1.442695, %v4144_v15  ;;  %v8836_v24 = vmul.f32 -1.442695, %v4257_v21  ;;  %v16421_v57 = vld [vmem:[#allocation50_spill] sm:$0xff] }
 0x6b4   : > { %v5660_v27 = vsub.f32 0.0, %v5596_v41  ;;  %10207 = vpow2.f32 %v8832_v63  ;;  %v8837_v45 = vmul.f32 -1.442695, %v4146_v62  ;;  %v13819_v34 = vadd.f32 1e-12, %v11027_v7 }
 0x6b5   : > { %10209 = vpow2.f32 %v8833_v4  ;;  %v10192_v5 = vpop.eup %10191  ;;  %v8839_v3 = vmul.f32 -1.442695, %v4259_v31  ;;  %v13823_v15 = vadd.f32 1e-12, %v11028_v48  ;;  %v13828_v6 = vadd.f32 1e-12, %v11029_v52 }
 0x6b6   : > { %v13813_v1 = vadd.f32 %v5722_v32, %v5660_v27  ;;  %10211 = vpow2.f32 %v8835_v35  ;;  %v10194_v8 = vpop.eup %10193  ;;  %v4703_v43 = vadd.f32 1e-12, %v10192_v5  ;;  %v9701_v41 = vld [vmem:[%s16214_s16 + $0x60] ss:$8 sps:$4 sm:$0xff]   ;;  %v11030_v35 = vld [vmem:[%s11311_s28 + $0x130] sm:$0xff]  ;;  %v16425_v37 = vsub.f32 1.0, %v13731_v23 }
 0x6b7   : > { %10213 = vpow2.f32 %v8834_v25  ;;  %v4702_v63 = vadd.f32 1e-12, %v10194_v8  ;;  %v13838_v42 = vadd.f32 1e-12, %v11030_v35  ;;  %6963 = vmatpush1.bf16.msra.mxu1 %v9701_v41  ;;  %v13868_v35 = vadd.f32 1e-12, %v11032_v22 }
 0x6b8   : > { %v10196_v11 = vpop.eup %10195  ;;  %10215 = vpow2.f32 %v8836_v24  ;;  %4767 = vst [vmem:[%s13436_s24 + $0xd0] sm:$0xff] %v4703_v43  ;;  %v4831_v26 = vadd.f32 1e-12, %v4703_v43  ;;  %v13844_v43 = vpop.f32.mrb[92].mxu0  ;;  %v11033_v22 = vld [vmem:[%s11311_s28 + $0x150] sm:$0xff] }
 0x6b9   : > { %v10198_v21 = vpop.eup %10197  ;;  %v4704_v61 = vadd.f32 1e-12, %v10196_v11  ;;  %10217 = vpow2.f32 %v8837_v45  ;;  %4766 = vst [vmem:[%s13436_s24 + $0xc8] sm:$0xff] %v4702_v63  ;;  %v4830_v27 = vadd.f32 1e-12, %v4702_v63  ;;  %v13846_v11 = vpop.f32.mrb[124].mxu1 }
 0x6ba   : > { %v10200_v4 = vpop.eup %10199  ;;  %v4982_v62 = vmul.f32 0.6931472, %v10198_v21  ;;  %10219 = vpow2.f32 %v8839_v3  ;;  %v5151_v40 = vsub.f32 1.0, %v4831_v26  ;;  %v11031_v63 = vld [vmem:[%s11311_s28 + $0x158] sm:$0xff]  ;;  %v13852_v41 = vpop.f32.mrb[93].mxu0 }
 0x6bb   : > { %v10202_v32 = vpop.eup %10201  ;;  %10221 = vlog2.f32 %v4831_v26  ;;  %4768 = vst [vmem:[%s13436_s24 + $0xd8] sm:$0xff] %v4704_v61  ;;  %v4832_v31 = vadd.f32 1e-12, %v4704_v61  ;;  %v4705_v28 = vadd.f32 1e-12, %v10200_v4  ;;  %v5150_v5 = vsub.f32 1.0, %v4830_v27 }
 0x6bc   : > { %v10204_v25 = vpop.eup %10203  ;;  %v5085_v24 = vmax.f32 %v4982_v62, -100.0  ;;  %v5238_v45 = vmul.f32 0.6931472, %v10202_v32  ;;  %10223 = vlog2.f32 %v4830_v27  ;;  %v13849_v10 = vadd.f32 1e-12, %v11031_v63  ;;  %v16418_v26 = vld [vmem:[#allocation22_spill] sm:$0xff] }
 0x6bd   : > { %v10206_v7 = vpop.eup %10205  ;;  %10225 = vlog2.f32 %v5151_v40  ;;  %v5152_v3 = vsub.f32 1.0, %v4832_v31  ;;  %4769 = vst [vmem:[%s13436_s24 + $0xe0] sm:$0xff] %v4705_v28  ;;  %v4833_v48 = vadd.f32 1e-12, %v4705_v28  ;;  %v4515_v27 = vadd.f32 1.0, %v10204_v25  ;;  %v13855_v32 = vpop.f32.mrb[125].mxu1 }
 0x6be   : > { %v10208_v52 = vpop.eup %10207  ;;  %v5341_v21 = vmax.f32 %v5238_v45, -100.0  ;;  %v5405_v61 = vmul.f32 %v5085_v24, %v16418_v26  ;;  %10227 = vlog2.f32 %v5150_v5  ;;  %v9706_v40 = vld [vmem:[%s16214_s16 + $0x74] ss:$8 sps:$4 sm:$0xff]   ;;  %v16419_v45 = vsub.f32 1.0, %v16418_v26  ;;  %v16420_v63 = vld [vmem:[#allocation49_spill] sm:$0xff] }
 0x6bf   : > { %v10210_v4 = vpop.eup %10209  ;;  %10229 = vlog2.f32 %v4832_v31  ;;  %v5153_v62 = vsub.f32 1.0, %v4833_v48  ;;  %v4514_v5 = vadd.f32 1.0, %v10206_v7  ;;  %v4148_v53 = vadd.f32 %v16420_v63, %v13279_v56  ;;  %v9704_v31 = vld [vmem:[%s16214_s16 + $0x70] ss:$8 sps:$4 sm:$0xff]   ;;  %6964 = vmatprep.subr.bf16.mxu1 %v9706_v40  ;;  %v13873_v63 = vpop.f32.mrb[94].mxu0 }
 0x6c0   : > { %v10212_v28 = vpop.eup %10211  ;;  %v5533_v24 = vmul.f32 %v16419_v45, %v5341_v21  ;;  %10231 = vlog2.f32 %v5152_v3  ;;  %v4516_v8 = vadd.f32 1.0, %v10208_v52  ;;  %v4261_v26 = vadd.f32 %v16421_v57, %v13281_v0  ;;  %6965 = vmatpush1.bf16.msra.mxu1 %v9704_v31  ;;  %v13879_v52 = vpop.f32.mrb[126].mxu1 }
 0x6c1   : > { %v10214_v25 = vpop.eup %10213  ;;  %10233 = vlog2.f32 %v4833_v48  ;;  %v4517_v45 = vadd.f32 1.0, %v10210_v4  ;;  %v13877_v18 = vadd.f32 1e-12, %v11033_v22  ;;  %v4519_v48 = vadd.f32 1.0, %v10212_v28  ;;  %v13888_v55 = vpop.f32.mrb[95].mxu0 }
 0x6c2   : > { %v10216_v3 = vpop.eup %10215  ;;  %v5597_v21 = vadd.f32 %v5533_v24, %v5405_v61  ;;  %10235 = vlog2.f32 %v5153_v62  ;;  %v4518_v7 = vadd.f32 1.0, %v10214_v25  ;;  %v8838_v61 = vmul.f32 -1.442695, %v4148_v53  ;;  %16422 = vst [vmem:[#allocation15_spill] sm:$0xff] %v13888_v55 }
 0x6c3   : > { %v10218_v49 = vpop.eup %10217  ;;  %10237 = vrcp.f32 %v4515_v27  ;;  %v4520_v4 = vadd.f32 1.0, %v10216_v3  ;;  %v8840_v24 = vmul.f32 -1.442695, %v4261_v26  ;;  %v13883_v31 = vadd.f32 %v13562_v50, %v13274_v14  ;;  %v13894_v26 = vpop.f32.mrb[127].mxu1 }
 0x6c4   : > { %v10220_v57 = vpop.eup %10219  ;;  %v5661_v40 = vsub.f32 0.0, %v5597_v21  ;;  %10239 = vrcp.f32 %v4514_v5  ;;  %v4521_v28 = vadd.f32 1.0, %v10218_v49  ;;  %16423 = vst [vmem:[#allocation40_spill] sm:$0xff] %v13894_v26 }
 0x6c5   : > { %v10222_v62 = vpop.eup %10221  ;;  %10241 = vrcp.f32 %v4516_v8  ;;  %v4523_v53 = vadd.f32 1.0, %v10220_v57  ;;  %v13892_v8 = vadd.f32 %v13619_v39, %v13276_v13  ;;  %v9707_v39 = vld [vmem:[%s16214_s16 + $0x80] ss:$8 sps:$4 sm:$0xff]  }
 0x6c6   : > { %v10224_v47 = vpop.eup %10223  ;;  %v13886_v22 = vadd.f32 %v13813_v1, %v5661_v40  ;;  %v4986_v27 = vmul.f32 0.6931472, %v10222_v62  ;;  %10243 = vrcp.f32 %v4517_v45  ;;  %v13898_v1 = vadd.f32 %v13625_v36, %v13279_v56  ;;  %v9709_v36 = vld [vmem:[%s16214_s16 + $0x84] ss:$8 sps:$4 sm:$0xff]  }
 0x6c7   : > { %v10226_v5 = vpop.eup %10225  ;;  %v4984_v25 = vmul.f32 0.6931472, %v10224_v47  ;;  %10245 = vrcp.f32 %v4519_v48  ;;  %v13902_v47 = vadd.f32 %v13634_v58, %v13281_v0  ;;  %6966 = vmatprep.subr.bf16.mxu1 %v9709_v36 }
 0x6c8   : > { %v10228_v50 = vpop.eup %10227  ;;  %v5087_v3 = vmax.f32 %v4986_v27, -100.0  ;;  %v5242_v21 = vmul.f32 0.6931472, %v10226_v5  ;;  %10247 = vrcp.f32 %v4518_v7  ;;  %v16424_v5 = vld [vmem:[#allocation20_spill] sm:$0xff]  ;;  %6967 = vmatpush1.bf16.msra.mxu1 %v9707_v39 }
 0x6c9   : > { %v10230_v49 = vpop.eup %10229  ;;  %v5086_v45 = vmax.f32 %v4984_v25, -100.0  ;;  %v5240_v40 = vmul.f32 0.6931472, %v10228_v50  ;;  %10249 = vrcp.f32 %v4520_v4 }
 0x6ca   : > { %v10232_v48 = vpop.eup %10231  ;;  %v5343_v57 = vmax.f32 %v5242_v21, -100.0  ;;  %v5407_v7 = vmul.f32 %v5087_v3, %v13731_v23  ;;  %v4988_v62 = vmul.f32 0.6931472, %v10230_v49  ;;  %10251 = vrcp.f32 %v4521_v28  ;;  %v13914_v3 = vpop.f32.mrb[96].mxu0 }
 0x6cb   : > { %v10234_v27 = vpop.eup %10233  ;;  %v5342_v4 = vmax.f32 %v5240_v40, -100.0  ;;  %v5406_v25 = vmul.f32 %v5086_v45, %v16424_v5  ;;  %v5244_v58 = vmul.f32 0.6931472, %v10232_v48  ;;  %10253 = vrcp.f32 %v4523_v53 }
 0x6cc   : > { %v10236_v50 = vpop.eup %10235  ;;  %v5535_v33 = vmul.f32 %v16425_v37, %v5343_v57  ;;  %v5088_v46 = vmax.f32 %v4988_v62, -100.0  ;;  %v4990_v21 = vmul.f32 0.6931472, %v10234_v27  ;;  %10255 = vpow2.f32 %v8838_v61 }
 0x6cd   : > { %v10238_v28 = vpop.eup %10237  ;;  %v16426_v49 = vsub.f32 1.0, %v16424_v5  ;;  %v5344_v55 = vmax.f32 %v5244_v58, -100.0  ;;  %v5246_v40 = vmul.f32 0.6931472, %v10236_v50  ;;  %10257 = vpow2.f32 %v8840_v24  ;;  %v16428_v50 = vld [vmem:[#allocation23_spill] sm:$0xff] }
 0x6ce   : > { %v10240_v53 = vpop.eup %10239  ;;  %v5599_v45 = vadd.f32 %v5535_v33, %v5407_v7  ;;  %v5408_v23 = vmul.f32 %v5088_v46, %v13690_v16  ;;  %v5089_v37 = vmax.f32 %v4990_v21, -100.0  ;;  %v4707_v48 = vadd.f32 1e-12, %v10238_v28 }
 0x6cf   : > { %v5534_v26 = vmul.f32 %v16426_v49, %v5342_v4  ;;  %v10242_v61 = vpop.eup %10241  ;;  %v16427_v62 = vsub.f32 1.0, %v13690_v16  ;;  %v5345_v27 = vmax.f32 %v5246_v40, -100.0  ;;  %v4706_v5 = vadd.f32 1e-12, %v10240_v53  ;;  %v13926_v16 = vpop.f32.mrb[97].mxu0 }
 0x6d0   : > { %v10244_v4 = vpop.eup %10243  ;;  %v5663_v58 = vsub.f32 0.0, %v5599_v45  ;;  %v5409_v24 = vmul.f32 %v5089_v37, %v16428_v50  ;;  %4771 = vst [vmem:[%s13436_s24 + $0xf0] sm:$0xff] %v4707_v48  ;;  %v4835_v39 = vadd.f32 1e-12, %v4707_v48  ;;  %v4708_v33 = vadd.f32 1e-12, %v10242_v61 }
 0x6d1   : > { %v5598_v57 = vadd.f32 %v5534_v26, %v5406_v25  ;;  %v5536_v36 = vmul.f32 %v16427_v62, %v5344_v55  ;;  %v10246_v7 = vpop.eup %10245  ;;  %v16429_v28 = vsub.f32 1.0, %v16428_v50  ;;  %4770 = vst [vmem:[%s13436_s24 + $0xe8] sm:$0xff] %v4706_v5  ;;  %v4834_v26 = vadd.f32 1e-12, %v4706_v5  ;;  %16430 = vst [vmem:[#allocation41_spill] sm:$0xff] %v13926_v16 }
 0x6d2   : > { %v10248_v55 = vpop.eup %10247  ;;  %10259 = vlog2.f32 %v4835_v39  ;;  %v5155_v25 = vsub.f32 1.0, %v4835_v39  ;;  %4772 = vst [vmem:[%s13436_s24 + $0xf8] sm:$0xff] %v4708_v33  ;;  %v4836_v40 = vadd.f32 1e-12, %v4708_v33  ;;  %v4709_v53 = vadd.f32 1e-12, %v10244_v4 }
 0x6d3   : > { %v5662_v46 = vsub.f32 0.0, %v5598_v57  ;;  %v5600_v21 = vadd.f32 %v5536_v36, %v5408_v23  ;;  %v5537_v49 = vmul.f32 %v16429_v28, %v5345_v27  ;;  %v10250_v45 = vpop.eup %10249  ;;  %10261 = vlog2.f32 %v4834_v26  ;;  %v9712_v23 = vld [vmem:[%s16214_s16 + $0x94] ss:$8 sps:$4 sm:$0xff]   ;;  %v9710_v5 = vld [vmem:[%s16214_s16 + $0x90] ss:$8 sps:$4 sm:$0xff]   ;;  %v13937_v28 = vpop.f32.mrb[98].mxu0 }
 0x6d4   : > { %v10252_v57 = vpop.eup %10251  ;;  %10263 = vlog2.f32 %v5155_v25  ;;  %v5154_v62 = vsub.f32 1.0, %v4834_v26  ;;  %v5156_v36 = vsub.f32 1.0, %v4836_v40  ;;  %4773 = vst [vmem:[%s13436_s24 + $0x100] sm:$0xff] %v4709_v53  ;;  %v4837_v27 = vadd.f32 1e-12, %v4709_v53  ;;  %6968 = vmatprep.subr.bf16.mxu1 %v9712_v23  ;;  %16431 = vst [vmem:[#allocation42_spill] sm:$0xff] %v13937_v28 }
 0x6d5   : > { %v5725_v37 = vadd.f32 %v13886_v22, %v5662_v46  ;;  %v5664_v48 = vsub.f32 0.0, %v5600_v21  ;;  %v5601_v61 = vadd.f32 %v5537_v49, %v5409_v24  ;;  %v10254_v4 = vpop.eup %10253  ;;  %10265 = vlog2.f32 %v4836_v40  ;;  %6969 = vmatpush1.bf16.msra.mxu1 %v9710_v5 }
 0x6d6   : > { %v4711_v24 = vadd.f32 1e-12, %v10246_v7  ;;  %v10256_v39 = vpop.eup %10255  ;;  %10267 = vlog2.f32 %v5154_v62  ;;  %v5157_v33 = vsub.f32 1.0, %v4837_v27  ;;  %v4710_v46 = vadd.f32 1e-12, %v10248_v55 }
 0x6d7   : > { %v5726_v22 = vadd.f32 %v5725_v37, %v5663_v58  ;;  %v5665_v50 = vsub.f32 0.0, %v5601_v61  ;;  %v4712_v21 = vadd.f32 1e-12, %v10250_v45  ;;  %v10258_v49 = vpop.eup %10257  ;;  %10269 = vlog2.f32 %v5156_v36 }
 0x6d8   : > { %4775 = vst [vmem:[%s13436_s24 + $0x110] sm:$0xff] %v4711_v24  ;;  %v4839_v58 = vadd.f32 1e-12, %v4711_v24  ;;  %v4713_v25 = vadd.f32 1e-12, %v10252_v57  ;;  %10271 = vlog2.f32 %v4837_v27  ;;  %4774 = vst [vmem:[%s13436_s24 + $0x108] sm:$0xff] %v4710_v46 }
 0x6d9   : > { %v5727_v26 = vadd.f32 %v5726_v22, %v5664_v48  ;;  %v4838_v7 = vadd.f32 1e-12, %v4710_v46  ;;  %4776 = vst [vmem:[%s13436_s24 + $0x118] sm:$0xff] %v4712_v21  ;;  %v4840_v40 = vadd.f32 1e-12, %v4712_v21  ;;  %10273 = vlog2.f32 %v5157_v33  ;;  %v13948_v57 = vpop.f32.mrb[99].mxu0 }
 0x6da   : > { %v4715_v53 = vadd.f32 1e-12, %v10254_v4  ;;  %v5159_v55 = vsub.f32 1.0, %v4839_v58  ;;  %4777 = vst [vmem:[%s13436_s24 + $0x120] sm:$0xff] %v4713_v25  ;;  %v4841_v45 = vadd.f32 1e-12, %v4713_v25  ;;  %10275 = vlog2.f32 %v4839_v58 }
 0x6db   : > { %v13942_v37 = vadd.f32 %v5727_v26, %v5665_v50  ;;  %v5158_v23 = vsub.f32 1.0, %v4838_v7  ;;  %16432 = vst [vmem:[#allocation43_spill] sm:$0xff] %v13948_v57  ;;  %v5160_v62 = vsub.f32 1.0, %v4840_v40  ;;  %v13951_v27 = vmul.f32 -1.442695, %v13883_v31 }
 0x6dc   : > { %4779 = vst [vmem:[%s13436_s24 + $0x130] sm:$0xff] %v4715_v53  ;;  %10277 = vlog2.f32 %v5159_v55  ;;  %v4843_v36 = vadd.f32 1e-12, %v4715_v53  ;;  %v10260_v5 = vpop.eup %10259  ;;  %v13954_v4 = vmul.f32 -1.442695, %v13892_v8  ;;  %v13961_v50 = vadd.f32 %v13641_v38, %v13274_v14 }
 0x6dd   : > { %10279 = vlog2.f32 %v4838_v7  ;;  %v13957_v22 = vmul.f32 -1.442695, %v13898_v1  ;;  %v10262_v24 = vpop.eup %10261  ;;  %v4994_v33 = vmul.f32 0.6931472, %v10260_v5  ;;  %v5161_v46 = vsub.f32 1.0, %v4841_v45 }
 0x6de   : > { %10281 = vlog2.f32 %v5158_v23  ;;  %v13964_v21 = vmul.f32 -1.442695, %v13902_v47  ;;  %v10264_v31 = vpop.eup %10263  ;;  %v4992_v26 = vmul.f32 0.6931472, %v10262_v24  ;;  %v4522_v58 = vadd.f32 1.0, %v10256_v39 }
 0x6df   : > { %10283 = vlog2.f32 %v4840_v40  ;;  %v13968_v8 = vadd.f32 %v13651_v30, %v13276_v13  ;;  %v9715_v38 = vld [vmem:[%s16214_s16 + $0xa4] ss:$8 sps:$4 sm:$0xff]   ;;  %v10266_v1 = vpop.eup %10265  ;;  %v5091_v25 = vmax.f32 %v4994_v33, -100.0  ;;  %v5250_v7 = vmul.f32 0.6931472, %v10264_v31 }
 0x6e0   : > { %10285 = vlog2.f32 %v5160_v62  ;;  %v5163_v53 = vsub.f32 1.0, %v4843_v36  ;;  %v9713_v47 = vld [vmem:[%s16214_s16 + $0xa0] ss:$8 sps:$4 sm:$0xff]   ;;  %v10268_v55 = vpop.eup %10267  ;;  %v5090_v40 = vmax.f32 %v4992_v26, -100.0  ;;  %v4996_v39 = vmul.f32 0.6931472, %v10266_v1  ;;  %6970 = vmatprep.subr.bf16.mxu1 %v9715_v38 }
 0x6e1   : > { %10287 = vlog2.f32 %v4841_v45  ;;  %v4524_v23 = vadd.f32 1.0, %v10258_v49  ;;  %v10270_v30 = vpop.eup %10269  ;;  %v5347_v5 = vmax.f32 %v5250_v7, -100.0  ;;  %v5411_v24 = vmul.f32 %v5091_v25, %v13809_v44  ;;  %6971 = vmatpush1.bf16.msra.mxu1 %v9713_v47  ;;  %v16433_v62 = vld [vmem:[#allocation21_spill] sm:$0xff]  ;;  %v13980_v38 = vpop.f32.mrb[100].mxu0 }
 0x6e2   : > { %v5248_v48 = vmul.f32 0.6931472, %v10268_v55  ;;  %10289 = vlog2.f32 %v5161_v46  ;;  %v10272_v33 = vpop.eup %10271  ;;  %v5410_v31 = vmul.f32 %v5090_v40, %v16433_v62  ;;  %v5092_v61 = vmax.f32 %v4996_v39, -100.0  ;;  %16435 = vst [vmem:[#allocation18_spill] sm:$0xff] %v13980_v38  ;;  %v13983_v55 = vpop.f32.mrb[101].mxu0 }
 0x6e3   : > { %v5252_v57 = vmul.f32 0.6931472, %v10270_v30  ;;  %10291 = vlog2.f32 %v4843_v36  ;;  %v10274_v28 = vpop.eup %10273  ;;  %v16434_v26 = vsub.f32 1.0, %v13809_v44  ;;  %v4998_v49 = vmul.f32 0.6931472, %v10272_v33 }
 0x6e4   : > { %v5346_v45 = vmax.f32 %v5248_v48, -100.0  ;;  %10293 = vlog2.f32 %v5163_v53  ;;  %v10276_v7 = vpop.eup %10275  ;;  %v5412_v46 = vmul.f32 %v5092_v61, %v13697_v59  ;;  %v5254_v47 = vmul.f32 0.6931472, %v10274_v28  ;;  %v16438_v28 = vld [vmem:[#allocation26_spill] sm:$0xff] }
 0x6e5   : > { %v5539_v1 = vmul.f32 %v16434_v26, %v5347_v5  ;;  %v5348_v25 = vmax.f32 %v5252_v57, -100.0  ;;  %10295 = vrcp.f32 %v4522_v58  ;;  %v16436_v36 = vsub.f32 1.0, %v16433_v62 }
 0x6e6   : > { %v10278_v40 = vpop.eup %10277  ;;  %v5093_v44 = vmax.f32 %v4998_v49, -100.0  ;;  %v5002_v5 = vmul.f32 0.6931472, %v10276_v7  ;;  %v16437_v53 = vsub.f32 1.0, %v13697_v59  ;;  %v5349_v26 = vmax.f32 %v5254_v47, -100.0 }
 0x6e7   : > { %v5603_v39 = vadd.f32 %v5539_v1, %v5411_v24  ;;  %v5538_v30 = vmul.f32 %v16436_v36, %v5346_v45  ;;  %v10280_v48 = vpop.eup %10279  ;;  %v5258_v38 = vmul.f32 0.6931472, %v10278_v40  ;;  %10297 = vrcp.f32 %v4524_v23 }
 0x6e8   : > { %v5540_v33 = vmul.f32 %v16437_v53, %v5348_v25  ;;  %v10282_v57 = vpop.eup %10281  ;;  %v5413_v58 = vmul.f32 %v5093_v44, %v16438_v28  ;;  %v5095_v16 = vmax.f32 %v5002_v5, -100.0  ;;  %v13992_v24 = vadd.f32 %v13657_v51, %v13279_v56 }
 0x6e9   : > { %v5602_v61 = vadd.f32 %v5538_v30, %v5410_v31  ;;  %v10284_v62 = vpop.eup %10283  ;;  %v16439_v45 = vsub.f32 1.0, %v16438_v28  ;;  %v5351_v7 = vmax.f32 %v5258_v38, -100.0  ;;  %v5000_v59 = vmul.f32 0.6931472, %v10280_v48 }
 0x6ea   : > { %v5604_v1 = vadd.f32 %v5540_v33, %v5412_v46  ;;  %v10286_v25 = vpop.eup %10285  ;;  %v5415_v23 = vmul.f32 %v5095_v16, %v13828_v6  ;;  %v5256_v40 = vmul.f32 0.6931472, %v10282_v57  ;;  %v5004_v31 = vmul.f32 0.6931472, %v10284_v62  ;;  %v9718_v46 = vld [vmem:[%s16214_s16 + $0xb4] ss:$8 sps:$4 sm:$0xff]  }
 0x6eb   : > { %v5541_v49 = vmul.f32 %v16439_v45, %v5349_v26  ;;  %v5666_v47 = vsub.f32 0.0, %v5602_v61  ;;  %v10288_v36 = vpop.eup %10287  ;;  %v5667_v30 = vsub.f32 0.0, %v5603_v39  ;;  %v16440_v5 = vsub.f32 1.0, %v13828_v6  ;;  %v9716_v16 = vld [vmem:[%s16214_s16 + $0xb0] ss:$8 sps:$4 sm:$0xff]   ;;  %v16441_v6 = vld [vmem:[#allocation24_spill] sm:$0xff]  ;;  %6972 = vmatprep.subr.bf16.mxu1 %v9718_v46 }
 0x6ec   : > { %v5094_v53 = vmax.f32 %v5000_v59, -100.0  ;;  %v10290_v33 = vpop.eup %10289  ;;  %v5350_v48 = vmax.f32 %v5256_v40, -100.0  ;;  %v5096_v26 = vmax.f32 %v5004_v31, -100.0  ;;  %v5260_v61 = vmul.f32 0.6931472, %v10286_v25  ;;  %v14010_v25 = vpop.f32.mrb[102].mxu0  ;;  %6973 = vmatpush1.bf16.msra.mxu1 %v9716_v16 }
 0x6ed   : > { %v5605_v44 = vadd.f32 %v5541_v49, %v5413_v58  ;;  %v5543_v51 = vmul.f32 %v16440_v5, %v5351_v7  ;;  %v5729_v38 = vadd.f32 %v13942_v37, %v5666_v47  ;;  %v10292_v39 = vpop.eup %10291  ;;  %v5668_v57 = vsub.f32 0.0, %v5604_v1  ;;  %v16444_v16 = vld [vmem:[#allocation27_spill] sm:$0xff] }
 0x6ee   : > { %v5414_v58 = vmul.f32 %v5094_v53, %v16441_v6  ;;  %v5006_v62 = vmul.f32 0.6931472, %v10288_v36  ;;  %v10294_v45 = vpop.eup %10293  ;;  %v16442_v7 = vsub.f32 1.0, %v16441_v6  ;;  %v5352_v37 = vmax.f32 %v5260_v61, -100.0 }
 0x6ef   : > { %v5607_v28 = vadd.f32 %v5543_v51, %v5415_v23  ;;  %v5730_v49 = vadd.f32 %v5729_v38, %v5667_v30  ;;  %v5416_v47 = vmul.f32 %v5096_v26, %v13819_v34  ;;  %v10296_v40 = vpop.eup %10295  ;;  %v5669_v31 = vsub.f32 0.0, %v5605_v44  ;;  %v14014_v38 = vpop.f32.mrb[103].mxu0 }
 0x6f0   : > { %v5542_v59 = vmul.f32 %v16442_v7, %v5350_v48  ;;  %v5097_v5 = vmax.f32 %v5006_v62, -100.0  ;;  %v5262_v1 = vmul.f32 0.6931472, %v10290_v33  ;;  %v5010_v23 = vmul.f32 0.6931472, %v10292_v39 }
 0x6f1   : > { %v5731_v51 = vadd.f32 %v5730_v49, %v5668_v57  ;;  %v16443_v36 = vsub.f32 1.0, %v13819_v34  ;;  %v5266_v30 = vmul.f32 0.6931472, %v10294_v45  ;;  %v9719_v48 = vld [vmem:[%s16214_s16 + $0xc0] ss:$8 sps:$4 sm:$0xff]   ;;  %v10298_v26 = vpop.eup %10297  ;;  %v16445_v45 = vsub.f32 1.0, %v16444_v16 }
 0x6f2   : > { %v5606_v53 = vadd.f32 %v5542_v59, %v5414_v58  ;;  %v5353_v61 = vmax.f32 %v5262_v1, -100.0  ;;  %v5417_v44 = vmul.f32 %v5097_v5, %v16444_v16  ;;  %v5099_v6 = vmax.f32 %v5010_v23, -100.0  ;;  %v9721_v39 = vld [vmem:[%s16214_s16 + $0xc4] ss:$8 sps:$4 sm:$0xff]   ;;  %v14033_v23 = vpop.f32.mrb[104].mxu0 }
 0x6f3   : > { %v5544_v46 = vmul.f32 %v16443_v36, %v5352_v37  ;;  %v4714_v33 = vadd.f32 1e-12, %v10296_v40  ;;  %v5732_v34 = vadd.f32 %v5731_v51, %v5669_v31  ;;  %v5355_v62 = vmax.f32 %v5266_v30, -100.0  ;;  %6974 = vmatprep.subr.bf16.mxu1 %v9721_v39  ;;  %v9724_v40 = vld [vmem:[%s16214_s16 + $0xd4] ss:$8 sps:$4 sm:$0xff]   ;;  %v14039_v30 = vpop.f32.mrb[105].mxu0 }
 0x6f4   : > { %v5670_v57 = vsub.f32 0.0, %v5606_v53  ;;  %v5545_v49 = vmul.f32 %v16445_v45, %v5353_v61  ;;  %v5419_v7 = vmul.f32 %v5099_v6, %v13838_v42  ;;  %v4716_v37 = vadd.f32 1e-12, %v10298_v26  ;;  %6975 = vmatpush1.bf16.msra.mxu1 %v9719_v48  ;;  %v9722_v51 = vld [vmem:[%s16214_s16 + $0xd0] ss:$8 sps:$4 sm:$0xff]  }
 0x6f5   : > { %v5608_v58 = vadd.f32 %v5544_v46, %v5416_v47  ;;  %4778 = vst [vmem:[%s13436_s24 + $0x128] sm:$0xff] %v4714_v33  ;;  %v4842_v59 = vadd.f32 1e-12, %v4714_v33  ;;  %v5671_v5 = vsub.f32 0.0, %v5607_v28  ;;  %v16446_v31 = vsub.f32 1.0, %v13838_v42  ;;  %6976 = vmatprep.subr.bf16.mxu1 %v9724_v40 }
 0x6f6   : > { %v5733_v1 = vadd.f32 %v5732_v34, %v5670_v57  ;;  %10299 = vpow2.f32 %v13951_v27  ;;  %v5609_v53 = vadd.f32 %v5545_v49, %v5417_v44  ;;  %4780 = vst [vmem:[%s13436_s24 + $0x138] sm:$0xff] %v4716_v37  ;;  %v4844_v46 = vadd.f32 1e-12, %v4716_v37  ;;  %v14044_v27 = vpop.f32.mrb[106].mxu0  ;;  %v9727_v6 = vld [vmem:[%s16214_s16 + $0xe4] ss:$8 sps:$4 sm:$0xff]  }
 0x6f7   : > { %v5547_v47 = vmul.f32 %v16446_v31, %v5355_v62  ;;  %10301 = vlog2.f32 %v4842_v59  ;;  %v5162_v36 = vsub.f32 1.0, %v4842_v59  ;;  %v5672_v28 = vsub.f32 0.0, %v5608_v58  ;;  %v14049_v44 = vpop.f32.mrb[107].mxu0  ;;  %v11034_v34 = vld [vmem:[%s11311_s28 + $0x170] sm:$0xff]  ;;  %v11035_v57 = vld [vmem:[%s11311_s28 + $0x198] sm:$0xff] }
 0x6f8   : > { %v5734_v42 = vadd.f32 %v5733_v1, %v5671_v5  ;;  %10303 = vpow2.f32 %v13954_v4  ;;  %v5164_v48 = vsub.f32 1.0, %v4844_v46  ;;  %v8845_v61 = vmul.f32 -1.442695, %v13961_v50  ;;  %6977 = vmatpush1.bf16.msra.mxu1 %v9722_v51  ;;  %v9725_v50 = vld [vmem:[%s16214_s16 + $0xe0] ss:$8 sps:$4 sm:$0xff]   ;;  %v14082_v5 = vpop.f32.mrb[108].mxu0 }
 0x6f9   : > { %v14041_v26 = vadd.f32 %v5547_v47, %v5419_v7  ;;  %10305 = vlog2.f32 %v5162_v36  ;;  %v4271_v16 = vadd.f32 %v13659_v29, %v13281_v0  ;;  %v5673_v39 = vsub.f32 0.0, %v5609_v53  ;;  %6978 = vmatprep.subr.bf16.mxu1 %v9727_v6  ;;  %v11036_v7 = vld [vmem:[%s11311_s28 + $0x1b8] sm:$0xff]  ;;  %v11038_v31 = vld [vmem:[%s11311_s28 + $0x1b0] sm:$0xff]  ;;  %v14092_v51 = vpop.f32.mrb[109].mxu0 }
 0x6fa   : > { %v5735_v33 = vadd.f32 %v5734_v42, %v5672_v28  ;;  %10307 = vlog2.f32 %v4844_v46  ;;  %v4162_v4 = vadd.f32 %v13692_v12, %v13274_v14  ;;  %v14060_v29 = vadd.f32 1e-12, %v11034_v34  ;;  %v9728_v28 = vld [vmem:[%s16214_s16 + $0xf0] ss:$8 sps:$4 sm:$0xff]   ;;  %v14100_v42 = vpop.f32.mrb[110].mxu0 }
 0x6fb   : > { %v14063_v58 = vadd.f32 1e-12, %v11035_v57  ;;  %10309 = vlog2.f32 %v5164_v48  ;;  %v8847_v62 = vmul.f32 -1.442695, %v13968_v8  ;;  %v8846_v12 = vmul.f32 -1.442695, %v13992_v24 }
 0x6fc   : > { %v14066_v45 = vadd.f32 %v5735_v33, %v5673_v39  ;;  %10311 = vpow2.f32 %v13957_v22  ;;  %v4275_v49 = vadd.f32 %v13694_v20, %v13276_v13  ;;  %v14073_v59 = vadd.f32 1e-12, %v11036_v7  ;;  %v9730_v8 = vld [vmem:[%s16214_s16 + $0xf4] ss:$8 sps:$4 sm:$0xff]   ;;  %6979 = vmatpush1.bf16.msra.mxu1 %v9725_v50  ;;  %16448 = vst [vmem:[#allocation19_spill] sm:$0xff] %v14100_v42  ;;  %v14104_v6 = vpop.f32.mrb[111].mxu0 }
 0x6fd   : > { %10313 = vpow2.f32 %v13964_v21  ;;  %v8848_v37 = vmul.f32 -1.442695, %v4271_v16  ;;  %v8849_v22 = vmul.f32 -1.442695, %v4162_v4  ;;  %v4164_v24 = vadd.f32 %v13709_v9, %v13279_v56  ;;  %v11037_v20 = vld [vmem:[%s11311_s28 + $0x190] sm:$0xff]  ;;  %6980 = vmatprep.subr.bf16.mxu1 %v9730_v8  ;;  %16449 = vst [vmem:[#allocation17_spill] sm:$0xff] %v14104_v6 }
 0x6fe   : > { %16447 = vst [vmem:[#allocation16_spill] sm:$0xff] %v14073_v59  ;;  %10315 = vpow2.f32 %v8845_v61  ;;  %v14085_v1 = vadd.f32 1e-12, %v11037_v20  ;;  %v14088_v21 = vadd.f32 1e-12, %v11038_v31  ;;  %v4277_v47 = vadd.f32 %v13715_v19, %v13281_v0  ;;  %v11039_v39 = vld [vmem:[%s11311_s28 + $0x1d8] sm:$0xff] }
 0x6ff   : > { %10317 = vpow2.f32 %v8847_v62  ;;  %v8851_v36 = vmul.f32 -1.442695, %v4275_v49  ;;  %v4166_v46 = vadd.f32 %v13735_v54, %v13274_v14  ;;  %v14107_v4 = vadd.f32 1e-12, %v11039_v39  ;;  %v11040_v57 = vld [vmem:[%s11311_s28 + $0x1f8] sm:$0xff]  ;;  %v11042_v61 = vld [vmem:[%s11311_s28 + $0x1f0] sm:$0xff] }
 0x700   : > { %v10300_v53 = vpop.eup %10299  ;;  %10319 = vpow2.f32 %v8846_v12  ;;  %v8850_v50 = vmul.f32 -1.442695, %v4164_v24  ;;  %6981 = vmatpush1.bf16.msra.mxu1 %v9728_v28  ;;  %v14110_v62 = vadd.f32 1e-12, %v11040_v57  ;;  %v8852_v49 = vmul.f32 -1.442695, %v4277_v47 }
 0x701   : > { %v10302_v19 = vpop.eup %10301  ;;  %v4525_v16 = vadd.f32 1.0, %v10300_v53  ;;  %10321 = vpow2.f32 %v8848_v37  ;;  %16450 = vst [vmem:[#allocation44_spill] sm:$0xff] %v14107_v4  ;;  %v8853_v20 = vmul.f32 -1.442695, %v4166_v46  ;;  %v11041_v53 = vld [vmem:[%s11311_s28 + $0x1d0] sm:$0xff]  ;;  %v14118_v47 = vpop.f32.mrb[112].mxu0 }
 0x702   : > { %v10304_v33 = vpop.eup %10303  ;;  %v5008_v54 = vmul.f32 0.6931472, %v10302_v19  ;;  %10323 = vpow2.f32 %v8849_v22  ;;  %16451 = vst [vmem:[#allocation45_spill] sm:$0xff] %v14110_v62  ;;  %v14113_v39 = vadd.f32 1e-12, %v11041_v53  ;;  %v4279_v22 = vadd.f32 %v13771_v60, %v13276_v13  ;;  %v16453_v57 = vld [vmem:[#allocation25_spill] sm:$0xff] }
 0x703   : > { %v10306_v34 = vpop.eup %10305  ;;  %10325 = vrcp.f32 %v4525_v16  ;;  %v4527_v12 = vadd.f32 1.0, %v10304_v33  ;;  %16454 = vst [vmem:[#allocation47_spill] sm:$0xff] %v14118_v47  ;;  %v16456_v60 = vsub.f32 1.0, %v16453_v57  ;;  %v14129_v48 = vadd.f32 1e-12, %v11042_v61  ;;  %s16150_s28 = scalar_lea.sflag [#allocation4], %s671_s4 }
 0x704   : > { %v10308_v7 = vpop.eup %10307  ;;  %v5098_v37 = vmax.f32 %v5008_v54, -100.0  ;;  %v5264_v8 = vmul.f32 0.6931472, %v10306_v34  ;;  %10327 = vpow2.f32 %v8851_v36  ;;  %16452 = vst [vmem:[#allocation46_spill] sm:$0xff] %v14113_v39  ;;  %v4168_v34 = vadd.f32 %v13778_v2, %v13279_v56 }
 0x705   : > { %v10310_v31 = vpop.eup %10309  ;;  %v5012_v19 = vmul.f32 0.6931472, %v10308_v7  ;;  %10329 = vrcp.f32 %v4527_v12  ;;  %v14122_v12 = vpop.f32.mrb[113].mxu0  ;;  %16458 = vst [vmem:[#allocation49_spill] sm:$0xff] %v14129_v48 }
 0x706   : > { %v10312_v24 = vpop.eup %10311  ;;  %v5354_v28 = vmax.f32 %v5264_v8, -100.0  ;;  %v5418_v16 = vmul.f32 %v5098_v37, %v16453_v57  ;;  %v5268_v33 = vmul.f32 0.6931472, %v10310_v31  ;;  %10331 = vpow2.f32 %v8850_v50  ;;  %16455 = vst [vmem:[#allocation48_spill] sm:$0xff] %v14122_v12  ;;  %v14126_v31 = vpop.f32.mrb[114].mxu0 }
 0x707   : > { %v10314_v36 = vpop.eup %10313  ;;  %v5100_v46 = vmax.f32 %v5012_v19, -100.0  ;;  %v4526_v54 = vadd.f32 1.0, %v10312_v24  ;;  %10333 = vpow2.f32 %v8852_v49  ;;  %16457 = vst [vmem:[#allocation22_spill] sm:$0xff] %v14126_v31  ;;  %v14132_v2 = vpop.f32.mrb[115].mxu0  ;;  %v16460_v57 = vsub.f32 1.0, %v13823_v15 }
 0x708   : > { %v10316_v7 = vpop.eup %10315  ;;  %v5546_v8 = vmul.f32 %v16456_v60, %v5354_v28  ;;  %v5356_v53 = vmax.f32 %v5268_v33, -100.0  ;;  %v4528_v37 = vadd.f32 1.0, %v10314_v36  ;;  %10335 = vpow2.f32 %v8853_v20  ;;  %16459 = vst [vmem:[#allocation50_spill] sm:$0xff] %v14132_v2 }
 0x709   : > { %v10318_v50 = vpop.eup %10317  ;;  %v5420_v49 = vmul.f32 %v5100_v46, %v13823_v15  ;;  %10337 = vrcp.f32 %v4526_v54  ;;  %v4529_v19 = vadd.f32 1.0, %v10316_v7  ;;  %v8855_v60 = vmul.f32 -1.442695, %v4279_v22 }
 0x70a   : > { %v10320_v24 = vpop.eup %10319  ;;  %v5610_v9 = vadd.f32 %v5546_v8, %v5418_v16  ;;  %v5548_v28 = vmul.f32 %v16460_v57, %v5356_v53  ;;  %10339 = vrcp.f32 %v4528_v37  ;;  %v4531_v33 = vadd.f32 1.0, %v10318_v50 }
 0x70b   : > { %v10322_v20 = vpop.eup %10321  ;;  %10341 = vrcp.f32 %v4529_v19  ;;  %v4530_v36 = vadd.f32 1.0, %v10320_v24  ;;  %v14136_v40 = vmul.f32 -1.442695, %v4168_v34  ;;  %v4281_v15 = vadd.f32 %v13825_v17, %v13281_v0 }
 0x70c   : > { %v10324_v61 = vpop.eup %10323  ;;  %v5674_v62 = vsub.f32 0.0, %v5610_v9  ;;  %v5612_v46 = vadd.f32 %v5548_v28, %v5420_v49  ;;  %10343 = vrcp.f32 %v4531_v33  ;;  %v4532_v54 = vadd.f32 1.0, %v10322_v20 }
 0x70d   : > { %v10326_v7 = vpop.eup %10325  ;;  %10345 = vrcp.f32 %v4530_v36  ;;  %v4533_v16 = vadd.f32 1.0, %v10324_v61  ;;  %v4172_v8 = vadd.f32 %v13844_v43, %v13274_v14  ;;  %v5675_v22 = vsub.f32 0.0, %v14041_v26  ;;  %v14156_v61 = vpop.f32.mrb[116].mxu0 }
 0x70e   : > { %v10328_v53 = vpop.eup %10327  ;;  %v5737_v34 = vadd.f32 %v14066_v45, %v5674_v62  ;;  %v4717_v37 = vadd.f32 1e-12, %v10326_v7  ;;  %10347 = vrcp.f32 %v4532_v54  ;;  %v5676_v50 = vsub.f32 0.0, %v5612_v46  ;;  %16461 = vst [vmem:[#allocation20_spill] sm:$0xff] %v14156_v61 }
 0x70f   : > { %v10330_v9 = vpop.eup %10329  ;;  %10349 = vrcp.f32 %v4533_v16  ;;  %v4535_v49 = vadd.f32 1.0, %v10328_v53  ;;  %v4285_v19 = vadd.f32 %v13846_v11, %v13276_v13  ;;  %v4174_v45 = vadd.f32 %v13852_v41, %v13279_v56 }
 0x710   : > { %v10332_v24 = vpop.eup %10331  ;;  %v5738_v17 = vadd.f32 %v5737_v34, %v5675_v22  ;;  %4781 = vst [vmem:[%s13436_s24 + $0x140] sm:$0xff] %v4717_v37  ;;  %v4845_v57 = vadd.f32 1e-12, %v4717_v37  ;;  %v4719_v43 = vadd.f32 1e-12, %v10330_v9  ;;  %10351 = vpow2.f32 %v8855_v60 }
 0x711   : > { %v10334_v28 = vpop.eup %10333  ;;  %10353 = vrcp.f32 %v4535_v49  ;;  %v4534_v26 = vadd.f32 1.0, %v10332_v24  ;;  %v4287_v62 = vadd.f32 %v13855_v32, %v13281_v0  ;;  %v14158_v54 = vmul.f32 -1.442695, %v4281_v15 }
 0x712   : > { %v14151_v33 = vpop.eup %10335  ;;  %v14153_v20 = vadd.f32 %v5738_v17, %v5676_v50  ;;  %10355 = vlog2.f32 %v4845_v57  ;;  %v5165_v11 = vsub.f32 1.0, %v4845_v57  ;;  %4783 = vst [vmem:[%s13436_s24 + $0x150] sm:$0xff] %v4719_v43  ;;  %v4847_v36 = vadd.f32 1e-12, %v4719_v43  ;;  %v14168_v50 = vpop.f32.mrb[117].mxu0 }
 0x713   : > { %v10338_v60 = vpop.eup %10337  ;;  %10357 = vrcp.f32 %v4534_v26  ;;  %v4536_v46 = vadd.f32 1.0, %v10334_v28  ;;  %v14160_v41 = vmul.f32 -1.442695, %v4172_v8  ;;  %v14162_v53 = vmul.f32 -1.442695, %v4285_v19  ;;  %16462 = vst [vmem:[#allocation23_spill] sm:$0xff] %v14168_v50 }
 0x714   : > { %v10340_v7 = vpop.eup %10339  ;;  %10359 = vlog2.f32 %v5165_v11  ;;  %v5167_v32 = vsub.f32 1.0, %v4847_v36  ;;  %v4718_v16 = vadd.f32 1e-12, %v10338_v60  ;;  %v14164_v37 = vmul.f32 -1.442695, %v4174_v45  ;;  %v14177_v45 = vpop.f32.mrb[118].mxu0 }
 0x715   : > { %v10342_v22 = vpop.eup %10341  ;;  %10361 = vlog2.f32 %v4847_v36  ;;  %v4720_v34 = vadd.f32 1e-12, %v10340_v7  ;;  %v4176_v9 = vadd.f32 %v13873_v63, %v13274_v14  ;;  %v14171_v24 = vmul.f32 -1.442695, %v4287_v62  ;;  %16463 = vst [vmem:[#allocation21_spill] sm:$0xff] %v14177_v45  ;;  %v16470_v50 = vld [vmem:[#allocation30_spill] sm:$0xff] }
 0x716   : > { %v10344_v15 = vpop.eup %10343  ;;  %10363 = vlog2.f32 %v5167_v32  ;;  %4782 = vst [vmem:[%s13436_s24 + $0x148] sm:$0xff] %v4718_v16  ;;  %v4846_v8 = vadd.f32 1e-12, %v4718_v16  ;;  %v4721_v49 = vadd.f32 1e-12, %v10342_v22  ;;  %v4289_v43 = vadd.f32 %v13879_v52, %v13276_v13  ;;  %v16465_v22 = vld [vmem:[#allocation15_spill] sm:$0xff] }
 0x717   : > { %v10346_v19 = vpop.eup %10345  ;;  %4784 = vst [vmem:[%s13436_s24 + $0x158] sm:$0xff] %v4720_v34  ;;  %v4848_v17 = vadd.f32 1e-12, %v4720_v34  ;;  %v4723_v57 = vadd.f32 1e-12, %v10344_v15  ;;  %10365 = vrcp.f32 %v4536_v46  ;;  %v14180_v46 = vpop.f32.mrb[119].mxu0  ;;  %v14200_v59 = vadd.f32 %v16465_v22, %v13279_v56 }
 0x718   : > { %v10348_v14 = vpop.eup %10347  ;;  %10367 = vlog2.f32 %v4846_v8  ;;  %v5166_v63 = vsub.f32 1.0, %v4846_v8  ;;  %4785 = vst [vmem:[%s13436_s24 + $0x160] sm:$0xff] %v4721_v49  ;;  %v4849_v28 = vadd.f32 1e-12, %v4721_v49  ;;  %v4722_v26 = vadd.f32 1e-12, %v10346_v19 }
 0x719   : > { %v10350_v62 = vpop.eup %10349  ;;  %10369 = vlog2.f32 %v4848_v17  ;;  %v5168_v11 = vsub.f32 1.0, %v4848_v17  ;;  %4787 = vst [vmem:[%s13436_s24 + $0x170] sm:$0xff] %v4723_v57  ;;  %v4851_v36 = vadd.f32 1e-12, %v4723_v57  ;;  %v4724_v60 = vadd.f32 1e-12, %v10348_v14 }
 0x71a   : > { %16464 = vst [vmem:[#allocation26_spill] sm:$0xff] %v14180_v46  ;;  %v14182_v13 = vpop.eup %10351  ;;  %10371 = vlog2.f32 %v5166_v63  ;;  %v5169_v52 = vsub.f32 1.0, %v4849_v28  ;;  %4786 = vst [vmem:[%s13436_s24 + $0x168] sm:$0xff] %v4722_v26  ;;  %v4850_v7 = vadd.f32 1e-12, %v4722_v26 }
 0x71b   : > { %v4725_v32 = vadd.f32 1e-12, %v10350_v62  ;;  %v10354_v16 = vpop.eup %10353  ;;  %10373 = vlog2.f32 %v5168_v11  ;;  %v5171_v34 = vsub.f32 1.0, %v4851_v36  ;;  %4788 = vst [vmem:[%s13436_s24 + $0x178] sm:$0xff] %v4724_v60  ;;  %v4852_v15 = vadd.f32 1e-12, %v4724_v60 }
 0x71c   : > { %v14190_v8 = vld [vmem:[%s16213_s15] sm:$0x3]  ;;  %v10356_v49 = vpop.eup %10355  ;;  %10375 = vlog2.f32 %v4849_v28  ;;  %v4727_v17 = vadd.f32 1e-12, %v10354_v16  ;;  %v14193_v57 = vmul.f32 -1.442695, %v4176_v9 }
 0x71d   : > { %4789 = vst [vmem:[%s13436_s24 + $0x180] sm:$0xff] %v4725_v32  ;;  %v4853_v19 = vadd.f32 1e-12, %v4725_v32  ;;  %v10358_v14 = vpop.eup %10357  ;;  %v5014_v63 = vmul.f32 0.6931472, %v10356_v49  ;;  %10377 = vlog2.f32 %v5169_v52  ;;  %v5170_v26 = vsub.f32 1.0, %v4850_v7 }
 0x71e   : > { %v14195_v62 = vmul.f32 -1.442695, %v4289_v43  ;;  %v10360_v11 = vpop.eup %10359  ;;  %10379 = vlog2.f32 %v4851_v36  ;;  %4791 = vst [vmem:[%s13436_s24 + $0x190] sm:$0xff] %v4727_v17  ;;  %v4726_v60 = vadd.f32 1e-12, %v10358_v14  ;;  %v16466_v28 = vld [vmem:[#allocation13_spill] sm:$0xff] }
 0x71f   : > { %v14204_v32 = vrot.slane %v14190_v8, %v16466_v28  ;;  %v14206_v9 = vpop.f32.mrb[120].mxu0  ;;  %v10362_v16 = vpop.eup %10361  ;;  %v5101_v52 = vmax.f32 %v5014_v63, -100.0  ;;  %v5270_v49 = vmul.f32 0.6931472, %v10360_v11  ;;  %10381 = vlog2.f32 %v5171_v34 }
 0x720   : > { %16467 = vst [vmem:[#allocation24_spill] sm:$0xff] %v14206_v9  ;;  %v5172_v43 = vsub.f32 1.0, %v4852_v15  ;;  %v14208_v46 = vpop.f32.mrb[121].mxu0  ;;  %v10364_v36 = vpop.eup %10363  ;;  %v5018_v48 = vmul.f32 0.6931472, %v10362_v16  ;;  %10383 = vlog2.f32 %v4850_v7  ;;  %v5173_v14 = vsub.f32 1.0, %v4853_v19 }
 0x721   : > { %16468 = vst [vmem:[#allocation27_spill] sm:$0xff] %v14208_v46  ;;  %v14210_v45 = vadd.f32 1e-12, %v4727_v17  ;;  %4790 = vst [vmem:[%s13436_s24 + $0x188] sm:$0xff] %v4726_v60  ;;  %v14213_v56 = vpop.f32.mrb[122].mxu0  ;;  %v10366_v22 = vpop.eup %10365  ;;  %v5357_v28 = vmax.f32 %v5270_v49, -100.0  ;;  %v5421_v9 = vmul.f32 %v5101_v52, %v16470_v50  ;;  %10385 = vlog2.f32 %v5170_v26 }
 0x722   : > { %16469 = vst [vmem:[#allocation25_spill] sm:$0xff] %v14213_v56  ;;  %v5274_v61 = vmul.f32 0.6931472, %v10364_v36  ;;  %v14216_v63 = vpop.f32.mrb[123].mxu0  ;;  %v10368_v34 = vpop.eup %10367  ;;  %v5103_v11 = vmax.f32 %v5018_v48, -100.0  ;;  %10387 = vlog2.f32 %v4852_v15  ;;  %v16472_v46 = vsub.f32 1.0, %v16470_v50 }
 0x723   : > { %16471 = vst [vmem:[#allocation15_spill] sm:$0xff] %v14216_v63  ;;  %v14218_v16 = vadd.f32 1e-12, %v4726_v60  ;;  %v4728_v7 = vadd.f32 1e-12, %v10366_v22  ;;  %v10370_v17 = vpop.eup %10369  ;;  %10389 = vlog2.f32 %v5172_v43  ;;  %v16473_v60 = vsub.f32 1.0, %v13877_v18 }
 0x724   : > { %v5549_v2 = vmul.f32 %v16472_v46, %v5357_v28  ;;  %v5359_v56 = vmax.f32 %v5274_v61, -100.0  ;;  %v5016_v39 = vmul.f32 0.6931472, %v10368_v34  ;;  %v10372_v49 = vpop.eup %10371  ;;  %v5423_v52 = vmul.f32 %v5103_v11, %v13877_v18  ;;  %v14228_v43 = vpop.f32.mrb[124].mxu0  ;;  %v16475_v36 = vld [vmem:[#allocation28_spill] sm:$0xff] }
 0x725   : > { %v5020_v26 = vmul.f32 0.6931472, %v10370_v17  ;;  %10391 = vlog2.f32 %v4853_v19  ;;  %4792 = vst [vmem:[%s13436_s24 + $0x198] sm:$0xff] %v4728_v7  ;;  %v10374_v48 = vpop.eup %10373  ;;  %v5272_v31 = vmul.f32 0.6931472, %v10372_v49  ;;  %16474 = vst [vmem:[#allocation30_spill] sm:$0xff] %v14228_v43 }
 0x726   : > { %v5613_v15 = vadd.f32 %v5549_v2, %v5421_v9  ;;  %v5551_v22 = vmul.f32 %v16473_v60, %v5359_v56  ;;  %v5102_v63 = vmax.f32 %v5016_v39, -100.0  ;;  %v10376_v50 = vpop.eup %10375  ;;  %v5276_v61 = vmul.f32 0.6931472, %v10374_v48  ;;  %v14231_v2 = vpop.f32.mrb[125].mxu0 }
 0x727   : > { %v5104_v46 = vmax.f32 %v5020_v26, -100.0  ;;  %10393 = vlog2.f32 %v5173_v14  ;;  %v10378_v34 = vpop.eup %10377  ;;  %v5358_v17 = vmax.f32 %v5272_v31, -100.0  ;;  %16476 = vst [vmem:[#allocation28_spill] sm:$0xff] %v14231_v2  ;;  %v5022_v56 = vmul.f32 0.6931472, %v10376_v50  ;;  %v14234_v26 = vpop.f32.mrb[126].mxu0 }
 0x728   : > { %v5677_v19 = vsub.f32 0.0, %v5613_v15  ;;  %v5615_v11 = vadd.f32 %v5551_v22, %v5423_v52  ;;  %v5422_v12 = vmul.f32 %v5102_v63, %v16475_v36  ;;  %v10380_v18 = vpop.eup %10379  ;;  %v5360_v9 = vmax.f32 %v5276_v61, -100.0  ;;  %16477 = vst [vmem:[#allocation51_spill] sm:$0xff] %v14234_v26  ;;  %v14241_v63 = vpop.f32.mrb[127].mxu0 }
 0x729   : > { %v5424_v39 = vmul.f32 %v5104_v46, %v13849_v10  ;;  %v5278_v49 = vmul.f32 0.6931472, %v10378_v34  ;;  %v10382_v14 = vpop.eup %10381  ;;  %v16478_v60 = vsub.f32 1.0, %v16475_v36  ;;  %v5026_v52 = vmul.f32 0.6931472, %v10380_v18  ;;  %16479 = vst [vmem:[#allocation52_spill] sm:$0xff] %v14241_v63 }
 0x72a   : > { %v5740_v48 = vadd.f32 %v14153_v20, %v5677_v19  ;;  %v14239_v31 = vadd.f32 1e-12, %v4728_v7  ;;  %v10384_v22 = vpop.eup %10383  ;;  %v16480_v61 = vsub.f32 1.0, %v13849_v10  ;;  %v5105_v46 = vmax.f32 %v5022_v56, -100.0  ;;  %v14245_v2 = vpop.f32.mrb[128].mxu0  ;;  %v16483_v18 = vld [vmem:[#allocation31_spill] sm:$0xff] }
 0x72b   : > { %v5550_v15 = vmul.f32 %v16478_v60, %v5358_v17  ;;  %v5361_v50 = vmax.f32 %v5278_v49, -100.0  ;;  %v5282_v34 = vmul.f32 0.6931472, %v10382_v14  ;;  %16481 = vst [vmem:[#allocation53_spill] sm:$0xff] %v14245_v2  ;;  %v10386_v26 = vpop.eup %10385  ;;  %v5107_v20 = vmax.f32 %v5026_v52, -100.0  ;;  %v14248_v36 = vpop.f32.mrb[129].mxu0 }
 0x72c   : > { %v5552_v28 = vmul.f32 %v16480_v61, %v5360_v9  ;;  %v5024_v19 = vmul.f32 0.6931472, %v10384_v22  ;;  %10395 = vlog2.f32 %v14210_v45  ;;  %16482 = vst [vmem:[#allocation54_spill] sm:$0xff] %v14248_v36  ;;  %v10388_v7 = vpop.eup %10387  ;;  %v5425_v60 = vmul.f32 %v5105_v46, %v16483_v18  ;;  %v14253_v49 = vpop.f32.mrb[130].mxu0 }
 0x72d   : > { %v5614_v43 = vadd.f32 %v5550_v15, %v5422_v12  ;;  %v16484_v10 = vsub.f32 1.0, %v16483_v18  ;;  %v5363_v56 = vmax.f32 %v5282_v34, -100.0  ;;  %16485 = vst [vmem:[#allocation31_spill] sm:$0xff] %v14253_v49  ;;  %v10390_v14 = vpop.eup %10389  ;;  %v5427_v12 = vmul.f32 %v5107_v20, %v14060_v29  ;;  %v14256_v22 = vpop.f32.mrb[131].mxu0  ;;  %v16488_v34 = vld [vmem:[#allocation29_spill] sm:$0xff] }
 0x72e   : > { %v5616_v17 = vadd.f32 %v5552_v28, %v5424_v39  ;;  %v5106_v15 = vmax.f32 %v5024_v19, -100.0  ;;  %v5280_v52 = vmul.f32 0.6931472, %v10386_v26  ;;  %16486 = vst [vmem:[#allocation55_spill] sm:$0xff] %v14256_v22  ;;  %v5679_v36 = vsub.f32 0.0, %v5615_v11 }
 0x72f   : > { %v5553_v9 = vmul.f32 %v16484_v10, %v5361_v50  ;;  %v5678_v61 = vsub.f32 0.0, %v5614_v43  ;;  %v10392_v2 = vpop.eup %10391  ;;  %v16487_v28 = vsub.f32 1.0, %v14060_v29  ;;  %v5028_v46 = vmul.f32 0.6931472, %v10388_v7 }
 0x730   : > { %v5362_v50 = vmax.f32 %v5280_v52, -100.0  ;;  %v5426_v10 = vmul.f32 %v5106_v15, %v16488_v34  ;;  %v5284_v49 = vmul.f32 0.6931472, %v10390_v14  ;;  %v5680_v43 = vsub.f32 0.0, %v5616_v17  ;;  %v16494_v15 = vld [vmem:[#allocation34_spill] sm:$0xff] }
 0x731   : > { %v5617_v63 = vadd.f32 %v5553_v9, %v5425_v60  ;;  %v5555_v39 = vmul.f32 %v16487_v28, %v5363_v56  ;;  %v5741_v18 = vadd.f32 %v5740_v48, %v5678_v61  ;;  %v10394_v47 = vpop.eup %10393  ;;  %v5108_v20 = vmax.f32 %v5028_v46, -100.0  ;;  %v14263_v9 = vpop.f32.mrb[132].mxu0 }
 0x732   : > { %v5030_v19 = vmul.f32 0.6931472, %v10392_v2  ;;  %v16489_v22 = vsub.f32 1.0, %v16488_v34  ;;  %v5364_v11 = vmax.f32 %v5284_v49, -100.0  ;;  %v5286_v60 = vmul.f32 0.6931472, %v10394_v47 }
 0x733   : > { %v5619_v6 = vadd.f32 %v5555_v39, %v5427_v12  ;;  %v5742_v26 = vadd.f32 %v5741_v18, %v5679_v36  ;;  %16490 = vst [vmem:[#allocation29_spill] sm:$0xff] %v14263_v9  ;;  %v5681_v29 = vsub.f32 0.0, %v5617_v63  ;;  %v5428_v48 = vmul.f32 %v5108_v20, %v13868_v35  ;;  %v14268_v14 = vpop.f32.mrb[133].mxu0 }
 0x734   : > { %v5554_v42 = vmul.f32 %v16489_v22, %v5362_v50  ;;  %v5109_v7 = vmax.f32 %v5030_v19, -100.0  ;;  %v16491_v56 = vsub.f32 1.0, %v14210_v45  ;;  %16492 = vst [vmem:[#allocation56_spill] sm:$0xff] %v14268_v14  ;;  %v16493_v2 = vsub.f32 1.0, %v13868_v35  ;;  %v16497_v50 = vld [vmem:[#allocation14_spill] sm:$0xff] }
 0x735   : > { %v5743_v17 = vadd.f32 %v5742_v26, %v5680_v43  ;;  %v5365_v12 = vmax.f32 %v5286_v60, -100.0  ;;  %v5176_v47 = vsub.f32 1.0, %v14239_v31  ;;  %v4537_v63 = vadd.f32 1.0, %v14151_v33  ;;  %v16498_v26 = vld [vmem:[#allocation40_spill] sm:$0xff]  ;;  %v16564_v14 = vld [vmem:[#allocation26_spill] sm:$0xff] }
 0x736   : > { %10397 = vlog2.f32 %v16491_v56  ;;  %v5618_v61 = vadd.f32 %v5554_v42, %v5426_v10  ;;  %v5556_v36 = vmul.f32 %v16493_v2, %v5364_v11  ;;  %v5429_v49 = vmul.f32 %v5109_v7, %v16494_v15  ;;  %v10396_v52 = vpop.eup %10395 }
 0x737   : > { %10399 = vlog2.f32 %v14218_v16  ;;  %v5744_v22 = vadd.f32 %v5743_v17, %v5681_v29  ;;  %v16495_v39 = vsub.f32 1.0, %v16494_v15  ;;  %v5034_v42 = vmul.f32 0.6931472, %v10396_v52  ;;  %v16501_v29 = vld [vmem:[#allocation41_spill] sm:$0xff] }
 0x738   : > { %v5682_v45 = vsub.f32 0.0, %v5618_v61  ;;  %v5620_v28 = vadd.f32 %v5556_v36, %v5428_v48  ;;  %v16496_v35 = vsub.f32 1.0, %v14218_v16  ;;  %v4539_v18 = vadd.f32 1.0, %v14182_v13  ;;  %v14289_v16 = vpop.f32.mrb[134].mxu0  ;;  %v16504_v36 = vld [vmem:[#allocation18_spill] sm:$0xff] }
 0x739   : > { %v5557_v46 = vmul.f32 %v16495_v39, %v5365_v12  ;;  %v14283_v34 = vrot.slane %v14190_v8, %v16497_v50  ;;  %v5683_v10 = vsub.f32 0.0, %v5619_v6  ;;  %v5111_v20 = vmax.f32 %v5034_v42, -100.0  ;;  %16499 = vst [vmem:[#allocation34_spill] sm:$0xff] %v14289_v16  ;;  %v14295_v6 = vpop.f32.mrb[135].mxu0 }
 0x73a   : > { %10401 = vlog2.f32 %v16496_v35  ;;  %v5745_v43 = vadd.f32 %v5744_v22, %v5682_v45  ;;  %v8862_v19 = vmul.f32 -1.442695, %v14200_v59  ;;  %v4291_v11 = vadd.f32 %v16498_v26, %v13281_v0  ;;  %16500 = vst [vmem:[#allocation40_spill] sm:$0xff] %v14295_v6  ;;  %v16502_v0 = vld [vmem:[#allocation42_spill] sm:$0xff]  ;;  %v14337_v22 = vpop.f32.mrb[136].mxu0  ;;  %v16565_v6 = vld [vmem:[#allocation24_spill] sm:$0xff] }
 0x73b   : > { %v5621_v33 = vadd.f32 %v5557_v46, %v5429_v49  ;;  %10403 = vlog2.f32 %v14239_v31  ;;  %v5684_v60 = vsub.f32 0.0, %v5620_v28  ;;  %v14293_v8 = vadd.f32 %v13914_v3, %v14204_v32  ;;  %v16503_v3 = vld [vmem:[#allocation43_spill] sm:$0xff]  ;;  %16505 = vst [vmem:[#allocation41_spill] sm:$0xff] %v14337_v22 }
 0x73c   : > { %10405 = vlog2.f32 %v5176_v47  ;;  %v5746_v13 = vadd.f32 %v5745_v43, %v5683_v10  ;;  %v5431_v31 = vmul.f32 %v5111_v20, %v14085_v1  ;;  %v14300_v59 = vadd.f32 %v16501_v29, %v14283_v34 }
 0x73d   : > { %10407 = vrcp.f32 %v4537_v63  ;;  %v14304_v48 = vadd.f32 %v16502_v0, %v14204_v32  ;;  %v5685_v56 = vsub.f32 0.0, %v5621_v33  ;;  %v14309_v17 = vadd.f32 %v16503_v3, %v14283_v34 }
 0x73e   : > { %10409 = vrcp.f32 %v4539_v18  ;;  %v5747_v7 = vadd.f32 %v5746_v13, %v5684_v60  ;;  %v8864_v2 = vmul.f32 -1.442695, %v4291_v11  ;;  %v14314_v12 = vadd.f32 %v16504_v36, %v14204_v32 }
 0x73f   : > { %10411 = vpow2.f32 %v14136_v40  ;;  %v14318_v15 = vadd.f32 %v13983_v55, %v14283_v34  ;;  %v14324_v40 = vmul.f32 1.442695, %v14293_v8  ;;  %v14331_v52 = vmul.f32 1.442695, %v14304_v48 }
 0x740   : > { %v10398_v61 = vpop.eup %10397  ;;  %10413 = vpow2.f32 %v14158_v54  ;;  %v14320_v49 = vadd.f32 %v5747_v7, %v5685_v56  ;;  %v14328_v54 = vmul.f32 1.442695, %v14300_v59  ;;  %v14335_v55 = vadd.f32 %v14010_v25, %v14204_v32  ;;  %v16511_v7 = vld [vmem:[#allocation32_spill] sm:$0xff] }
 0x741   : > { %v5290_v47 = vmul.f32 0.6931472, %v10398_v61  ;;  %10415 = vpow2.f32 %v14160_v41  ;;  %v10400_v63 = vpop.eup %10399  ;;  %v14341_v28 = vmul.f32 1.442695, %v14309_v17  ;;  %v14348_v42 = vmul.f32 1.442695, %v14314_v12 }
 0x742   : > { %10417 = vpow2.f32 %v14162_v53  ;;  %v5032_v41 = vmul.f32 0.6931472, %v10400_v63  ;;  %v14343_v53 = vpop.f32.mrb[137].mxu0  ;;  %v14351_v25 = vmul.f32 1.442695, %v14318_v15  ;;  %vm6266_vm0 = vcmp.gt.f32.partialorder %v14293_v8, 0.0 }
 0x743   : > { %v5367_v45 = vmax.f32 %v5290_v47, -100.0  ;;  %10419 = vpow2.f32 %v14164_v37  ;;  %16506 = vst [vmem:[#allocation42_spill] sm:$0xff] %v14343_v53  ;;  %v14353_v35 = vpop.f32.mrb[138].mxu0  ;;  %v16508_v37 = vsub.f32 1.0, %v14085_v1  ;;  %v14363_v60 = vmul.f32 1.442695, %v14335_v55 }
 0x744   : > { %v10402_v39 = vpop.eup %10401  ;;  %10421 = vpow2.f32 %v14171_v24  ;;  %16507 = vst [vmem:[#allocation43_spill] sm:$0xff] %v14353_v35  ;;  %v5110_v43 = vmax.f32 %v5032_v41, -100.0  ;;  %v14358_v20 = vpop.f32.mrb[139].mxu0  ;;  %vm6268_vm1 = vcmp.gt.f32.partialorder %v14304_v48, 0.0  ;;  %vm6267_vm2 = vcmp.gt.f32.partialorder %v14300_v59, 0.0 }
 0x745   : > { %v10404_v18 = vpop.eup %10403  ;;  %v5559_v10 = vmul.f32 %v16508_v37, %v5367_v45  ;;  %v5288_v33 = vmul.f32 0.6931472, %v10402_v39  ;;  %10423 = vpow2.f32 %v14193_v57  ;;  %16509 = vst [vmem:[#allocation18_spill] sm:$0xff] %v14358_v20  ;;  %v14365_v13 = vpop.f32.mrb[140].mxu0  ;;  %v14380_v37 = vadd.f32 %v14033_v23, %v14204_v32  ;;  %v16539_v20 = vld [vmem:[#allocation35_spill] sm:$0xff] }
 0x746   : > { %v10406_v26 = vpop.eup %10405  ;;  %v5036_v11 = vmul.f32 0.6931472, %v10404_v18  ;;  %10425 = vpow2.f32 %v14195_v62  ;;  %16510 = vst [vmem:[#allocation57_spill] sm:$0xff] %v14365_v13  ;;  %v5430_v56 = vmul.f32 %v5110_v43, %v16511_v7  ;;  %v14368_v57 = vpop.f32.mrb[141].mxu0  ;;  %v14372_v62 = vadd.f32 %v14014_v38, %v14283_v34 }
 0x747   : > { %v10408_v29 = vpop.eup %10407  ;;  %v5623_v1 = vadd.f32 %v5559_v10, %v5431_v31  ;;  %v5366_v0 = vmax.f32 %v5288_v33, -100.0  ;;  %v5292_v3 = vmul.f32 0.6931472, %v10406_v26  ;;  %16512 = vst [vmem:[#allocation32_spill] sm:$0xff] %v14368_v57  ;;  %10427 = vpow2.f32 %v8862_v19  ;;  %v14374_v63 = vpop.f32.mrb[142].mxu0 }
 0x748   : > { %v10410_v61 = vpop.eup %10409  ;;  %v5112_v36 = vmax.f32 %v5036_v11, -100.0  ;;  %v4729_v47 = vadd.f32 1e-12, %v10408_v29  ;;  %16513 = vst [vmem:[#allocation58_spill] sm:$0xff] %v14374_v63  ;;  %v16514_v31 = vsub.f32 1.0, %v16511_v7  ;;  %v14382_v10 = vpop.f32.mrb[143].mxu0  ;;  %10429 = vpow2.f32 %v8864_v2 }
 0x749   : > { %v10412_v45 = vpop.eup %10411  ;;  %v5368_v39 = vmax.f32 %v5292_v3, -100.0  ;;  %v4731_v18 = vadd.f32 1e-12, %v10410_v61  ;;  %16515 = vst [vmem:[#allocation59_spill] sm:$0xff] %v14382_v10  ;;  %v14388_v33 = vadd.f32 %v14039_v30, %v14283_v34  ;;  %v16516_v29 = vsub.f32 1.0, %v14063_v58 }
 0x74a   : > { %v5558_v41 = vmul.f32 %v16514_v31, %v5366_v0  ;;  %v10414_v19 = vpop.eup %10413  ;;  %v5432_v43 = vmul.f32 %v5112_v36, %v14063_v58  ;;  %4793 = vst [vmem:[%s13436_s24 + $0x1a0] sm:$0xff] %v4729_v47  ;;  %v4857_v38 = vadd.f32 1e-12, %v4729_v47  ;;  %v14395_v7 = vadd.f32 %v14044_v27, %v14204_v32 }
 0x74b   : > { %v10416_v26 = vpop.eup %10415  ;;  %v5560_v0 = vmul.f32 %v16516_v29, %v5368_v39  ;;  %4795 = vst [vmem:[%s13436_s24 + $0x1b0] sm:$0xff] %v4731_v18  ;;  %v4859_v23 = vadd.f32 1e-12, %v4731_v18  ;;  %v4538_v36 = vadd.f32 1.0, %v10412_v45  ;;  %v4540_v2 = vadd.f32 1.0, %v10414_v19 }
 0x74c   : > { %v5622_v11 = vadd.f32 %v5558_v41, %v5430_v56  ;;  %v10418_v3 = vpop.eup %10417  ;;  %10431 = vlog2.f32 %v4857_v38  ;;  %v5177_v61 = vsub.f32 1.0, %v4857_v38  ;;  %v14397_v56 = vpop.f32.mrb[144].mxu0  ;;  %v4541_v41 = vadd.f32 1.0, %v10416_v26 }
 0x74d   : > { %v10420_v47 = vpop.eup %10419  ;;  %v5624_v30 = vadd.f32 %v5560_v0, %v5432_v43  ;;  %10433 = vlog2.f32 %v4859_v23  ;;  %v5179_v24 = vsub.f32 1.0, %v4859_v23  ;;  %16517 = vst [vmem:[#allocation60_spill] sm:$0xff] %v14397_v56  ;;  %v14400_v39 = vmul.f32 1.442695, %v14372_v62  ;;  %v14406_v18 = vpop.f32.mrb[145].mxu0 }
 0x74e   : > { %v5686_v31 = vsub.f32 0.0, %v5622_v11  ;;  %v10422_v58 = vpop.eup %10421  ;;  %10435 = vlog2.f32 %v5177_v61  ;;  %v14404_v27 = vadd.f32 %v14049_v44, %v14283_v34  ;;  %16519 = vst [vmem:[#allocation62_spill] sm:$0xff] %v14406_v18  ;;  %v5687_v19 = vsub.f32 0.0, %v5623_v1  ;;  %v14409_v11 = vpop.f32.mrb[146].mxu0 }
 0x74f   : > { %v10424_v45 = vpop.eup %10423  ;;  %10437 = vlog2.f32 %v5179_v24  ;;  %v4543_v38 = vadd.f32 1.0, %v10418_v3  ;;  %16520 = vst [vmem:[#allocation63_spill] sm:$0xff] %v14409_v11  ;;  %v4542_v26 = vadd.f32 1.0, %v10420_v47  ;;  %v14412_v0 = vmul.f32 1.442695, %v14380_v37  ;;  %v14417_v44 = vpop.f32.mrb[147].mxu0 }
 0x750   : > { %16518 = vst [vmem:[#allocation61_spill] sm:$0xff] %v14404_v27  ;;  %v5749_v43 = vadd.f32 %v14320_v49, %v5686_v31  ;;  %v10426_v29 = vpop.eup %10425  ;;  %10439 = vrcp.f32 %v4538_v36  ;;  %v14415_v23 = vmul.f32 1.442695, %v14388_v33  ;;  %16521 = vst [vmem:[#allocation64_spill] sm:$0xff] %v14417_v44  ;;  %v5688_v61 = vsub.f32 0.0, %v5624_v30  ;;  %v16524_v30 = vld [vmem:[#allocation19_spill] sm:$0xff] }
 0x751   : > { %10441 = vrcp.f32 %v4540_v2  ;;  %v4544_v1 = vadd.f32 1.0, %v10422_v58  ;;  %v10428_v49 = vpop.eup %10427  ;;  %v4545_v24 = vadd.f32 1.0, %v10424_v45  ;;  %v14421_v3 = vadd.f32 %v14082_v5, %v14204_v32  ;;  %v16528_v5 = vld [vmem:[#allocation47_spill] sm:$0xff] }
 0x752   : > { %v5750_v46 = vadd.f32 %v5749_v43, %v5687_v19  ;;  %10443 = vrcp.f32 %v4541_v41  ;;  %v14425_v36 = vadd.f32 %v14092_v51, %v14283_v34  ;;  %v4547_v31 = vadd.f32 1.0, %v10426_v29  ;;  %v10430_v2 = vpop.eup %10429  ;;  %v16526_v41 = vld [vmem:[#allocation17_spill] sm:$0xff] }
 0x753   : > { %16522 = vst [vmem:[#allocation65_spill] sm:$0xff] %v14421_v3  ;;  %10445 = vrcp.f32 %v4543_v38  ;;  %v14431_v19 = vadd.f32 %v16524_v30, %v14204_v32  ;;  %v4546_v58 = vadd.f32 1.0, %v10428_v49  ;;  %v14435_v45 = vadd.f32 %v16526_v41, %v14283_v34  ;;  %v16530_v38 = vld [vmem:[#allocation48_spill] sm:$0xff] }
 0x754   : > { %16523 = vst [vmem:[#allocation66_spill] sm:$0xff] %v14425_v36  ;;  %v14427_v47 = vadd.f32 %v5750_v46, %v5688_v61  ;;  %10447 = vrcp.f32 %v4542_v26  ;;  %v14439_v43 = vadd.f32 %v16528_v5, %v14204_v32  ;;  %v4548_v51 = vadd.f32 1.0, %v10430_v2  ;;  %v14448_v61 = vpop.f32.mrb[148].mxu0 }
 0x755   : > { %16525 = vst [vmem:[#allocation19_spill] sm:$0xff] %v14431_v19  ;;  %16527 = vst [vmem:[#allocation17_spill] sm:$0xff] %v14435_v45  ;;  %10449 = vrcp.f32 %v4544_v1  ;;  %v14442_v46 = vmul.f32 1.442695, %v14395_v7  ;;  %v14446_v29 = vadd.f32 %v16530_v38, %v14283_v34  ;;  %v14451_v49 = vmul.f32 1.442695, %v14404_v27 }
 0x756   : > { %16529 = vst [vmem:[#allocation47_spill] sm:$0xff] %v14439_v43  ;;  %16532 = vst [vmem:[#allocation67_spill] sm:$0xff] %v14448_v61  ;;  %v10432_v26 = vpop.eup %10431  ;;  %10451 = vrcp.f32 %v4545_v24  ;;  %v14454_v30 = vmul.f32 1.442695, %v14421_v3  ;;  %v16533_v1 = vld [vmem:[#allocation22_spill] sm:$0xff]  ;;  %v14460_v41 = vpop.f32.mrb[149].mxu0 }
 0x757   : > { %16531 = vst [vmem:[#allocation48_spill] sm:$0xff] %v14446_v29  ;;  %v14458_v2 = vadd.f32 %v16533_v1, %v14204_v32  ;;  %16535 = vst [vmem:[#allocation68_spill] sm:$0xff] %v14460_v41  ;;  %v10434_v5 = vpop.eup %10433  ;;  %v5038_v50 = vmul.f32 0.6931472, %v10432_v26  ;;  %10453 = vrcp.f32 %v4547_v31  ;;  %v14463_v38 = vmul.f32 1.442695, %v14425_v36 }
 0x758   : > { %v14466_v24 = vmul.f32 1.442695, %v14431_v19  ;;  %v10436_v4 = vpop.eup %10435  ;;  %v5042_v61 = vmul.f32 0.6931472, %v10434_v5  ;;  %10455 = vrcp.f32 %v4546_v58  ;;  %v14469_v44 = vmul.f32 1.442695, %v14435_v45 }
 0x759   : > { %16534 = vst [vmem:[#allocation22_spill] sm:$0xff] %v14458_v2  ;;  %v14472_v1 = vmul.f32 1.442695, %v14439_v43  ;;  %v10438_v11 = vpop.eup %10437  ;;  %v5113_v41 = vmax.f32 %v5038_v50, -100.0  ;;  %v5294_v18 = vmul.f32 0.6931472, %v10436_v4  ;;  %10457 = vrcp.f32 %v4548_v51 }
 0x75a   : > { %v14475_v31 = vmul.f32 1.442695, %v14446_v29  ;;  %v10440_v26 = vpop.eup %10439  ;;  %v5115_v63 = vmax.f32 %v5042_v61, -100.0  ;;  %v5298_v5 = vmul.f32 0.6931472, %v10438_v11  ;;  %10459 = vpow2.f32 %v14324_v40  ;;  %v14485_v61 = vpop.f32.mrb[150].mxu0 }
 0x75b   : > { %v14479_v58 = vmul.f32 1.442695, %v14458_v2  ;;  %v10442_v57 = vpop.eup %10441  ;;  %v5369_v13 = vmax.f32 %v5294_v18, -100.0  ;;  %v5433_v35 = vmul.f32 %v5113_v41, %v16539_v20  ;;  %v4730_v53 = vadd.f32 1e-12, %v10440_v26  ;;  %16540 = vst [vmem:[#allocation35_spill] sm:$0xff] %v14485_v61 }
 0x75c   : > { %16536 = vst [vmem:[#allocation69_spill] sm:$0xff] %v14475_v31  ;;  %v10444_v4 = vpop.eup %10443  ;;  %v5371_v50 = vmax.f32 %v5298_v5, -100.0  ;;  %v5435_v51 = vmul.f32 %v5115_v63, %v14088_v21  ;;  %v4732_v22 = vadd.f32 1e-12, %v10442_v57  ;;  %10461 = vpow2.f32 %v14328_v54  ;;  %v14491_v40 = vpop.f32.mrb[151].mxu0  ;;  %v16570_v19 = vld [vmem:[#allocation33_spill] sm:$0xff] }
 0x75d   : > { %16538 = vst [vmem:[#allocation70_spill] sm:$0xff] %v14479_v58  ;;  %v10446_v11 = vpop.eup %10445  ;;  %v16541_v10 = vsub.f32 1.0, %v16539_v20  ;;  %4794 = vst [vmem:[%s13436_s24 + $0x1a8] sm:$0xff] %v4730_v53  ;;  %v4858_v18 = vadd.f32 1e-12, %v4730_v53  ;;  %10463 = vpow2.f32 %v14331_v52  ;;  %v16543_v63 = vsub.f32 1.0, %v14088_v21 }
 0x75e   : > { %v4733_v41 = vadd.f32 1e-12, %v10444_v4  ;;  %16542 = vst [vmem:[#allocation71_spill] sm:$0xff] %v14491_v40  ;;  %v10448_v26 = vpop.eup %10447  ;;  %4796 = vst [vmem:[%s13436_s24 + $0x1b8] sm:$0xff] %v4732_v22  ;;  %v4860_v54 = vadd.f32 1e-12, %v4732_v22  ;;  %10465 = vpow2.f32 %v14341_v28 }
 0x75f   : > { %v5561_v56 = vmul.f32 %v16541_v10, %v5369_v13  ;;  %v5563_v57 = vmul.f32 %v16543_v63, %v5371_v50  ;;  %v4735_v5 = vadd.f32 1e-12, %v10446_v11  ;;  %v14497_v20 = vpop.f32.mrb[152].mxu0  ;;  %v10450_v13 = vpop.eup %10449  ;;  %10467 = vlog2.f32 %v4858_v18  ;;  %v16547_v22 = vld [vmem:[#allocation50_spill] sm:$0xff]  ;;  %v16571_v3 = vld [vmem:[#allocation16_spill] sm:$0xff] }
 0x760   : > { %16544 = vst [vmem:[#allocation72_spill] sm:$0xff] %v14497_v20  ;;  %v5178_v53 = vsub.f32 1.0, %v4858_v18  ;;  %4797 = vst [vmem:[%s13436_s24 + $0x1c0] sm:$0xff] %v4733_v41  ;;  %v4861_v52 = vadd.f32 1e-12, %v4733_v41  ;;  %v14500_v4 = vpop.f32.mrb[153].mxu0  ;;  %v10452_v40 = vpop.eup %10451  ;;  %10469 = vlog2.f32 %v4860_v54  ;;  %v14507_v50 = vadd.f32 %v16547_v22, %v14283_v34 }
 0x761   : > { %v5625_v10 = vadd.f32 %v5561_v56, %v5433_v35  ;;  %16545 = vst [vmem:[#allocation73_spill] sm:$0xff] %v14500_v4  ;;  %v14502_v61 = vadd.f32 %v5563_v57, %v5435_v51  ;;  %v5180_v21 = vsub.f32 1.0, %v4860_v54  ;;  %4799 = vst [vmem:[%s13436_s24 + $0x1d0] sm:$0xff] %v4735_v5  ;;  %v14509_v28 = vpop.f32.mrb[154].mxu0  ;;  %v10454_v35 = vpop.eup %10453  ;;  %v4734_v18 = vadd.f32 1e-12, %v10448_v26 }
 0x762   : > { %16548 = vst [vmem:[#allocation50_spill] sm:$0xff] %v14507_v50  ;;  %16549 = vst [vmem:[#allocation75_spill] sm:$0xff] %v14509_v28  ;;  %10471 = vlog2.f32 %v5178_v53  ;;  %v5181_v11 = vsub.f32 1.0, %v4861_v52  ;;  %v14511_v41 = vpop.f32.mrb[155].mxu0  ;;  %v10456_v51 = vpop.eup %10455  ;;  %v4863_v63 = vadd.f32 1e-12, %v4735_v5 }
 0x763   : > { %16546 = vst [vmem:[#allocation74_spill] sm:$0xff] %v14502_v61  ;;  %v5689_v56 = vsub.f32 0.0, %v5625_v10  ;;  %16550 = vst [vmem:[#allocation76_spill] sm:$0xff] %v14511_v41  ;;  %10473 = vlog2.f32 %v5180_v21  ;;  %v4736_v57 = vadd.f32 1e-12, %v10450_v13  ;;  %v16551_v54 = vld [vmem:[#allocation20_spill] sm:$0xff]  ;;  %v10458_v61 = vpop.eup %10457 }
 0x764   : > { %v14515_v22 = vadd.f32 %v16551_v54, %v14204_v32  ;;  %10475 = vlog2.f32 %v4861_v52  ;;  %4798 = vst [vmem:[%s13436_s24 + $0x1c8] sm:$0xff] %v4734_v18  ;;  %v4862_v10 = vadd.f32 1e-12, %v4734_v18  ;;  %v4737_v53 = vadd.f32 1e-12, %v10452_v40  ;;  %v16553_v13 = vld [vmem:[#allocation23_spill] sm:$0xff]  ;;  %v10460_v54 = vpop.eup %10459 }
 0x765   : > { %v14518_v28 = vadd.f32 %v14427_v47, %v5689_v56  ;;  %10477 = vlog2.f32 %v5181_v11  ;;  %4800 = vst [vmem:[%s13436_s24 + $0x1d8] sm:$0xff] %v4736_v57  ;;  %v4739_v26 = vadd.f32 1e-12, %v10454_v35  ;;  %v4738_v5 = vadd.f32 1e-12, %v10456_v51  ;;  %v16556_v40 = vld [vmem:[#allocation21_spill] sm:$0xff] }
 0x766   : > { %16552 = vst [vmem:[#allocation20_spill] sm:$0xff] %v14515_v22  ;;  %v14524_v21 = vadd.f32 %v16553_v13, %v14283_v34  ;;  %v5182_v41 = vsub.f32 1.0, %v4862_v10  ;;  %4801 = vst [vmem:[%s13436_s24 + $0x1e0] sm:$0xff] %v4737_v53  ;;  %v14527_v4 = vadd.f32 1e-12, %v10458_v61  ;;  %v14534_v52 = vadd.f32 %v16556_v40, %v14204_v32  ;;  %v14536_v56 = vpop.f32.mrb[156].mxu0  ;;  %v10462_v35 = vpop.eup %10461 }
 0x767   : > { %v14530_v47 = vmul.f32 1.442695, %v14507_v50  ;;  %16558 = vst [vmem:[#allocation78_spill] sm:$0xff] %v14536_v56  ;;  %v5183_v11 = vsub.f32 1.0, %v4863_v63  ;;  %v4864_v18 = vadd.f32 1e-12, %v4736_v57  ;;  %10479 = vpow2.f32 %v14348_v42  ;;  %v10464_v13 = vpop.eup %10463 }
 0x768   : > { %16554 = vst [vmem:[#allocation23_spill] sm:$0xff] %v14524_v21  ;;  %16557 = vst [vmem:[#allocation21_spill] sm:$0xff] %v14534_v52  ;;  %v14542_v61 = vmul.f32 1.442695, %v14515_v22  ;;  %v14544_v51 = vpop.f32.mrb[157].mxu0  ;;  %10481 = vlog2.f32 %v4862_v10  ;;  %v10466_v56 = vpop.eup %10465  ;;  %v14564_v10 = vadd.f32 %v16565_v6, %v14204_v32  ;;  %v8913_v6 = vadd.f32 -1.0, %v10460_v54 }
 0x769   : > { %16555 = vst [vmem:[#allocation77_spill] sm:$0xff] %v14530_v47  ;;  %4803 = vst [vmem:[%s13436_s24 + $0x1f0] sm:$0xff] %v4739_v26  ;;  %v14547_v40 = vadd.f32 1e-12, %v4737_v53  ;;  %v14549_v16 = vadd.f32 1e-12, %v4739_v26  ;;  %10483 = vlog2.f32 %v5182_v41  ;;  %v10468_v26 = vpop.eup %10467 }
 0x76a   : > { %4802 = vst [vmem:[%s13436_s24 + $0x1e8] sm:$0xff] %v4738_v5  ;;  %16559 = vst [vmem:[#allocation79_spill] sm:$0xff] %v14542_v61  ;;  %v14553_v57 = vpop.f32.mrb[158].mxu0  ;;  %v14556_v42 = vmul.f32 1.442695, %v14524_v21  ;;  %10485 = vlog2.f32 %v4863_v63  ;;  %v16569_v22 = vld [vmem:[#allocation25_spill] sm:$0xff] }
 0x76b   : > { %16560 = vst [vmem:[#allocation80_spill] sm:$0xff] %v14544_v51  ;;  %4804 = vst [vmem:[%s13436_s24 + $0x1f8] sm:$0xff] %v14527_v4  ;;  %v14560_v51 = vadd.f32 %v16564_v14, %v14283_v34  ;;  %v14566_v53 = vpop.f32.mrb[159].mxu0  ;;  %v14568_v20 = vadd.f32 1e-12, %v4738_v5  ;;  %v10470_v14 = vpop.eup %10469  ;;  %10487 = vlog2.f32 %v5183_v11  ;;  %v5184_v50 = vsub.f32 1.0, %v4864_v18 }
 0x76c   : > { %16562 = vst [vmem:[#allocation81_spill] sm:$0xff] %v14553_v57  ;;  %16563 = vst [vmem:[#allocation82_spill] sm:$0xff] %v14556_v42  ;;  %v14572_v41 = vmul.f32 1.442695, %v14534_v52  ;;  %v16568_v57 = vld [vmem:[#allocation27_spill] sm:$0xff]  ;;  %v10472_v63 = vpop.eup %10471  ;;  %v5185_v2 = vsub.f32 1.0, %v14547_v40  ;;  %10489 = vlog2.f32 %v4864_v18 }
 0x76d   : > { %16566 = vst [vmem:[#allocation26_spill] sm:$0xff] %v14566_v53  ;;  %v14576_v21 = vadd.f32 %v16568_v57, %v14283_v34  ;;  %v5040_v42 = vmul.f32 0.6931472, %v10468_v26  ;;  %v14580_v53 = vadd.f32 %v16569_v22, %v14204_v32  ;;  %v5044_v5 = vmul.f32 0.6931472, %v10470_v14  ;;  %s11047_s24 = sshll.u32 %s11107_s3, 4  ;;  %s11048_s24 = int_to_ptr.vmem [resolvable:$false] %s11047_s24 }
 0x76e   : > { %16567 = vst [vmem:[#allocation24_spill] sm:$0xff] %v14572_v41  ;;  %v5187_v52 = vsub.f32 1.0, %v14549_v16  ;;  %v10474_v41 = vpop.eup %10473  ;;  %v5296_v29 = vmul.f32 0.6931472, %v10472_v63  ;;  %v8914_v43 = vadd.f32 -1.0, %v10462_v35  ;;  %v8915_v26 = vadd.f32 -1.0, %v10464_v13  ;;  %p11050_p0 = scmp.lt.s32.totalorder %s16146_s0, %s11048_s24 }
 0x76f   : > { %v5114_v57 = vmax.f32 %v5040_v42, -100.0  ;;  %v10476_v11 = vpop.eup %10475  ;;  %v5116_v54 = vmax.f32 %v5044_v5, -100.0  ;;  %v5300_v45 = vmul.f32 0.6931472, %v10474_v41  ;;  %v5186_v22 = vsub.f32 1.0, %v14568_v20  ;;  %s11049_s2 = scalar_lea.vmem %s11048_s24, 16384 }
 0x770   : > { %v10478_v14 = vpop.eup %10477  ;;  %v5370_v61 = vmax.f32 %v5296_v29, -100.0  ;;  %v5046_v36 = vmul.f32 0.6931472, %v10476_v11  ;;  %v6522_v9 = vmul.f32 1.6732632, %v8913_v6  ;;  %10491 = vlog2.f32 %v5184_v50  ;;  %v16574_v50 = vld [vmem:[#allocation38_spill] sm:$0xff]  ;;  %p11051_p1 = scmp.lt.s32.totalorder %s11049_s2, %s11043_s25 }
 0x771   : > { %v5434_v47 = vmul.f32 %v5114_v57, %v16570_v19  ;;  %v5372_v58 = vmax.f32 %v5300_v45, -100.0  ;;  %v5436_v42 = vmul.f32 %v5116_v54, %v16571_v3  ;;  %v5302_v63 = vmul.f32 0.6931472, %v10478_v14  ;;  %v10480_v35 = vpop.eup %10479 }
 0x772   : > { %v16572_v13 = vsub.f32 1.0, %v16570_v19  ;;  %v5117_v18 = vmax.f32 %v5046_v36, -100.0  ;;  %v6523_v5 = vmul.f32 1.6732632, %v8914_v43  ;;  %v6524_v31 = vmul.f32 1.6732632, %v8915_v26  ;;  %v10482_v27 = vpop.eup %10481  ;;  %p11052_p2 = por %p11051_p1, %p11050_p0 }
 0x773   : > { %vm6269_vm3 = vcmp.gt.f32.partialorder %v14309_v17, 0.0  ;;  %v16573_v29 = vsub.f32 1.0, %v16571_v3  ;;  %v5373_v11 = vmax.f32 %v5302_v63, -100.0  ;;  %10493 = vlog2.f32 %v14547_v40  ;;  %v10484_v6 = vpop.eup %10483 }
 0x774   : > { %v5562_v41 = vmul.f32 %v16572_v13, %v5370_v61  ;;  %v8916_v45 = vadd.f32 -1.0, %v10466_v56  ;;  %v14596_v14 = vmul.f32 %v5117_v18, %v16574_v50  ;;  %v5048_v19 = vmul.f32 0.6931472, %v10482_v27  ;;  %v10486_v43 = vpop.eup %10485  ;;  %v16580_v13 = vld [vmem:[#allocation36_spill] sm:$0xff]  ;;  %p11053_p3 = pnand %p11052_p2, %p11046_p13 }
 0x775   : > { %v5564_v57 = vmul.f32 %v16573_v29, %v5372_v58  ;;  %v6586_v36 = vsel %vm6266_vm0, %v14293_v8, %v6522_v9  ;;  %v16577_v3 = vsub.f32 1.0, %v16574_v50  ;;  %v5304_v26 = vmul.f32 0.6931472, %v10484_v6  ;;  %v10488_v56 = vpop.eup %10487 }
 0x776   : > { %v5626_v54 = vadd.f32 %v5562_v41, %v5434_v47  ;;  %16575 = vst [vmem:[#allocation27_spill] sm:$0xff] %v14596_v14  ;;  %10495 = vlog2.f32 %v5185_v2  ;;  %v5118_v47 = vmax.f32 %v5048_v19, -100.0  ;;  %v6588_v27 = vsel %vm6268_vm1, %v14304_v48, %v6524_v31  ;;  %v10490_v2 = vpop.eup %10489  ;;  %v16611_v14 = vld [vmem:[#allocation17_spill] sm:$0xff] }
 0x777   : > { %v14601_v61 = vadd.f32 %v5564_v57, %v5436_v42  ;;  %v14605_v58 = vmul.f32 %v16577_v3, %v5373_v11  ;;  %10497 = vlog2.f32 %v14549_v16  ;;  %v5374_v63 = vmax.f32 %v5304_v26, -100.0 }
 0x778   : > { %v5690_v40 = vsub.f32 0.0, %v5626_v54  ;;  %10499 = vlog2.f32 %v5187_v52  ;;  %v6650_v9 = vmul.f32 1.050701, %v6586_v36  ;;  %v6652_v8 = vmul.f32 1.050701, %v6588_v27  ;;  %v16587_v36 = vld [vmem:[#allocation51_spill] sm:$0xff] }
 0x779   : > { %16576 = vst [vmem:[#allocation25_spill] sm:$0xff] %v14601_v61  ;;  %16578 = vst [vmem:[#allocation33_spill] sm:$0xff] %v14605_v58  ;;  %v14615_v41 = vmul.f32 %v5118_v47, %v16580_v13  ;;  %10501 = vlog2.f32 %v14568_v20  ;;  %v6587_v16 = vsel %vm6267_vm2, %v14300_v59, %v6523_v5  ;;  %v16582_v18 = vsub.f32 1.0, %v16580_v13  ;;  %v16589_v47 = vld [vmem:[#allocation53_spill] sm:$0xff]  ;;  %v16607_v61 = vld [vmem:[#allocation66_spill] sm:$0xff] }
 0x77a   : > { %v14612_v42 = vadd.f32 %v14518_v28, %v5690_v40  ;;  %10503 = vlog2.f32 %v5186_v22  ;;  %v6714_v31 = vpack.c.bf16 %v6652_v8, %v6650_v9  ;;  %v6525_v52 = vmul.f32 1.6732632, %v8916_v45  ;;  %v10492_v59 = vpop.eup %10491  ;;  %v16584_v22 = vld [vmem:[#allocation15_spill] sm:$0xff] }
 0x77b   : > { %16581 = vst [vmem:[#allocation38_spill] sm:$0xff] %v14615_v41  ;;  %v14623_v48 = vmul.f32 %v16582_v18, %v5374_v63  ;;  %10505 = vpow2.f32 %v14351_v25  ;;  %v14627_v28 = vmul.f32 1.442695, %v14560_v51  ;;  %v14630_v29 = vmul.f32 1.442695, %v14564_v10  ;;  %v16585_v25 = vld [vmem:[#allocation30_spill] sm:$0xff] }
 0x77c   : > { %16579 = vst [vmem:[#allocation16_spill] sm:$0xff] %v14612_v42  ;;  %v14633_v20 = vmul.f32 1.442695, %v14576_v21  ;;  %v6589_v5 = vsel %vm6269_vm3, %v14309_v17, %v6525_v52  ;;  %10507 = vpow2.f32 %v14363_v60  ;;  %v14641_v57 = vadd.f32 %v16584_v22, %v14283_v34  ;;  %v16586_v60 = vld [vmem:[#allocation28_spill] sm:$0xff]  ;;  %v16604_v22 = vld [vmem:[#allocation65_spill] sm:$0xff]  ;;  %v16609_v41 = vld [vmem:[#allocation19_spill] sm:$0xff] }
 0x77d   : > { %16583 = vst [vmem:[#allocation36_spill] sm:$0xff] %v14623_v48  ;;  %v14645_v11 = vadd.f32 %v16585_v25, %v14204_v32  ;;  %v6651_v45 = vmul.f32 1.050701, %v6587_v16  ;;  %v6653_v6 = vmul.f32 1.050701, %v6589_v5  ;;  %vm6270_vm4 = vcmp.gt.f32.partialorder %v14314_v12, 0.0  ;;  %v10494_v17 = vpop.eup %10493 }
 0x77e   : > { %10509 = vpow2.f32 %v14400_v39  ;;  %v14650_v54 = vmul.f32 1.442695, %v14580_v53  ;;  %v8917_v50 = vadd.f32 -1.0, %v10480_v35  ;;  %v14655_v19 = vadd.f32 %v16586_v60, %v14283_v34  ;;  %v16588_v39 = vld [vmem:[#allocation52_spill] sm:$0xff] }
 0x77f   : > { %10511 = vpow2.f32 %v14412_v0  ;;  %v14659_v3 = vadd.f32 %v16587_v36, %v14204_v32  ;;  %v6715_v26 = vpack.c.bf16 %v6653_v6, %v6651_v45  ;;  %v14664_v40 = vadd.f32 %v16588_v39, %v14283_v34  ;;  %v16600_v39 = vld [vmem:[#allocation61_spill] sm:$0xff] }
 0x780   : > { %10513 = vpow2.f32 %v14415_v23  ;;  %v14668_v35 = vadd.f32 %v16589_v47, %v14204_v32  ;;  %v14670_v0 = vpop.eup %10495  ;;  %v14672_v27 = vmul.f32 0.6931472, %v10486_v43  ;;  %v14674_v63 = vmul.f32 0.6931472, %v10488_v56  ;;  %v16601_v47 = vld [vmem:[#allocation69_spill] sm:$0xff] }
 0x781   : > { %16590 = vst [vmem:[#allocation15_spill] sm:$0xff] %v14670_v0  ;;  %v14677_v9 = vadd.f32 1e-12, %v14527_v4  ;;  %10515 = vpow2.f32 %v14442_v46  ;;  %v14680_v23 = vpop.eup %10497  ;;  %v14682_v8 = vmul.f32 0.6931472, %v10490_v2  ;;  %vm6271_vm5 = vcmp.gt.f32.partialorder %v14318_v15, 0.0  ;;  %6982 = vmatprep.mubr.bf16.mxu1 %v6715_v26 }
 0x782   : > { %16591 = vst [vmem:[#allocation30_spill] sm:$0xff] %v14672_v27  ;;  %16592 = vst [vmem:[#allocation28_spill] sm:$0xff] %v14674_v63  ;;  %v14684_v13 = vmul.f32 0.6931472, %v10492_v59  ;;  %10517 = vpow2.f32 %v14451_v49  ;;  %v14689_v43 = vmul.f32 1.442695, %v14641_v57  ;;  %v14691_v56 = vpop.eup %10499  ;;  %6983 = vmatmul.mubr.bf16.vlgmr.msra.gmra.mrb[128].mxu1 %v6714_v31 }
 0x783   : > { %16593 = vst [vmem:[#allocation51_spill] sm:$0xff] %v14677_v9  ;;  %16594 = vst [vmem:[#allocation52_spill] sm:$0xff] %v14682_v8  ;;  %v6526_v4 = vmul.f32 1.6732632, %v8917_v50  ;;  %vm6272_vm6 = vcmp.gt.f32.partialorder %v14335_v55, 0.0  ;;  %10519 = vpow2.f32 %v14454_v30  ;;  %v14701_v2 = vpop.eup %10501  ;;  %vm6273_vm7 = vcmp.gt.f32.partialorder %v14372_v62, 0.0 }
 0x784   : > { %16595 = vst [vmem:[#allocation53_spill] sm:$0xff] %v14684_v13  ;;  %16596 = vst [vmem:[#allocation83_spill] sm:$0xff] %v14691_v56  ;;  %v14696_v46 = vmul.f32 1.442695, %v14645_v11  ;;  %v14699_v16 = vmul.f32 1.442695, %v14655_v19  ;;  %10521 = vpow2.f32 %v14463_v38  ;;  %v14714_v31 = vpop.eup %10503 }
 0x785   : > { %v14706_v49 = vmul.f32 1.442695, %v14659_v3  ;;  %v14709_v18 = vmul.f32 1.442695, %v14664_v40  ;;  %v14712_v30 = vmul.f32 1.442695, %v14668_v35  ;;  %10523 = vpow2.f32 %v14466_v24  ;;  %v10506_v38 = vpop.eup %10505 }
 0x786   : > { %16597 = vst [vmem:[#allocation84_spill] sm:$0xff] %v14714_v31  ;;  %vm6274_vm8 = vcmp.gt.f32.partialorder %v14380_v37, 0.0  ;;  %v14723_v45 = vmul.f32 0.6931472, %v10494_v17  ;;  %vm6275_vm9 = vcmp.gt.f32.partialorder %v14388_v33, 0.0  ;;  %10525 = vpow2.f32 %v14469_v44  ;;  %v10508_v6 = vpop.eup %10507  ;;  %v16599_v24 = vld [vmem:[#allocation54_spill] sm:$0xff] }
 0x787   : > { %v6590_v50 = vsel %vm6270_vm4, %v14314_v12, %v6526_v4  ;;  %v8918_v60 = vadd.f32 -1.0, %v10506_v38  ;;  %vm6276_vm10 = vcmp.gt.f32.partialorder %v14395_v7, 0.0  ;;  %10527 = vpow2.f32 %v14472_v1  ;;  %v16602_v44 = vld [vmem:[#allocation31_spill] sm:$0xff] }
 0x788   : > { %16598 = vst [vmem:[#allocation85_spill] sm:$0xff] %v14723_v45  ;;  %v14734_v36 = vadd.f32 %v16599_v24, %v14283_v34  ;;  %v10510_v17 = vpop.eup %10509  ;;  %v8919_v26 = vadd.f32 -1.0, %v10508_v6  ;;  %vm6277_vm11 = vcmp.gt.f32.partialorder %v16600_v39, 0.0  ;;  %10529 = vpow2.f32 %v16601_v47  ;;  %v16603_v12 = vld [vmem:[#allocation55_spill] sm:$0xff]  ;;  %v16605_v24 = vld [vmem:[#allocation70_spill] sm:$0xff]  ;;  %v16606_v6 = vld [vmem:[#allocation29_spill] sm:$0xff] }
 0x789   : > { %v14740_v25 = vadd.f32 %v16602_v44, %v14204_v32  ;;  %v14744_v4 = vadd.f32 %v16603_v12, %v14283_v34  ;;  %v10512_v38 = vpop.eup %10511  ;;  %v6527_v1 = vmul.f32 1.6732632, %v8918_v60  ;;  %v8920_v59 = vadd.f32 -1.0, %v10510_v17  ;;  %v16608_v12 = vld [vmem:[#allocation77_spill] sm:$0xff] }
 0x78a   : > { %vm6278_vm12 = vcmp.gt.f32.partialorder %v16604_v22, 0.0  ;;  %10531 = vpow2.f32 %v16605_v24  ;;  %v14750_v52 = vadd.f32 %v16606_v6, %v14204_v32  ;;  %v10514_v47 = vpop.eup %10513  ;;  %v14752_v5 = vmul.f32 1.050701, %v6590_v50  ;;  %v16610_v6 = vld [vmem:[#allocation79_spill] sm:$0xff] }
 0x78b   : > { %v6528_v44 = vmul.f32 1.6732632, %v8919_v26  ;;  %v8921_v42 = vadd.f32 -1.0, %v10512_v38  ;;  %vm6279_vm13 = vcmp.gt.f32.partialorder %v16607_v61, 0.0  ;;  %10533 = vpow2.f32 %v16608_v12  ;;  %v10516_v48 = vpop.eup %10515 }
 0x78c   : > { %v6591_v60 = vsel %vm6271_vm5, %v14318_v15, %v6527_v1  ;;  %v6529_v17 = vmul.f32 1.6732632, %v8920_v59  ;;  %v8922_v24 = vadd.f32 -1.0, %v10514_v47  ;;  %vm6280_vm14 = vcmp.gt.f32.partialorder %v16609_v41, 0.0  ;;  %v10518_v58 = vpop.eup %10517  ;;  %v16612_v47 = vld [vmem:[#allocation47_spill] sm:$0xff] }
 0x78d   : > { %10535 = vpow2.f32 %v16610_v6  ;;  %v14761_v50 = vmul.f32 1.050701, %v6591_v60  ;;  %v6592_v26 = vsel %vm6272_vm6, %v14335_v55, %v6528_v44  ;;  %v6530_v38 = vmul.f32 1.6732632, %v8921_v42  ;;  %v10520_v13 = vpop.eup %10519  ;;  %v16613_v44 = vld [vmem:[#allocation48_spill] sm:$0xff] }
 0x78e   : > { %v8923_v12 = vadd.f32 -1.0, %v10516_v48  ;;  %vm6281_vm15 = vcmp.gt.f32.partialorder %v16611_v14, 0.0  ;;  %v14767_v63 = vmul.f32 1.050701, %v6592_v26  ;;  %v6593_v15 = vsel %vm6273_vm7, %v14372_v62, %v6529_v17  ;;  %v10522_v60 = vpop.eup %10521 }
 0x78f   : > { %v6531_v59 = vmul.f32 1.6732632, %v8922_v24  ;;  %v8924_v1 = vadd.f32 -1.0, %v10518_v58  ;;  %vm6282_vm0 = vcmp.gt.f32.partialorder %v16612_v47, 0.0  ;;  %v6657_v6 = vmul.f32 1.050701, %v6593_v15  ;;  %v10524_v26 = vpop.eup %10523 }
 0x790   : > { %v6594_v55 = vsel %vm6274_vm8, %v14380_v37, %v6530_v38  ;;  %v6532_v42 = vmul.f32 1.6732632, %v8923_v12  ;;  %v8925_v48 = vadd.f32 -1.0, %v10520_v13  ;;  %vm6283_vm1 = vcmp.gt.f32.partialorder %v16613_v44, 0.0  ;;  %v16614_v24 = vld [vmem:[#allocation22_spill] sm:$0xff]  ;;  %v10526_v15 = vpop.eup %10525 }
 0x791   : > { %v14777_v8 = vmul.f32 1.050701, %v6594_v55  ;;  %v6595_v62 = vsel %vm6275_vm9, %v14388_v33, %v6531_v59  ;;  %v6533_v58 = vmul.f32 1.6732632, %v8924_v1  ;;  %v8926_v17 = vadd.f32 -1.0, %v10522_v60  ;;  %v16615_v12 = vld [vmem:[#allocation50_spill] sm:$0xff]  ;;  %v10528_v55 = vpop.eup %10527 }
 0x792   : > { %vm6284_vm2 = vcmp.gt.f32.partialorder %v16614_v24, 0.0  ;;  %v6659_v27 = vmul.f32 1.050701, %v6595_v62  ;;  %v6596_v37 = vsel %vm6276_vm10, %v14395_v7, %v6532_v42  ;;  %v6534_v13 = vmul.f32 1.6732632, %v8925_v48  ;;  %v10530_v60 = vpop.eup %10529 }
 0x793   : > { %v8927_v38 = vadd.f32 -1.0, %v10524_v26  ;;  %vm6285_vm3 = vcmp.gt.f32.partialorder %v16615_v12, 0.0  ;;  %v14787_v56 = vmul.f32 1.050701, %v6596_v37  ;;  %v6597_v33 = vsel %vm6277_vm11, %v16600_v39, %v6533_v58 }
 0x794   : > { %v6535_v59 = vmul.f32 1.6732632, %v8926_v17  ;;  %v8928_v1 = vadd.f32 -1.0, %v10526_v15  ;;  %v6661_v9 = vmul.f32 1.050701, %v6597_v33  ;;  %v6598_v62 = vsel %vm6278_vm12, %v16604_v22, %v6534_v13  ;;  %v10532_v48 = vpop.eup %10531 }
 0x795   : > { %v6536_v7 = vmul.f32 1.6732632, %v8927_v38  ;;  %v8929_v42 = vadd.f32 -1.0, %v10528_v55  ;;  %v14795_v26 = vmul.f32 1.050701, %v6598_v62  ;;  %v8930_v31 = vadd.f32 -1.0, %v10530_v60  ;;  %v10534_v39 = vpop.eup %10533 }
 0x796   : > { %v6599_v37 = vsel %vm6279_vm13, %v16607_v61, %v6535_v59  ;;  %v6537_v45 = vmul.f32 1.6732632, %v8928_v1  ;;  %v8931_v22 = vadd.f32 -1.0, %v10532_v48  ;;  %v8932_v61 = vadd.f32 -1.0, %v10534_v39 }
 0x797   : > { %v14800_v58 = vmul.f32 1.050701, %v6599_v37  ;;  %v6600_v17 = vsel %vm6280_vm14, %v16609_v41, %v6536_v7  ;;  %v6538_v15 = vmul.f32 1.6732632, %v8929_v42  ;;  %v10536_v13 = vpop.eup %10535  ;;  %v6539_v33 = vmul.f32 1.6732632, %v8930_v31 }
 0x798   : > { %v14805_v38 = vmul.f32 1.050701, %v6600_v17  ;;  %v6601_v55 = vsel %vm6281_vm15, %v16611_v14, %v6537_v45  ;;  %v6540_v60 = vmul.f32 1.6732632, %v8931_v22  ;;  %v6717_v62 = vpack.c.bf16 %v6657_v6, %v14761_v50  ;;  %v16616_v41 = vld [vmem:[#allocation20_spill] sm:$0xff] }
 0x799   : > { %v6665_v59 = vmul.f32 1.050701, %v6601_v55  ;;  %v6602_v1 = vsel %vm6282_vm0, %v16612_v47, %v6538_v15  ;;  %vm6286_vm4 = vcmp.gt.f32.partialorder %v16616_v41, 0.0  ;;  %v6603_v42 = vsel %vm6283_vm1, %v16613_v44, %v6539_v33  ;;  %v16617_v47 = vld [vmem:[#allocation82_spill] sm:$0xff]  ;;  %v16618_v37 = vld [vmem:[#allocation24_spill] sm:$0xff]  ;;  %v16623_v55 = vld [vmem:[#allocation23_spill] sm:$0xff] }
 0x79a   : > { %v14815_v7 = vmul.f32 1.050701, %v6602_v1  ;;  %v6541_v48 = vmul.f32 1.6732632, %v8932_v61  ;;  %v6716_v14 = vpack.c.bf16 %v14767_v63, %v14752_v5  ;;  %v14822_v31 = vmul.f32 1.050701, %v6603_v42  ;;  %6992 = vmatprep.mubr.bf16.mxu1 %v6717_v62 }
 0x79b   : > { %v6604_v45 = vsel %vm6284_vm2, %v16614_v24, %v6540_v60  ;;  %v8933_v50 = vadd.f32 -1.0, %v10536_v13  ;;  %10537 = vpow2.f32 %v16617_v47  ;;  %v6719_v63 = vpack.c.bf16 %v6661_v9, %v6659_v27  ;;  %v16619_v9 = vld [vmem:[#allocation56_spill] sm:$0xff]  ;;  %v16626_v62 = vld [vmem:[#allocation21_spill] sm:$0xff] }
 0x79c   : > { %v14828_v6 = vmul.f32 1.050701, %v6604_v45  ;;  %v6605_v44 = vsel %vm6285_vm3, %v16615_v12, %v6541_v48  ;;  %6993 = vmatmul.mubr.bf16.gmra.mrb[132].mxu1 %v6716_v14  ;;  %10539 = vpow2.f32 %v16618_v37  ;;  %v6718_v24 = vpack.c.bf16 %v14787_v56, %v14777_v8  ;;  %v16628_v48 = vld [vmem:[#allocation57_spill] sm:$0xff] }
 0x79d   : > { %v14834_v5 = vmul.f32 1.050701, %v6605_v44  ;;  %v6542_v39 = vmul.f32 1.6732632, %v8933_v50  ;;  %10541 = vpow2.f32 %v14627_v28  ;;  %7002 = vmatprep.mubr.bf16.mxu1 %v6719_v63  ;;  %v6721_v17 = vpack.c.bf16 %v6665_v59, %v14800_v58  ;;  %v16621_v58 = vld [vmem:[#allocation40_spill] sm:$0xff]  ;;  %v16625_v59 = vld [vmem:[#allocation43_spill] sm:$0xff] }
 0x79e   : > { %10543 = vpow2.f32 %v14630_v29  ;;  %v6396_v28 = vmul.f32 1.442695, %v14734_v36  ;;  %v14851_v8 = vadd.f32 %v16619_v9, %v14283_v34  ;;  %v16620_v29 = vld [vmem:[#allocation34_spill] sm:$0xff]  ;;  %v14860_v22 = vadd.f32 %v16621_v58, %v14283_v34  ;;  %v16629_v58 = vld [vmem:[#allocation32_spill] sm:$0xff] }
 0x79f   : > { %10545 = vpow2.f32 %v14633_v20  ;;  %v14856_v56 = vadd.f32 %v16620_v29, %v14204_v32  ;;  %v16622_v20 = vld [vmem:[#allocation41_spill] sm:$0xff]  ;;  %vm6287_vm5 = vcmp.gt.f32.partialorder %v16623_v55, 0.0  ;;  %v6398_v33 = vmul.f32 1.442695, %v14740_v25 }
 0x7a0   : > { %10547 = vpow2.f32 %v14650_v54  ;;  %v14864_v13 = vadd.f32 %v16622_v20, %v14204_v32  ;;  %v16624_v54 = vld [vmem:[#allocation42_spill] sm:$0xff]  ;;  %v14875_v1 = vadd.f32 %v16625_v59, %v14204_v32  ;;  %v6606_v60 = vsel %vm6286_vm4, %v16616_v41, %v6542_v39 }
 0x7a1   : > { %10549 = vpow2.f32 %v14689_v43  ;;  %v14871_v61 = vadd.f32 %v16624_v54, %v14283_v34  ;;  %vm6288_vm6 = vcmp.gt.f32.partialorder %v16626_v62, 0.0  ;;  %v16627_v43 = vld [vmem:[#allocation18_spill] sm:$0xff]  ;;  %v14888_v14 = vadd.f32 %v16628_v48, %v14204_v32  ;;  %v16631_v48 = vld [vmem:[#allocation59_spill] sm:$0xff] }
 0x7a2   : > { %10551 = vpow2.f32 %v14696_v46  ;;  %v14884_v42 = vadd.f32 %v16627_v43, %v14283_v34  ;;  %vm6289_vm7 = vcmp.gt.f32.partialorder %v14560_v51, 0.0  ;;  %v6400_v45 = vmul.f32 1.442695, %v14744_v4  ;;  %v16630_v54 = vld [vmem:[#allocation58_spill] sm:$0xff] }
 0x7a3   : > { %10553 = vpow2.f32 %v14699_v16  ;;  %v6402_v41 = vmul.f32 1.442695, %v14750_v52  ;;  %v14895_v50 = vmul.f32 1.442695, %v14851_v8  ;;  %vm6290_vm8 = vcmp.gt.f32.partialorder %v14564_v10, 0.0 }
 0x7a4   : > { %7003 = vmatmul.mubr.bf16.gmra.mrb[136].mxu1 %v6718_v24  ;;  %10555 = vpow2.f32 %v14706_v49  ;;  %v14900_v46 = vmul.f32 1.442695, %v14856_v56  ;;  %v14903_v47 = vmul.f32 1.442695, %v14860_v22  ;;  %v14906_v16 = vmul.f32 1.442695, %v14864_v13 }
 0x7a5   : > { %v10538_v44 = vpop.eup %10537  ;;  %v14908_v37 = vmul.f32 1.050701, %v6606_v60  ;;  %vm6291_vm9 = vcmp.gt.f32.partialorder %v14576_v21, 0.0  ;;  %7012 = vmatprep.mubr.bf16.mxu1 %v6721_v17  ;;  %10557 = vpow2.f32 %v14709_v18  ;;  %v14913_v63 = vmul.f32 1.442695, %v14871_v61 }
 0x7a6   : > { %v14916_v49 = vmul.f32 1.442695, %v14875_v1  ;;  %v10540_v39 = vpop.eup %10539  ;;  %v8934_v24 = vadd.f32 -1.0, %v10538_v44  ;;  %vm6292_vm10 = vcmp.gt.f32.partialorder %v14580_v53, 0.0  ;;  %10559 = vpow2.f32 %v14712_v30 }
 0x7a7   : > { %v14921_v9 = vmul.f32 1.442695, %v14884_v42  ;;  %v14924_v29 = vmul.f32 1.442695, %v14888_v14  ;;  %v10542_v17 = vpop.eup %10541  ;;  %v8935_v18 = vadd.f32 -1.0, %v10540_v39  ;;  %vm6293_vm11 = vcmp.gt.f32.partialorder %v14641_v57, 0.0 }
 0x7a8   : > { %10561 = vpow2.f32 %v6396_v28  ;;  %v14929_v20 = vadd.f32 %v16629_v58, %v14283_v34  ;;  %v14933_v59 = vadd.f32 %v16630_v54, %v14204_v32  ;;  %v10544_v30 = vpop.eup %10543  ;;  %v6543_v60 = vmul.f32 1.6732632, %v8934_v24  ;;  %v16632_v58 = vld [vmem:[#allocation60_spill] sm:$0xff] }
 0x7a9   : > { %v8936_v43 = vadd.f32 -1.0, %v10542_v17  ;;  %vm6294_vm12 = vcmp.gt.f32.partialorder %v14645_v11, 0.0  ;;  %10563 = vpow2.f32 %v6398_v33  ;;  %v14938_v44 = vadd.f32 %v16631_v48, %v14283_v34  ;;  %v10546_v39 = vpop.eup %10545 }
 0x7aa   : > { %v6544_v28 = vmul.f32 1.6732632, %v8935_v18  ;;  %v8937_v15 = vadd.f32 -1.0, %v10544_v30  ;;  %vm6295_vm13 = vcmp.gt.f32.partialorder %v14655_v19, 0.0  ;;  %10565 = vpow2.f32 %v6400_v45  ;;  %v10548_v27 = vpop.eup %10547 }
 0x7ab   : > { %v14943_v54 = vadd.f32 %v16632_v58, %v14204_v32  ;;  %v6607_v24 = vsel %vm6287_vm5, %v16623_v55, %v6543_v60  ;;  %v6545_v33 = vmul.f32 1.6732632, %v8936_v43  ;;  %v8938_v17 = vadd.f32 -1.0, %v10546_v39  ;;  %v10550_v48 = vpop.eup %10549 }
 0x7ac   : > { %vm6296_vm14 = vcmp.gt.f32.partialorder %v14659_v3, 0.0  ;;  %10567 = vpow2.f32 %v6402_v41  ;;  %v14949_v18 = vmul.f32 1.050701, %v6607_v24  ;;  %v6608_v45 = vsel %vm6288_vm6, %v16626_v62, %v6544_v28  ;;  %v10552_v12 = vpop.eup %10551 }
 0x7ad   : > { %v6546_v30 = vmul.f32 1.6732632, %v8937_v15  ;;  %v8939_v58 = vadd.f32 -1.0, %v10548_v27  ;;  %vm6297_vm15 = vcmp.gt.f32.partialorder %v14664_v40, 0.0  ;;  %v14955_v0 = vmul.f32 1.050701, %v6608_v45  ;;  %v10554_v62 = vpop.eup %10553 }
 0x7ae   : > { %v6609_v55 = vsel %vm6289_vm7, %v14560_v51, %v6545_v33  ;;  %v6547_v60 = vmul.f32 1.6732632, %v8938_v17  ;;  %v8940_v41 = vadd.f32 -1.0, %v10550_v48  ;;  %v16633_v43 = vpack.c.bf16 %v14805_v38, %v14795_v26  ;;  %v10556_v51 = vpop.eup %10555 }
 0x7af   : > { %vm6298_vm0 = vcmp.gt.f32.partialorder %v14668_v35, 0.0  ;;  %v6673_v15 = vmul.f32 1.050701, %v6609_v55  ;;  %v6610_v27 = vsel %vm6290_vm8, %v14564_v10, %v6546_v30  ;;  %v6548_v39 = vmul.f32 1.6732632, %v8939_v58  ;;  %v10558_v10 = vpop.eup %10557 }
 0x7b0   : > { %7013 = vmatmul.mubr.bf16.gmra.mrb[140].mxu1 %v16633_v43  ;;  %v8941_v28 = vadd.f32 -1.0, %v10552_v12  ;;  %v16634_v24 = vpack.c.bf16 %v14834_v5, %v14822_v31  ;;  %vm6299_vm1 = vcmp.gt.f32.partialorder %v14734_v36, 0.0  ;;  %v14971_v33 = vmul.f32 1.050701, %v6610_v27  ;;  %v10560_v45 = vpop.eup %10559 }
 0x7b1   : > { %v6611_v26 = vsel %vm6291_vm9, %v14576_v21, %v6547_v60  ;;  %v6549_v38 = vmul.f32 1.6732632, %v8940_v41  ;;  %v8942_v17 = vadd.f32 -1.0, %v10554_v62  ;;  %vm6300_vm2 = vcmp.gt.f32.partialorder %v14740_v25, 0.0 }
 0x7b2   : > { %7022 = vmatprep.mubr.bf16.mxu1 %v16634_v24  ;;  %v14977_v48 = vmul.f32 1.050701, %v6611_v26  ;;  %v6612_v31 = vsel %vm6292_vm10, %v14580_v53, %v6548_v39  ;;  %v6550_v5 = vmul.f32 1.6732632, %v8941_v28  ;;  %v8943_v12 = vadd.f32 -1.0, %v10556_v51  ;;  %v10562_v60 = vpop.eup %10561 }
 0x7b3   : > { %vm6301_vm3 = vcmp.gt.f32.partialorder %v14744_v4, 0.0  ;;  %v14983_v30 = vmul.f32 1.050701, %v6612_v31  ;;  %v6613_v21 = vsel %vm6293_vm11, %v14641_v57, %v6549_v38  ;;  %v6551_v58 = vmul.f32 1.6732632, %v8942_v17  ;;  %v10564_v27 = vpop.eup %10563 }
 0x7b4   : > { %v8944_v55 = vadd.f32 -1.0, %v10558_v10  ;;  %v6677_v41 = vmul.f32 1.050701, %v6613_v21  ;;  %v6614_v43 = vsel %vm6294_vm12, %v14645_v11, %v6550_v5  ;;  %v6552_v53 = vmul.f32 1.6732632, %v8943_v12  ;;  %v10566_v57 = vpop.eup %10565 }
 0x7b5   : > { %v8945_v62 = vadd.f32 -1.0, %v10560_v45  ;;  %v14991_v39 = vmul.f32 1.050701, %v6614_v43  ;;  %v6615_v28 = vsel %vm6295_vm13, %v14655_v19, %v6551_v58  ;;  %v8946_v51 = vadd.f32 -1.0, %v10562_v60 }
 0x7b6   : > { %v6553_v24 = vmul.f32 1.6732632, %v8944_v55  ;;  %v14996_v26 = vmul.f32 1.050701, %v6615_v28  ;;  %v6616_v38 = vsel %vm6296_vm14, %v14659_v3, %v6552_v53  ;;  %v8947_v11 = vadd.f32 -1.0, %v10564_v27  ;;  %v10568_v10 = vpop.eup %10567  ;;  %v16638_v28 = vld [vmem:[#allocation64_spill] sm:$0xff] }
 0x7b7   : > { %v6554_v17 = vmul.f32 1.6732632, %v8945_v62  ;;  %v15001_v31 = vmul.f32 1.050701, %v6616_v38  ;;  %v16635_v19 = vpack.c.bf16 %v14828_v6, %v14815_v7  ;;  %v6555_v12 = vmul.f32 1.6732632, %v8946_v51 }
 0x7b8   : > { %v6617_v5 = vsel %vm6297_vm15, %v14664_v40, %v6553_v24  ;;  %v8948_v45 = vadd.f32 -1.0, %v10566_v57  ;;  %vm6302_vm4 = vcmp.gt.f32.partialorder %v14750_v52, 0.0  ;;  %v6556_v58 = vmul.f32 1.6732632, %v8947_v11  ;;  %v16637_v62 = vld [vmem:[#allocation63_spill] sm:$0xff] }
 0x7b9   : > { %7023 = vmatmul.mubr.bf16.gmra.mrb[144].mxu1 %v16635_v19  ;;  %v15010_v21 = vmul.f32 1.050701, %v6617_v5  ;;  %v6618_v3 = vsel %vm6298_vm0, %v14668_v35, %v6554_v17  ;;  %v6725_v55 = vpack.c.bf16 %v6673_v15, %v14949_v18  ;;  %v6619_v40 = vsel %vm6299_vm1, %v14734_v36, %v6555_v12  ;;  %v16639_v24 = vld [vmem:[#allocation67_spill] sm:$0xff] }
 0x7ba   : > { %v15016_v60 = vmul.f32 1.050701, %v6618_v3  ;;  %v6557_v7 = vmul.f32 1.6732632, %v8948_v45  ;;  %v6724_v6 = vpack.c.bf16 %v14955_v0, %v14908_v37  ;;  %v15023_v43 = vmul.f32 1.050701, %v6619_v40 }
 0x7bb   : > { %v6620_v53 = vsel %vm6300_vm2, %v14740_v25, %v6556_v58  ;;  %7032 = vmatprep.mubr.bf16.mxu1 %v6725_v55  ;;  %v8949_v35 = vadd.f32 -1.0, %v10568_v10  ;;  %10569 = vpow2.f32 %v14895_v50  ;;  %v6727_v0 = vpack.c.bf16 %v6677_v41, %v14977_v48  ;;  %v16642_v11 = vld [vmem:[#allocation71_spill] sm:$0xff]  ;;  %v16644_v58 = vld [vmem:[#allocation73_spill] sm:$0xff] }
 0x7bc   : > { %v15029_v18 = vmul.f32 1.050701, %v6620_v53  ;;  %v6621_v36 = vsel %vm6301_vm3, %v14744_v4, %v6557_v7  ;;  %10571 = vpow2.f32 %v14900_v46  ;;  %v6726_v25 = vpack.c.bf16 %v14983_v30, %v14971_v33  ;;  %v16636_v33 = vld [vmem:[#allocation62_spill] sm:$0xff] }
 0x7bd   : > { %v15036_v37 = vmul.f32 1.050701, %v6621_v36  ;;  %v6558_v15 = vmul.f32 1.6732632, %v8949_v35  ;;  %10573 = vpow2.f32 %v14903_v47  ;;  %v6729_v50 = vpack.c.bf16 %v15010_v21, %v14996_v26 }
 0x7be   : > { %10575 = vpow2.f32 %v14906_v16  ;;  %v6728_v4 = vpack.c.bf16 %v15001_v31, %v14991_v39  ;;  %v6730_v46 = vpack.c.bf16 %v15029_v18, %v15016_v60  ;;  %v6420_v48 = vmul.f32 1.442695, %v14929_v20 }
 0x7bf   : > { %10577 = vpow2.f32 %v14913_v63  ;;  %v6731_v47 = vpack.c.bf16 %v15036_v37, %v15023_v43  ;;  %v15054_v30 = vadd.f32 %v16636_v33, %v14283_v34  ;;  %v6422_v16 = vmul.f32 1.442695, %v14933_v59 }
 0x7c0   : > { %10579 = vpow2.f32 %v14916_v49  ;;  %v6424_v41 = vmul.f32 1.442695, %v14938_v44  ;;  %v15061_v27 = vadd.f32 %v16637_v62, %v14204_v32  ;;  %v6622_v63 = vsel %vm6302_vm4, %v14750_v52, %v6558_v15  ;;  %v16640_v52 = vld [vmem:[#allocation68_spill] sm:$0xff] }
 0x7c1   : > { %7033 = vmatmul.mubr.bf16.gmra.mrb[148].mxu1 %v6724_v6  ;;  %vm6303_vm5 = vcmp.gt.f32.partialorder %v14851_v8, 0.0  ;;  %10581 = vpow2.f32 %v14921_v9  ;;  %v15070_v49 = vadd.f32 %v16638_v28, %v14283_v34  ;;  %v15074_v51 = vadd.f32 %v16639_v24, %v14204_v32  ;;  %v16641_v9 = vld [vmem:[#allocation35_spill] sm:$0xff] }
 0x7c2   : > { %7042 = vmatprep.mubr.bf16.mxu1 %v6727_v0  ;;  %vm6304_vm6 = vcmp.gt.f32.partialorder %v14856_v56, 0.0  ;;  %10583 = vpow2.f32 %v14924_v29  ;;  %v6426_v57 = vmul.f32 1.442695, %v14943_v54  ;;  %v15081_v26 = vadd.f32 %v16640_v52, %v14283_v34  ;;  %v16643_v29 = vld [vmem:[#allocation72_spill] sm:$0xff] }
 0x7c3   : > { %v15085_v38 = vadd.f32 %v16641_v9, %v14204_v32  ;;  %vm6305_vm7 = vcmp.gt.f32.partialorder %v14860_v22, 0.0  ;;  %10585 = vpow2.f32 %v6420_v48  ;;  %v6428_v17 = vmul.f32 1.442695, %v15054_v30 }
 0x7c4   : > { %v15091_v10 = vadd.f32 %v16642_v11, %v14283_v34  ;;  %v15095_v5 = vadd.f32 %v16643_v29, %v14204_v32  ;;  %v15097_v19 = vmul.f32 1.050701, %v6622_v63  ;;  %vm6306_vm8 = vcmp.gt.f32.partialorder %v14864_v13, 0.0 }
 0x7c5   : > { %10587 = vpow2.f32 %v6422_v16  ;;  %v6430_v12 = vmul.f32 1.442695, %v15061_v27  ;;  %v10570_v45 = vpop.eup %10569  ;;  %vm6307_vm9 = vcmp.gt.f32.partialorder %v14871_v61, 0.0  ;;  %v6432_v21 = vmul.f32 1.442695, %v15070_v49 }
 0x7c6   : > { %10589 = vpow2.f32 %v6424_v41  ;;  %v6434_v3 = vmul.f32 1.442695, %v15074_v51  ;;  %v15106_v55 = vadd.f32 %v16644_v58, %v14283_v34  ;;  %v10572_v40 = vpop.eup %10571  ;;  %v8950_v7 = vadd.f32 -1.0, %v10570_v45  ;;  %v16645_v41 = vld [vmem:[#allocation75_spill] sm:$0xff]  ;;  %v16646_v45 = vld [vmem:[#allocation76_spill] sm:$0xff] }
 0x7c7   : > { %10591 = vpow2.f32 %v6426_v57  ;;  %v15109_v6 = vmul.f32 1.442695, %v15081_v26  ;;  %v15112_v53 = vmul.f32 1.442695, %v15085_v38  ;;  %v10574_v35 = vpop.eup %10573  ;;  %v8951_v36 = vadd.f32 -1.0, %v10572_v40 }
 0x7c8   : > { %vm6308_vm10 = vcmp.gt.f32.partialorder %v14875_v1, 0.0  ;;  %10593 = vpow2.f32 %v6428_v17  ;;  %v15116_v0 = vmul.f32 1.442695, %v15091_v10  ;;  %v15119_v15 = vmul.f32 1.442695, %v15095_v5  ;;  %v10576_v48 = vpop.eup %10575 }
 0x7c9   : > { %v6559_v33 = vmul.f32 1.6732632, %v8950_v7  ;;  %v8952_v16 = vadd.f32 -1.0, %v10574_v35  ;;  %7043 = vmatmul.mubr.bf16.gmra.mrb[152].mxu1 %v6726_v25  ;;  %vm6309_vm11 = vcmp.gt.f32.partialorder %v14884_v42, 0.0  ;;  %10595 = vpow2.f32 %v6430_v12  ;;  %v10578_v63 = vpop.eup %10577 }
 0x7ca   : > { %v15124_v62 = vadd.f32 %v16645_v41, %v14204_v32  ;;  %v6560_v28 = vmul.f32 1.6732632, %v8951_v36  ;;  %v8953_v24 = vadd.f32 -1.0, %v10576_v48  ;;  %7052 = vmatprep.mubr.bf16.mxu1 %v6729_v50  ;;  %vm6310_vm12 = vcmp.gt.f32.partialorder %v14888_v14, 0.0  ;;  %v10580_v25 = vpop.eup %10579 }
 0x7cb   : > { %vm6311_vm13 = vcmp.gt.f32.partialorder %v14929_v20, 0.0  ;;  %10597 = vpow2.f32 %v6432_v21  ;;  %v15129_v57 = vmul.f32 1.442695, %v15106_v55  ;;  %v6623_v52 = vsel %vm6303_vm5, %v14851_v8, %v6559_v33  ;;  %v10582_v11 = vpop.eup %10581 }
 0x7cc   : > { %v6561_v9 = vmul.f32 1.6732632, %v8952_v16  ;;  %v8954_v17 = vadd.f32 -1.0, %v10578_v63  ;;  %vm6312_vm14 = vcmp.gt.f32.partialorder %v14933_v59, 0.0  ;;  %10599 = vpow2.f32 %v6434_v3  ;;  %v10584_v58 = vpop.eup %10583 }
 0x7cd   : > { %v6624_v50 = vsel %vm6304_vm6, %v14856_v56, %v6560_v28  ;;  %v6562_v29 = vmul.f32 1.6732632, %v8953_v24  ;;  %v8955_v12 = vadd.f32 -1.0, %v10580_v25  ;;  %vm6313_vm15 = vcmp.gt.f32.partialorder %v14938_v44, 0.0  ;;  %v10586_v35 = vpop.eup %10585 }
 0x7ce   : > { %v15141_v21 = vadd.f32 %v16646_v45, %v14283_v34  ;;  %v6625_v8 = vsel %vm6305_vm7, %v14860_v22, %v6561_v9  ;;  %v6563_v40 = vmul.f32 1.6732632, %v8954_v17  ;;  %v8956_v3 = vadd.f32 -1.0, %v10582_v11 }
 0x7cf   : > { %v15147_v7 = vmul.f32 1.442695, %v15124_v62  ;;  %v15149_v56 = vmul.f32 1.050701, %v6623_v52  ;;  %v6626_v36 = vsel %vm6306_vm8, %v14864_v13, %v6562_v29  ;;  %v6564_v48 = vmul.f32 1.6732632, %v8955_v12  ;;  %v10588_v16 = vpop.eup %10587 }
 0x7d0   : > { %v8957_v33 = vadd.f32 -1.0, %v10584_v58  ;;  %v15154_v41 = vmul.f32 1.050701, %v6624_v50  ;;  %v6627_v22 = vsel %vm6307_vm9, %v14871_v61, %v6563_v40  ;;  %v6565_v63 = vmul.f32 1.6732632, %v8956_v3  ;;  %v10590_v24 = vpop.eup %10589  ;;  %v16647_v13 = vld [vmem:[#allocation78_spill] sm:$0xff] }
 0x7d1   : > { %v8958_v28 = vadd.f32 -1.0, %v10586_v35  ;;  %vm6314_vm0 = vcmp.gt.f32.partialorder %v14943_v54, 0.0  ;;  %vm6316_vm1 = vcmp.gt.f32.partialorder %v15061_v27, 0.0  ;;  %v6689_v25 = vmul.f32 1.050701, %v6625_v8  ;;  %v10592_v11 = vpop.eup %10591  ;;  %7053 = vmatmul.mubr.bf16.gmra.mrb[156].mxu1 %v6728_v4 }
 0x7d2   : > { %v6566_v52 = vmul.f32 1.6732632, %v8957_v33  ;;  %v8959_v9 = vadd.f32 -1.0, %v10588_v16  ;;  %vm6315_vm2 = vcmp.gt.f32.partialorder %v15054_v30, 0.0  ;;  %vm6317_vm3 = vcmp.gt.f32.partialorder %v15070_v49, 0.0  ;;  %v10594_v45 = vpop.eup %10593  ;;  %7062 = vmatprep.mubr.bf16.mxu1 %v6731_v47 }
 0x7d3   : > { %v15165_v17 = vadd.f32 %v16647_v13, %v14204_v32  ;;  %v15167_v61 = vmul.f32 1.050701, %v6626_v36  ;;  %v6628_v50 = vsel %vm6308_vm10, %v14875_v1, %v6564_v48  ;;  %v6567_v29 = vmul.f32 1.6732632, %v8958_v28  ;;  %v10596_v1 = vpop.eup %10595 }
 0x7d4   : > { %v8960_v12 = vadd.f32 -1.0, %v10590_v24  ;;  %v15175_v58 = vmul.f32 1.050701, %v6627_v22  ;;  %v6629_v8 = vsel %vm6309_vm11, %v14884_v42, %v6565_v63  ;;  %v6568_v40 = vmul.f32 1.6732632, %v8959_v9 }
 0x7d5   : > { %v8961_v3 = vadd.f32 -1.0, %v10592_v11  ;;  %v6630_v39 = vsel %vm6310_vm12, %v14888_v14, %v6566_v52  ;;  %v6631_v31 = vsel %vm6311_vm13, %v14929_v20, %v6567_v29  ;;  %v8962_v35 = vadd.f32 -1.0, %v10594_v45  ;;  %v10598_v36 = vpop.eup %10597  ;;  %v16649_v29 = vld [vmem:[#allocation81_spill] sm:$0xff] }
 0x7d6   : > { %v6569_v4 = vmul.f32 1.6732632, %v8960_v12  ;;  %v15189_v48 = vmul.f32 1.050701, %v6628_v50  ;;  %v6632_v42 = vsel %vm6312_vm14, %v14933_v59, %v6568_v40  ;;  %v8963_v37 = vadd.f32 -1.0, %v10596_v1  ;;  %v10600_v47 = vpop.eup %10599 }
 0x7d7   : > { %v6570_v43 = vmul.f32 1.6732632, %v8961_v3  ;;  %v6693_v33 = vmul.f32 1.050701, %v6629_v8  ;;  %v6571_v16 = vmul.f32 1.6732632, %v8962_v35  ;;  %v6733_v24 = vpack.c.bf16 %v6689_v25, %v15149_v56 }
 0x7d8   : > { %v6633_v14 = vsel %vm6313_vm15, %v14938_v44, %v6569_v4  ;;  %v8964_v22 = vadd.f32 -1.0, %v10598_v36  ;;  %v15197_v20 = vmul.f32 1.050701, %v6630_v39  ;;  %v15199_v63 = vmul.f32 1.050701, %v6631_v31  ;;  %v16651_v31 = vld [vmem:[#allocation15_spill] sm:$0xff] }
 0x7d9   : > { %v6572_v28 = vmul.f32 1.6732632, %v8963_v37  ;;  %v15202_v52 = vmul.f32 1.050701, %v6632_v42  ;;  %v15204_v59 = vmul.f32 1.050701, %v6633_v14  ;;  %v6732_v13 = vpack.c.bf16 %v15154_v41, %v15097_v19  ;;  %7063 = vmatmul.mubr.bf16.gmra.mrb[160].mxu1 %v6730_v46 }
 0x7da   : > { %v6573_v9 = vmul.f32 1.6732632, %v8964_v22  ;;  %v6634_v44 = vsel %vm6314_vm0, %v14943_v54, %v6570_v43  ;;  %v8965_v50 = vadd.f32 -1.0, %v10600_v47  ;;  %10601 = vpow2.f32 %v15109_v6  ;;  %7072 = vmatprep.mubr.bf16.mxu1 %v6733_v24  ;;  %v16652_v35 = vld [vmem:[#allocation84_spill] sm:$0xff]  ;;  %v16654_v14 = vld [vmem:[#allocation51_spill] sm:$0xff] }
 0x7db   : > { %v6636_v11 = vsel %vm6316_vm1, %v15061_v27, %v6572_v28  ;;  %v6635_v56 = vsel %vm6315_vm2, %v15054_v30, %v6571_v16  ;;  %10603 = vpow2.f32 %v15112_v53  ;;  %v6735_v54 = vpack.c.bf16 %v6693_v33, %v15175_v58  ;;  %v16655_v22 = vld [vmem:[#allocation83_spill] sm:$0xff] }
 0x7dc   : > { %v6637_v19 = vsel %vm6317_vm3, %v15070_v49, %v6573_v9  ;;  %v15226_v27 = vmul.f32 1.050701, %v6636_v11  ;;  %10605 = vpow2.f32 %v15116_v0  ;;  %v6734_v60 = vpack.c.bf16 %v15189_v48, %v15167_v61 }
 0x7dd   : > { %v15228_v41 = vmul.f32 1.050701, %v6637_v19  ;;  %v6574_v18 = vmul.f32 1.6732632, %v8965_v50  ;;  %10607 = vpow2.f32 %v15119_v15  ;;  %v6448_v46 = vmul.f32 1.442695, %v15141_v21 }
 0x7de   : > { %v6737_v30 = vpack.c.bf16 %v15204_v59, %v15199_v63  ;;  %v15237_v49 = vmul.f32 1.050701, %v6635_v56  ;;  %vm6318_vm4 = vcmp.gt.f32.partialorder %v15074_v51, 0.0  ;;  %10609 = vpow2.f32 %v15129_v57  ;;  %v16648_v15 = vld [vmem:[#allocation80_spill] sm:$0xff]  ;;  %v16650_v57 = vld [vmem:[#allocation26_spill] sm:$0xff] }
 0x7df   : > { %v6736_v6 = vpack.c.bf16 %v15202_v52, %v15197_v20  ;;  %v15243_v53 = vmul.f32 1.050701, %v6634_v44  ;;  %10611 = vpow2.f32 %v15147_v7  ;;  %v6450_v0 = vmul.f32 1.442695, %v15165_v17  ;;  %v16664_v52 = vld [vmem:[#allocation37_spill] sm:$0xff] }
 0x7e0   : > { %v15249_v25 = vadd.f32 %v16648_v15, %v14283_v34  ;;  %vm6319_vm5 = vcmp.gt.f32.partialorder %v15081_v26, 0.0  ;;  %10613 = vpow2.f32 %v6448_v46  ;;  %v15254_v12 = vadd.f32 %v16649_v29, %v14204_v32  ;;  %v16658_v46 = vld [vmem:[#allocation30_spill] sm:$0xff] }
 0x7e1   : > { %v15258_v45 = vadd.f32 %v16650_v57, %v14283_v34  ;;  %v6739_v7 = vpack.c.bf16 %v15228_v41, %v15237_v49  ;;  %v6638_v58 = vsel %vm6318_vm4, %v15074_v51, %v6574_v18  ;;  %10615 = vpow2.f32 %v6450_v0  ;;  %7073 = vmatmul.mubr.bf16.gmra.mrb[164].mxu1 %v6732_v13  ;;  %v16657_v18 = vld [vmem:[#allocation46_spill] sm:$0xff] }
 0x7e2   : > { %v6452_v8 = vmul.f32 1.442695, %v15249_v25  ;;  %v6738_v40 = vpack.c.bf16 %v15226_v27, %v15243_v53  ;;  %vm6320_vm6 = vcmp.gt.f32.partialorder %v15085_v38, 0.0  ;;  %vm6321_vm7 = vcmp.gt.f32.partialorder %v15091_v10, 0.0  ;;  %7082 = vmatprep.mubr.bf16.mxu1 %v6735_v54 }
 0x7e3   : > { %v6454_v32 = vmul.f32 1.442695, %v15254_v12  ;;  %v6456_v34 = vmul.f32 1.442695, %v15258_v45  ;;  %vm6322_vm8 = vcmp.gt.f32.partialorder %v15095_v5, 0.0  ;;  %vm6323_vm9 = vcmp.gt.f32.partialorder %v15106_v55, 0.0 }
 0x7e4   : > { %10617 = vpow2.f32 %v6452_v8  ;;  %v15272_v51 = vmul.f32 0.6931472, %v14701_v2  ;;  %v15275_v3 = vmul.f32 0.6931472, %v14680_v23  ;;  %v10602_v1 = vpop.eup %10601  ;;  %v15277_v39 = vmul.f32 1.050701, %v6638_v58 }
 0x7e5   : > { %10619 = vpow2.f32 %v6454_v32  ;;  %v15281_v4 = vmul.f32 0.6931472, %v16651_v31  ;;  %v15284_v36 = vmul.f32 0.6931472, %v16652_v35  ;;  %v10604_v42 = vpop.eup %10603  ;;  %v8966_v43 = vadd.f32 -1.0, %v10602_v1  ;;  %v16653_v23 = vld [vmem:[#allocation85_spill] sm:$0xff] }
 0x7e6   : > { %vm6324_vm10 = vcmp.gt.f32.partialorder %v15124_v62, 0.0  ;;  %10621 = vpow2.f32 %v6456_v34  ;;  %v5121_v2 = vmax.f32 %v16653_v23, -100.0  ;;  %v5122_v37 = vmax.f32 %v15272_v51, -100.0  ;;  %v10606_v47 = vpop.eup %10605  ;;  %v16660_v32 = vld [vmem:[#allocation44_spill] sm:$0xff] }
 0x7e7   : > { %v8967_v33 = vadd.f32 -1.0, %v10604_v42  ;;  %vm6325_vm11 = vcmp.gt.f32.partialorder %v15141_v21, 0.0  ;;  %10623 = vlog2.f32 %v16654_v14  ;;  %v5123_v16 = vmax.f32 %v15275_v3, -100.0  ;;  %v10608_v24 = vpop.eup %10607  ;;  %v16661_v34 = vld [vmem:[#allocation52_spill] sm:$0xff] }
 0x7e8   : > { %v15293_v28 = vmul.f32 0.6931472, %v16655_v22  ;;  %v6575_v9 = vmul.f32 1.6732632, %v8966_v43  ;;  %v8968_v13 = vadd.f32 -1.0, %v10606_v47  ;;  %vm6326_vm12 = vcmp.gt.f32.partialorder %v15165_v17, 0.0  ;;  %v10610_v50 = vpop.eup %10609 }
 0x7e9   : > { %v16656_v44 = vsub.f32 1.0, %v16654_v14  ;;  %v5377_v11 = vmax.f32 %v15281_v4, -100.0  ;;  %v6576_v56 = vmul.f32 1.6732632, %v8967_v33  ;;  %v8969_v19 = vadd.f32 -1.0, %v10608_v24  ;;  %v10612_v29 = vpop.eup %10611  ;;  %7083 = vmatmul.mubr.bf16.gmra.mrb[168].mxu1 %v6734_v60 }
 0x7ea   : > { %v5378_v54 = vmax.f32 %v15284_v36, -100.0  ;;  %v16659_v0 = vmax.f32 %v16658_v46, -100.0  ;;  %v6639_v57 = vsel %vm6319_vm5, %v15081_v26, %v6575_v9  ;;  %v6577_v58 = vmul.f32 1.6732632, %v8968_v13  ;;  %v10614_v35 = vpop.eup %10613  ;;  %7092 = vmatprep.mubr.bf16.mxu1 %v6737_v30 }
 0x7eb   : > { %10625 = vlog2.f32 %v16656_v44  ;;  %v8970_v8 = vadd.f32 -1.0, %v10610_v50  ;;  %vm6327_vm13 = vcmp.gt.f32.partialorder %v15249_v25, 0.0  ;;  %v16662_v1 = vmax.f32 %v16661_v34, -100.0  ;;  %v10616_v26 = vpop.eup %10615 }
 0x7ec   : > { %v15303_v15 = vmul.f32 %v16659_v0, %v16657_v18  ;;  %v15314_v42 = vmul.f32 1.050701, %v6639_v57  ;;  %v6640_v43 = vsel %vm6320_vm6, %v15085_v38, %v6576_v56  ;;  %v6578_v47 = vmul.f32 1.6732632, %v8969_v19 }
 0x7ed   : > { %v15312_v31 = vmul.f32 %v16662_v1, %v16660_v32  ;;  %v8971_v33 = vadd.f32 -1.0, %v10612_v29  ;;  %vm6328_vm14 = vcmp.gt.f32.partialorder %v15254_v12, 0.0  ;;  %v15320_v14 = vmul.f32 1.050701, %v6640_v43 }
 0x7ee   : > { %v6641_v22 = vsel %vm6321_vm7, %v15091_v10, %v6577_v58  ;;  %v6579_v24 = vmul.f32 1.6732632, %v8970_v8  ;;  %v8972_v9 = vadd.f32 -1.0, %v10614_v35  ;;  %vm6329_vm15 = vcmp.gt.f32.partialorder %v15258_v45, 0.0  ;;  %v10618_v50 = vpop.eup %10617 }
 0x7ef   : > { %v15329_v38 = vmul.f32 1.050701, %v6641_v22  ;;  %v6642_v13 = vsel %vm6322_vm8, %v15095_v5, %v6578_v47  ;;  %v6580_v44 = vmul.f32 1.6732632, %v8971_v33  ;;  %v8973_v10 = vadd.f32 -1.0, %v10616_v26  ;;  %v10620_v19 = vpop.eup %10619 }
 0x7f0   : > { %v15337_v56 = vmul.f32 1.050701, %v6642_v13  ;;  %v6643_v61 = vsel %vm6323_vm9, %v15106_v55, %v6579_v24  ;;  %v6581_v48 = vmul.f32 1.6732632, %v8972_v9  ;;  %v6740_v60 = vpack.c.bf16 %v15320_v14, %v15277_v39  ;;  %v10622_v30 = vpop.eup %10621  ;;  %v16663_v13 = vld [vmem:[#allocation39_spill] sm:$0xff]  ;;  %v16683_v14 = vld [vmem:[#allocation13_spill] sm:$0xff] }
 0x7f1   : > { %v15344_v46 = vmul.f32 1.050701, %v6643_v61  ;;  %v6644_v5 = vsel %vm6324_vm10, %v15124_v62, %v6580_v44  ;;  %v6582_v63 = vmul.f32 1.6732632, %v8973_v10  ;;  %v8974_v59 = vadd.f32 -1.0, %v10618_v50  ;;  %v10624_v58 = vpop.eup %10623  ;;  %7093 = vmatmul.mubr.bf16.gmra.mrb[172].mxu1 %v6736_v6  ;;  %v16665_v50 = vld [vmem:[#allocation49_spill] sm:$0xff] }
 0x7f2   : > { %v15349_v0 = vmul.f32 1.050701, %v6644_v5  ;;  %v6645_v55 = vsel %vm6325_vm11, %v15141_v21, %v6581_v48  ;;  %v8975_v29 = vadd.f32 -1.0, %v10620_v19  ;;  %v6741_v57 = vpack.c.bf16 %v15329_v38, %v15314_v42  ;;  %7102 = vmatprep.mubr.bf16.mxu1 %v6739_v7  ;;  %v16667_v48 = vld [vmem:[#allocation28_spill] sm:$0xff]  ;;  %v16670_v19 = vld [vmem:[#allocation53_spill] sm:$0xff] }
 0x7f3   : > { %v6709_v8 = vmul.f32 1.050701, %v6645_v55  ;;  %v6646_v34 = vsel %vm6326_vm12, %v15165_v17, %v6582_v63  ;;  %v6583_v62 = vmul.f32 1.6732632, %v8974_v59  ;;  %v8976_v1 = vadd.f32 -1.0, %v10622_v30  ;;  %v16676_v55 = vld [vmem:[#allocation27_spill] sm:$0xff] }
 0x7f4   : > { %v15359_v43 = vmul.f32 1.050701, %v6646_v34  ;;  %v6584_v47 = vmul.f32 1.6732632, %v8975_v29  ;;  %v6742_v33 = vpack.c.bf16 %v15349_v0, %v15337_v56  ;;  %v5379_v21 = vmax.f32 %v15293_v28, -100.0  ;;  %v16677_v29 = vld [vmem:[#allocation33_spill] sm:$0xff] }
 0x7f5   : > { %v10626_v35 = vpop.eup %10625  ;;  %v6647_v42 = vsel %vm6327_vm13, %v15249_v25, %v6583_v62  ;;  %v6585_v26 = vmul.f32 1.6732632, %v8976_v1  ;;  %v6743_v22 = vpack.c.bf16 %v6709_v8, %v15344_v46  ;;  %v5060_v24 = vmul.f32 0.6931472, %v10624_v58  ;;  %v16679_v8 = vld [vmem:[#allocation36_spill] sm:$0xff] }
 0x7f6   : > { %v6711_v17 = vmul.f32 1.050701, %v6647_v42  ;;  %v6648_v9 = vsel %vm6328_vm14, %v15254_v12, %v6584_v47  ;;  %v5316_v38 = vmul.f32 0.6931472, %v10626_v35  ;;  %v5441_v28 = vmul.f32 %v5121_v2, %v16663_v13  ;;  %v16666_v2 = vld [vmem:[#allocation45_spill] sm:$0xff]  ;;  %v16680_v35 = vld [vmem:[#allocation74_spill] sm:$0xff] }
 0x7f7   : > { %v6712_v44 = vmul.f32 1.050701, %v6648_v9  ;;  %v6649_v25 = vsel %vm6329_vm15, %v15258_v45, %v6585_v26  ;;  %v5124_v20 = vmax.f32 %v5060_v24, -100.0  ;;  %v5442_v6 = vmul.f32 %v5122_v37, %v16664_v52  ;;  %v16681_v47 = vld [vmem:[#allocation25_spill] sm:$0xff]  ;;  %v16682_v42 = vld [vmem:[#allocation16_spill] sm:$0xff] }
 0x7f8   : > { %v6713_v12 = vmul.f32 1.050701, %v6649_v25  ;;  %v5380_v10 = vmax.f32 %v5316_v38, -100.0  ;;  %v5443_v23 = vmul.f32 %v5123_v16, %v16665_v50  ;;  %v5508_v56 = vsub.f32 1.0, %v16666_v2  ;;  %v6778_v39 = vld [vmem:[%s16215_s17] sm:$0x3] }
 0x7f9   : > { %v6744_v61 = vpack.c.bf16 %v6712_v44, %v15359_v43  ;;  %v5444_v45 = vmul.f32 %v5124_v20, %v16666_v2  ;;  %v16668_v41 = vmax.f32 %v16667_v48, -100.0  ;;  %v16669_v49 = vsub.f32 1.0, %v16657_v18  ;;  %7103 = vmatmul.mubr.bf16.gmra.mrb[176].mxu1 %v6738_v40 }
 0x7fa   : > { %v16671_v51 = vmax.f32 %v16670_v19, -100.0  ;;  %v16672_v37 = vsub.f32 1.0, %v16660_v32  ;;  %v6745_v5 = vpack.c.bf16 %v6713_v12, %v6711_v17  ;;  %v16673_v3 = vsub.f32 1.0, %v16663_v13  ;;  %v16678_v32 = vld [vmem:[#allocation38_spill] sm:$0xff]  ;;  %7112 = vmatprep.mubr.bf16.mxu1 %v6741_v57 }
 0x7fb   : > { %v5567_v7 = vmul.f32 %v16669_v49, %v16668_v41  ;;  %v16674_v63 = vsub.f32 1.0, %v16664_v52  ;;  %v16675_v30 = vsub.f32 1.0, %v16665_v50  ;;  %v5572_v0 = vmul.f32 %v5508_v56, %v5380_v10 }
 0x7fc   : > { %v5568_v46 = vmul.f32 %v16672_v37, %v16671_v51  ;;  %v5569_v16 = vmul.f32 %v16673_v3, %v5377_v11  ;;  %v5629_v58 = vadd.f32 %v16677_v29, %v16676_v55  ;;  %v5630_v34 = vadd.f32 %v16679_v8, %v16678_v32 }
 0x7fd   : > { %v5570_v59 = vmul.f32 %v16674_v63, %v5378_v54  ;;  %v5571_v18 = vmul.f32 %v16675_v30, %v5379_v21  ;;  %v5631_v4 = vadd.f32 %v5567_v7, %v15303_v15  ;;  %v5691_v43 = vsub.f32 0.0, %v16680_v35 }
 0x7fe   : > { %v5632_v62 = vadd.f32 %v5568_v46, %v15312_v31  ;;  %v5633_v11 = vadd.f32 %v5569_v16, %v5441_v28  ;;  %v5636_v54 = vadd.f32 %v5572_v0, %v5444_v45  ;;  %v5692_v21 = vsub.f32 0.0, %v16681_v47  ;;  %v7591_v46 = vld [vmem:[%s16216_s18] sm:$0x3] }
 0x7ff   : > { %v5634_v1 = vadd.f32 %v5570_v59, %v5442_v6  ;;  %v5635_v36 = vadd.f32 %v5571_v18, %v5443_v23  ;;  %v5754_v26 = vadd.f32 %v16682_v42, %v5691_v43  ;;  %v5693_v24 = vsub.f32 0.0, %v5629_v58 }
 0x800   : > { %v5694_v15 = vsub.f32 0.0, %v5630_v34  ;;  %v5695_v31 = vsub.f32 0.0, %v5631_v4  ;;  %v5696_v13 = vsub.f32 0.0, %v5632_v62  ;;  %v5697_v27 = vsub.f32 0.0, %v5633_v11 }
 0x801   : > { %v5755_v17 = vadd.f32 %v5754_v26, %v5692_v21  ;;  %7113 = vmatmul.mubr.bf16.gmra.mrb[180].mxu1 %v6740_v60  ;;  %v5698_v40 = vsub.f32 0.0, %v5634_v1  ;;  %v5699_v57 = vsub.f32 0.0, %v5635_v36  ;;  %v5700_v20 = vsub.f32 0.0, %v5636_v54 }
 0x802   : > { %7122 = vmatprep.mubr.bf16.mxu1 %v6743_v22  ;;  %v15431_v60 = vrot.slane %v6778_v39, %v16683_v14  ;;  %v16684_v22 = vld [vmem:[#allocation14_spill] sm:$0xff]  ;;  %v15444_v0 = vrot.slane %v7591_v46, %v16683_v14 }
 0x803   : > { %v5756_v9 = vadd.f32 %v5755_v17, %v5693_v24  ;;  %v15434_v12 = vrot.slane %v6778_v39, %v16684_v22  ;;  %v15447_v58 = vrot.slane %v7591_v46, %v16684_v22 }
 0x805   : > { %v5757_v38 = vadd.f32 %v5756_v9, %v5694_v15 }
 0x807   : > { %v5758_v28 = vadd.f32 %v5757_v38, %v5695_v31 }
 0x809   : > { %v5759_v53 = vadd.f32 %v5758_v28, %v5696_v13  ;;  %7123 = vmatmul.mubr.bf16.gmra.mrb[184].mxu1 %v6742_v33 }
 0x80a   : > { %7132 = vmatprep.mubr.bf16.mxu1 %v6745_v5 }
 0x80b   : > { %v5760_v44 = vadd.f32 %v5759_v53, %v5697_v27 }
 0x80d   : > { %v5761_v25 = vadd.f32 %v5760_v44, %v5698_v40 }
 0x80f   : > { %v5762_v52 = vadd.f32 %v5761_v25, %v5699_v57 }
 0x811   : > { %v15425_v6 = vadd.f32 %v5762_v52, %v5700_v20  ;;  %7133 = vmatmul.mubr.bf16.gmra.mrb[188].mxu1 %v6744_v61 }
 0x855   : > { %v6984_v10 = vpop.f32.mrb[128].mxu1 }
 0x856   : > { %v6985_v50 = vadd.f32 %v6984_v10, %v15431_v60  ;;  %v6986_v33 = vpop.f32.mrb[129].mxu1 }
 0x857   : > { %v6987_v23 = vadd.f32 %v6986_v33, %v15434_v12  ;;  %v6988_v2 = vpop.f32.mrb[130].mxu1 }
 0x858   : > { %v7207_v56 = vmul.f32 1.442695, %v6985_v50  ;;  %v6989_v61 = vadd.f32 %v6988_v2, %v15431_v60  ;;  %v6990_v45 = vpop.f32.mrb[131].mxu1  ;;  %vm7143_vm0 = vcmp.gt.f32.partialorder %v6985_v50, 0.0 }
 0x859   : > { %v7209_v48 = vmul.f32 1.442695, %v6987_v23  ;;  %v6991_v41 = vadd.f32 %v6990_v45, %v15434_v12  ;;  %vm7144_vm1 = vcmp.gt.f32.partialorder %v6987_v23, 0.0 }
 0x85a   : > { %10627 = vpow2.f32 %v7207_v56  ;;  %v7211_v49 = vmul.f32 1.442695, %v6989_v61  ;;  %vm7145_vm2 = vcmp.gt.f32.partialorder %v6989_v61, 0.0 }
 0x85b   : > { %10629 = vpow2.f32 %v7209_v48  ;;  %v7213_v7 = vmul.f32 1.442695, %v6991_v41  ;;  %vm7146_vm3 = vcmp.gt.f32.partialorder %v6991_v41, 0.0 }
 0x85c   : > { %10631 = vpow2.f32 %v7211_v49 }
 0x85d   : > { %10633 = vpow2.f32 %v7213_v7 }
 0x864   : > { %v10628_v19 = vpop.eup %10627 }
 0x865   : > { %v10630_v51 = vpop.eup %10629  ;;  %v9009_v37 = vadd.f32 -1.0, %v10628_v19 }
 0x866   : > { %v10632_v5 = vpop.eup %10631  ;;  %v9010_v3 = vadd.f32 -1.0, %v10630_v51 }
 0x867   : > { %v10634_v16 = vpop.eup %10633  ;;  %v9011_v63 = vadd.f32 -1.0, %v10632_v5  ;;  %v7399_v59 = vmul.f32 1.6732632, %v9009_v37 }
 0x868   : > { %v9012_v30 = vadd.f32 -1.0, %v10634_v16  ;;  %v7400_v18 = vmul.f32 1.6732632, %v9010_v3 }
 0x869   : > { %v7401_v55 = vmul.f32 1.6732632, %v9011_v63  ;;  %v7463_v29 = vsel %vm7143_vm0, %v6985_v50, %v7399_v59 }
 0x86a   : > { %v7402_v32 = vmul.f32 1.6732632, %v9012_v30  ;;  %v7464_v8 = vsel %vm7144_vm1, %v6987_v23, %v7400_v18  ;;  %v7527_v34 = vmul.f32 1.050701, %v7463_v29 }
 0x86b   : > { %v7465_v4 = vsel %vm7145_vm2, %v6989_v61, %v7401_v55  ;;  %v7528_v11 = vmul.f32 1.050701, %v7464_v8 }
 0x86c   : > { %v7529_v1 = vmul.f32 1.050701, %v7465_v4  ;;  %v7466_v36 = vsel %vm7146_vm3, %v6991_v41, %v7402_v32  ;;  %v7603_v54 = vmul.f32 %v15444_v0, %v7527_v34 }
 0x86d   : > { %v7530_v47 = vmul.f32 1.050701, %v7466_v36  ;;  %v7604_v26 = vmul.f32 %v15447_v58, %v7528_v11 }
 0x86e   : > { %v7605_v9 = vmul.f32 %v15444_v0, %v7529_v1 }
 0x86f   : > { %v6994_v62 = vpop.f32.mrb[132].mxu1  ;;  %v7667_v13 = vadd.f32 %v7604_v26, %v7603_v54  ;;  %v7606_v27 = vmul.f32 %v15447_v58, %v7530_v47 }
 0x870   : > { %v6995_v35 = vadd.f32 %v6994_v62, %v15431_v60  ;;  %v6996_v43 = vpop.f32.mrb[133].mxu1 }
 0x871   : > { %v6997_v21 = vadd.f32 %v6996_v43, %v15434_v12  ;;  %v6998_v42 = vpop.f32.mrb[134].mxu1  ;;  %7668 = vadd.xlane.f32.xlu1 %v7667_v13  ;;  %v7670_v40 = vadd.f32 %v7606_v27, %v7605_v9 }
 0x872   : > { %v7215_v24 = vmul.f32 1.442695, %v6995_v35  ;;  %v15454_v17 = vadd.f32 %v6998_v42, %v15431_v60  ;;  %v7000_v15 = vpop.f32.mrb[135].mxu1  ;;  %vm7147_vm4 = vcmp.gt.f32.partialorder %v6995_v35, 0.0 }
 0x873   : > { %v7217_v31 = vmul.f32 1.442695, %v6997_v21  ;;  %v15458_v38 = vadd.f32 %v7000_v15, %v15434_v12  ;;  %vm7148_vm5 = vcmp.gt.f32.partialorder %v6997_v21, 0.0 }
 0x874   : > { %10635 = vpow2.f32 %v7215_v24  ;;  %v7219_v28 = vmul.f32 1.442695, %v15454_v17  ;;  %vm7149_vm6 = vcmp.gt.f32.partialorder %v15454_v17, 0.0 }
 0x875   : > { %10637 = vpow2.f32 %v7217_v31  ;;  %v7221_v53 = vmul.f32 1.442695, %v15458_v38  ;;  %7671 = vadd.xlane.f32.xlu1 %v7670_v40  ;;  %vm7150_vm7 = vcmp.gt.f32.partialorder %v15458_v38, 0.0 }
 0x876   : > { %10639 = vpow2.f32 %v7219_v28 }
 0x877   : > { %10641 = vpow2.f32 %v7221_v53  ;;  %v7004_v44 = vpop.f32.mrb[136].mxu1 }
 0x878   : > { %v15464_v57 = vadd.f32 %v7004_v44, %v15431_v60  ;;  %v7006_v25 = vpop.f32.mrb[137].mxu1 }
 0x879   : > { %v15467_v20 = vadd.f32 %v7006_v25, %v15434_v12  ;;  %v7008_v52 = vpop.f32.mrb[138].mxu1 }
 0x87a   : > { %v7223_v39 = vmul.f32 1.442695, %v15464_v57  ;;  %v15471_v14 = vadd.f32 %v7008_v52, %v15431_v60  ;;  %v7010_v22 = vpop.f32.mrb[139].mxu1  ;;  %vm7151_vm8 = vcmp.gt.f32.partialorder %v15464_v57, 0.0 }
 0x87b   : > { %v7225_v10 = vmul.f32 1.442695, %v15467_v20  ;;  %v15475_v50 = vadd.f32 %v7010_v22, %v15434_v12  ;;  %vm7152_vm9 = vcmp.gt.f32.partialorder %v15467_v20, 0.0 }
 0x87c   : > { %10643 = vpow2.f32 %v7223_v39  ;;  %v7227_v33 = vmul.f32 1.442695, %v15471_v14  ;;  %vm7153_vm10 = vcmp.gt.f32.partialorder %v15471_v14, 0.0 }
 0x87d   : > { %10645 = vpow2.f32 %v7225_v10  ;;  %v7229_v23 = vmul.f32 1.442695, %v15475_v50  ;;  %vm7154_vm11 = vcmp.gt.f32.partialorder %v15475_v50, 0.0 }
 0x87e   : > { %v10636_v2 = vpop.eup %10635  ;;  %10647 = vpow2.f32 %v7227_v33 }
 0x87f   : > { %v10638_v56 = vpop.eup %10637  ;;  %v9013_v61 = vadd.f32 -1.0, %v10636_v2  ;;  %10649 = vpow2.f32 %v7229_v23 }
 0x880   : > { %v10640_v48 = vpop.eup %10639  ;;  %v9014_v41 = vadd.f32 -1.0, %v10638_v56 }
 0x881   : > { %v10642_v19 = vpop.eup %10641  ;;  %v7403_v51 = vmul.f32 1.6732632, %v9013_v61  ;;  %v9015_v37 = vadd.f32 -1.0, %v10640_v48 }
 0x882   : > { %v7404_v3 = vmul.f32 1.6732632, %v9014_v41  ;;  %v9016_v16 = vadd.f32 -1.0, %v10642_v19 }
 0x883   : > { %v7014_v45 = vpop.f32.mrb[140].mxu1  ;;  %v7467_v59 = vsel %vm7147_vm4, %v6995_v35, %v7403_v51  ;;  %v7405_v29 = vmul.f32 1.6732632, %v9015_v37 }
 0x884   : > { %v15480_v49 = vadd.f32 %v7014_v45, %v15431_v60  ;;  %v7016_v7 = vpop.f32.mrb[141].mxu1  ;;  %v7468_v55 = vsel %vm7148_vm5, %v6997_v21, %v7404_v3  ;;  %v7531_v34 = vmul.f32 1.050701, %v7467_v59  ;;  %v7406_v4 = vmul.f32 1.6732632, %v9016_v16 }
 0x885   : > { %v15483_v46 = vadd.f32 %v7016_v7, %v15434_v12  ;;  %v7018_v5 = vpop.f32.mrb[142].mxu1  ;;  %v7532_v1 = vmul.f32 1.050701, %v7468_v55  ;;  %v7469_v26 = vsel %vm7149_vm6, %v15454_v17, %v7405_v29 }
 0x886   : > { %v7231_v63 = vmul.f32 1.442695, %v15480_v49  ;;  %v7020_v18 = vpop.f32.mrb[143].mxu1  ;;  %v15488_v32 = vadd.f32 %v7018_v5, %v15431_v60  ;;  %v10644_v8 = vpop.eup %10643  ;;  %v7470_v9 = vsel %vm7150_vm7, %v15458_v38, %v7406_v4  ;;  %v7607_v28 = vmul.f32 %v15444_v0, %v7531_v34 }
 0x887   : > { %v7233_v30 = vmul.f32 1.442695, %v15483_v46  ;;  %v15491_v62 = vadd.f32 %v7020_v18, %v15434_v12  ;;  %v10646_v11 = vpop.eup %10645  ;;  %v9017_v36 = vadd.f32 -1.0, %v10644_v8  ;;  %v7608_v44 = vmul.f32 %v15447_v58, %v7532_v1 }
 0x888   : > { %10651 = vpow2.f32 %v7231_v63  ;;  %v7235_v35 = vmul.f32 1.442695, %v15488_v32  ;;  %v10648_v43 = vpop.eup %10647  ;;  %v9018_v54 = vadd.f32 -1.0, %v10646_v11  ;;  %v7533_v52 = vmul.f32 1.050701, %v7469_v26 }
 0x889   : > { %10653 = vpow2.f32 %v7233_v30  ;;  %v7237_v47 = vmul.f32 1.442695, %v15491_v62  ;;  %v10650_v42 = vpop.eup %10649  ;;  %v7407_v27 = vmul.f32 1.6732632, %v9017_v36  ;;  %v9019_v53 = vadd.f32 -1.0, %v10648_v43 }
 0x88a   : > { %10655 = vpow2.f32 %v7235_v35  ;;  %v7408_v25 = vmul.f32 1.6732632, %v9018_v54  ;;  %v9020_v38 = vadd.f32 -1.0, %v10650_v42  ;;  %v7534_v10 = vmul.f32 1.050701, %v7470_v9 }
 0x88b   : > { %10657 = vpow2.f32 %v7237_v47  ;;  %v7471_v56 = vsel %vm7151_vm8, %v15464_v57, %v7407_v27  ;;  %v7409_v61 = vmul.f32 1.6732632, %v9019_v53  ;;  %v7673_v45 = vadd.f32 %v7608_v44, %v7607_v28 }
 0x88c   : > { %v7024_v21 = vpop.f32.mrb[144].mxu1  ;;  %v7472_v41 = vsel %vm7152_vm9, %v15467_v20, %v7408_v25  ;;  %v7410_v7 = vmul.f32 1.6732632, %v9020_v38  ;;  %v7609_v57 = vmul.f32 %v15444_v0, %v7533_v52  ;;  %v7535_v59 = vmul.f32 1.050701, %v7471_v56 }
 0x88d   : > { %v15499_v24 = vadd.f32 %v7024_v21, %v15431_v60  ;;  %v7026_v15 = vpop.f32.mrb[145].mxu1  ;;  %7674 = vadd.xlane.f32.xlu1 %v7673_v45  ;;  %v7610_v30 = vmul.f32 %v15447_v58, %v7534_v10  ;;  %v7536_v29 = vmul.f32 1.050701, %v7472_v41  ;;  %v7473_v8 = vsel %vm7153_vm10, %v15471_v14, %v7409_v61 }
 0x88e   : > { %v15503_v31 = vadd.f32 %v7026_v15, %v15434_v12  ;;  %v7028_v13 = vpop.f32.mrb[146].mxu1  ;;  %v7474_v11 = vsel %vm7154_vm11, %v15475_v50, %v7410_v7  ;;  %vm7155_vm12 = vcmp.gt.f32.partialorder %v15480_v49, 0.0  ;;  %v7537_v47 = vmul.f32 1.050701, %v7473_v8 }
 0x88f   : > { %v7239_v17 = vmul.f32 1.442695, %v15499_v24  ;;  %v7030_v40 = vpop.f32.mrb[147].mxu1  ;;  %v15514_v33 = vadd.f32 %v7028_v13, %v15431_v60  ;;  %v7676_v35 = vadd.f32 %v7610_v30, %v7609_v57  ;;  %v7538_v26 = vmul.f32 1.050701, %v7474_v11 }
 0x890   : > { %v7241_v39 = vmul.f32 1.442695, %v15503_v31  ;;  %v15517_v23 = vadd.f32 %v7030_v40, %v15434_v12  ;;  %v7611_v50 = vmul.f32 %v15444_v0, %v7535_v59  ;;  %v7612_v9 = vmul.f32 %v15447_v58, %v7536_v29 }
 0x891   : > { %10659 = vpow2.f32 %v7239_v17  ;;  %v7243_v51 = vmul.f32 1.442695, %v15514_v33  ;;  %7677 = vadd.xlane.f32.xlu1 %v7676_v35  ;;  %vm7156_vm13 = vcmp.gt.f32.partialorder %v15483_v46, 0.0  ;;  %vm7157_vm14 = vcmp.gt.f32.partialorder %v15488_v32, 0.0 }
 0x892   : > { %v10652_v22 = vpop.eup %10651  ;;  %10661 = vpow2.f32 %v7241_v39  ;;  %v7245_v3 = vmul.f32 1.442695, %v15517_v23  ;;  %v7613_v10 = vmul.f32 %v15444_v0, %v7537_v47  ;;  %v7614_v61 = vmul.f32 %v15447_v58, %v7538_v26 }
 0x893   : > { %v10654_v2 = vpop.eup %10653  ;;  %v9021_v19 = vadd.f32 -1.0, %v10652_v22  ;;  %10663 = vpow2.f32 %v7243_v51  ;;  %v7679_v22 = vadd.f32 %v7612_v9, %v7611_v50  ;;  %vm7158_vm15 = vcmp.gt.f32.partialorder %v15491_v62, 0.0 }
 0x894   : > { %v7034_v48 = vpop.f32.mrb[148].mxu1  ;;  %v9022_v5 = vadd.f32 -1.0, %v10654_v2  ;;  %v10656_v55 = vpop.eup %10655  ;;  %10665 = vpow2.f32 %v7245_v3  ;;  %vm7159_vm0 = vcmp.gt.f32.partialorder %v15499_v24, 0.0  ;;  %vm7160_vm1 = vcmp.gt.f32.partialorder %v15503_v31, 0.0 }
 0x895   : > { %v7036_v37 = vpop.f32.mrb[149].mxu1  ;;  %v15526_v16 = vadd.f32 %v7034_v48, %v15431_v60  ;;  %v10658_v4 = vpop.eup %10657  ;;  %v7411_v1 = vmul.f32 1.6732632, %v9021_v19  ;;  %v9023_v36 = vadd.f32 -1.0, %v10656_v55  ;;  %7680 = vadd.xlane.f32.xlu1 %v7679_v22  ;;  %vm7161_vm2 = vcmp.gt.f32.partialorder %v15514_v33, 0.0 }
 0x896   : > { %v7038_v63 = vpop.f32.mrb[150].mxu1  ;;  %v15531_v20 = vadd.f32 %v7036_v37, %v15434_v12  ;;  %v7412_v43 = vmul.f32 1.6732632, %v9022_v5  ;;  %v9024_v54 = vadd.f32 -1.0, %v10658_v4  ;;  %vm7162_vm3 = vcmp.gt.f32.partialorder %v15517_v23, 0.0 }
 0x897   : > { %v7040_v18 = vpop.f32.mrb[151].mxu1  ;;  %v7247_v34 = vmul.f32 1.442695, %v15526_v16  ;;  %v15543_v21 = vadd.f32 %v7038_v63, %v15431_v60  ;;  %v7475_v28 = vsel %vm7155_vm12, %v15480_v49, %v7411_v1  ;;  %v7413_v27 = vmul.f32 1.6732632, %v9023_v36 }
 0x898   : > { %v7249_v14 = vmul.f32 1.442695, %v15531_v20  ;;  %v15546_v15 = vadd.f32 %v7040_v18, %v15434_v12  ;;  %v7476_v40 = vsel %vm7156_vm13, %v15483_v46, %v7412_v43  ;;  %v7414_v44 = vmul.f32 1.6732632, %v9024_v54 }
 0x899   : > { %10667 = vpow2.f32 %v7247_v34  ;;  %v7251_v25 = vmul.f32 1.442695, %v15543_v21  ;;  %v7539_v45 = vmul.f32 1.050701, %v7475_v28  ;;  %v7540_v48 = vmul.f32 1.050701, %v7476_v40 }
 0x89a   : > { %10669 = vpow2.f32 %v7249_v14  ;;  %v7253_v2 = vmul.f32 1.442695, %v15546_v15  ;;  %v7477_v19 = vsel %vm7157_vm14, %v15488_v32, %v7413_v27  ;;  %v7478_v5 = vsel %vm7158_vm15, %v15491_v62, %v7414_v44 }
 0x89b   : > { %v10660_v42 = vpop.eup %10659  ;;  %10671 = vpow2.f32 %v7251_v25  ;;  %v7682_v63 = vadd.f32 %v7614_v61, %v7613_v10  ;;  %v7541_v29 = vmul.f32 1.050701, %v7477_v19  ;;  %v7542_v34 = vmul.f32 1.050701, %v7478_v5 }
 0x89c   : > { %v7044_v13 = vpop.f32.mrb[152].mxu1  ;;  %v10662_v17 = vpop.eup %10661  ;;  %v9025_v52 = vadd.f32 -1.0, %v10660_v42  ;;  %10673 = vpow2.f32 %v7253_v2  ;;  %v7615_v36 = vmul.f32 %v15444_v0, %v7539_v45  ;;  %v7616_v9 = vmul.f32 %v15447_v58, %v7540_v48 }
 0x89d   : > { %v7046_v53 = vpop.f32.mrb[153].mxu1  ;;  %v9026_v39 = vadd.f32 -1.0, %v10662_v17  ;;  %v15558_v56 = vadd.f32 %v7044_v13, %v15431_v60  ;;  %v10664_v46 = vpop.eup %10663  ;;  %7683 = vadd.xlane.f32.xlu1 %v7682_v63  ;;  %v7617_v27 = vmul.f32 %v15444_v0, %v7541_v29  ;;  %vm7163_vm4 = vcmp.gt.f32.partialorder %v15526_v16, 0.0 }
 0x89e   : > { %v7048_v38 = vpop.f32.mrb[154].mxu1  ;;  %v15563_v41 = vadd.f32 %v7046_v53, %v15434_v12  ;;  %v10666_v7 = vpop.eup %10665  ;;  %v9027_v51 = vadd.f32 -1.0, %v10664_v46  ;;  %v7415_v3 = vmul.f32 1.6732632, %v9025_v52  ;;  %v7685_v17 = vadd.f32 %v7616_v9, %v7615_v36 }
 0x89f   : > { %v7050_v49 = vpop.f32.mrb[155].mxu1  ;;  %v15569_v37 = vadd.f32 %v7048_v38, %v15431_v60  ;;  %v7255_v57 = vmul.f32 1.442695, %v15558_v56  ;;  %v7416_v59 = vmul.f32 1.6732632, %v9026_v39  ;;  %v9028_v18 = vadd.f32 -1.0, %v10666_v7 }
 0x8a0   : > { %v7417_v30 = vmul.f32 1.6732632, %v9027_v51  ;;  %v7257_v32 = vmul.f32 1.442695, %v15563_v41  ;;  %v15578_v4 = vadd.f32 %v7050_v49, %v15434_v12  ;;  %v7479_v1 = vsel %vm7159_vm0, %v15499_v24, %v7415_v3 }
 0x8a1   : > { %10675 = vpow2.f32 %v7255_v57  ;;  %v7259_v62 = vmul.f32 1.442695, %v15569_v37  ;;  %v7480_v54 = vsel %vm7160_vm1, %v15503_v31, %v7416_v59  ;;  %v7418_v14 = vmul.f32 1.6732632, %v9028_v18  ;;  %7686 = vadd.xlane.f32.xlu1 %v7685_v17 }
 0x8a2   : > { %10677 = vpow2.f32 %v7257_v32  ;;  %v7481_v47 = vsel %vm7161_vm2, %v15514_v33, %v7417_v30  ;;  %v7261_v50 = vmul.f32 1.442695, %v15578_v4  ;;  %v7543_v28 = vmul.f32 1.050701, %v7479_v1 }
 0x8a3   : > { %v10668_v55 = vpop.eup %10667  ;;  %10679 = vpow2.f32 %v7259_v62  ;;  %v7618_v31 = vmul.f32 %v15447_v58, %v7542_v34  ;;  %v7544_v33 = vmul.f32 1.050701, %v7480_v54  ;;  %v7545_v44 = vmul.f32 1.050701, %v7481_v47 }
 0x8a4   : > { %v7054_v8 = vpop.f32.mrb[156].mxu1  ;;  %v10670_v43 = vpop.eup %10669  ;;  %v9029_v42 = vadd.f32 -1.0, %v10668_v55  ;;  %10681 = vpow2.f32 %v7261_v50  ;;  %v7482_v22 = vsel %vm7162_vm3, %v15517_v23, %v7418_v14  ;;  %vm7164_vm5 = vcmp.gt.f32.partialorder %v15531_v20, 0.0 }
 0x8a5   : > { %v7056_v11 = vpop.f32.mrb[157].mxu1  ;;  %v15588_v24 = vadd.f32 %v7054_v8, %v15431_v60  ;;  %v10672_v13 = vpop.eup %10671  ;;  %v9030_v53 = vadd.f32 -1.0, %v10670_v43  ;;  %v7688_v38 = vadd.f32 %v7618_v31, %v7617_v27  ;;  %v7546_v3 = vmul.f32 1.050701, %v7482_v22 }
 0x8a6   : > { %v7058_v35 = vpop.f32.mrb[158].mxu1  ;;  %v10674_v40 = vpop.eup %10673  ;;  %v15595_v52 = vadd.f32 %v7056_v11, %v15434_v12  ;;  %v7419_v10 = vmul.f32 1.6732632, %v9029_v42  ;;  %v9031_v49 = vadd.f32 -1.0, %v10672_v13  ;;  %v7619_v18 = vmul.f32 %v15444_v0, %v7543_v28 }
 0x8a7   : > { %v7060_v26 = vpop.f32.mrb[159].mxu1  ;;  %v7263_v25 = vmul.f32 1.442695, %v15588_v24  ;;  %v15601_v2 = vadd.f32 %v7058_v35, %v15431_v60  ;;  %v9032_v46 = vadd.f32 -1.0, %v10674_v40  ;;  %v7420_v23 = vmul.f32 1.6732632, %v9030_v53  ;;  %7689 = vadd.xlane.f32.xlu1 %v7688_v38 }
 0x8a8   : > { %v7265_v45 = vmul.f32 1.442695, %v15595_v52  ;;  %v15607_v48 = vadd.f32 %v7060_v26, %v15434_v12  ;;  %v7421_v59 = vmul.f32 1.6732632, %v9031_v49  ;;  %v7483_v55 = vsel %vm7163_vm4, %v15526_v16, %v7419_v10 }
 0x8a9   : > { %10683 = vpow2.f32 %v7263_v25  ;;  %v7267_v51 = vmul.f32 1.442695, %v15601_v2  ;;  %vm7165_vm6 = vcmp.gt.f32.partialorder %v15543_v21, 0.0  ;;  %v7422_v29 = vmul.f32 1.6732632, %v9032_v46 }
 0x8aa   : > { %10685 = vpow2.f32 %v7265_v45  ;;  %v7269_v30 = vmul.f32 1.442695, %v15607_v48  ;;  %v7620_v32 = vmul.f32 %v15447_v58, %v7544_v33  ;;  %v7484_v34 = vsel %vm7164_vm5, %v15531_v20, %v7420_v23 }
 0x8ab   : > { %v10676_v19 = vpop.eup %10675  ;;  %10687 = vpow2.f32 %v7267_v51  ;;  %v7621_v11 = vmul.f32 %v15444_v0, %v7545_v44  ;;  %vm7166_vm7 = vcmp.gt.f32.partialorder %v15546_v15, 0.0  ;;  %v7622_v35 = vmul.f32 %v15447_v58, %v7546_v3 }
 0x8ac   : > { %v15597_v39 = vpop.f32.mrb[160].mxu1  ;;  %v9033_v57 = vadd.f32 -1.0, %v10676_v19  ;;  %v10678_v63 = vpop.eup %10677  ;;  %10689 = vpow2.f32 %v7269_v30  ;;  %v7691_v36 = vadd.f32 %v7620_v32, %v7619_v18  ;;  %v7547_v54 = vmul.f32 1.050701, %v7483_v55 }
 0x8ad   : > { %v15603_v61 = vpop.f32.mrb[161].mxu1  ;;  %v10680_v8 = vpop.eup %10679  ;;  %v9034_v62 = vadd.f32 -1.0, %v10678_v63  ;;  %v7485_v47 = vsel %vm7165_vm6, %v15543_v21, %v7421_v59  ;;  %vm7167_vm8 = vcmp.gt.f32.partialorder %v15558_v56, 0.0  ;;  %vm7168_vm9 = vcmp.gt.f32.partialorder %v15563_v41, 0.0 }
 0x8ae   : > { %v7068_v7 = vpop.f32.mrb[162].mxu1  ;;  %v7423_v1 = vmul.f32 1.6732632, %v9033_v57  ;;  %v10682_v16 = vpop.eup %10681  ;;  %v7548_v14 = vmul.f32 1.050701, %v7484_v34  ;;  %v7486_v42 = vsel %vm7166_vm7, %v15546_v15, %v7422_v29  ;;  %v9035_v26 = vadd.f32 -1.0, %v10680_v8  ;;  %7692 = vadd.xlane.f32.xlu1 %v7691_v36 }
 0x8af   : > { %v7070_v5 = vpop.f32.mrb[163].mxu1  ;;  %v7694_v50 = vadd.f32 %v7622_v35, %v7621_v11  ;;  %v7424_v13 = vmul.f32 1.6732632, %v9034_v62  ;;  %vm7169_vm10 = vcmp.gt.f32.partialorder %v15569_v37, 0.0  ;;  %vm7170_vm11 = vcmp.gt.f32.partialorder %v15578_v4, 0.0 }
 0x8b0   : > { %v9036_v28 = vadd.f32 -1.0, %v10682_v16  ;;  %v7549_v31 = vmul.f32 1.050701, %v7485_v47  ;;  %v7487_v33 = vsel %vm7167_vm8, %v15558_v56, %v7423_v1  ;;  %vm7171_vm12 = vcmp.gt.f32.partialorder %v15588_v24, 0.0 }
 0x8b1   : > { %v15632_v15 = vadd.f32 %v7068_v7, %v15431_v60  ;;  %v7550_v53 = vmul.f32 1.050701, %v7486_v42  ;;  %v15635_v40 = vadd.f32 %v7070_v5, %v15434_v12  ;;  %v7623_v44 = vmul.f32 %v15444_v0, %v7547_v54 }
 0x8b2   : > { %v7425_v38 = vmul.f32 1.6732632, %v9035_v26  ;;  %v15640_v22 = vadd.f32 %v15597_v39, %v15431_v60  ;;  %7695 = vadd.xlane.f32.xlu1 %v7694_v50  ;;  %v7624_v10 = vmul.f32 %v15447_v58, %v7548_v14  ;;  %v7551_v46 = vmul.f32 1.050701, %v7487_v33 }
 0x8b3   : > { %v10684_v21 = vpop.eup %10683  ;;  %v7275_v56 = vmul.f32 1.442695, %v15632_v15  ;;  %v7488_v45 = vsel %vm7168_vm9, %v15563_v41, %v7424_v13  ;;  %v7426_v7 = vmul.f32 1.6732632, %v9036_v28  ;;  %vm7172_vm13 = vcmp.gt.f32.partialorder %v15595_v52, 0.0 }
 0x8b4   : > { %v7074_v43 = vpop.f32.mrb[164].mxu1  ;;  %v9037_v17 = vadd.f32 -1.0, %v10684_v21  ;;  %v10686_v25 = vpop.eup %10685  ;;  %vm7173_vm14 = vcmp.gt.f32.partialorder %v15601_v2, 0.0  ;;  %v7277_v51 = vmul.f32 1.442695, %v15635_v40  ;;  %v7697_v5 = vadd.f32 %v7624_v10, %v7623_v44 }
 0x8b5   : > { %v7076_v20 = vpop.f32.mrb[165].mxu1  ;;  %v10688_v49 = vpop.eup %10687  ;;  %v9038_v23 = vadd.f32 -1.0, %v10686_v25  ;;  %vm7174_vm15 = vcmp.gt.f32.partialorder %v15607_v48, 0.0  ;;  %v15653_v63 = vadd.f32 %v15603_v61, %v15434_v12  ;;  %10691 = vpow2.f32 %v7275_v56 }
 0x8b6   : > { %v7078_v9 = vpop.f32.mrb[166].mxu1  ;;  %v7427_v19 = vmul.f32 1.6732632, %v9037_v17  ;;  %v9039_v39 = vadd.f32 -1.0, %v10688_v49  ;;  %v10690_v57 = vpop.eup %10689  ;;  %v15656_v41 = vadd.f32 %v7074_v43, %v15431_v60  ;;  %v7625_v59 = vmul.f32 %v15444_v0, %v7549_v31  ;;  %7698 = vadd.xlane.f32.xlu1 %v7697_v5 }
 0x8b7   : > { %v7080_v27 = vpop.f32.mrb[167].mxu1  ;;  %v7552_v18 = vmul.f32 1.050701, %v7488_v45  ;;  %v7489_v55 = vsel %vm7169_vm10, %v15569_v37, %v7425_v38  ;;  %v9040_v29 = vadd.f32 -1.0, %v10690_v57  ;;  %v7271_v32 = vmul.f32 1.442695, %v15640_v22 }
 0x8b8   : > { %v7490_v61 = vsel %vm7170_vm11, %v15578_v4, %v7426_v7  ;;  %10693 = vpow2.f32 %v7277_v51  ;;  %v7279_v34 = vmul.f32 1.442695, %v15656_v41  ;;  %v7626_v62 = vmul.f32 %v15447_v58, %v7550_v53 }
 0x8b9   : > { %v7491_v1 = vsel %vm7171_vm12, %v15588_v24, %v7427_v19  ;;  %v7428_v37 = vmul.f32 1.6732632, %v9038_v23  ;;  %v7429_v36 = vmul.f32 1.6732632, %v9039_v39  ;;  %v15672_v35 = vadd.f32 %v7076_v20, %v15434_v12 }
 0x8ba   : > { %v7553_v43 = vmul.f32 1.050701, %v7489_v55  ;;  %10695 = vpow2.f32 %v7279_v34  ;;  %v7700_v16 = vadd.f32 %v7626_v62, %v7625_v59  ;;  %v15675_v4 = vadd.f32 %v7078_v9, %v15431_v60 }
 0x8bb   : > { %v7554_v54 = vmul.f32 1.050701, %v7490_v61  ;;  %v7430_v47 = vmul.f32 1.6732632, %v9040_v29  ;;  %v7281_v14 = vmul.f32 1.442695, %v15672_v35  ;;  %v15679_v42 = vadd.f32 %v7080_v27, %v15434_v12 }
 0x8bc   : > { %v7084_v3 = vpop.f32.mrb[168].mxu1  ;;  %v7555_v26 = vmul.f32 1.050701, %v7491_v1  ;;  %10697 = vpow2.f32 %v7271_v32  ;;  %v7273_v24 = vmul.f32 1.442695, %v15653_v63  ;;  %7701 = vadd.xlane.f32.xlu1 %v7700_v16  ;;  %v7492_v50 = vsel %vm7172_vm13, %v15595_v52, %v7428_v37 }
 0x8bd   : > { %v7086_v30 = vpop.f32.mrb[169].mxu1  ;;  %v7283_v20 = vmul.f32 1.442695, %v15675_v4  ;;  %v7493_v9 = vsel %vm7173_vm14, %v15601_v2, %v7429_v36  ;;  %10699 = vpow2.f32 %v7281_v14  ;;  %v7285_v13 = vmul.f32 1.442695, %v15679_v42 }
 0x8be   : > { %v7088_v8 = vpop.f32.mrb[170].mxu1  ;;  %v7627_v27 = vmul.f32 %v15444_v0, %v7551_v46  ;;  %v7628_v21 = vmul.f32 %v15447_v58, %v7552_v18  ;;  %v15693_v31 = vadd.f32 %v7084_v3, %v15431_v60  ;;  %v7494_v52 = vsel %vm7174_vm15, %v15607_v48, %v7430_v47 }
 0x8bf   : > { %v7090_v11 = vpop.f32.mrb[171].mxu1  ;;  %10701 = vpow2.f32 %v7283_v20  ;;  %v7629_v53 = vmul.f32 %v15444_v0, %v7553_v43  ;;  %v7630_v2 = vmul.f32 %v15447_v58, %v7554_v54  ;;  %v15701_v17 = vadd.f32 %v7086_v30, %v15434_v12  ;;  %v10692_v25 = vpop.eup %10691 }
 0x8c0   : > { %v7556_v38 = vmul.f32 1.050701, %v7492_v50  ;;  %10703 = vpow2.f32 %v7273_v24  ;;  %v7703_v56 = vadd.f32 %v7628_v21, %v7627_v27  ;;  %v7287_v10 = vmul.f32 1.442695, %v15693_v31 }
 0x8c1   : > { %10705 = vpow2.f32 %v7285_v13  ;;  %v7706_v46 = vadd.f32 %v7630_v2, %v7629_v53  ;;  %v7289_v45 = vmul.f32 1.442695, %v15701_v17  ;;  %v15706_v48 = vadd.f32 %v7088_v8, %v15431_v60 }
 0x8c2   : > { %v10694_v7 = vpop.eup %10693  ;;  %v7557_v19 = vmul.f32 1.050701, %v7493_v9  ;;  %v7558_v23 = vmul.f32 1.050701, %v7494_v52  ;;  %7704 = vadd.xlane.f32.xlu1 %v7703_v56  ;;  %10707 = vpow2.f32 %v7287_v10  ;;  %v15709_v39 = vadd.f32 %v7090_v11, %v15434_v12 }
 0x8c3   : > { %v9043_v51 = vadd.f32 -1.0, %v10692_v25  ;;  %10709 = vpow2.f32 %v7289_v45  ;;  %v7291_v5 = vmul.f32 1.442695, %v15706_v48  ;;  %v7631_v3 = vmul.f32 %v15444_v0, %v7555_v26 }
 0x8c4   : > { %v7094_v28 = vpop.f32.mrb[172].mxu1  ;;  %v10696_v57 = vpop.eup %10695  ;;  %v7293_v59 = vmul.f32 1.442695, %v15709_v39  ;;  %v9044_v30 = vadd.f32 -1.0, %v10694_v7  ;;  %v7632_v18 = vmul.f32 %v15447_v58, %v7556_v38  ;;  %v7633_v61 = vmul.f32 %v15444_v0, %v7557_v19 }
 0x8c5   : > { %v7096_v33 = vpop.f32.mrb[173].mxu1  ;;  %10711 = vpow2.f32 %v7291_v5  ;;  %v9045_v32 = vadd.f32 -1.0, %v10696_v57  ;;  %v15718_v8 = vadd.f32 %v7094_v28, %v15431_v60  ;;  %vm7177_vm0 = vcmp.gt.f32.partialorder %v15632_v15, 0.0 }
 0x8c6   : > { %v7098_v44 = vpop.f32.mrb[174].mxu1  ;;  %v10698_v29 = vpop.eup %10697  ;;  %7707 = vadd.xlane.f32.xlu1 %v7706_v46  ;;  %v7433_v11 = vmul.f32 1.6732632, %v9043_v51  ;;  %v7709_v1 = vadd.f32 %v7632_v18, %v7631_v3  ;;  %v7634_v37 = vmul.f32 %v15447_v58, %v7558_v23  ;;  %10713 = vpow2.f32 %v7293_v59 }
 0x8c7   : > { %v7100_v49 = vpop.f32.mrb[175].mxu1  ;;  %v10700_v62 = vpop.eup %10699  ;;  %v7295_v54 = vmul.f32 1.442695, %v15718_v8  ;;  %v15729_v47 = vadd.f32 %v7096_v33, %v15434_v12  ;;  %v7434_v26 = vmul.f32 1.6732632, %v9044_v30  ;;  %v15734_v50 = vadd.f32 %v7098_v44, %v15431_v60 }
 0x8c8   : > { %v9046_v16 = vadd.f32 -1.0, %v10700_v62  ;;  %v7712_v20 = vadd.f32 %v7634_v37, %v7633_v61  ;;  %vm7175_vm1 = vcmp.gt.f32.partialorder %v15640_v22, 0.0  ;;  %vm7176_vm2 = vcmp.gt.f32.partialorder %v15653_v63, 0.0 }
 0x8c9   : > { %v10702_v43 = vpop.eup %10701  ;;  %vm7178_vm3 = vcmp.gt.f32.partialorder %v15635_v40, 0.0  ;;  %vm7179_vm4 = vcmp.gt.f32.partialorder %v15656_v41, 0.0  ;;  %v7435_v13 = vmul.f32 1.6732632, %v9045_v32  ;;  %10715 = vpow2.f32 %v7295_v54 }
 0x8ca   : > { %v9047_v24 = vadd.f32 -1.0, %v10702_v43  ;;  %v10704_v9 = vpop.eup %10703  ;;  %7710 = vadd.xlane.f32.xlu1 %v7709_v1  ;;  %v9041_v27 = vadd.f32 -1.0, %v10698_v29  ;;  %vm7180_vm5 = vcmp.gt.f32.partialorder %v15672_v35, 0.0  ;;  %v7436_v21 = vmul.f32 1.6732632, %v9046_v16 }
 0x8cb   : > { %v10706_v28 = vpop.eup %10705  ;;  %v7297_v33 = vmul.f32 1.442695, %v15729_v47  ;;  %v7497_v53 = vsel %vm7177_vm0, %v15632_v15, %v7433_v11  ;;  %v7299_v44 = vmul.f32 1.442695, %v15734_v50  ;;  %v15747_v25 = vadd.f32 %v7100_v49, %v15434_v12 }
 0x8cc   : > { %v15715_v55 = vpop.f32.mrb[176].mxu1  ;;  %v10708_v52 = vpop.eup %10707  ;;  %v7437_v2 = vmul.f32 1.6732632, %v9047_v24  ;;  %v9042_v56 = vadd.f32 -1.0, %v10704_v9  ;;  %v7498_v10 = vsel %vm7178_vm3, %v15635_v40, %v7434_v26  ;;  %vm7181_vm6 = vcmp.gt.f32.partialorder %v15675_v4, 0.0 }
 0x8cd   : > { %v15721_v34 = vpop.f32.mrb[177].mxu1  ;;  %v10710_v38 = vpop.eup %10709  ;;  %10717 = vpow2.f32 %v7297_v33  ;;  %v7499_v15 = vsel %vm7179_vm4, %v15656_v41, %v7435_v13  ;;  %vm7182_vm7 = vcmp.gt.f32.partialorder %v15679_v42, 0.0  ;;  %v9048_v45 = vadd.f32 -1.0, %v10706_v28 }
 0x8ce   : > { %v15725_v36 = vpop.f32.mrb[178].mxu1  ;;  %7713 = vadd.xlane.f32.xlu1 %v7712_v20  ;;  %10719 = vpow2.f32 %v7299_v44  ;;  %v7561_v19 = vmul.f32 1.050701, %v7497_v53  ;;  %v7500_v40 = vsel %vm7180_vm5, %v15672_v35, %v7436_v21  ;;  %vm7183_vm8 = vcmp.gt.f32.partialorder %v15693_v31, 0.0 }
 0x8cf   : > { %v15731_v14 = vpop.f32.mrb[179].mxu1  ;;  %v10712_v7 = vpop.eup %10711  ;;  %v9049_v23 = vadd.f32 -1.0, %v10708_v52  ;;  %v7562_v5 = vmul.f32 1.050701, %v7498_v10  ;;  %v7501_v41 = vsel %vm7181_vm6, %v15675_v4, %v7437_v2  ;;  %vm7184_vm9 = vcmp.gt.f32.partialorder %v15701_v17, 0.0 }
 0x8d0   : > { %v9050_v3 = vadd.f32 -1.0, %v10710_v38  ;;  %v7301_v57 = vmul.f32 1.442695, %v15747_v25  ;;  %v7563_v30 = vmul.f32 1.050701, %v7499_v15  ;;  %vm7185_vm10 = vcmp.gt.f32.partialorder %v15706_v48, 0.0  ;;  %v10714_v32 = vpop.eup %10713 }
 0x8d1   : > { %v7431_v35 = vmul.f32 1.6732632, %v9041_v27  ;;  %v7432_v18 = vmul.f32 1.6732632, %v9042_v56  ;;  %v15777_v29 = vadd.f32 %v15715_v55, %v15431_v60  ;;  %v7564_v61 = vmul.f32 1.050701, %v7500_v40 }
 0x8d2   : > { %v7438_v62 = vmul.f32 1.6732632, %v9048_v45  ;;  %v9051_v4 = vadd.f32 -1.0, %v10712_v7  ;;  %10721 = vpow2.f32 %v7301_v57  ;;  %v15779_v11 = vmul.f32 1.050701, %v7501_v41 }
 0x8d3   : > { %v7439_v1 = vmul.f32 1.6732632, %v9049_v23  ;;  %v7495_v37 = vsel %vm7175_vm1, %v15640_v22, %v7431_v35  ;;  %v7496_v43 = vsel %vm7176_vm2, %v15653_v63, %v7432_v18  ;;  %v10716_v16 = vpop.eup %10715  ;;  %v7440_v54 = vmul.f32 1.6732632, %v9050_v3 }
 0x8d4   : > { %v15753_v46 = vpop.f32.mrb[180].mxu1  ;;  %vm7186_vm11 = vcmp.gt.f32.partialorder %v15709_v39, 0.0  ;;  %v7559_v55 = vmul.f32 1.050701, %v7495_v37  ;;  %v7560_v26 = vmul.f32 1.050701, %v7496_v43  ;;  %v7637_v24 = vmul.f32 %v15444_v0, %v7561_v19 }
 0x8d5   : > { %v15759_v49 = vpop.f32.mrb[181].mxu1  ;;  %v9052_v20 = vadd.f32 -1.0, %v10714_v32  ;;  %vm7187_vm12 = vcmp.gt.f32.partialorder %v15718_v8, 0.0  ;;  %v9053_v9 = vadd.f32 -1.0, %v10716_v16  ;;  %v7303_v13 = vmul.f32 1.442695, %v15777_v29 }
 0x8d6   : > { %v15765_v51 = vpop.f32.mrb[182].mxu1  ;;  %v7441_v22 = vmul.f32 1.6732632, %v9051_v4  ;;  %v7635_v27 = vmul.f32 %v15444_v0, %v7559_v55  ;;  %v7636_v63 = vmul.f32 %v15447_v58, %v7560_v26  ;;  %v7638_v21 = vmul.f32 %v15447_v58, %v7562_v5 }
 0x8d7   : > { %v15772_v59 = vpop.f32.mrb[183].mxu1  ;;  %v10718_v52 = vpop.eup %10717  ;;  %v7502_v53 = vsel %vm7182_vm7, %v15679_v42, %v7438_v62  ;;  %10723 = vpow2.f32 %v7303_v13  ;;  %v15803_v2 = vadd.f32 %v15721_v34, %v15434_v12  ;;  %v15807_v44 = vadd.f32 %v15725_v36, %v15431_v60 }
 0x8d8   : > { %v10720_v56 = vpop.eup %10719  ;;  %v7503_v10 = vsel %vm7183_vm8, %v15693_v31, %v7439_v1  ;;  %v7715_v15 = vadd.f32 %v7636_v63, %v7635_v27  ;;  %v7718_v45 = vadd.f32 %v7638_v21, %v7637_v24  ;;  %v15816_v42 = vadd.f32 %v15731_v14, %v15434_v12 }
 0x8d9   : > { %v7504_v34 = vsel %vm7184_vm9, %v15701_v17, %v7440_v54  ;;  %v7442_v36 = vmul.f32 1.6732632, %v9052_v20  ;;  %v7443_v19 = vmul.f32 1.6732632, %v9053_v9  ;;  %vm7188_vm13 = vcmp.gt.f32.partialorder %v15729_v47, 0.0 }
 0x8da   : > { %v7305_v40 = vmul.f32 1.442695, %v15803_v2  ;;  %v7566_v23 = vmul.f32 1.050701, %v7502_v53  ;;  %v7505_v31 = vsel %vm7185_vm10, %v15706_v48, %v7441_v22  ;;  %v9054_v5 = vadd.f32 -1.0, %v10718_v52  ;;  %7716 = vadd.xlane.f32.xlu0 %v7715_v15 }
 0x8db   : > { %vm7189_vm14 = vcmp.gt.f32.partialorder %v15734_v50, 0.0  ;;  %v9055_v14 = vadd.f32 -1.0, %v10720_v56  ;;  %v7567_v41 = vmul.f32 1.050701, %v7503_v10  ;;  %v7307_v17 = vmul.f32 1.442695, %v15807_v44 }
 0x8dc   : > { %v15791_v28 = vpop.f32.mrb[184].mxu1  ;;  %10725 = vpow2.f32 %v7305_v40  ;;  %v7309_v3 = vmul.f32 1.442695, %v15816_v42  ;;  %v10722_v57 = vpop.eup %10721  ;;  %v7568_v35 = vmul.f32 1.050701, %v7504_v34  ;;  %v7639_v18 = vmul.f32 %v15444_v0, %v7563_v30 }
 0x8dd   : > { %v15796_v33 = vpop.f32.mrb[185].mxu1  ;;  %v7640_v32 = vmul.f32 %v15447_v58, %v7564_v61  ;;  %v15835_v48 = vadd.f32 %v15753_v46, %v15431_v60  ;;  %v7569_v62 = vmul.f32 1.050701, %v7505_v31  ;;  %v7506_v4 = vsel %vm7186_vm11, %v15709_v39, %v7442_v36 }
 0x8de   : > { %v15809_v38 = vpop.f32.mrb[186].mxu1  ;;  %v7507_v1 = vsel %vm7187_vm12, %v15718_v8, %v7443_v19  ;;  %10727 = vpow2.f32 %v7307_v17  ;;  %v7444_v43 = vmul.f32 1.6732632, %v9054_v5  ;;  %v7445_v30 = vmul.f32 1.6732632, %v9055_v14  ;;  %7719 = vadd.xlane.f32.xlu0 %v7718_v45 }
 0x8df   : > { %v15818_v7 = vpop.f32.mrb[187].mxu1  ;;  %vm7190_vm15 = vcmp.gt.f32.partialorder %v15747_v25, 0.0  ;;  %vm7191_vm0 = vcmp.gt.f32.partialorder %v15777_v29, 0.0  ;;  %10729 = vpow2.f32 %v7309_v3  ;;  %v7721_v46 = vadd.f32 %v7640_v32, %v7639_v18 }
 0x8e0   : > { %v9056_v16 = vadd.f32 -1.0, %v10722_v57  ;;  %v7311_v39 = vmul.f32 1.442695, %v15835_v48  ;;  %v7641_v8 = vmul.f32 %v15444_v0, %v15779_v11  ;;  %v7642_v54 = vmul.f32 %v15447_v58, %v7566_v23 }
 0x8e1   : > { %v15857_v26 = vadd.f32 %v15759_v49, %v15434_v12  ;;  %v15861_v24 = vadd.f32 %v15765_v51, %v15431_v60  ;;  %v15865_v20 = vadd.f32 %v15772_v59, %v15434_v12  ;;  %v7643_v9 = vmul.f32 %v15444_v0, %v7567_v41  ;;  %v10724_v11 = vpop.eup %10723 }
 0x8e2   : > { %v7570_v22 = vmul.f32 1.050701, %v7506_v4  ;;  %10731 = vpow2.f32 %v7311_v39  ;;  %v7724_v27 = vadd.f32 %v7642_v54, %v7641_v8  ;;  %v7644_v63 = vmul.f32 %v15447_v58, %v7568_v35  ;;  %7722 = vadd.xlane.f32.xlu0 %v7721_v46 }
 0x8e3   : > { %v7571_v49 = vmul.f32 1.050701, %v7507_v1  ;;  %v7508_v51 = vsel %vm7188_vm13, %v15729_v47, %v7444_v43  ;;  %v9057_v21 = vadd.f32 -1.0, %v10724_v11  ;;  %vm7192_vm1 = vcmp.gt.f32.partialorder %v15803_v2, 0.0 }
 0x8e4   : > { %v15843_v37 = vpop.f32.mrb[188].mxu1  ;;  %v7313_v59 = vmul.f32 1.442695, %v15857_v26  ;;  %v7509_v52 = vsel %vm7189_vm14, %v15734_v50, %v7445_v30  ;;  %v7446_v53 = vmul.f32 1.6732632, %v9056_v16  ;;  %vm7193_vm2 = vcmp.gt.f32.partialorder %v15807_v44, 0.0 }
 0x8e5   : > { %v15847_v61 = vpop.f32.mrb[189].mxu1  ;;  %v7315_v56 = vmul.f32 1.442695, %v15861_v24  ;;  %v7317_v10 = vmul.f32 1.442695, %v15865_v20  ;;  %v7727_v47 = vadd.f32 %v7644_v63, %v7643_v9  ;;  %v15884_v45 = vadd.f32 %v15791_v28, %v15431_v60 }
 0x8e6   : > { %v15853_v55 = vpop.f32.mrb[190].mxu1  ;;  %v7447_v15 = vmul.f32 1.6732632, %v9057_v21  ;;  %10733 = vpow2.f32 %v7313_v59  ;;  %v10726_v34 = vpop.eup %10725  ;;  %v7645_v36 = vmul.f32 %v15444_v0, %v7569_v62  ;;  %v7646_v50 = vmul.f32 %v15447_v58, %v7570_v22  ;;  %7725 = vadd.xlane.f32.xlu0 %v7724_v27 }
 0x8e7   : > { %v15868_v13 = vpop.f32.mrb[191].mxu1  ;;  %10735 = vpow2.f32 %v7315_v56  ;;  %v15890_v19 = vadd.f32 %v15796_v33, %v15434_v12  ;;  %v7572_v40 = vmul.f32 1.050701, %v7508_v51  ;;  %v7573_v23 = vmul.f32 1.050701, %v7509_v52 }
 0x8e8   : > { %v9058_v31 = vadd.f32 -1.0, %v10726_v34  ;;  %10737 = vpow2.f32 %v7317_v10  ;;  %v10728_v5 = vpop.eup %10727  ;;  %v7510_v28 = vsel %vm7190_vm15, %v15747_v25, %v7446_v53  ;;  %v7511_v14 = vsel %vm7191_vm0, %v15777_v29, %v7447_v15 }
 0x8e9   : > { %v7319_v41 = vmul.f32 1.442695, %v15884_v45  ;;  %v7730_v17 = vadd.f32 %v7646_v50, %v7645_v36  ;;  %v10730_v3 = vpop.eup %10729  ;;  %v9059_v57 = vadd.f32 -1.0, %v10728_v5  ;;  %vm7194_vm3 = vcmp.gt.f32.partialorder %v15816_v42, 0.0 }
 0x8ea   : > { %v7448_v33 = vmul.f32 1.6732632, %v9058_v31  ;;  %v7321_v35 = vmul.f32 1.442695, %v15890_v19  ;;  %v15903_v18 = vadd.f32 %v15809_v38, %v15431_v60  ;;  %v9060_v32 = vadd.f32 -1.0, %v10730_v3  ;;  %7728 = vadd.xlane.f32.xlu0 %v7727_v47 }
 0x8eb   : > { %vm7195_vm4 = vcmp.gt.f32.partialorder %v15835_v48, 0.0  ;;  %10739 = vpow2.f32 %v7319_v41  ;;  %v15908_v25 = vadd.f32 %v15818_v7, %v15434_v12  ;;  %v7647_v29 = vmul.f32 %v15444_v0, %v7571_v49 }
 0x8ec   : > { %v7574_v62 = vmul.f32 1.050701, %v7510_v28  ;;  %v7449_v4 = vmul.f32 1.6732632, %v9059_v57  ;;  %vm7196_vm5 = vcmp.gt.f32.partialorder %v15857_v26, 0.0  ;;  %10741 = vpow2.f32 %v7321_v35  ;;  %v10732_v1 = vpop.eup %10731 }
 0x8ed   : > { %v7512_v38 = vsel %vm7192_vm1, %v15803_v2, %v7448_v33  ;;  %vm7197_vm6 = vcmp.gt.f32.partialorder %v15861_v24, 0.0  ;;  %v7323_v43 = vmul.f32 1.442695, %v15903_v18  ;;  %v7648_v7 = vmul.f32 %v15447_v58, %v7572_v40 }
 0x8ee   : > { %v7575_v30 = vmul.f32 1.050701, %v7511_v14  ;;  %v9061_v46 = vadd.f32 -1.0, %v10732_v1  ;;  %vm7198_vm7 = vcmp.gt.f32.partialorder %v15865_v20, 0.0  ;;  %v7325_v16 = vmul.f32 1.442695, %v15908_v25  ;;  %7731 = vadd.xlane.f32.xlu0 %v7730_v17 }
 0x8ef   : > { %v7513_v39 = vsel %vm7193_vm2, %v15807_v44, %v7449_v4  ;;  %v7450_v8 = vmul.f32 1.6732632, %v9060_v32  ;;  %10743 = vpow2.f32 %v7323_v43  ;;  %v7733_v54 = vadd.f32 %v7648_v7, %v7647_v29 }
 0x8f0   : > { %v10734_v2 = vpop.eup %10733  ;;  %v7576_v9 = vmul.f32 1.050701, %v7512_v38  ;;  %v7451_v11 = vmul.f32 1.6732632, %v9061_v46  ;;  %10745 = vpow2.f32 %v7325_v16  ;;  %v15925_v22 = vadd.f32 %v15843_v37, %v15431_v60 }
 0x8f1   : > { %v10736_v27 = vpop.eup %10735  ;;  %v9062_v63 = vadd.f32 -1.0, %v10734_v2  ;;  %vm7199_vm8 = vcmp.gt.f32.partialorder %v15884_v45, 0.0  ;;  %v7649_v49 = vmul.f32 %v15444_v0, %v7573_v23  ;;  %v7650_v44 = vmul.f32 %v15447_v58, %v7574_v62 }
 0x8f2   : > { %v15932_v51 = vadd.f32 %v15847_v61, %v15434_v12  ;;  %v10738_v21 = vpop.eup %10737  ;;  %v7577_v59 = vmul.f32 1.050701, %v7513_v39  ;;  %v9063_v52 = vadd.f32 -1.0, %v10736_v27  ;;  %vm7200_vm9 = vcmp.gt.f32.partialorder %v15890_v19, 0.0  ;;  %7734 = vadd.xlane.f32.xlu0 %v7733_v54 }
 0x8f3   : > { %v7327_v37 = vmul.f32 1.442695, %v15925_v22  ;;  %v7514_v53 = vsel %vm7194_vm3, %v15816_v42, %v7450_v8  ;;  %v7452_v56 = vmul.f32 1.6732632, %v9062_v63  ;;  %v9064_v10 = vadd.f32 -1.0, %v10738_v21 }
 0x8f4   : > { %v7736_v15 = vadd.f32 %v7650_v44, %v7649_v49  ;;  %v7515_v47 = vsel %vm7195_vm4, %v15835_v48, %v7451_v11  ;;  %v7453_v61 = vmul.f32 1.6732632, %v9063_v52  ;;  %v7329_v34 = vmul.f32 1.442695, %v15932_v51 }
 0x8f5   : > { %10747 = vpow2.f32 %v7327_v37  ;;  %v10740_v36 = vpop.eup %10739  ;;  %v7516_v50 = vsel %vm7196_vm5, %v15857_v26, %v7452_v56  ;;  %v7454_v40 = vmul.f32 1.6732632, %v9064_v10  ;;  %vm7201_vm10 = vcmp.gt.f32.partialorder %v15903_v18, 0.0 }
 0x8f6   : > { %v15949_v42 = vadd.f32 %v15853_v55, %v15431_v60  ;;  %v15953_v48 = vadd.f32 %v15868_v13, %v15434_v12  ;;  %v10742_v23 = vpop.eup %10741  ;;  %v7578_v31 = vmul.f32 1.050701, %v7514_v53  ;;  %v7517_v5 = vsel %vm7197_vm6, %v15861_v24, %v7453_v61  ;;  %7737 = vadd.xlane.f32.xlu0 %v7736_v15 }
 0x8f7   : > { %v9065_v28 = vadd.f32 -1.0, %v10740_v36  ;;  %vm7202_vm11 = vcmp.gt.f32.partialorder %v15908_v25, 0.0  ;;  %10749 = vpow2.f32 %v7329_v34  ;;  %v7579_v26 = vmul.f32 1.050701, %v7515_v47 }
 0x8f8   : > { %v7580_v14 = vmul.f32 1.050701, %v7516_v50  ;;  %v7518_v60 = vsel %vm7198_vm7, %v15865_v20, %v7454_v40  ;;  %v9066_v55 = vadd.f32 -1.0, %v10742_v23  ;;  %v7581_v41 = vmul.f32 1.050701, %v7517_v5 }
 0x8f9   : > { %v7455_v12 = vmul.f32 1.6732632, %v9065_v28  ;;  %v7331_v13 = vmul.f32 1.442695, %v15949_v42  ;;  %v7651_v17 = vmul.f32 %v15444_v0, %v7575_v30  ;;  %v10744_v3 = vpop.eup %10743  ;;  %v7582_v24 = vmul.f32 1.050701, %v7518_v60 }
 0x8fa   : > { %v7456_v33 = vmul.f32 1.6732632, %v9066_v55  ;;  %v7333_v57 = vmul.f32 1.442695, %v15953_v48  ;;  %v7652_v35 = vmul.f32 %v15447_v58, %v7576_v9  ;;  %v10746_v32 = vpop.eup %10745  ;;  %v9067_v29 = vadd.f32 -1.0, %v10744_v3 }
 0x8fb   : > { %v7519_v20 = vsel %vm7199_vm8, %v15884_v45, %v7455_v12  ;;  %10751 = vpow2.f32 %v7331_v13  ;;  %v7653_v62 = vmul.f32 %v15444_v0, %v7577_v59  ;;  %v9068_v38 = vadd.f32 -1.0, %v10746_v32  ;;  %v16001_v32 = vld [vmem:[#allocation2] ss:$0 sm:$0xff] }
 0x8fc   : > { %v7583_v4 = vmul.f32 1.050701, %v7519_v20  ;;  %v7520_v1 = vsel %vm7200_vm9, %v15890_v19, %v7456_v33  ;;  %10753 = vpow2.f32 %v7333_v57  ;;  %v7457_v7 = vmul.f32 1.6732632, %v9067_v29 }
 0x8fd   : > { %v7584_v43 = vmul.f32 1.050701, %v7520_v1  ;;  %v7739_v30 = vadd.f32 %v7652_v35, %v7651_v17  ;;  %v7654_v46 = vmul.f32 %v15447_v58, %v7578_v31  ;;  %v7458_v16 = vmul.f32 1.6732632, %v9068_v38 }
 0x8fe   : > { %v7655_v39 = vmul.f32 %v15444_v0, %v7579_v26  ;;  %v7656_v45 = vmul.f32 %v15447_v58, %v7580_v14  ;;  %v7657_v8 = vmul.f32 %v15444_v0, %v7581_v41  ;;  %v7521_v2 = vsel %vm7201_vm10, %v15903_v18, %v7457_v7 }
 0x8ff   : > { %v10748_v54 = vpop.eup %10747  ;;  %7740 = vadd.xlane.f32.xlu0 %v7739_v30  ;;  %v7742_v19 = vadd.f32 %v7654_v46, %v7653_v62  ;;  %v7658_v9 = vmul.f32 %v15447_v58, %v7582_v24  ;;  %v7659_v11 = vmul.f32 %v15444_v0, %v7583_v4  ;;  %v7585_v27 = vmul.f32 1.050701, %v7521_v2  ;;  %v7669_v24 = vpop.xlane.xlu1 %7668 }
 0x900   : > { %v7522_v63 = vsel %vm7202_vm11, %v15908_v25, %v7458_v16  ;;  %v9069_v49 = vadd.f32 -1.0, %v10748_v54  ;;  %v7745_v44 = vadd.f32 %v7656_v45, %v7655_v39  ;;  %v7660_v37 = vmul.f32 %v15447_v58, %v7584_v43 }
 0x901   : > { %v10750_v21 = vpop.eup %10749  ;;  %v7586_v59 = vmul.f32 1.050701, %v7522_v63  ;;  %v7748_v52 = vadd.f32 %v7658_v9, %v7657_v8  ;;  %v7661_v56 = vmul.f32 %v15444_v0, %v7585_v27  ;;  %vm7203_vm12 = vcmp.gt.f32.partialorder %v15925_v22, 0.0 }
 0x902   : > { %v7459_v53 = vmul.f32 1.6732632, %v9069_v49  ;;  %v9070_v18 = vadd.f32 -1.0, %v10750_v21  ;;  %v7751_v10 = vadd.f32 %v7660_v37, %v7659_v11  ;;  %vm7204_vm13 = vcmp.gt.f32.partialorder %v15932_v51, 0.0 }
 0x903   : > { %7743 = vadd.xlane.f32.xlu0 %v7742_v19  ;;  %v7662_v15 = vmul.f32 %v15447_v58, %v7586_v59  ;;  %vm7205_vm14 = vcmp.gt.f32.partialorder %v15949_v42, 0.0  ;;  %vm7206_vm15 = vcmp.gt.f32.partialorder %v15953_v48, 0.0  ;;  %vm8122_vm0 = vcmask 7168  }
 0x904   : > { %v7523_v47 = vsel %vm7203_vm12, %v15925_v22, %v7459_v53  ;;  %v7460_v25 = vmul.f32 1.6732632, %v9070_v18 }
 0x905   : > { %v10752_v61 = vpop.eup %10751  ;;  %v7587_v34 = vmul.f32 1.050701, %v7523_v47  ;;  %v7754_v36 = vadd.f32 %v7662_v15, %v7661_v56 }
 0x906   : > { %v10754_v50 = vpop.eup %10753  ;;  %v7524_v40 = vsel %vm7204_vm13, %v15932_v51, %v7460_v25  ;;  %v9071_v23 = vadd.f32 -1.0, %v10752_v61 }
 0x907   : > { %v7588_v31 = vmul.f32 1.050701, %v7524_v40  ;;  %v9072_v5 = vadd.f32 -1.0, %v10754_v50  ;;  %7746 = vadd.xlane.f32.xlu0 %v7745_v44  ;;  %v7663_v28 = vmul.f32 %v15444_v0, %v7587_v34 }
 0x908   : > { %v7461_v26 = vmul.f32 1.6732632, %v9071_v23 }
 0x909   : > { %v7462_v14 = vmul.f32 1.6732632, %v9072_v5  ;;  %v7664_v22 = vmul.f32 %v15447_v58, %v7588_v31 }
 0x90a   : > { %v7525_v60 = vsel %vm7205_vm14, %v15949_v42, %v7461_v26  ;;  %v7672_v42 = vpop.xlane.xlu1 %7671 }
 0x90b   : > { %v7589_v55 = vmul.f32 1.050701, %v7525_v60  ;;  %v7526_v41 = vsel %vm7206_vm15, %v15953_v48, %v7462_v14  ;;  %7749 = vadd.xlane.f32.xlu0 %v7748_v52  ;;  %v7757_v51 = vadd.f32 %v7664_v22, %v7663_v28 }
 0x90c   : > { %v7590_v12 = vmul.f32 1.050701, %v7526_v41 }
 0x90d   : > { %v7665_v13 = vmul.f32 %v15444_v0, %v7589_v55  ;;  %v7770_v0 = vadd.f32 %v16001_v32, %v7669_v24 }
 0x90e   : > { %v7666_v17 = vmul.f32 %v15447_v58, %v7590_v12  ;;  %v7771_v58 = vadd.f32 %v16001_v32, %v7672_v42 }
 0x90f   : > { %7752 = vadd.xlane.f32.xlu0 %v7751_v10  ;;  %v9074_v62 = vmul.f32 -1.442695, %v7770_v0 }
 0x910   : > { %v7760_v3 = vadd.f32 %v7666_v17, %v7665_v13  ;;  %v9075_v1 = vmul.f32 -1.442695, %v7771_v58 }
 0x911   : > { %10755 = vpow2.f32 %v9074_v62 }
 0x912   : > { %10757 = vpow2.f32 %v9075_v1 }
 0x913   : > { %7755 = vadd.xlane.f32.xlu0 %v7754_v36 }
 0x917   : > { %7758 = vadd.xlane.f32.xlu0 %v7757_v51 }
 0x91a   : > { %v7675_v33 = vpop.xlane.xlu1 %7674 }
 0x91b   : > { %7761 = vadd.xlane.f32.xlu0 %v7760_v3  ;;  %v7772_v4 = vadd.f32 %v16001_v32, %v7675_v33  ;;  %v10756_v8 = vpop.eup %10755 }
 0x91c   : > { %v10758_v54 = vpop.eup %10757  ;;  %v7898_v19 = vadd.f32 1.0, %v10756_v8 }
 0x91d   : > { %v7899_v27 = vadd.f32 1.0, %v10758_v54 }
 0x91e   : > { %v7678_v57 = vpop.xlane.xlu1 %7677 }
 0x91f   : > { %5764 = vadd.xlane.f32.xlu0 %v15425_v6  ;;  %v7773_v38 = vadd.f32 %v16001_v32, %v7678_v57  ;;  %v9076_v6 = vmul.f32 -1.442695, %v7772_v4 }
 0x921   : > { %v9077_v43 = vmul.f32 -1.442695, %v7773_v38  ;;  %10759 = vpow2.f32 %v9076_v6 }
 0x922   : > { %v7681_v35 = vpop.xlane.xlu1 %7680 }
 0x923   : > { %v7774_v7 = vadd.f32 %v16001_v32, %v7681_v35  ;;  %10761 = vpow2.f32 %v9077_v43 }
 0x925   : > { %v9078_v16 = vmul.f32 -1.442695, %v7774_v7 }
 0x927   : > { %10763 = vpow2.f32 %v9078_v16 }
 0x92a   : > { %v7684_v48 = vpop.xlane.xlu1 %7683 }
 0x92b   : > { %v7775_v46 = vadd.f32 %v16001_v32, %v7684_v48  ;;  %v10760_v11 = vpop.eup %10759 }
 0x92c   : > { %v7900_v44 = vadd.f32 1.0, %v10760_v11 }
 0x92d   : > { %v9079_v45 = vmul.f32 -1.442695, %v7775_v46  ;;  %v10762_v63 = vpop.eup %10761 }
 0x92e   : > { %v7687_v20 = vpop.xlane.xlu1 %7686  ;;  %v7901_v21 = vadd.f32 1.0, %v10762_v63 }
 0x92f   : > { %v7776_v2 = vadd.f32 %v16001_v32, %v7687_v20  ;;  %10765 = vpow2.f32 %v9079_v45 }
 0x930   : > { %10767 = vrcp.f32 %v7898_v19 }
 0x931   : > { %v9080_v49 = vmul.f32 -1.442695, %v7776_v2  ;;  %10769 = vrcp.f32 %v7899_v27  ;;  %v10764_v59 = vpop.eup %10763 }
 0x932   : > { %v7902_v18 = vadd.f32 1.0, %v10764_v59 }
 0x933   : > { %10771 = vpow2.f32 %v9080_v49 }
 0x934   : > { %v7690_v29 = vpop.xlane.xlu1 %7689  ;;  %10773 = vrcp.f32 %v7900_v44 }
 0x935   : > { %v7777_v37 = vadd.f32 %v16001_v32, %v7690_v29  ;;  %10775 = vrcp.f32 %v7901_v21 }
 0x936   : > { %10777 = vrcp.f32 %v7902_v18 }
 0x937   : > { %v9081_v15 = vmul.f32 -1.442695, %v7777_v37 }
 0x939   : > { %v10766_v53 = vpop.eup %10765  ;;  %10779 = vpow2.f32 %v9081_v15 }
 0x93a   : > { %v7903_v25 = vadd.f32 1.0, %v10766_v53  ;;  %v10768_v36 = vpop.eup %10767 }
 0x93b   : > { %v7693_v30 = vpop.xlane.xlu1 %7692  ;;  %v10770_v40 = vpop.eup %10769  ;;  %v7994_v28 = vadd.f32 1e-12, %v10768_v36 }
 0x93c   : > { %v7778_v56 = vadd.f32 %v16001_v32, %v7693_v30  ;;  %10781 = vrcp.f32 %v7903_v25  ;;  %v7995_v14 = vadd.f32 1e-12, %v10770_v40 }
 0x93d   : > { %v10772_v31 = vpop.eup %10771 }
 0x93e   : > { %v9082_v34 = vmul.f32 -1.442695, %v7778_v56  ;;  %v10774_v26 = vpop.eup %10773  ;;  %v7904_v55 = vadd.f32 1.0, %v10772_v31 }
 0x93f   : > { %v7696_v39 = vpop.xlane.xlu1 %7695  ;;  %v10776_v60 = vpop.eup %10775  ;;  %v7996_v12 = vadd.f32 1e-12, %v10774_v26 }
 0x940   : > { %v7779_v10 = vadd.f32 %v16001_v32, %v7696_v39  ;;  %10783 = vpow2.f32 %v9082_v34  ;;  %v7997_v3 = vadd.f32 1e-12, %v10776_v60  ;;  %v10778_v42 = vpop.eup %10777 }
 0x941   : > { %v7998_v58 = vadd.f32 1e-12, %v10778_v42 }
 0x942   : > { %v9083_v50 = vmul.f32 -1.442695, %v7779_v10 }
 0x943   : > { %v7699_v9 = vpop.xlane.xlu1 %7698  ;;  %v10780_v35 = vpop.eup %10779 }
 0x944   : > { %v7780_v47 = vadd.f32 %v16001_v32, %v7699_v9  ;;  %10785 = vpow2.f32 %v9083_v50  ;;  %v7905_v38 = vadd.f32 1.0, %v10780_v35 }
 0x946   : > { %v9084_v23 = vmul.f32 -1.442695, %v7780_v47  ;;  %v10782_v0 = vpop.eup %10781 }
 0x947   : > { %v7999_v7 = vadd.f32 1e-12, %v10782_v0 }
 0x948   : > { %10787 = vpow2.f32 %v9084_v23 }
 0x949   : > { %v7702_v52 = vpop.xlane.xlu1 %7701  ;;  %10789 = vlog2.f32 %v7994_v28 }
 0x94a   : > { %v7781_v5 = vadd.f32 %v16001_v32, %v7702_v52  ;;  %10791 = vlog2.f32 %v7995_v14  ;;  %v10784_v4 = vpop.eup %10783 }
 0x94b   : > { %10793 = vrcp.f32 %v7904_v55  ;;  %v7906_v46 = vadd.f32 1.0, %v10784_v4 }
 0x94c   : > { %v9085_v51 = vmul.f32 -1.442695, %v7781_v5 }
 0x94e   : > { %10795 = vpow2.f32 %v9085_v51  ;;  %v10786_v1 = vpop.eup %10785 }
 0x94f   : > { %v7705_v61 = vpop.xlane.xlu1 %7704  ;;  %10797 = vlog2.f32 %v7996_v12  ;;  %v7907_v8 = vadd.f32 1.0, %v10786_v1 }
 0x950   : > { %v7782_v41 = vadd.f32 %v16001_v32, %v7705_v61  ;;  %10799 = vlog2.f32 %v7997_v3 }
 0x952   : > { %v9086_v33 = vmul.f32 -1.442695, %v7782_v41  ;;  %v10788_v43 = vpop.eup %10787 }
 0x953   : > { %v7708_v22 = vpop.xlane.xlu1 %7707  ;;  %v16021_v45 = vpop.eup %10789  ;;  %v7908_v2 = vadd.f32 1.0, %v10788_v43 }
 0x954   : > { %v7783_v13 = vadd.f32 %v16001_v32, %v7708_v22  ;;  %10801 = vpow2.f32 %v9086_v33  ;;  %v16023_v54 = vpop.eup %10791 }
 0x955   : > { %v10794_v9 = vpop.eup %10793 }
 0x956   : > { %v9087_v48 = vmul.f32 -1.442695, %v7783_v13  ;;  %v8000_v37 = vadd.f32 1e-12, %v10794_v9 }
 0x957   : > { %v7711_v29 = vpop.xlane.xlu1 %7710 }
 0x958   : > { %v7784_v16 = vadd.f32 %v16001_v32, %v7711_v29  ;;  %v10796_v63 = vpop.eup %10795 }
 0x959   : > { %v16026_v21 = vpop.eup %10797  ;;  %v7909_v56 = vadd.f32 1.0, %v10796_v63 }
 0x95a   : > { %v9088_v49 = vmul.f32 -1.442695, %v7784_v16  ;;  %v16029_v52 = vpop.eup %10799 }
 0x95b   : > { %v7714_v19 = vpop.xlane.xlu1 %7713 }
 0x95c   : > { %v7785_v59 = vadd.f32 %v16001_v32, %v7714_v19 }
 0x95e   : > { %v10802_v18 = vpop.eup %10801  ;;  %v9089_v61 = vmul.f32 -1.442695, %v7785_v59 }
 0x95f   : > { %v7910_v36 = vadd.f32 1.0, %v10802_v18 }
 0x967   : > { %v7717_v17 = vpop.xlane.xlu0 %7716 }
 0x968   : > { %v7786_v24 = vadd.f32 %v16001_v32, %v7717_v17 }
 0x96a   : > { %v9090_v57 = vmul.f32 -1.442695, %v7786_v24 }
 0x96b   : > { %v7720_v20 = vpop.xlane.xlu0 %7719 }
 0x96c   : > { %v7787_v62 = vadd.f32 %v16001_v32, %v7720_v20  ;;  %10803 = vpow2.f32 %v9090_v57 }
 0x96d   : > { %10805 = vpow2.f32 %v9087_v48 }
 0x96e   : > { %v9091_v6 = vmul.f32 -1.442695, %v7787_v62  ;;  %10807 = vlog2.f32 %v7998_v58 }
 0x96f   : > { %v7723_v30 = vpop.xlane.xlu0 %7722 }
 0x970   : > { %v7788_v39 = vadd.f32 %v16001_v32, %v7723_v30  ;;  %10809 = vpow2.f32 %v9091_v6 }
 0x971   : > { %10811 = vrcp.f32 %v7905_v38 }
 0x972   : > { %10813 = vlog2.f32 %v7999_v7  ;;  %v9092_v11 = vmul.f32 -1.442695, %v7788_v39 }
 0x973   : > { %v7726_v27 = vpop.xlane.xlu0 %7725  ;;  %10815 = vrcp.f32 %v7906_v46 }
 0x974   : > { %v7789_v44 = vadd.f32 %v16001_v32, %v7726_v27  ;;  %10817 = vrcp.f32 %v7907_v8 }
 0x975   : > { %10819 = vrcp.f32 %v7908_v2 }
 0x976   : > { %v9093_v53 = vmul.f32 -1.442695, %v7789_v44  ;;  %10821 = vpow2.f32 %v9092_v11  ;;  %v10804_v15 = vpop.eup %10803 }
 0x977   : > { %v7729_v10 = vpop.xlane.xlu0 %7728  ;;  %10823 = vpow2.f32 %v9088_v49  ;;  %v10806_v25 = vpop.eup %10805  ;;  %v7914_v23 = vadd.f32 1.0, %v10804_v15 }
 0x978   : > { %v7790_v47 = vadd.f32 %v16001_v32, %v7729_v10  ;;  %10825 = vpow2.f32 %v9093_v53  ;;  %v16032_v34 = vpop.eup %10807  ;;  %v7911_v28 = vadd.f32 1.0, %v10806_v25 }
 0x979   : > { %10827 = vlog2.f32 %v8000_v37 }
 0x97a   : > { %v9094_v50 = vmul.f32 -1.442695, %v7790_v47  ;;  %v10810_v40 = vpop.eup %10809  ;;  %10829 = vrcp.f32 %v7909_v56 }
 0x97b   : > { %v7732_v31 = vpop.xlane.xlu0 %7731  ;;  %v10812_v5 = vpop.eup %10811  ;;  %v7915_v60 = vadd.f32 1.0, %v10810_v40 }
 0x97c   : > { %10831 = vpow2.f32 %v9094_v50  ;;  %v7791_v26 = vadd.f32 %v16001_v32, %v7732_v31  ;;  %v16035_v14 = vpop.eup %10813  ;;  %v8001_v51 = vadd.f32 1e-12, %v10812_v5 }
 0x97d   : > { %10833 = vpow2.f32 %v9089_v61  ;;  %v10816_v22 = vpop.eup %10815 }
 0x97e   : > { %10835 = vrcp.f32 %v7910_v36  ;;  %v9095_v55 = vmul.f32 -1.442695, %v7791_v26  ;;  %v10818_v41 = vpop.eup %10817  ;;  %v8002_v24 = vadd.f32 1e-12, %v10816_v22 }
 0x97f   : > { %10837 = vrcp.f32 %v7914_v23  ;;  %v7735_v12 = vpop.xlane.xlu0 %7734  ;;  %v10820_v13 = vpop.eup %10819  ;;  %v8003_v33 = vadd.f32 1e-12, %v10818_v41 }
 0x980   : > { %10839 = vrcp.f32 %v7911_v28  ;;  %v7792_v17 = vadd.f32 %v16001_v32, %v7735_v12  ;;  %v10822_v3 = vpop.eup %10821  ;;  %v8004_v48 = vadd.f32 1e-12, %v10820_v13 }
 0x981   : > { %10841 = vpow2.f32 %v9095_v55  ;;  %v10824_v42 = vpop.eup %10823  ;;  %v7916_v58 = vadd.f32 1.0, %v10822_v3 }
 0x982   : > { %10843 = vrcp.f32 %v7915_v60  ;;  %v9096_v57 = vmul.f32 -1.442695, %v7792_v17  ;;  %v10826_v35 = vpop.eup %10825  ;;  %v7912_v4 = vadd.f32 1.0, %v10824_v42 }
 0x983   : > { %10845 = vlog2.f32 %v8001_v51  ;;  %v7738_v20 = vpop.xlane.xlu0 %7737  ;;  %v16038_v0 = vpop.eup %10827  ;;  %v7917_v38 = vadd.f32 1.0, %v10826_v35 }
 0x984   : > { %10847 = vpow2.f32 %v9096_v57  ;;  %v7793_v29 = vadd.f32 %v16001_v32, %v7738_v20  ;;  %v10830_v62 = vpop.eup %10829 }
 0x985   : > { %10849 = vlog2.f32 %v8002_v24  ;;  %v8005_v30 = vadd.f32 1e-12, %v10830_v62 }
 0x986   : > { %v10832_v1 = vpop.eup %10831  ;;  %10851 = vlog2.f32 %v8003_v33  ;;  %v9097_v43 = vmul.f32 -1.442695, %v7793_v29 }
 0x987   : > { %v10834_v6 = vpop.eup %10833  ;;  %10853 = vlog2.f32 %v8004_v48  ;;  %v7918_v16 = vadd.f32 1.0, %v10832_v1 }
 0x988   : > { %v10836_v7 = vpop.eup %10835  ;;  %10855 = vrcp.f32 %v7916_v58  ;;  %v7913_v2 = vadd.f32 1.0, %v10834_v6 }
 0x989   : > { %v10838_v46 = vpop.eup %10837  ;;  %10857 = vrcp.f32 %v7912_v4  ;;  %v8006_v27 = vadd.f32 1e-12, %v10836_v7 }
 0x98a   : > { %v10840_v8 = vpop.eup %10839  ;;  %10859 = vrcp.f32 %v7917_v38  ;;  %v8042_v63 = vsub.f32 1.0, %v10838_v46  ;;  %v8163_v61 = vadd.f32 1e-12, %v10838_v46 }
 0x98b   : > { %v10842_v9 = vpop.eup %10841  ;;  %10861 = vpow2.f32 %v9097_v43  ;;  %v8007_v59 = vadd.f32 1e-12, %v10840_v8  ;;  %v8013_v8 = vmul.f32 0.6931472, %v16023_v54 }
 0x98c   : > { %v7741_v39 = vpop.xlane.xlu0 %7740  ;;  %v10844_v11 = vpop.eup %10843  ;;  %10863 = vlog2.f32 %v8005_v30  ;;  %v7919_v18 = vadd.f32 1.0, %v10842_v9  ;;  %v8058_v25 = vadd.f32 1e-12, %v8042_v63  ;;  %v8179_v55 = vadd.f32 1e-12, %v8163_v61 }
 0x98d   : > { %v7794_v19 = vadd.f32 %v16001_v32, %v7741_v39  ;;  %v16042_v44 = vpop.eup %10845  ;;  %10865 = vrcp.f32 %v7918_v16  ;;  %v8043_v15 = vsub.f32 1.0, %v10844_v11  ;;  %v8164_v5 = vadd.f32 1e-12, %v10844_v11 }
 0x98e   : > { %v10848_v53 = vpop.eup %10847  ;;  %10867 = vrcp.f32 %v7913_v2  ;;  %v16061_v16 = vmul.f32 0.6931472, %v16021_v45  ;;  %v16067_v45 = vmul.f32 0.6931472, %v16026_v21 }
 0x98f   : > { %v9098_v49 = vmul.f32 -1.442695, %v7794_v19  ;;  %v16045_v10 = vpop.eup %10849  ;;  %v7920_v40 = vadd.f32 1.0, %v10848_v53  ;;  %v8059_v22 = vadd.f32 1e-12, %v8043_v15 }
 0x990   : > { %v7744_v37 = vpop.xlane.xlu0 %7743  ;;  %v16047_v47 = vpop.eup %10851  ;;  %v8180_v3 = vadd.f32 1e-12, %v8164_v5 }
 0x991   : > { %v7795_v56 = vadd.f32 %v16001_v32, %v7744_v37  ;;  %10869 = vpow2.f32 %v9098_v49  ;;  %v16049_v50 = vpop.eup %10853 }
 0x992   : > { %10871 = vlog2.f32 %v8006_v27  ;;  %v10856_v31 = vpop.eup %10855 }
 0x993   : > { %v9099_v36 = vmul.f32 -1.442695, %v7795_v56  ;;  %10873 = vlog2.f32 %v8007_v59  ;;  %v10858_v26 = vpop.eup %10857  ;;  %v8044_v12 = vsub.f32 1.0, %v10856_v31  ;;  %v8165_v24 = vadd.f32 1e-12, %v10856_v31 }
 0x994   : > { %v7747_v23 = vpop.xlane.xlu0 %7746  ;;  %10875 = vrcp.f32 %v7919_v18  ;;  %v10860_v60 = vpop.eup %10859  ;;  %v8008_v57 = vadd.f32 1e-12, %v10858_v26  ;;  %v16070_v18 = vmul.f32 0.6931472, %v16029_v52  ;;  %v16073_v56 = vmul.f32 0.6931472, %v16032_v34 }
 0x995   : > { %v7796_v28 = vadd.f32 %v16001_v32, %v7747_v23  ;;  %10877 = vpow2.f32 %v9099_v36  ;;  %v10862_v51 = vpop.eup %10861  ;;  %v8045_v35 = vsub.f32 1.0, %v10860_v60  ;;  %v8060_v58 = vadd.f32 1e-12, %v8044_v12 }
 0x996   : > { %10879 = vlog2.f32 %v8058_v25  ;;  %v16052_v17 = vpop.eup %10863  ;;  %v7921_v42 = vadd.f32 1.0, %v10862_v51  ;;  %v8166_v29 = vadd.f32 1e-12, %v10860_v60  ;;  %v8181_v1 = vadd.f32 1e-12, %v8165_v24 }
 0x997   : > { %v9100_v41 = vmul.f32 -1.442695, %v7796_v28  ;;  %10881 = vrcp.f32 %v7920_v40  ;;  %v10866_v33 = vpop.eup %10865  ;;  %v8061_v7 = vadd.f32 1e-12, %v8045_v35  ;;  %v16077_v31 = vmul.f32 0.6931472, %v16035_v14 }
 0x998   : > { %v7750_v13 = vpop.xlane.xlu0 %7749  ;;  %v16054_v48 = vpop.eup %10867  ;;  %v8046_v38 = vsub.f32 1.0, %v10866_v33  ;;  %v8167_v30 = vadd.f32 1e-12, %v10866_v33  ;;  %v8182_v2 = vadd.f32 1e-12, %v8166_v29 }
 0x999   : > { %10883 = vpow2.f32 %v9100_v41  ;;  %v7797_v19 = vadd.f32 %v16001_v32, %v7750_v13  ;;  %v16081_v34 = vmul.f32 0.6931472, %v16038_v0 }
 0x99a   : > { %10885 = vlog2.f32 %v8059_v22  ;;  %v8062_v27 = vadd.f32 1e-12, %v8046_v38  ;;  %v8183_v37 = vadd.f32 1e-12, %v8167_v30 }
 0x99b   : > { %10887 = vlog2.f32 %v8179_v55  ;;  %v10870_v20 = vpop.eup %10869  ;;  %v9101_v36 = vmul.f32 -1.442695, %v7797_v19 }
 0x99c   : > { %10889 = vrcp.f32 %v7921_v42  ;;  %v7753_v62 = vpop.xlane.xlu0 %7752  ;;  %v16056_v4 = vpop.eup %10871  ;;  %v7922_v6 = vadd.f32 1.0, %v10870_v20 }
 0x99d   : > { %10891 = vlog2.f32 %v8180_v3  ;;  %v16058_v43 = vpop.eup %10873  ;;  %v7798_v49 = vadd.f32 %v16001_v32, %v7753_v62 }
 0x99e   : > { %10893 = vlog2.f32 %v8008_v57  ;;  %v10876_v46 = vpop.eup %10875 }
 0x99f   : > { %10895 = vrcp.f32 %v7922_v6  ;;  %v10878_v39 = vpop.eup %10877  ;;  %v8047_v53 = vsub.f32 1.0, %v10876_v46  ;;  %v8168_v15 = vadd.f32 1e-12, %v10876_v46  ;;  %v9102_v5 = vmul.f32 -1.442695, %v7798_v49 }
 0x9a0   : > { %10897 = vlog2.f32 %v8060_v58  ;;  %v7756_v9 = vpop.xlane.xlu0 %7755  ;;  %v10880_v11 = vpop.eup %10879  ;;  %v7923_v63 = vadd.f32 1.0, %v10878_v39 }
 0x9a1   : > { %10899 = vlog2.f32 %v8181_v1  ;;  %v10882_v59 = vpop.eup %10881  ;;  %v7799_v40 = vadd.f32 %v16001_v32, %v7756_v9  ;;  %v8063_v26 = vadd.f32 1e-12, %v8047_v53  ;;  %v8184_v41 = vadd.f32 1e-12, %v8168_v15 }
 0x9a2   : > { %10901 = vlog2.f32 %v8061_v7  ;;  %v8048_v22 = vsub.f32 1.0, %v10882_v59  ;;  %v8169_v51 = vadd.f32 1e-12, %v10882_v59  ;;  %v8075_v14 = vmul.f32 0.6931472, %v10880_v11 }
 0x9a3   : > { %v10884_v54 = vpop.eup %10883  ;;  %10903 = vrcp.f32 %v7923_v63  ;;  %v9103_v3 = vmul.f32 -1.442695, %v7799_v40  ;;  %v16087_v1 = vadd.f32 1e-12, %v16054_v48 }
 0x9a4   : > { %v10886_v25 = vpop.eup %10885  ;;  %10905 = vlog2.f32 %v8182_v2  ;;  %v7924_v61 = vadd.f32 1.0, %v10884_v54  ;;  %v7759_v21 = vpop.xlane.xlu0 %7758  ;;  %v8064_v58 = vadd.f32 1e-12, %v8048_v22  ;;  %v8185_v6 = vadd.f32 1e-12, %v8169_v51 }
 0x9a5   : > { %v10888_v23 = vpop.eup %10887  ;;  %10907 = vlog2.f32 %v8062_v27  ;;  %v7800_v52 = vadd.f32 %v16001_v32, %v7759_v21  ;;  %v8077_v55 = vmul.f32 0.6931472, %v10886_v25  ;;  %v8106_v30 = vadd.f32 %v8075_v14, %v16061_v16 }
 0x9a6   : > { %v10890_v28 = vpop.eup %10889  ;;  %10909 = vlog2.f32 %v8183_v37  ;;  %v8196_v13 = vmul.f32 0.6931472, %v10888_v23 }
 0x9a7   : > { %v10892_v60 = vpop.eup %10891  ;;  %10911 = vrcp.f32 %v7924_v61  ;;  %v8049_v33 = vsub.f32 1.0, %v10890_v28  ;;  %v9104_v0 = vmul.f32 -1.442695, %v7800_v52  ;;  %v8170_v29 = vadd.f32 1e-12, %v10890_v28 }
 0x9a8   : > { %v16083_v12 = vpop.eup %10893  ;;  %10913 = vpow2.f32 %v9101_v36  ;;  %v7762_v24 = vpop.xlane.xlu0 %7761  ;;  %v8198_v20 = vmul.f32 0.6931472, %v10892_v60  ;;  %v8107_v38 = vadd.f32 %v8077_v55, %v8013_v8  ;;  %v8227_v46 = vsel %vm8122_vm0, %v8196_v13, 0.0 }
 0x9a9   : > { %v10896_v42 = vpop.eup %10895  ;;  %10915 = vpow2.f32 %v9102_v5  ;;  %v7801_v57 = vadd.f32 %v16001_v32, %v7762_v24  ;;  %v8065_v19 = vadd.f32 1e-12, %v8049_v33  ;;  %v8186_v8 = vadd.f32 1e-12, %v8170_v29 }
 0x9aa   : > { %v10898_v35 = vpop.eup %10897  ;;  %10917 = vlog2.f32 %v8063_v26  ;;  %v8050_v39 = vsub.f32 1.0, %v10896_v42  ;;  %v8228_v48 = vsel %vm8122_vm0, %v8198_v20, 0.0  ;;  %v8171_v63 = vadd.f32 1e-12, %v10896_v42 }
 0x9ab   : > { %v10900_v62 = vpop.eup %10899  ;;  %10919 = vlog2.f32 %v8184_v41  ;;  %v9105_v9 = vmul.f32 -1.442695, %v7801_v57  ;;  %v8124_v59 = vsel %vm8122_vm0, %v8107_v38, 0.0  ;;  %v8123_v54 = vsel %vm8122_vm0, %v8106_v30, 0.0 }
 0x9ac   : > { %v10902_v7 = vpop.eup %10901  ;;  %10921 = vpow2.f32 %v9103_v3  ;;  %v5765_v32 = vpop.xlane.xlu0 %5764  ;;  %v8079_v15 = vmul.f32 0.6931472, %v10898_v35  ;;  %v8066_v25 = vadd.f32 1e-12, %v8050_v39  ;;  %v8229_v36 = vadd.f32 %v8228_v48, %v8227_v46 }
 0x9ad   : > { %v10904_v2 = vpop.eup %10903  ;;  %10923 = vpow2.f32 %v9104_v0  ;;  %v5766_v11 = vrot.slane %v5765_v32, 4  ;;  %v8200_v40 = vmul.f32 0.6931472, %v10900_v62  ;;  %v8125_v5 = vadd.f32 %v8124_v59, %v8123_v54 }
 0x9ae   : > { %v10906_v27 = vpop.eup %10905  ;;  %10925 = vlog2.f32 %v8064_v58  ;;  %v8051_v16 = vsub.f32 1.0, %v10904_v2  ;;  %v8081_v52 = vmul.f32 0.6931472, %v10902_v7  ;;  %v8187_v28 = vadd.f32 1e-12, %v8171_v63 }
 0x9af   : > { %v10908_v49 = vpop.eup %10907  ;;  %10927 = vlog2.f32 %v8185_v6  ;;  %v5767_v37 = vadd.f32 %v5766_v11, %v5765_v32  ;;  %v8172_v60 = vadd.f32 1e-12, %v10904_v2  ;;  %v8108_v14 = vadd.f32 %v8079_v15, %v16067_v45 }
 0x9b0   : > { %v10910_v53 = vpop.eup %10909  ;;  %10929 = vpow2.f32 %v9105_v9  ;;  %v8067_v22 = vadd.f32 1e-12, %v8051_v16  ;;  %v8230_v42 = vsel %vm8122_vm0, %v8200_v40, 0.0  ;;  %v8202_v33 = vmul.f32 0.6931472, %v10906_v27 }
 0x9b1   : > { %v10912_v61 = vpop.eup %10911  ;;  %10931 = vlog2.f32 %v8065_v19  ;;  %v5768_v21 = vrot.slane %v5767_v37, 2  ;;  %v8109_v35 = vadd.f32 %v8081_v52, %v16070_v18  ;;  %v8083_v20 = vmul.f32 0.6931472, %v10908_v49 }
 0x9b2   : > { %v10914_v23 = vpop.eup %10913  ;;  %10933 = vlog2.f32 %v8186_v8  ;;  %v8173_v13 = vadd.f32 1e-12, %v10912_v61  ;;  %v8052_v58 = vsub.f32 1.0, %v10912_v61  ;;  %v8188_v62 = vadd.f32 1e-12, %v8172_v60 }
 0x9b3   : > { %v10916_v26 = vpop.eup %10915  ;;  %v7925_v55 = vadd.f32 1.0, %v10914_v23  ;;  %v5769_v41 = vadd.f32 %v5768_v21, %v5767_v37  ;;  %10935 = vlog2.f32 %v8066_v25  ;;  %v8204_v7 = vmul.f32 0.6931472, %v10910_v53 }
 0x9b4   : > { %v10918_v51 = vpop.eup %10917  ;;  %v7926_v3 = vadd.f32 1.0, %v10916_v26  ;;  %v8189_v30 = vadd.f32 1e-12, %v8173_v13  ;;  %v8126_v32 = vsel %vm8122_vm0, %v8108_v14, 0.0  ;;  %v8231_v2 = vadd.f32 %v8230_v42, %v8229_v36 }
 0x9b5   : > { %v10920_v24 = vpop.eup %10919  ;;  %10937 = vrcp.f32 %v7925_v55  ;;  %v5770_v0 = vrot.slane %v5769_v41, 1  ;;  %v8085_v19 = vmul.f32 0.6931472, %v10918_v51  ;;  %v8232_v9 = vsel %vm8122_vm0, %v8202_v33, 0.0 }
 0x9b6   : > { %v10922_v57 = vpop.eup %10921  ;;  %10939 = vlog2.f32 %v8187_v28  ;;  %v8206_v11 = vmul.f32 0.6931472, %v10920_v24  ;;  %v8068_v27 = vadd.f32 1e-12, %v8052_v58  ;;  %v8110_v8 = vadd.f32 %v8083_v20, %v16073_v56 }
 0x9b7   : > { %v10924_v29 = vpop.eup %10923  ;;  %10941 = vlog2.f32 %v8067_v22  ;;  %v7927_v38 = vadd.f32 1.0, %v10922_v57  ;;  %v5771_v45 = vadd.f32 %v5770_v0, %v5769_v41  ;;  %v8128_v16 = vsel %vm8122_vm0, %v8109_v35, 0.0 }
 0x9b8   : > { %v10926_v6 = vpop.eup %10925  ;;  %10943 = vrcp.f32 %v7926_v3  ;;  %v7928_v46 = vadd.f32 1.0, %v10924_v29  ;;  %v8234_v37 = vsel %vm8122_vm0, %v8204_v7, 0.0  ;;  %v8127_v54 = vadd.f32 %v8126_v32, %v8125_v5 }
 0x9b9   : > { %v10928_v39 = vpop.eup %10927  ;;  %10945 = vrcp.f32 %v7927_v38  ;;  %9180 = vpush %v5771_v45  ;;  %v8087_v63 = vmul.f32 0.6931472, %v10926_v6  ;;  %v8233_v15 = vadd.f32 %v8232_v9, %v8231_v2  ;;  %v8111_v25 = vadd.f32 %v8085_v19, %v16077_v31 }
 0x9ba   : > { %v10930_v18 = vpop.eup %10929  ;;  %10947 = vrcp.f32 %v7928_v46  ;;  %v8208_v53 = vmul.f32 0.6931472, %v10928_v39  ;;  %v8025_v36 = vmul.f32 0.6931472, %v16042_v44  ;;  %v16105_v56 = vmul.f32 0.6931472, %v16045_v10 }
 0x9bb   : > { %v10932_v48 = vpop.eup %10931  ;;  %10949 = vlog2.f32 %v8188_v62  ;;  %v7929_v49 = vadd.f32 1.0, %v10930_v18  ;;  %v8236_v40 = vsel %vm8122_vm0, %v8206_v11, 0.0  ;;  %v8129_v23 = vadd.f32 %v8128_v16, %v8127_v54 }
 0x9bc   : > { %v10934_v59 = vpop.eup %10933  ;;  %10951 = vlog2.f32 %v8189_v30  ;;  %v8130_v52 = vsel %vm8122_vm0, %v8110_v8, 0.0  ;;  %v8235_v28 = vadd.f32 %v8234_v37, %v8233_v15  ;;  %v8112_v5 = vadd.f32 %v8087_v63, %v16081_v34 }
 0x9bd   : > { %10953 = vrcp.f32 %v7929_v49  ;;  %v10936_v61 = vpop.eup %10935  ;;  %v8089_v22 = vmul.f32 0.6931472, %v10932_v48  ;;  %v8238_v55 = vsel %vm8122_vm0, %v8208_v53, 0.0  ;;  %v8029_v10 = vmul.f32 0.6931472, %v16047_v47 }
 0x9be   : > { %10955 = vlog2.f32 %v8068_v27  ;;  %v8237_v41 = vadd.f32 %v8236_v40, %v8235_v28  ;;  %v8132_v51 = vsel %vm8122_vm0, %v8111_v25, 0.0  ;;  %v8210_v13 = vmul.f32 0.6931472, %v10934_v59 }
 0x9bf   : > { %v10938_v21 = vpop.eup %10937  ;;  %10957 = vlog2.f32 %v16087_v1  ;;  %v8131_v42 = vadd.f32 %v8130_v52, %v8129_v23  ;;  %v8134_v35 = vsel %vm8122_vm0, %v8112_v5, 0.0  ;;  %v8113_v29 = vadd.f32 %v8089_v22, %v8025_v36 }
 0x9c0   : > { %v10940_v26 = vpop.eup %10939  ;;  %v8053_v31 = vsub.f32 1.0, %v10938_v21  ;;  %v8174_v60 = vadd.f32 1e-12, %v10938_v21  ;;  %v8239_v57 = vadd.f32 %v8238_v55, %v8237_v41  ;;  %v8240_v30 = vsel %vm8122_vm0, %v8210_v13, 0.0 }
 0x9c1   : > { %v10942_v44 = vpop.eup %10941  ;;  %v8212_v45 = vmul.f32 0.6931472, %v10940_v26  ;;  %v8091_v2 = vmul.f32 0.6931472, %v10936_v61  ;;  %v8031_v61 = vmul.f32 0.6931472, %v16049_v50  ;;  %v8133_v40 = vadd.f32 %v8132_v51, %v8131_v42 }
 0x9c2   : > { %v10944_v14 = vpop.eup %10943  ;;  %v8069_v3 = vadd.f32 1e-12, %v8053_v31  ;;  %v8190_v24 = vadd.f32 1e-12, %v8174_v60  ;;  %v8093_v49 = vmul.f32 0.6931472, %v10942_v44  ;;  %v8241_v54 = vadd.f32 %v8240_v30, %v8239_v57 }
 0x9c3   : > { %v10946_v34 = vpop.eup %10945  ;;  %v8054_v33 = vsub.f32 1.0, %v10944_v14  ;;  %v8175_v0 = vadd.f32 1e-12, %v10944_v14  ;;  %v8242_v8 = vsel %vm8122_vm0, %v8212_v45, 0.0  ;;  %v8114_v25 = vadd.f32 %v8091_v2, %v16105_v56 }
 0x9c4   : > { %v10948_v20 = vpop.eup %10947  ;;  %10959 = vlog2.f32 %v8069_v3  ;;  %v8176_v58 = vadd.f32 1e-12, %v10946_v34  ;;  %v8055_v47 = vsub.f32 1.0, %v10946_v34  ;;  %v8243_v21 = vadd.f32 %v8242_v8, %v8241_v54 }
 0x9c5   : > { %v10950_v1 = vpop.eup %10949  ;;  %v8177_v62 = vadd.f32 1e-12, %v10948_v20  ;;  %v8191_v38 = vadd.f32 1e-12, %v8175_v0  ;;  %10961 = vlog2.f32 %v8190_v24  ;;  %v8056_v46 = vsub.f32 1.0, %v10948_v20 }
 0x9c6   : > { %v10952_v6 = vpop.eup %10951  ;;  %v8192_v7 = vadd.f32 1e-12, %v8176_v58  ;;  %v8070_v39 = vadd.f32 1e-12, %v8054_v33  ;;  %v8071_v18 = vadd.f32 1e-12, %v8055_v47  ;;  %v8115_v23 = vadd.f32 %v8093_v49, %v8029_v10 }
 0x9c7   : > { %v10954_v32 = vpop.eup %10953  ;;  %v8193_v19 = vadd.f32 1e-12, %v8177_v62  ;;  %10963 = vlog2.f32 %v8191_v38  ;;  %v8214_v27 = vmul.f32 0.6931472, %v10950_v1  ;;  %v8072_v63 = vadd.f32 1e-12, %v8056_v46 }
 0x9c8   : > { %v10956_v9 = vpop.eup %10955  ;;  %v8178_v11 = vadd.f32 1e-12, %v10954_v32  ;;  %10965 = vlog2.f32 %v8192_v7  ;;  %v8057_v48 = vsub.f32 1.0, %v10954_v32  ;;  %v8216_v16 = vmul.f32 0.6931472, %v10952_v6 }
 0x9c9   : > { %10967 = vlog2.f32 %v8193_v19  ;;  %v10958_v53 = vpop.eup %10957  ;;  %v8095_v15 = vmul.f32 0.6931472, %v10956_v9  ;;  %v8244_v36 = vsel %vm8122_vm0, %v8214_v27, 0.0  ;;  %v8136_v52 = vsel %vm8122_vm0, %v8113_v29, 0.0 }
 0x9ca   : > { %v8194_v59 = vadd.f32 1e-12, %v8178_v11  ;;  %v8073_v37 = vadd.f32 1e-12, %v8057_v48  ;;  %10969 = vlog2.f32 %v8070_v39  ;;  %v8033_v5 = vmul.f32 0.6931472, %v16052_v17 }
 0x9cb   : > { %10971 = vlog2.f32 %v8071_v18  ;;  %v8246_v26 = vsel %vm8122_vm0, %v8216_v16, 0.0  ;;  %v8135_v22 = vadd.f32 %v8134_v35, %v8133_v40  ;;  %v8245_v56 = vadd.f32 %v8244_v36, %v8243_v21 }
 0x9cc   : > { %10973 = vlog2.f32 %v8194_v59  ;;  %v8116_v50 = vadd.f32 %v8095_v15, %v8031_v61  ;;  %v8138_v55 = vsel %vm8122_vm0, %v8114_v25, 0.0  ;;  %v8140_v13 = vsel %vm8122_vm0, %v8115_v23, 0.0 }
 0x9cd   : > { %10975 = vlog2.f32 %v8072_v63  ;;  %v8137_v41 = vadd.f32 %v8136_v52, %v8135_v22  ;;  %v8247_v14 = vadd.f32 %v8246_v26, %v8245_v56  ;;  %v8035_v20 = vmul.f32 0.6931472, %v16056_v4 }
 0x9ce   : > { %v10960_v28 = vpop.eup %10959  ;;  %10977 = vlog2.f32 %v8073_v37  ;;  %v8142_v57 = vsel %vm8122_vm0, %v8116_v50, 0.0  ;;  %v8037_v46 = vmul.f32 0.6931472, %v16058_v43  ;;  %v8039_v18 = vmul.f32 0.6931472, %v16083_v12 }
 0x9cf   : > { %v10962_v31 = vpop.eup %10961  ;;  %v8097_v60 = vmul.f32 0.6931472, %v10960_v28  ;;  %v8139_v42 = vadd.f32 %v8138_v55, %v8137_v41  ;;  %v8041_v27 = vmul.f32 0.6931472, %v10958_v53 }
 0x9d0   : > { %v8218_v44 = vmul.f32 0.6931472, %v10962_v31 }
 0x9d1   : > { %v10964_v51 = vpop.eup %10963  ;;  %v8117_v10 = vadd.f32 %v8097_v60, %v8033_v5  ;;  %v8141_v29 = vadd.f32 %v8140_v13, %v8139_v42 }
 0x9d2   : > { %v10966_v3 = vpop.eup %10965  ;;  %v8220_v24 = vmul.f32 0.6931472, %v10964_v51  ;;  %v8248_v17 = vsel %vm8122_vm0, %v8218_v44, 0.0 }
 0x9d3   : > { %v10968_v34 = vpop.eup %10967  ;;  %v8222_v33 = vmul.f32 0.6931472, %v10966_v3  ;;  %v8249_v0 = vadd.f32 %v8248_v17, %v8247_v14  ;;  %v8144_v6 = vsel %vm8122_vm0, %v8117_v10, 0.0  ;;  %v8143_v32 = vadd.f32 %v8142_v57, %v8141_v29 }
 0x9d4   : > { %v10970_v35 = vpop.eup %10969  ;;  %v8224_v58 = vmul.f32 0.6931472, %v10968_v34  ;;  %v8250_v47 = vsel %vm8122_vm0, %v8220_v24, 0.0 }
 0x9d5   : > { %v10972_v1 = vpop.eup %10971  ;;  %v8251_v62 = vadd.f32 %v8250_v47, %v8249_v0  ;;  %v8252_v38 = vsel %vm8122_vm0, %v8222_v33, 0.0  ;;  %v8099_v45 = vmul.f32 0.6931472, %v10970_v35  ;;  %v8145_v63 = vadd.f32 %v8144_v6, %v8143_v32 }
 0x9d6   : > { %v10974_v7 = vpop.eup %10973  ;;  %v8254_v30 = vsel %vm8122_vm0, %v8224_v58, 0.0  ;;  %v8101_v39 = vmul.f32 0.6931472, %v10972_v1 }
 0x9d7   : > { %v10976_v2 = vpop.eup %10975  ;;  %v8226_v4 = vmul.f32 0.6931472, %v10974_v7  ;;  %v8253_v19 = vadd.f32 %v8252_v38, %v8251_v62  ;;  %v8118_v9 = vadd.f32 %v8099_v45, %v8035_v20 }
 0x9d8   : > { %v10978_v11 = vpop.eup %10977  ;;  %v8103_v48 = vmul.f32 0.6931472, %v10976_v2  ;;  %v8119_v8 = vadd.f32 %v8101_v39, %v8037_v46 }
 0x9d9   : > { %v8255_v49 = vadd.f32 %v8254_v30, %v8253_v19  ;;  %v8256_v59 = vsel %vm8122_vm0, %v8226_v4, 0.0  ;;  %v8105_v16 = vmul.f32 0.6931472, %v10978_v11  ;;  %v8146_v43 = vsel %vm8122_vm0, %v8118_v9, 0.0 }
 0x9da   : > { %v8120_v37 = vadd.f32 %v8103_v48, %v8039_v18  ;;  %v8147_v54 = vadd.f32 %v8146_v43, %v8145_v63  ;;  %v8148_v15 = vsel %vm8122_vm0, %v8119_v8, 0.0 }
 0x9db   : > { %v8257_v12 = vadd.f32 %v8256_v59, %v8255_v49  ;;  %v8121_v25 = vadd.f32 %v8105_v16, %v8041_v27 }
 0x9dc   : > { %v8149_v53 = vadd.f32 %v8148_v15, %v8147_v54  ;;  %v8150_v61 = vsel %vm8122_vm0, %v8120_v37, 0.0 }
 0x9dd   : > { %8258 = vadd.xlane.f32.xlu0 %v8257_v12  ;;  %v8152_v36 = vsel %vm8122_vm0, %v8121_v25, 0.0 }
 0x9de   : > { %v8151_v40 = vadd.f32 %v8150_v61, %v8149_v53 }
 0x9e0   : > { %v8153_v21 = vadd.f32 %v8152_v36, %v8151_v40 }
 0x9e2   : > { %8154 = vadd.xlane.f32.xlu1 %v8153_v21 }
 0x9e3   : > { %11056 = shalt.err (!%p11053_p3)
}
 0x9e4   : > { %s11057_s4 = scalar_lea.hbm %s16144_s26, 8192  ;;  %s11061_s30 = scalar_lea.hbm %s16218_s20, 16384 }
 0x9e5   : > { %p11058_p4 = scmp.ne.s32.totalorder %s16144_s26, %s11057_s4  ;;  %p11062_p9 = scmp.lt.u32.totalorder %s16144_s26, %s16218_s20 }
 0x9e6   : > { %p11063_p10 = scmp.lt.u32.totalorder %s11061_s30, %s11057_s4  ;;  %p11065_p12 = scmp.lt.u32.totalorder %s11057_s4, %s16144_s26 }
 0x9e7   : > { %p11059_p7 = pnand %p11058_p4, %p11261_p5 }
 0x9e8   : > { %p11064_p11 = por %p11063_p10, %p11062_p9 }
 0x9e9   : > { %p11060_p8 = pneg %p11059_p7 }
 0x9ea   : > { %p11066_p13 = por %p11065_p12, %p11064_p11 }
 0x9ec   : > { %p11067_p0 = pnand %p11066_p13, %p11060_p8 }
 0x9ee   : > { %11070 = shalt.err (!%p11067_p0)
}
 0x9ef   : > { %s11108_s25 = smov 512   ;;  %s11109_s3 = smov 32   ;;  %v16685_v14 = vlaneseq  ;;  %v16686_v13 = vld [vmem:[#allocation12_spill] sm:$0xff] }
 0x9f0   : > { %9186 = dma.vmem_to_hbm [thread:$0]  (%p11261_p5), %s16146_s0, 8192, %s16144_s26, %s16150_s28, %s11108_s25, %s11108_s25, %s11109_s3   ;;  %vm8271_vm1 = vcmp.eq.s32.totalorder %v16686_v13, 0 }
 0x9f1   : > { %p695_p1 = scmp.lt.s32.totalorder %s11244_s19, 1  ;;  %v8270_v10 = vand.u32 127, %v16685_v14  ;;  %s9181_s22 = spop %9180 }
 0x9f2   : > { %v8282_v42 = vstv %s9181_s22 }
 0x9f3   : > { %s16698_s19 = smov (!%p695_p1, %s11244_s19), 1  ;;  %vm8276_vm2 = vcmp.eq.s32.totalorder %v8270_v10, 2  ;;  %vm8274_vm3 = vcmp.eq.s32.totalorder %v8270_v10, 1  ;;  %vm8272_vm4 = vcmp.eq.s32.totalorder %v8270_v10, 0 }
 0x9f4   : > { %s8416_s26 = sshll.u32 %s16698_s19, 3  ;;  %vm8277_vm5 = vmand %vm8271_vm1, %vm8276_vm2 }
 0x9f5   : > { %vm8275_vm6 = vmand %vm8271_vm1, %vm8274_vm3  ;;  %s698_s4 = scalar_lea.vmem %s16219_s21, %s8416_s26 }
 0x9f6   : > { %vm8273_vm7 = vmand %vm8271_vm1, %vm8272_vm4 }
 0xa6a   : > { %v8259_v23 = vpop.xlane.xlu0 %8258 }
 0xa6b   : > { %v8260_v52 = vrot.slane %v8259_v23, 4 }
 0xa6d   : > { %v8261_v28 = vadd.f32 %v8260_v52, %v8259_v23 }
 0xa6f   : > { %v8262_v5 = vrot.slane %v8261_v28, 2  ;;  %v8155_v26 = vpop.xlane.xlu1 %8154 }
 0xa70   : > { %v8156_v22 = vrot.slane %v8155_v26, 4 }
 0xa71   : > { %v8263_v56 = vadd.f32 %v8262_v5, %v8261_v28 }
 0xa72   : > { %v8157_v31 = vadd.f32 %v8156_v22, %v8155_v26 }
 0xa73   : > { %v8264_v55 = vrot.slane %v8263_v56, 1 }
 0xa74   : > { %v8158_v60 = vrot.slane %v8157_v31, 2 }
 0xa75   : > { %v8265_v51 = vadd.f32 %v8264_v55, %v8263_v56 }
 0xa76   : > { %v8159_v50 = vadd.f32 %v8158_v60, %v8157_v31 }
 0xa78   : > { %v8160_v44 = vrot.slane %v8159_v50, 1 }
 0xa7a   : > { %v8161_v41 = vadd.f32 %v8160_v44, %v8159_v50 }
 0xa7c   : > { %9182 = vpush %v8161_v41 }
 0xa7d   : > { %9184 = vpush %v8265_v51 }
 0xaad   : > { %s9183_s0 = spop %9182 }
 0xaae   : > { %v8280_v3 = vstv %s9183_s0  ;;  %s9185_s28 = spop %9184 }
 0xaaf   : > { %v8278_v24 = vstv %s9185_s28 }
 0xab0   : > { %v8279_v17 = vsel %vm8277_vm5, %v8278_v24, 0.0 }
 0xab1   : > { %v8281_v34 = vsel %vm8275_vm6, %v8280_v3, %v8279_v17 }
 0xab2   : > { %v8283_v33 = vsel %vm8273_vm7, %v8282_v42, %v8281_v34 }
 0xab3   : > { %8284 = vst [vmem:[%s698_s4] sm:$0xff] %v8283_v33 }
 0xab4 PF: > { %s16687_s5 = sld [smem:[#allocation8_spill]]  ;;  %s16688_s23 = sld [smem:[#allocation6_spill]] }
 0xaba   : > { %p9192_p5 = scmp.ge.s32.totalorder %s16687_s5, 2  ;;  %s8322_s19 = sand.u32 1, %s16688_s23  }
 0xabb   : > { %s8323_s29 = scalar_lea.sflag [#allocation4], %s8322_s19 }
 0xabc   : > { %p9189_p2 = pnand %p9192_p5, %p11265_p6 }
 0xabe   : > { %11088 = dma.done.wait (!%p9189_p2), %s8323_s29, 8192  }
 0xabf   : > { %11090 = vsyncadd (!%p9189_p2), %s8323_s29, 4294959104  ;;  %s16690_s28 = sld [smem:[#allocation9_spill]]  ;;  %s16691_s1 = sld [smem:[#allocation7_spill]] }
 0xac0   : > { %s16692_s3 = sld [smem:[#allocation10_spill]]  ;;  %s16693_s26 = smov %s11097_s27 }
 0xac5   : > { %p34_p3 = scmp.ge.s32.totalorder %s16690_s28, 4   ;;  %s16694_s27 = smov %s16691_s1 }
 0xac7   :  { %36 = sbr.rel (!%p34_p3) target bundleno = 10 (0xa), region = 150 }
 0xace   :  { %8335 = vsyncpa [#allocation4], 1 }
 0xacf   :  { %8337 = vsyncpa [#allocation4 + $0x1], 1 }

</bundles_post_ra>
